<compile_context>
chip_gen: v7x
topology: tpu7x:2x2x1
jax: 0.10.0
libtpu: 0.0.40
codegen_flags: <defaults>
</compile_context>

<pallas_src>
import jax
import jax.numpy as jnp
from jax.experimental import pallas as pl
from jax.experimental.pallas import tpu as pltpu

_BN_EPS = 1e-5


# --------------------------------------------------------------------------
# Layer 0: ConvTranspose2d(k=4, s=1, p=0) on a 1x1 input == linear projection
#   y[n, kh, kw, co] = sum_ci z[n, ci] * W[ci, co, kh, kw]
# fused with training-mode BatchNorm + ReLU.
# --------------------------------------------------------------------------
def _make_proj_kernel(N, Cout):
    def kernel(z_ref, w_ref, g_ref, b_ref, o_ref, acc_ref):
        s = jnp.zeros((1, Cout), jnp.float32)
        ss = jnp.zeros((1, Cout), jnp.float32)
        for t in range(16):                                   # 16 spatial taps
            y = jnp.dot(z_ref[...], w_ref[t],
                        preferred_element_type=jnp.float32)   # (N, Cout) f32
            acc_ref[t] = y
            s = s + jnp.sum(y, axis=0, keepdims=True)
            ss = ss + jnp.sum(y * y, axis=0, keepdims=True)
        cnt = float(N * 16)
        mean = s / cnt
        var = jnp.maximum(ss / cnt - mean * mean, 0.0)        # biased (train)
        scale = g_ref[...] * jax.lax.rsqrt(var + _BN_EPS)
        shift = b_ref[...] - mean * scale
        for t in range(16):
            o_ref[:, t, :] = jnp.maximum(
                acc_ref[t] * scale + shift, 0.0).astype(o_ref.dtype)
    return kernel


def _project_latent(z2d, w, gamma, beta):
    """z2d (N, Cin) -> NHWC (N, 4, 4, Cout) bf16, BN(train) + ReLU fused."""
    N, Cin = z2d.shape
    Cout = w.shape[1]
    # torch layout (Cin, Cout, kh, kw) -> (kh*kw, Cin, Cout)
    w16 = jnp.transpose(w, (2, 3, 0, 1)).reshape(16, Cin, Cout).astype(jnp.bfloat16)
    vmem = pl.BlockSpec(memory_space=pltpu.MemorySpace.VMEM)
    out = pl.pallas_call(
        _make_proj_kernel(N, Cout),
        out_shape=jax.ShapeDtypeStruct((N, 16, Cout), jnp.bfloat16),
        in_specs=[vmem, vmem, vmem, vmem],
        out_specs=vmem,
        scratch_shapes=[pltpu.VMEM((16, N, Cout), jnp.float32)],
    )(z2d.astype(jnp.bfloat16), w16,
      gamma.reshape(1, Cout).astype(jnp.float32),
      beta.reshape(1, Cout).astype(jnp.float32))
    return out.reshape(N, 4, 4, Cout)


# --------------------------------------------------------------------------
# Stride-2 ConvTranspose2d(k=4, s=2, p=1) via sub-pixel phase decomposition.
#
# With x padded by 1 pixel (xpad), output phase (ph, pw) at (m, j):
#   y[n, 2m+ph, 2j+pw, co] =
#     sum_{a,b in {0,1}} xpad[n, m+ph+a, j+pw+b, :] @ wf[ph+2a, pw+2b]
# where wf[kh, kw] = W[:, :, 3-kh, 3-kw]  (flipped kernel).
# The kernel writes phase-packed output (N, [2*ph+pw]*H + m, W, Cout) plus
# per-image (sum, sumsq) BN statistics.
# --------------------------------------------------------------------------
def _make_phase_conv_kernel(H, W, Cout, use_bn, act):
    def conv_rows(x_ref, w_ref, y_ref, st_acc):
        @pl.loop(0, H)
        def _(m):
            rows = [x_ref[0, m + r] for r in range(3)]                # (Wp, Cin)
            win = [[rows[r][c:c + W, :] for c in range(3)] for r in range(3)]
            row_s = jnp.zeros((1, Cout), jnp.float32)
            row_ss = jnp.zeros((1, Cout), jnp.float32)
            for ph in range(2):
                for pw in range(2):
                    acc = jnp.zeros((W, Cout), jnp.float32)
                    for a in range(2):
                        for b in range(2):
                            acc = acc + jnp.dot(
                                win[ph + a][pw + b],
                                w_ref[ph + 2 * a, pw + 2 * b],
                                preferred_element_type=jnp.float32)
                    idx = (2 * ph + pw) * H + m
                    if use_bn:
                        row_s = row_s + jnp.sum(acc, axis=0, keepdims=True)
                        row_ss = row_ss + jnp.sum(acc * acc, axis=0, keepdims=True)
                        y_ref[0, idx] = acc.astype(y_ref.dtype)
                    else:
                        y = jnp.tanh(acc) if act == "tanh" else jnp.maximum(acc, 0.0)
                        y_ref[0, idx] = y.astype(y_ref.dtype)
            if use_bn:
                st_acc[0:1, :] = st_acc[0:1, :] + row_s
                st_acc[1:2, :] = st_acc[1:2, :] + row_ss

    if use_bn:
        def kernel(x_ref, w_ref, y_ref, st_ref, st_acc):
            st_acc[...] = jnp.zeros_like(st_acc)
            conv_rows(x_ref, w_ref, y_ref, st_acc)
            st_ref[0] = st_acc[...]
    else:
        def kernel(x_ref, w_ref, y_ref):
            conv_rows(x_ref, w_ref, y_ref, None)
    return kernel


def _bn_act_kernel(y_ref, sc_ref, sh_ref, o_ref):
    y = y_ref[...].astype(jnp.float32)
    o_ref[...] = jnp.maximum(y * sc_ref[...] + sh_ref[...], 0.0).astype(o_ref.dtype)


def _bn_act(y_flat, scale, shift):
    """(N, M, C) raw conv output -> normalized + ReLU, bf16, tiled grid."""
    N, M, C = y_flat.shape
    TM = 128 if M % 128 == 0 else M
    return pl.pallas_call(
        _bn_act_kernel,
        grid=(N, M // TM),
        in_specs=[pl.BlockSpec((1, TM, C), lambda n, t: (n, t, 0)),
                  pl.BlockSpec((1, 1, C), lambda n, t: (0, 0, 0)),
                  pl.BlockSpec((1, 1, C), lambda n, t: (0, 0, 0))],
        out_specs=pl.BlockSpec((1, TM, C), lambda n, t: (n, t, 0)),
        out_shape=jax.ShapeDtypeStruct((N, M, C), jnp.bfloat16),
        compiler_params=pltpu.CompilerParams(
            dimension_semantics=("parallel", "parallel")),
    )(y_flat, scale.reshape(1, 1, C), shift.reshape(1, 1, C))


def _conv_transpose2x_block(x_nhwc, w, gamma, beta, *, use_bn, act):
    """ConvTranspose2d(k=4, s=2, p=1, bias=False) [+ BN] + activation (NHWC)."""
    N, H, W, Cin = x_nhwc.shape
    Cout = w.shape[1]
    Hp, Wp = H + 2, W + 2

    xpad = jnp.pad(x_nhwc.astype(jnp.bfloat16),
                   ((0, 0), (1, 1), (1, 1), (0, 0)))
    # flipped kernel laid out (kh, kw, Cin, Cout) for NHWC matmuls (bf16)
    w_flip = jnp.transpose(w[:, :, ::-1, ::-1], (2, 3, 0, 1)).astype(jnp.bfloat16)

    kernel = _make_phase_conv_kernel(H, W, Cout, use_bn, act)
    y_dtype = jnp.bfloat16 if use_bn else jnp.float32
    in_specs = [pl.BlockSpec((1, Hp, Wp, Cin), lambda n: (n, 0, 0, 0)),
                pl.BlockSpec((4, 4, Cin, Cout), lambda n: (0, 0, 0, 0))]
    y_spec = pl.BlockSpec((1, 4 * H, W, Cout), lambda n: (n, 0, 0, 0))
    y_shape = jax.ShapeDtypeStruct((N, 4 * H, W, Cout), y_dtype)
    cparams = pltpu.CompilerParams(dimension_semantics=("parallel",))

    if use_bn:
        y, st = pl.pallas_call(
            kernel,
            grid=(N,),
            in_specs=in_specs,
            out_specs=(y_spec, pl.BlockSpec((1, 2, Cout), lambda n: (n, 0, 0))),
            out_shape=(y_shape, jax.ShapeDtypeStruct((N, 2, Cout), jnp.float32)),
            scratch_shapes=[pltpu.VMEM((2, Cout), jnp.float32)],
            compiler_params=cparams,
        )(xpad, w_flip)
        # training-mode batch statistics, f32 (biased variance, like torch)
        cnt = float(N * 4 * H * W)
        mean = jnp.sum(st[:, 0, :], axis=0) / cnt
        var = jnp.maximum(jnp.sum(st[:, 1, :], axis=0) / cnt - mean * mean, 0.0)
        scale = gamma.astype(jnp.float32) * jax.lax.rsqrt(var + _BN_EPS)
        shift = beta.astype(jnp.float32) - mean * scale
        y = _bn_act(y.reshape(N, 4 * H * W, Cout), scale, shift)
    else:
        y = pl.pallas_call(
            kernel,
            grid=(N,),
            in_specs=in_specs,
            out_specs=y_spec,
            out_shape=y_shape,
            compiler_params=cparams,
        )(xpad, w_flip)

    # depth-to-space: (N, [ph, pw, m], j, C) -> (N, 2H, 2W, C)
    y6 = y.reshape(N, 2, 2, H, W, Cout)
    y6 = jnp.transpose(y6, (0, 3, 1, 4, 2, 5))
    return y6.reshape(N, 2 * H, 2 * W, Cout)


_LAYER_CFG = [
    dict(use_bn=True, act="relu"),    # 8d -> 4d,  4x4  -> 8x8
    dict(use_bn=True, act="relu"),    # 4d -> 2d,  8x8  -> 16x16
    dict(use_bn=True, act="relu"),    # 2d -> d,   16x16-> 32x32
    dict(use_bn=False, act="tanh"),   # d  -> 3,   32x32-> 64x64
]


def init_generator_params(key, latent_size=32, depths=16):
    """Deterministic synthetic parameters matching the nn.Module's shapes."""
    chans = [latent_size, depths * 8, depths * 4, depths * 2, depths, 3]
    params = []
    for i in range(5):
        key, kw, kg, kb = jax.random.split(key, 4)
        cin, cout = chans[i], chans[i + 1]
        w = 0.02 * jax.random.normal(kw, (cin, cout, 4, 4), jnp.float32)
        if i < 4:
            gamma = 1.0 + 0.1 * jax.random.normal(kg, (cout,), jnp.float32)
            beta = 0.05 * jax.random.normal(kb, (cout,), jnp.float32)
        else:
            gamma = jnp.ones((cout,), jnp.float32)   # unused: last layer has no BN
            beta = jnp.zeros((cout,), jnp.float32)
        params.append((w, gamma, beta))
    return params


@jax.jit
def generator_forward(params, z_nchw):
    N = z_nchw.shape[0]
    # layer 0: 1x1 spatial input -> pure linear projection + BN + ReLU
    w0, g0, b0 = params[0]
    x = _project_latent(z_nchw.reshape(N, -1), w0, g0, b0)        # (N,4,4,8d) bf16
    for (w, gamma, beta), cfg in zip(params[1:], _LAYER_CFG):
        x = _conv_transpose2x_block(x, w, gamma, beta, **cfg)
    return jnp.transpose(x, (0, 3, 1, 2)).astype(jnp.float32)     # NHWC -> NCHW


if __name__ == "__main__":
    latent_size, depths, batch = 32, 16, 2          # scaled-down Generator(32, 16)
    key = jax.random.PRNGKey(0)
    kz, kp = jax.random.split(key)
    params = init_generator_params(kp, latent_size, depths)
    z = jax.random.normal(kz, (batch, latent_size, 1, 1), jnp.float32)  # NCHW latent

    out = generator_forward(params, z)
    out = jax.block_until_ready(out)

    assert out.shape == (batch, 3, 64, 64), out.shape
    assert out.dtype == jnp.float32
    assert bool(jnp.all(jnp.isfinite(out)))
    assert bool(jnp.all(jnp.abs(out) <= 1.0))       # Tanh output range
    print("KERNEL_OK")
</pallas_src>

<mosaic_0001>
module attributes {stable_mosaic.version = 11 : i64} {
  func.func @kernel(%arg0: memref<2x32xbf16, #tpu.memory_space<vmem>>, %arg1: memref<16x32x128xbf16, #tpu.memory_space<vmem>>, %arg2: memref<1x128xf32, #tpu.memory_space<vmem>>, %arg3: memref<1x128xf32, #tpu.memory_space<vmem>>, %arg4: memref<2x16x128xbf16, #tpu.memory_space<vmem>>, %arg5: memref<16x2x128xf32, #tpu.memory_space<vmem>>) attributes {dimension_semantics = [], scalar_prefetch = 0 : i64, scratch_operands = 1 : i64, tpu.core_type = #tpu.core_type<tc>} {
    %cst = arith.constant 0.000000e+00 : f32
    %0 = vector.broadcast %cst : f32 to vector<1x128xf32>
    %cst_0 = arith.constant 0.000000e+00 : f32
    %1 = vector.broadcast %cst_0 : f32 to vector<1x128xf32>
    %c0 = arith.constant 0 : index
    %c0_1 = arith.constant 0 : index
    %2 = vector.load %arg0[%c0, %c0_1] : memref<2x32xbf16, #tpu.memory_space<vmem>>, vector<2x32xbf16>
    %c0_2 = arith.constant 0 : index
    %c0_3 = arith.constant 0 : index
    %c0_4 = arith.constant 0 : index
    %3 = vector.load %arg1[%c0_2, %c0_3, %c0_4] : memref<16x32x128xbf16, #tpu.memory_space<vmem>>, vector<1x32x128xbf16>
    %4 = vector.shape_cast %3 : vector<1x32x128xbf16> to vector<32x128xbf16>
    %cst_5 = arith.constant dense<0.000000e+00> : vector<2x128xf32>
    %5 = tpu.matmul %2, %4, %cst_5 {dimension_numbers = #tpu.dot_dimension_numbers<[1], [0], [0], [1], [0, 0, 1, 1], [], []>} : vector<2x32xbf16>, vector<32x128xbf16>, vector<2x128xf32> -> vector<2x128xf32>
    %c0_6 = arith.constant 0 : index
    %c0_7 = arith.constant 0 : index
    %c0_8 = arith.constant 0 : index
    %6 = vector.load %arg5[%c0_6, %c0_7, %c0_8] : memref<16x2x128xf32, #tpu.memory_space<vmem>>, vector<1x2x128xf32>
    %7 = vector.shape_cast %6 : vector<1x2x128xf32> to vector<2x128xf32>
    %8 = vector.shape_cast %5 : vector<2x128xf32> to vector<1x2x128xf32>
    tpu.vector_store %arg5[%c0_6, %c0_7, %c0_8], %8 {strides = array<i32>} : memref<16x2x128xf32, #tpu.memory_space<vmem>>, vector<1x2x128xf32>,
    %cst_9 = arith.constant dense<0.000000e+00> : vector<128xf32>
    %9 = vector.multi_reduction <add>, %5, %cst_9 [0] : vector<2x128xf32> to vector<128xf32>
    %10 = vector.shape_cast %9 : vector<128xf32> to vector<1x128xf32>
    %11 = arith.addf %0, %10 : vector<1x128xf32>
    %12 = arith.mulf %5, %5 : vector<2x128xf32>
    %cst_10 = arith.constant dense<0.000000e+00> : vector<128xf32>
    %13 = vector.multi_reduction <add>, %12, %cst_10 [0] : vector<2x128xf32> to vector<128xf32>
    %14 = vector.shape_cast %13 : vector<128xf32> to vector<1x128xf32>
    %15 = arith.addf %1, %14 : vector<1x128xf32>
    %c0_11 = arith.constant 0 : index
    %c0_12 = arith.constant 0 : index
    %16 = vector.load %arg0[%c0_11, %c0_12] : memref<2x32xbf16, #tpu.memory_space<vmem>>, vector<2x32xbf16>
    %c1 = arith.constant 1 : index
    %c0_13 = arith.constant 0 : index
    %c0_14 = arith.constant 0 : index
    %17 = vector.load %arg1[%c1, %c0_13, %c0_14] : memref<16x32x128xbf16, #tpu.memory_space<vmem>>, vector<1x32x128xbf16>
    %18 = vector.shape_cast %17 : vector<1x32x128xbf16> to vector<32x128xbf16>
    %cst_15 = arith.constant dense<0.000000e+00> : vector<2x128xf32>
    %19 = tpu.matmul %16, %18, %cst_15 {dimension_numbers = #tpu.dot_dimension_numbers<[1], [0], [0], [1], [0, 0, 1, 1], [], []>} : vector<2x32xbf16>, vector<32x128xbf16>, vector<2x128xf32> -> vector<2x128xf32>
    %c1_16 = arith.constant 1 : index
    %c0_17 = arith.constant 0 : index
    %c0_18 = arith.constant 0 : index
    %20 = vector.load %arg5[%c1_16, %c0_17, %c0_18] : memref<16x2x128xf32, #tpu.memory_space<vmem>>, vector<1x2x128xf32>
    %21 = vector.shape_cast %20 : vector<1x2x128xf32> to vector<2x128xf32>
    %22 = vector.shape_cast %19 : vector<2x128xf32> to vector<1x2x128xf32>
    tpu.vector_store %arg5[%c1_16, %c0_17, %c0_18], %22 {strides = array<i32>} : memref<16x2x128xf32, #tpu.memory_space<vmem>>, vector<1x2x128xf32>,
    %cst_19 = arith.constant dense<0.000000e+00> : vector<128xf32>
    %23 = vector.multi_reduction <add>, %19, %cst_19 [0] : vector<2x128xf32> to vector<128xf32>
    %24 = vector.shape_cast %23 : vector<128xf32> to vector<1x128xf32>
    %25 = arith.addf %11, %24 : vector<1x128xf32>
    %26 = arith.mulf %19, %19 : vector<2x128xf32>
    %cst_20 = arith.constant dense<0.000000e+00> : vector<128xf32>
    %27 = vector.multi_reduction <add>, %26, %cst_20 [0] : vector<2x128xf32> to vector<128xf32>
    %28 = vector.shape_cast %27 : vector<128xf32> to vector<1x128xf32>
    %29 = arith.addf %15, %28 : vector<1x128xf32>
    %c0_21 = arith.constant 0 : index
    %c0_22 = arith.constant 0 : index
    %30 = vector.load %arg0[%c0_21, %c0_22] : memref<2x32xbf16, #tpu.memory_space<vmem>>, vector<2x32xbf16>
    %c2 = arith.constant 2 : index
    %c0_23 = arith.constant 0 : index
    %c0_24 = arith.constant 0 : index
    %31 = vector.load %arg1[%c2, %c0_23, %c0_24] : memref<16x32x128xbf16, #tpu.memory_space<vmem>>, vector<1x32x128xbf16>
    %32 = vector.shape_cast %31 : vector<1x32x128xbf16> to vector<32x128xbf16>
    %cst_25 = arith.constant dense<0.000000e+00> : vector<2x128xf32>
    %33 = tpu.matmul %30, %32, %cst_25 {dimension_numbers = #tpu.dot_dimension_numbers<[1], [0], [0], [1], [0, 0, 1, 1], [], []>} : vector<2x32xbf16>, vector<32x128xbf16>, vector<2x128xf32> -> vector<2x128xf32>
    %c2_26 = arith.constant 2 : index
    %c0_27 = arith.constant 0 : index
    %c0_28 = arith.constant 0 : index
    %34 = vector.load %arg5[%c2_26, %c0_27, %c0_28] : memref<16x2x128xf32, #tpu.memory_space<vmem>>, vector<1x2x128xf32>
    %35 = vector.shape_cast %34 : vector<1x2x128xf32> to vector<2x128xf32>
    %36 = vector.shape_cast %33 : vector<2x128xf32> to vector<1x2x128xf32>
    tpu.vector_store %arg5[%c2_26, %c0_27, %c0_28], %36 {strides = array<i32>} : memref<16x2x128xf32, #tpu.memory_space<vmem>>, vector<1x2x128xf32>,
    %cst_29 = arith.constant dense<0.000000e+00> : vector<128xf32>
    %37 = vector.multi_reduction <add>, %33, %cst_29 [0] : vector<2x128xf32> to vector<128xf32>
    %38 = vector.shape_cast %37 : vector<128xf32> to vector<1x128xf32>
    %39 = arith.addf %25, %38 : vector<1x128xf32>
    %40 = arith.mulf %33, %33 : vector<2x128xf32>
    %cst_30 = arith.constant dense<0.000000e+00> : vector<128xf32>
    %41 = vector.multi_reduction <add>, %40, %cst_30 [0] : vector<2x128xf32> to vector<128xf32>
    %42 = vector.shape_cast %41 : vector<128xf32> to vector<1x128xf32>
    %43 = arith.addf %29, %42 : vector<1x128xf32>
    %c0_31 = arith.constant 0 : index
    %c0_32 = arith.constant 0 : index
    %44 = vector.load %arg0[%c0_31, %c0_32] : memref<2x32xbf16, #tpu.memory_space<vmem>>, vector<2x32xbf16>
    %c3 = arith.constant 3 : index
    %c0_33 = arith.constant 0 : index
    %c0_34 = arith.constant 0 : index
    %45 = vector.load %arg1[%c3, %c0_33, %c0_34] : memref<16x32x128xbf16, #tpu.memory_space<vmem>>, vector<1x32x128xbf16>
    %46 = vector.shape_cast %45 : vector<1x32x128xbf16> to vector<32x128xbf16>
    %cst_35 = arith.constant dense<0.000000e+00> : vector<2x128xf32>
    %47 = tpu.matmul %44, %46, %cst_35 {dimension_numbers = #tpu.dot_dimension_numbers<[1], [0], [0], [1], [0, 0, 1, 1], [], []>} : vector<2x32xbf16>, vector<32x128xbf16>, vector<2x128xf32> -> vector<2x128xf32>
    %c3_36 = arith.constant 3 : index
    %c0_37 = arith.constant 0 : index
    %c0_38 = arith.constant 0 : index
    %48 = vector.load %arg5[%c3_36, %c0_37, %c0_38] : memref<16x2x128xf32, #tpu.memory_space<vmem>>, vector<1x2x128xf32>
    %49 = vector.shape_cast %48 : vector<1x2x128xf32> to vector<2x128xf32>
    %50 = vector.shape_cast %47 : vector<2x128xf32> to vector<1x2x128xf32>
    tpu.vector_store %arg5[%c3_36, %c0_37, %c0_38], %50 {strides = array<i32>} : memref<16x2x128xf32, #tpu.memory_space<vmem>>, vector<1x2x128xf32>,
    %cst_39 = arith.constant dense<0.000000e+00> : vector<128xf32>
    %51 = vector.multi_reduction <add>, %47, %cst_39 [0] : vector<2x128xf32> to vector<128xf32>
    %52 = vector.shape_cast %51 : vector<128xf32> to vector<1x128xf32>
    %53 = arith.addf %39, %52 : vector<1x128xf32>
    %54 = arith.mulf %47, %47 : vector<2x128xf32>
    %cst_40 = arith.constant dense<0.000000e+00> : vector<128xf32>
    %55 = vector.multi_reduction <add>, %54, %cst_40 [0] : vector<2x128xf32> to vector<128xf32>
    %56 = vector.shape_cast %55 : vector<128xf32> to vector<1x128xf32>
    %57 = arith.addf %43, %56 : vector<1x128xf32>
    %c0_41 = arith.constant 0 : index
    %c0_42 = arith.constant 0 : index
    %58 = vector.load %arg0[%c0_41, %c0_42] : memref<2x32xbf16, #tpu.memory_space<vmem>>, vector<2x32xbf16>
    %c4 = arith.constant 4 : index
    %c0_43 = arith.constant 0 : index
    %c0_44 = arith.constant 0 : index
    %59 = vector.load %arg1[%c4, %c0_43, %c0_44] : memref<16x32x128xbf16, #tpu.memory_space<vmem>>, vector<1x32x128xbf16>
    %60 = vector.shape_cast %59 : vector<1x32x128xbf16> to vector<32x128xbf16>
    %cst_45 = arith.constant dense<0.000000e+00> : vector<2x128xf32>
    %61 = tpu.matmul %58, %60, %cst_45 {dimension_numbers = #tpu.dot_dimension_numbers<[1], [0], [0], [1], [0, 0, 1, 1], [], []>} : vector<2x32xbf16>, vector<32x128xbf16>, vector<2x128xf32> -> vector<2x128xf32>
    %c4_46 = arith.constant 4 : index
    %c0_47 = arith.constant 0 : index
    %c0_48 = arith.constant 0 : index
    %62 = vector.load %arg5[%c4_46, %c0_47, %c0_48] : memref<16x2x128xf32, #tpu.memory_space<vmem>>, vector<1x2x128xf32>
    %63 = vector.shape_cast %62 : vector<1x2x128xf32> to vector<2x128xf32>
    %64 = vector.shape_cast %61 : vector<2x128xf32> to vector<1x2x128xf32>
    tpu.vector_store %arg5[%c4_46, %c0_47, %c0_48], %64 {strides = array<i32>} : memref<16x2x128xf32, #tpu.memory_space<vmem>>, vector<1x2x128xf32>,
    %cst_49 = arith.constant dense<0.000000e+00> : vector<128xf32>
    %65 = vector.multi_reduction <add>, %61, %cst_49 [0] : vector<2x128xf32> to vector<128xf32>
    %66 = vector.shape_cast %65 : vector<128xf32> to vector<1x128xf32>
    %67 = arith.addf %53, %66 : vector<1x128xf32>
    %68 = arith.mulf %61, %61 : vector<2x128xf32>
    %cst_50 = arith.constant dense<0.000000e+00> : vector<128xf32>
    %69 = vector.multi_reduction <add>, %68, %cst_50 [0] : vector<2x128xf32> to vector<128xf32>
    %70 = vector.shape_cast %69 : vector<128xf32> to vector<1x128xf32>
    %71 = arith.addf %57, %70 : vector<1x128xf32>
    %c0_51 = arith.constant 0 : index
    %c0_52 = arith.constant 0 : index
    %72 = vector.load %arg0[%c0_51, %c0_52] : memref<2x32xbf16, #tpu.memory_space<vmem>>, vector<2x32xbf16>
    %c5 = arith.constant 5 : index
    %c0_53 = arith.constant 0 : index
    %c0_54 = arith.constant 0 : index
    %73 = vector.load %arg1[%c5, %c0_53, %c0_54] : memref<16x32x128xbf16, #tpu.memory_space<vmem>>, vector<1x32x128xbf16>
    %74 = vector.shape_cast %73 : vector<1x32x128xbf16> to vector<32x128xbf16>
    %cst_55 = arith.constant dense<0.000000e+00> : vector<2x128xf32>
    %75 = tpu.matmul %72, %74, %cst_55 {dimension_numbers = #tpu.dot_dimension_numbers<[1], [0], [0], [1], [0, 0, 1, 1], [], []>} : vector<2x32xbf16>, vector<32x128xbf16>, vector<2x128xf32> -> vector<2x128xf32>
    %c5_56 = arith.constant 5 : index
    %c0_57 = arith.constant 0 : index
    %c0_58 = arith.constant 0 : index
    %76 = vector.load %arg5[%c5_56, %c0_57, %c0_58] : memref<16x2x128xf32, #tpu.memory_space<vmem>>, vector<1x2x128xf32>
    %77 = vector.shape_cast %76 : vector<1x2x128xf32> to vector<2x128xf32>
    %78 = vector.shape_cast %75 : vector<2x128xf32> to vector<1x2x128xf32>
    tpu.vector_store %arg5[%c5_56, %c0_57, %c0_58], %78 {strides = array<i32>} : memref<16x2x128xf32, #tpu.memory_space<vmem>>, vector<1x2x128xf32>,
    %cst_59 = arith.constant dense<0.000000e+00> : vector<128xf32>
    %79 = vector.multi_reduction <add>, %75, %cst_59 [0] : vector<2x128xf32> to vector<128xf32>
    %80 = vector.shape_cast %79 : vector<128xf32> to vector<1x128xf32>
    %81 = arith.addf %67, %80 : vector<1x128xf32>
    %82 = arith.mulf %75, %75 : vector<2x128xf32>
    %cst_60 = arith.constant dense<0.000000e+00> : vector<128xf32>
    %83 = vector.multi_reduction <add>, %82, %cst_60 [0] : vector<2x128xf32> to vector<128xf32>
    %84 = vector.shape_cast %83 : vector<128xf32> to vector<1x128xf32>
    %85 = arith.addf %71, %84 : vector<1x128xf32>
    %c0_61 = arith.constant 0 : index
    %c0_62 = arith.constant 0 : index
    %86 = vector.load %arg0[%c0_61, %c0_62] : memref<2x32xbf16, #tpu.memory_space<vmem>>, vector<2x32xbf16>
    %c6 = arith.constant 6 : index
    %c0_63 = arith.constant 0 : index
    %c0_64 = arith.constant 0 : index
    %87 = vector.load %arg1[%c6, %c0_63, %c0_64] : memref<16x32x128xbf16, #tpu.memory_space<vmem>>, vector<1x32x128xbf16>
    %88 = vector.shape_cast %87 : vector<1x32x128xbf16> to vector<32x128xbf16>
    %cst_65 = arith.constant dense<0.000000e+00> : vector<2x128xf32>
    %89 = tpu.matmul %86, %88, %cst_65 {dimension_numbers = #tpu.dot_dimension_numbers<[1], [0], [0], [1], [0, 0, 1, 1], [], []>} : vector<2x32xbf16>, vector<32x128xbf16>, vector<2x128xf32> -> vector<2x128xf32>
    %c6_66 = arith.constant 6 : index
    %c0_67 = arith.constant 0 : index
    %c0_68 = arith.constant 0 : index
    %90 = vector.load %arg5[%c6_66, %c0_67, %c0_68] : memref<16x2x128xf32, #tpu.memory_space<vmem>>, vector<1x2x128xf32>
    %91 = vector.shape_cast %90 : vector<1x2x128xf32> to vector<2x128xf32>
    %92 = vector.shape_cast %89 : vector<2x128xf32> to vector<1x2x128xf32>
    tpu.vector_store %arg5[%c6_66, %c0_67, %c0_68], %92 {strides = array<i32>} : memref<16x2x128xf32, #tpu.memory_space<vmem>>, vector<1x2x128xf32>,
    %cst_69 = arith.constant dense<0.000000e+00> : vector<128xf32>
    %93 = vector.multi_reduction <add>, %89, %cst_69 [0] : vector<2x128xf32> to vector<128xf32>
    %94 = vector.shape_cast %93 : vector<128xf32> to vector<1x128xf32>
    %95 = arith.addf %81, %94 : vector<1x128xf32>
    %96 = arith.mulf %89, %89 : vector<2x128xf32>
    %cst_70 = arith.constant dense<0.000000e+00> : vector<128xf32>
    %97 = vector.multi_reduction <add>, %96, %cst_70 [0] : vector<2x128xf32> to vector<128xf32>
    %98 = vector.shape_cast %97 : vector<128xf32> to vector<1x128xf32>
    %99 = arith.addf %85, %98 : vector<1x128xf32>
    %c0_71 = arith.constant 0 : index
    %c0_72 = arith.constant 0 : index
    %100 = vector.load %arg0[%c0_71, %c0_72] : memref<2x32xbf16, #tpu.memory_space<vmem>>, vector<2x32xbf16>
    %c7 = arith.constant 7 : index
    %c0_73 = arith.constant 0 : index
    %c0_74 = arith.constant 0 : index
    %101 = vector.load %arg1[%c7, %c0_73, %c0_74] : memref<16x32x128xbf16, #tpu.memory_space<vmem>>, vector<1x32x128xbf16>
    %102 = vector.shape_cast %101 : vector<1x32x128xbf16> to vector<32x128xbf16>
    %cst_75 = arith.constant dense<0.000000e+00> : vector<2x128xf32>
    %103 = tpu.matmul %100, %102, %cst_75 {dimension_numbers = #tpu.dot_dimension_numbers<[1], [0], [0], [1], [0, 0, 1, 1], [], []>} : vector<2x32xbf16>, vector<32x128xbf16>, vector<2x128xf32> -> vector<2x128xf32>
    %c7_76 = arith.constant 7 : index
    %c0_77 = arith.constant 0 : index
    %c0_78 = arith.constant 0 : index
    %104 = vector.load %arg5[%c7_76, %c0_77, %c0_78] : memref<16x2x128xf32, #tpu.memory_space<vmem>>, vector<1x2x128xf32>
    %105 = vector.shape_cast %104 : vector<1x2x128xf32> to vector<2x128xf32>
    %106 = vector.shape_cast %103 : vector<2x128xf32> to vector<1x2x128xf32>
    tpu.vector_store %arg5[%c7_76, %c0_77, %c0_78], %106 {strides = array<i32>} : memref<16x2x128xf32, #tpu.memory_space<vmem>>, vector<1x2x128xf32>,
    %cst_79 = arith.constant dense<0.000000e+00> : vector<128xf32>
    %107 = vector.multi_reduction <add>, %103, %cst_79 [0] : vector<2x128xf32> to vector<128xf32>
    %108 = vector.shape_cast %107 : vector<128xf32> to vector<1x128xf32>
    %109 = arith.addf %95, %108 : vector<1x128xf32>
    %110 = arith.mulf %103, %103 : vector<2x128xf32>
    %cst_80 = arith.constant dense<0.000000e+00> : vector<128xf32>
    %111 = vector.multi_reduction <add>, %110, %cst_80 [0] : vector<2x128xf32> to vector<128xf32>
    %112 = vector.shape_cast %111 : vector<128xf32> to vector<1x128xf32>
    %113 = arith.addf %99, %112 : vector<1x128xf32>
    %c0_81 = arith.constant 0 : index
    %c0_82 = arith.constant 0 : index
    %114 = vector.load %arg0[%c0_81, %c0_82] : memref<2x32xbf16, #tpu.memory_space<vmem>>, vector<2x32xbf16>
    %c8 = arith.constant 8 : index
    %c0_83 = arith.constant 0 : index
    %c0_84 = arith.constant 0 : index
    %115 = vector.load %arg1[%c8, %c0_83, %c0_84] : memref<16x32x128xbf16, #tpu.memory_space<vmem>>, vector<1x32x128xbf16>
    %116 = vector.shape_cast %115 : vector<1x32x128xbf16> to vector<32x128xbf16>
    %cst_85 = arith.constant dense<0.000000e+00> : vector<2x128xf32>
    %117 = tpu.matmul %114, %116, %cst_85 {dimension_numbers = #tpu.dot_dimension_numbers<[1], [0], [0], [1], [0, 0, 1, 1], [], []>} : vector<2x32xbf16>, vector<32x128xbf16>, vector<2x128xf32> -> vector<2x128xf32>
    %c8_86 = arith.constant 8 : index
    %c0_87 = arith.constant 0 : index
    %c0_88 = arith.constant 0 : index
    %118 = vector.load %arg5[%c8_86, %c0_87, %c0_88] : memref<16x2x128xf32, #tpu.memory_space<vmem>>, vector<1x2x128xf32>
    %119 = vector.shape_cast %118 : vector<1x2x128xf32> to vector<2x128xf32>
    %120 = vector.shape_cast %117 : vector<2x128xf32> to vector<1x2x128xf32>
    tpu.vector_store %arg5[%c8_86, %c0_87, %c0_88], %120 {strides = array<i32>} : memref<16x2x128xf32, #tpu.memory_space<vmem>>, vector<1x2x128xf32>,
    %cst_89 = arith.constant dense<0.000000e+00> : vector<128xf32>
    %121 = vector.multi_reduction <add>, %117, %cst_89 [0] : vector<2x128xf32> to vector<128xf32>
    %122 = vector.shape_cast %121 : vector<128xf32> to vector<1x128xf32>
    %123 = arith.addf %109, %122 : vector<1x128xf32>
    %124 = arith.mulf %117, %117 : vector<2x128xf32>
    %cst_90 = arith.constant dense<0.000000e+00> : vector<128xf32>
    %125 = vector.multi_reduction <add>, %124, %cst_90 [0] : vector<2x128xf32> to vector<128xf32>
    %126 = vector.shape_cast %125 : vector<128xf32> to vector<1x128xf32>
    %127 = arith.addf %113, %126 : vector<1x128xf32>
    %c0_91 = arith.constant 0 : index
    %c0_92 = arith.constant 0 : index
    %128 = vector.load %arg0[%c0_91, %c0_92] : memref<2x32xbf16, #tpu.memory_space<vmem>>, vector<2x32xbf16>
    %c9 = arith.constant 9 : index
    %c0_93 = arith.constant 0 : index
    %c0_94 = arith.constant 0 : index
    %129 = vector.load %arg1[%c9, %c0_93, %c0_94] : memref<16x32x128xbf16, #tpu.memory_space<vmem>>, vector<1x32x128xbf16>
    %130 = vector.shape_cast %129 : vector<1x32x128xbf16> to vector<32x128xbf16>
    %cst_95 = arith.constant dense<0.000000e+00> : vector<2x128xf32>
    %131 = tpu.matmul %128, %130, %cst_95 {dimension_numbers = #tpu.dot_dimension_numbers<[1], [0], [0], [1], [0, 0, 1, 1], [], []>} : vector<2x32xbf16>, vector<32x128xbf16>, vector<2x128xf32> -> vector<2x128xf32>
    %c9_96 = arith.constant 9 : index
    %c0_97 = arith.constant 0 : index
    %c0_98 = arith.constant 0 : index
    %132 = vector.load %arg5[%c9_96, %c0_97, %c0_98] : memref<16x2x128xf32, #tpu.memory_space<vmem>>, vector<1x2x128xf32>
    %133 = vector.shape_cast %132 : vector<1x2x128xf32> to vector<2x128xf32>
    %134 = vector.shape_cast %131 : vector<2x128xf32> to vector<1x2x128xf32>
    tpu.vector_store %arg5[%c9_96, %c0_97, %c0_98], %134 {strides = array<i32>} : memref<16x2x128xf32, #tpu.memory_space<vmem>>, vector<1x2x128xf32>,
    %cst_99 = arith.constant dense<0.000000e+00> : vector<128xf32>
    %135 = vector.multi_reduction <add>, %131, %cst_99 [0] : vector<2x128xf32> to vector<128xf32>
    %136 = vector.shape_cast %135 : vector<128xf32> to vector<1x128xf32>
    %137 = arith.addf %123, %136 : vector<1x128xf32>
    %138 = arith.mulf %131, %131 : vector<2x128xf32>
    %cst_100 = arith.constant dense<0.000000e+00> : vector<128xf32>
    %139 = vector.multi_reduction <add>, %138, %cst_100 [0] : vector<2x128xf32> to vector<128xf32>
    %140 = vector.shape_cast %139 : vector<128xf32> to vector<1x128xf32>
    %141 = arith.addf %127, %140 : vector<1x128xf32>
    %c0_101 = arith.constant 0 : index
    %c0_102 = arith.constant 0 : index
    %142 = vector.load %arg0[%c0_101, %c0_102] : memref<2x32xbf16, #tpu.memory_space<vmem>>, vector<2x32xbf16>
    %c10 = arith.constant 10 : index
    %c0_103 = arith.constant 0 : index
    %c0_104 = arith.constant 0 : index
    %143 = vector.load %arg1[%c10, %c0_103, %c0_104] : memref<16x32x128xbf16, #tpu.memory_space<vmem>>, vector<1x32x128xbf16>
    %144 = vector.shape_cast %143 : vector<1x32x128xbf16> to vector<32x128xbf16>
    %cst_105 = arith.constant dense<0.000000e+00> : vector<2x128xf32>
    %145 = tpu.matmul %142, %144, %cst_105 {dimension_numbers = #tpu.dot_dimension_numbers<[1], [0], [0], [1], [0, 0, 1, 1], [], []>} : vector<2x32xbf16>, vector<32x128xbf16>, vector<2x128xf32> -> vector<2x128xf32>
    %c10_106 = arith.constant 10 : index
    %c0_107 = arith.constant 0 : index
    %c0_108 = arith.constant 0 : index
    %146 = vector.load %arg5[%c10_106, %c0_107, %c0_108] : memref<16x2x128xf32, #tpu.memory_space<vmem>>, vector<1x2x128xf32>
    %147 = vector.shape_cast %146 : vector<1x2x128xf32> to vector<2x128xf32>
    %148 = vector.shape_cast %145 : vector<2x128xf32> to vector<1x2x128xf32>
    tpu.vector_store %arg5[%c10_106, %c0_107, %c0_108], %148 {strides = array<i32>} : memref<16x2x128xf32, #tpu.memory_space<vmem>>, vector<1x2x128xf32>,
    %cst_109 = arith.constant dense<0.000000e+00> : vector<128xf32>
    %149 = vector.multi_reduction <add>, %145, %cst_109 [0] : vector<2x128xf32> to vector<128xf32>
    %150 = vector.shape_cast %149 : vector<128xf32> to vector<1x128xf32>
    %151 = arith.addf %137, %150 : vector<1x128xf32>
    %152 = arith.mulf %145, %145 : vector<2x128xf32>
    %cst_110 = arith.constant dense<0.000000e+00> : vector<128xf32>
    %153 = vector.multi_reduction <add>, %152, %cst_110 [0] : vector<2x128xf32> to vector<128xf32>
    %154 = vector.shape_cast %153 : vector<128xf32> to vector<1x128xf32>
    %155 = arith.addf %141, %154 : vector<1x128xf32>
    %c0_111 = arith.constant 0 : index
    %c0_112 = arith.constant 0 : index
    %156 = vector.load %arg0[%c0_111, %c0_112] : memref<2x32xbf16, #tpu.memory_space<vmem>>, vector<2x32xbf16>
    %c11 = arith.constant 11 : index
    %c0_113 = arith.constant 0 : index
    %c0_114 = arith.constant 0 : index
    %157 = vector.load %arg1[%c11, %c0_113, %c0_114] : memref<16x32x128xbf16, #tpu.memory_space<vmem>>, vector<1x32x128xbf16>
    %158 = vector.shape_cast %157 : vector<1x32x128xbf16> to vector<32x128xbf16>
    %cst_115 = arith.constant dense<0.000000e+00> : vector<2x128xf32>
    %159 = tpu.matmul %156, %158, %cst_115 {dimension_numbers = #tpu.dot_dimension_numbers<[1], [0], [0], [1], [0, 0, 1, 1], [], []>} : vector<2x32xbf16>, vector<32x128xbf16>, vector<2x128xf32> -> vector<2x128xf32>
    %c11_116 = arith.constant 11 : index
    %c0_117 = arith.constant 0 : index
    %c0_118 = arith.constant 0 : index
    %160 = vector.load %arg5[%c11_116, %c0_117, %c0_118] : memref<16x2x128xf32, #tpu.memory_space<vmem>>, vector<1x2x128xf32>
    %161 = vector.shape_cast %160 : vector<1x2x128xf32> to vector<2x128xf32>
    %162 = vector.shape_cast %159 : vector<2x128xf32> to vector<1x2x128xf32>
    tpu.vector_store %arg5[%c11_116, %c0_117, %c0_118], %162 {strides = array<i32>} : memref<16x2x128xf32, #tpu.memory_space<vmem>>, vector<1x2x128xf32>,
    %cst_119 = arith.constant dense<0.000000e+00> : vector<128xf32>
    %163 = vector.multi_reduction <add>, %159, %cst_119 [0] : vector<2x128xf32> to vector<128xf32>
    %164 = vector.shape_cast %163 : vector<128xf32> to vector<1x128xf32>
    %165 = arith.addf %151, %164 : vector<1x128xf32>
    %166 = arith.mulf %159, %159 : vector<2x128xf32>
    %cst_120 = arith.constant dense<0.000000e+00> : vector<128xf32>
    %167 = vector.multi_reduction <add>, %166, %cst_120 [0] : vector<2x128xf32> to vector<128xf32>
    %168 = vector.shape_cast %167 : vector<128xf32> to vector<1x128xf32>
    %169 = arith.addf %155, %168 : vector<1x128xf32>
    %c0_121 = arith.constant 0 : index
    %c0_122 = arith.constant 0 : index
    %170 = vector.load %arg0[%c0_121, %c0_122] : memref<2x32xbf16, #tpu.memory_space<vmem>>, vector<2x32xbf16>
    %c12 = arith.constant 12 : index
    %c0_123 = arith.constant 0 : index
    %c0_124 = arith.constant 0 : index
    %171 = vector.load %arg1[%c12, %c0_123, %c0_124] : memref<16x32x128xbf16, #tpu.memory_space<vmem>>, vector<1x32x128xbf16>
    %172 = vector.shape_cast %171 : vector<1x32x128xbf16> to vector<32x128xbf16>
    %cst_125 = arith.constant dense<0.000000e+00> : vector<2x128xf32>
    %173 = tpu.matmul %170, %172, %cst_125 {dimension_numbers = #tpu.dot_dimension_numbers<[1], [0], [0], [1], [0, 0, 1, 1], [], []>} : vector<2x32xbf16>, vector<32x128xbf16>, vector<2x128xf32> -> vector<2x128xf32>
    %c12_126 = arith.constant 12 : index
    %c0_127 = arith.constant 0 : index
    %c0_128 = arith.constant 0 : index
    %174 = vector.load %arg5[%c12_126, %c0_127, %c0_128] : memref<16x2x128xf32, #tpu.memory_space<vmem>>, vector<1x2x128xf32>
    %175 = vector.shape_cast %174 : vector<1x2x128xf32> to vector<2x128xf32>
    %176 = vector.shape_cast %173 : vector<2x128xf32> to vector<1x2x128xf32>
    tpu.vector_store %arg5[%c12_126, %c0_127, %c0_128], %176 {strides = array<i32>} : memref<16x2x128xf32, #tpu.memory_space<vmem>>, vector<1x2x128xf32>,
    %cst_129 = arith.constant dense<0.000000e+00> : vector<128xf32>
    %177 = vector.multi_reduction <add>, %173, %cst_129 [0] : vector<2x128xf32> to vector<128xf32>
    %178 = vector.shape_cast %177 : vector<128xf32> to vector<1x128xf32>
    %179 = arith.addf %165, %178 : vector<1x128xf32>
    %180 = arith.mulf %173, %173 : vector<2x128xf32>
    %cst_130 = arith.constant dense<0.000000e+00> : vector<128xf32>
    %181 = vector.multi_reduction <add>, %180, %cst_130 [0] : vector<2x128xf32> to vector<128xf32>
    %182 = vector.shape_cast %181 : vector<128xf32> to vector<1x128xf32>
    %183 = arith.addf %169, %182 : vector<1x128xf32>
    %c0_131 = arith.constant 0 : index
    %c0_132 = arith.constant 0 : index
    %184 = vector.load %arg0[%c0_131, %c0_132] : memref<2x32xbf16, #tpu.memory_space<vmem>>, vector<2x32xbf16>
    %c13 = arith.constant 13 : index
    %c0_133 = arith.constant 0 : index
    %c0_134 = arith.constant 0 : index
    %185 = vector.load %arg1[%c13, %c0_133, %c0_134] : memref<16x32x128xbf16, #tpu.memory_space<vmem>>, vector<1x32x128xbf16>
    %186 = vector.shape_cast %185 : vector<1x32x128xbf16> to vector<32x128xbf16>
    %cst_135 = arith.constant dense<0.000000e+00> : vector<2x128xf32>
    %187 = tpu.matmul %184, %186, %cst_135 {dimension_numbers = #tpu.dot_dimension_numbers<[1], [0], [0], [1], [0, 0, 1, 1], [], []>} : vector<2x32xbf16>, vector<32x128xbf16>, vector<2x128xf32> -> vector<2x128xf32>
    %c13_136 = arith.constant 13 : index
    %c0_137 = arith.constant 0 : index
    %c0_138 = arith.constant 0 : index
    %188 = vector.load %arg5[%c13_136, %c0_137, %c0_138] : memref<16x2x128xf32, #tpu.memory_space<vmem>>, vector<1x2x128xf32>
    %189 = vector.shape_cast %188 : vector<1x2x128xf32> to vector<2x128xf32>
    %190 = vector.shape_cast %187 : vector<2x128xf32> to vector<1x2x128xf32>
    tpu.vector_store %arg5[%c13_136, %c0_137, %c0_138], %190 {strides = array<i32>} : memref<16x2x128xf32, #tpu.memory_space<vmem>>, vector<1x2x128xf32>,
    %cst_139 = arith.constant dense<0.000000e+00> : vector<128xf32>
    %191 = vector.multi_reduction <add>, %187, %cst_139 [0] : vector<2x128xf32> to vector<128xf32>
    %192 = vector.shape_cast %191 : vector<128xf32> to vector<1x128xf32>
    %193 = arith.addf %179, %192 : vector<1x128xf32>
    %194 = arith.mulf %187, %187 : vector<2x128xf32>
    %cst_140 = arith.constant dense<0.000000e+00> : vector<128xf32>
    %195 = vector.multi_reduction <add>, %194, %cst_140 [0] : vector<2x128xf32> to vector<128xf32>
    %196 = vector.shape_cast %195 : vector<128xf32> to vector<1x128xf32>
    %197 = arith.addf %183, %196 : vector<1x128xf32>
    %c0_141 = arith.constant 0 : index
    %c0_142 = arith.constant 0 : index
    %198 = vector.load %arg0[%c0_141, %c0_142] : memref<2x32xbf16, #tpu.memory_space<vmem>>, vector<2x32xbf16>
    %c14 = arith.constant 14 : index
    %c0_143 = arith.constant 0 : index
    %c0_144 = arith.constant 0 : index
    %199 = vector.load %arg1[%c14, %c0_143, %c0_144] : memref<16x32x128xbf16, #tpu.memory_space<vmem>>, vector<1x32x128xbf16>
    %200 = vector.shape_cast %199 : vector<1x32x128xbf16> to vector<32x128xbf16>
    %cst_145 = arith.constant dense<0.000000e+00> : vector<2x128xf32>
    %201 = tpu.matmul %198, %200, %cst_145 {dimension_numbers = #tpu.dot_dimension_numbers<[1], [0], [0], [1], [0, 0, 1, 1], [], []>} : vector<2x32xbf16>, vector<32x128xbf16>, vector<2x128xf32> -> vector<2x128xf32>
    %c14_146 = arith.constant 14 : index
    %c0_147 = arith.constant 0 : index
    %c0_148 = arith.constant 0 : index
    %202 = vector.load %arg5[%c14_146, %c0_147, %c0_148] : memref<16x2x128xf32, #tpu.memory_space<vmem>>, vector<1x2x128xf32>
    %203 = vector.shape_cast %202 : vector<1x2x128xf32> to vector<2x128xf32>
    %204 = vector.shape_cast %201 : vector<2x128xf32> to vector<1x2x128xf32>
    tpu.vector_store %arg5[%c14_146, %c0_147, %c0_148], %204 {strides = array<i32>} : memref<16x2x128xf32, #tpu.memory_space<vmem>>, vector<1x2x128xf32>,
    %cst_149 = arith.constant dense<0.000000e+00> : vector<128xf32>
    %205 = vector.multi_reduction <add>, %201, %cst_149 [0] : vector<2x128xf32> to vector<128xf32>
    %206 = vector.shape_cast %205 : vector<128xf32> to vector<1x128xf32>
    %207 = arith.addf %193, %206 : vector<1x128xf32>
    %208 = arith.mulf %201, %201 : vector<2x128xf32>
    %cst_150 = arith.constant dense<0.000000e+00> : vector<128xf32>
    %209 = vector.multi_reduction <add>, %208, %cst_150 [0] : vector<2x128xf32> to vector<128xf32>
    %210 = vector.shape_cast %209 : vector<128xf32> to vector<1x128xf32>
    %211 = arith.addf %197, %210 : vector<1x128xf32>
    %c0_151 = arith.constant 0 : index
    %c0_152 = arith.constant 0 : index
    %212 = vector.load %arg0[%c0_151, %c0_152] : memref<2x32xbf16, #tpu.memory_space<vmem>>, vector<2x32xbf16>
    %c15 = arith.constant 15 : index
    %c0_153 = arith.constant 0 : index
    %c0_154 = arith.constant 0 : index
    %213 = vector.load %arg1[%c15, %c0_153, %c0_154] : memref<16x32x128xbf16, #tpu.memory_space<vmem>>, vector<1x32x128xbf16>
    %214 = vector.shape_cast %213 : vector<1x32x128xbf16> to vector<32x128xbf16>
    %cst_155 = arith.constant dense<0.000000e+00> : vector<2x128xf32>
    %215 = tpu.matmul %212, %214, %cst_155 {dimension_numbers = #tpu.dot_dimension_numbers<[1], [0], [0], [1], [0, 0, 1, 1], [], []>} : vector<2x32xbf16>, vector<32x128xbf16>, vector<2x128xf32> -> vector<2x128xf32>
    %c15_156 = arith.constant 15 : index
    %c0_157 = arith.constant 0 : index
    %c0_158 = arith.constant 0 : index
    %216 = vector.load %arg5[%c15_156, %c0_157, %c0_158] : memref<16x2x128xf32, #tpu.memory_space<vmem>>, vector<1x2x128xf32>
    %217 = vector.shape_cast %216 : vector<1x2x128xf32> to vector<2x128xf32>
    %218 = vector.shape_cast %215 : vector<2x128xf32> to vector<1x2x128xf32>
    tpu.vector_store %arg5[%c15_156, %c0_157, %c0_158], %218 {strides = array<i32>} : memref<16x2x128xf32, #tpu.memory_space<vmem>>, vector<1x2x128xf32>,
    %cst_159 = arith.constant dense<0.000000e+00> : vector<128xf32>
    %219 = vector.multi_reduction <add>, %215, %cst_159 [0] : vector<2x128xf32> to vector<128xf32>
    %220 = vector.shape_cast %219 : vector<128xf32> to vector<1x128xf32>
    %221 = arith.addf %207, %220 : vector<1x128xf32>
    %222 = arith.mulf %215, %215 : vector<2x128xf32>
    %cst_160 = arith.constant dense<0.000000e+00> : vector<128xf32>
    %223 = vector.multi_reduction <add>, %222, %cst_160 [0] : vector<2x128xf32> to vector<128xf32>
    %224 = vector.shape_cast %223 : vector<128xf32> to vector<1x128xf32>
    %225 = arith.addf %211, %224 : vector<1x128xf32>
    %cst_161 = arith.constant 3.200000e+01 : f32
    %226 = vector.broadcast %cst_161 : f32 to vector<1x128xf32>
    %227 = arith.divf %221, %226 : vector<1x128xf32>
    %cst_162 = arith.constant 3.200000e+01 : f32
    %228 = vector.broadcast %cst_162 : f32 to vector<1x128xf32>
    %229 = arith.divf %225, %228 : vector<1x128xf32>
    %230 = arith.mulf %227, %227 : vector<1x128xf32>
    %231 = arith.subf %229, %230 : vector<1x128xf32>
    %cst_163 = arith.constant 0.000000e+00 : f32
    %232 = vector.broadcast %cst_163 : f32 to vector<1x128xf32>
    %233 = arith.maximumf %231, %232 : vector<1x128xf32>
    %c0_164 = arith.constant 0 : index
    %c0_165 = arith.constant 0 : index
    %234 = vector.load %arg2[%c0_164, %c0_165] : memref<1x128xf32, #tpu.memory_space<vmem>>, vector<1x128xf32>
    %cst_166 = arith.constant 9.99999974E-6 : f32
    %235 = vector.broadcast %cst_166 : f32 to vector<1x128xf32>
    %236 = arith.addf %233, %235 : vector<1x128xf32>
    %237 = math.rsqrt %236 : vector<1x128xf32>
    %238 = arith.mulf %234, %237 : vector<1x128xf32>
    %c0_167 = arith.constant 0 : index
    %c0_168 = arith.constant 0 : index
    %239 = vector.load %arg3[%c0_167, %c0_168] : memref<1x128xf32, #tpu.memory_space<vmem>>, vector<1x128xf32>
    %240 = arith.mulf %227, %238 : vector<1x128xf32>
    %241 = arith.subf %239, %240 : vector<1x128xf32>
    %c0_169 = arith.constant 0 : index
    %c0_170 = arith.constant 0 : index
    %c0_171 = arith.constant 0 : index
    %242 = vector.load %arg5[%c0_169, %c0_170, %c0_171] : memref<16x2x128xf32, #tpu.memory_space<vmem>>, vector<1x2x128xf32>
    %243 = vector.shape_cast %242 : vector<1x2x128xf32> to vector<2x128xf32>
    %244 = vector.broadcast %238 : vector<1x128xf32> to vector<2x128xf32>
    %245 = arith.mulf %243, %244 : vector<2x128xf32>
    %246 = vector.broadcast %241 : vector<1x128xf32> to vector<2x128xf32>
    %247 = arith.addf %245, %246 : vector<2x128xf32>
    %cst_172 = arith.constant 0.000000e+00 : f32
    %248 = vector.broadcast %cst_172 : f32 to vector<2x128xf32>
    %249 = arith.maximumf %247, %248 : vector<2x128xf32>
    %250 = arith.truncf %249 : vector<2x128xf32> to vector<2x128xbf16>
    %c0_173 = arith.constant 0 : index
    %c0_174 = arith.constant 0 : index
    %c0_175 = arith.constant 0 : index
    %251 = vector.load %arg4[%c0_173, %c0_174, %c0_175] : memref<2x16x128xbf16, #tpu.memory_space<vmem>>, vector<2x1x128xbf16>
    %252 = vector.shape_cast %251 : vector<2x1x128xbf16> to vector<2x128xbf16>
    %253 = vector.shape_cast %250 : vector<2x128xbf16> to vector<2x1x128xbf16>
    tpu.vector_store %arg4[%c0_173, %c0_174, %c0_175], %253 {strides = array<i32>} : memref<2x16x128xbf16, #tpu.memory_space<vmem>>, vector<2x1x128xbf16>,
    %c1_176 = arith.constant 1 : index
    %c0_177 = arith.constant 0 : index
    %c0_178 = arith.constant 0 : index
    %254 = vector.load %arg5[%c1_176, %c0_177, %c0_178] : memref<16x2x128xf32, #tpu.memory_space<vmem>>, vector<1x2x128xf32>
    %255 = vector.shape_cast %254 : vector<1x2x128xf32> to vector<2x128xf32>
    %256 = vector.broadcast %238 : vector<1x128xf32> to vector<2x128xf32>
    %257 = arith.mulf %255, %256 : vector<2x128xf32>
    %258 = vector.broadcast %241 : vector<1x128xf32> to vector<2x128xf32>
    %259 = arith.addf %257, %258 : vector<2x128xf32>
    %cst_179 = arith.constant 0.000000e+00 : f32
    %260 = vector.broadcast %cst_179 : f32 to vector<2x128xf32>
    %261 = arith.maximumf %259, %260 : vector<2x128xf32>
    %262 = arith.truncf %261 : vector<2x128xf32> to vector<2x128xbf16>
    %c0_180 = arith.constant 0 : index
    %c1_181 = arith.constant 1 : index
    %c0_182 = arith.constant 0 : index
    %263 = vector.load %arg4[%c0_180, %c1_181, %c0_182] : memref<2x16x128xbf16, #tpu.memory_space<vmem>>, vector<2x1x128xbf16>
    %264 = vector.shape_cast %263 : vector<2x1x128xbf16> to vector<2x128xbf16>
    %265 = vector.shape_cast %262 : vector<2x128xbf16> to vector<2x1x128xbf16>
    tpu.vector_store %arg4[%c0_180, %c1_181, %c0_182], %265 {strides = array<i32>} : memref<2x16x128xbf16, #tpu.memory_space<vmem>>, vector<2x1x128xbf16>,
    %c2_183 = arith.constant 2 : index
    %c0_184 = arith.constant 0 : index
    %c0_185 = arith.constant 0 : index
    %266 = vector.load %arg5[%c2_183, %c0_184, %c0_185] : memref<16x2x128xf32, #tpu.memory_space<vmem>>, vector<1x2x128xf32>
    %267 = vector.shape_cast %266 : vector<1x2x128xf32> to vector<2x128xf32>
    %268 = vector.broadcast %238 : vector<1x128xf32> to vector<2x128xf32>
    %269 = arith.mulf %267, %268 : vector<2x128xf32>
    %270 = vector.broadcast %241 : vector<1x128xf32> to vector<2x128xf32>
    %271 = arith.addf %269, %270 : vector<2x128xf32>
    %cst_186 = arith.constant 0.000000e+00 : f32
    %272 = vector.broadcast %cst_186 : f32 to vector<2x128xf32>
    %273 = arith.maximumf %271, %272 : vector<2x128xf32>
    %274 = arith.truncf %273 : vector<2x128xf32> to vector<2x128xbf16>
    %c0_187 = arith.constant 0 : index
    %c2_188 = arith.constant 2 : index
    %c0_189 = arith.constant 0 : index
    %275 = vector.load %arg4[%c0_187, %c2_188, %c0_189] : memref<2x16x128xbf16, #tpu.memory_space<vmem>>, vector<2x1x128xbf16>
    %276 = vector.shape_cast %275 : vector<2x1x128xbf16> to vector<2x128xbf16>
    %277 = vector.shape_cast %274 : vector<2x128xbf16> to vector<2x1x128xbf16>
    tpu.vector_store %arg4[%c0_187, %c2_188, %c0_189], %277 {strides = array<i32>} : memref<2x16x128xbf16, #tpu.memory_space<vmem>>, vector<2x1x128xbf16>,
    %c3_190 = arith.constant 3 : index
    %c0_191 = arith.constant 0 : index
    %c0_192 = arith.constant 0 : index
    %278 = vector.load %arg5[%c3_190, %c0_191, %c0_192] : memref<16x2x128xf32, #tpu.memory_space<vmem>>, vector<1x2x128xf32>
    %279 = vector.shape_cast %278 : vector<1x2x128xf32> to vector<2x128xf32>
    %280 = vector.broadcast %238 : vector<1x128xf32> to vector<2x128xf32>
    %281 = arith.mulf %279, %280 : vector<2x128xf32>
    %282 = vector.broadcast %241 : vector<1x128xf32> to vector<2x128xf32>
    %283 = arith.addf %281, %282 : vector<2x128xf32>
    %cst_193 = arith.constant 0.000000e+00 : f32
    %284 = vector.broadcast %cst_193 : f32 to vector<2x128xf32>
    %285 = arith.maximumf %283, %284 : vector<2x128xf32>
    %286 = arith.truncf %285 : vector<2x128xf32> to vector<2x128xbf16>
    %c0_194 = arith.constant 0 : index
    %c3_195 = arith.constant 3 : index
    %c0_196 = arith.constant 0 : index
    %287 = vector.load %arg4[%c0_194, %c3_195, %c0_196] : memref<2x16x128xbf16, #tpu.memory_space<vmem>>, vector<2x1x128xbf16>
    %288 = vector.shape_cast %287 : vector<2x1x128xbf16> to vector<2x128xbf16>
    %289 = vector.shape_cast %286 : vector<2x128xbf16> to vector<2x1x128xbf16>
    tpu.vector_store %arg4[%c0_194, %c3_195, %c0_196], %289 {strides = array<i32>} : memref<2x16x128xbf16, #tpu.memory_space<vmem>>, vector<2x1x128xbf16>,
    %c4_197 = arith.constant 4 : index
    %c0_198 = arith.constant 0 : index
    %c0_199 = arith.constant 0 : index
    %290 = vector.load %arg5[%c4_197, %c0_198, %c0_199] : memref<16x2x128xf32, #tpu.memory_space<vmem>>, vector<1x2x128xf32>
    %291 = vector.shape_cast %290 : vector<1x2x128xf32> to vector<2x128xf32>
    %292 = vector.broadcast %238 : vector<1x128xf32> to vector<2x128xf32>
    %293 = arith.mulf %291, %292 : vector<2x128xf32>
    %294 = vector.broadcast %241 : vector<1x128xf32> to vector<2x128xf32>
    %295 = arith.addf %293, %294 : vector<2x128xf32>
    %cst_200 = arith.constant 0.000000e+00 : f32
    %296 = vector.broadcast %cst_200 : f32 to vector<2x128xf32>
    %297 = arith.maximumf %295, %296 : vector<2x128xf32>
    %298 = arith.truncf %297 : vector<2x128xf32> to vector<2x128xbf16>
    %c0_201 = arith.constant 0 : index
    %c4_202 = arith.constant 4 : index
    %c0_203 = arith.constant 0 : index
    %299 = vector.load %arg4[%c0_201, %c4_202, %c0_203] : memref<2x16x128xbf16, #tpu.memory_space<vmem>>, vector<2x1x128xbf16>
    %300 = vector.shape_cast %299 : vector<2x1x128xbf16> to vector<2x128xbf16>
    %301 = vector.shape_cast %298 : vector<2x128xbf16> to vector<2x1x128xbf16>
    tpu.vector_store %arg4[%c0_201, %c4_202, %c0_203], %301 {strides = array<i32>} : memref<2x16x128xbf16, #tpu.memory_space<vmem>>, vector<2x1x128xbf16>,
    %c5_204 = arith.constant 5 : index
    %c0_205 = arith.constant 0 : index
    %c0_206 = arith.constant 0 : index
    %302 = vector.load %arg5[%c5_204, %c0_205, %c0_206] : memref<16x2x128xf32, #tpu.memory_space<vmem>>, vector<1x2x128xf32>
    %303 = vector.shape_cast %302 : vector<1x2x128xf32> to vector<2x128xf32>
    %304 = vector.broadcast %238 : vector<1x128xf32> to vector<2x128xf32>
    %305 = arith.mulf %303, %304 : vector<2x128xf32>
    %306 = vector.broadcast %241 : vector<1x128xf32> to vector<2x128xf32>
    %307 = arith.addf %305, %306 : vector<2x128xf32>
    %cst_207 = arith.constant 0.000000e+00 : f32
    %308 = vector.broadcast %cst_207 : f32 to vector<2x128xf32>
    %309 = arith.maximumf %307, %308 : vector<2x128xf32>
    %310 = arith.truncf %309 : vector<2x128xf32> to vector<2x128xbf16>
    %c0_208 = arith.constant 0 : index
    %c5_209 = arith.constant 5 : index
    %c0_210 = arith.constant 0 : index
    %311 = vector.load %arg4[%c0_208, %c5_209, %c0_210] : memref<2x16x128xbf16, #tpu.memory_space<vmem>>, vector<2x1x128xbf16>
    %312 = vector.shape_cast %311 : vector<2x1x128xbf16> to vector<2x128xbf16>
    %313 = vector.shape_cast %310 : vector<2x128xbf16> to vector<2x1x128xbf16>
    tpu.vector_store %arg4[%c0_208, %c5_209, %c0_210], %313 {strides = array<i32>} : memref<2x16x128xbf16, #tpu.memory_space<vmem>>, vector<2x1x128xbf16>,
    %c6_211 = arith.constant 6 : index
    %c0_212 = arith.constant 0 : index
    %c0_213 = arith.constant 0 : index
    %314 = vector.load %arg5[%c6_211, %c0_212, %c0_213] : memref<16x2x128xf32, #tpu.memory_space<vmem>>, vector<1x2x128xf32>
    %315 = vector.shape_cast %314 : vector<1x2x128xf32> to vector<2x128xf32>
    %316 = vector.broadcast %238 : vector<1x128xf32> to vector<2x128xf32>
    %317 = arith.mulf %315, %316 : vector<2x128xf32>
    %318 = vector.broadcast %241 : vector<1x128xf32> to vector<2x128xf32>
    %319 = arith.addf %317, %318 : vector<2x128xf32>
    %cst_214 = arith.constant 0.000000e+00 : f32
    %320 = vector.broadcast %cst_214 : f32 to vector<2x128xf32>
    %321 = arith.maximumf %319, %320 : vector<2x128xf32>
    %322 = arith.truncf %321 : vector<2x128xf32> to vector<2x128xbf16>
    %c0_215 = arith.constant 0 : index
    %c6_216 = arith.constant 6 : index
    %c0_217 = arith.constant 0 : index
    %323 = vector.load %arg4[%c0_215, %c6_216, %c0_217] : memref<2x16x128xbf16, #tpu.memory_space<vmem>>, vector<2x1x128xbf16>
    %324 = vector.shape_cast %323 : vector<2x1x128xbf16> to vector<2x128xbf16>
    %325 = vector.shape_cast %322 : vector<2x128xbf16> to vector<2x1x128xbf16>
    tpu.vector_store %arg4[%c0_215, %c6_216, %c0_217], %325 {strides = array<i32>} : memref<2x16x128xbf16, #tpu.memory_space<vmem>>, vector<2x1x128xbf16>,
    %c7_218 = arith.constant 7 : index
    %c0_219 = arith.constant 0 : index
    %c0_220 = arith.constant 0 : index
    %326 = vector.load %arg5[%c7_218, %c0_219, %c0_220] : memref<16x2x128xf32, #tpu.memory_space<vmem>>, vector<1x2x128xf32>
    %327 = vector.shape_cast %326 : vector<1x2x128xf32> to vector<2x128xf32>
    %328 = vector.broadcast %238 : vector<1x128xf32> to vector<2x128xf32>
    %329 = arith.mulf %327, %328 : vector<2x128xf32>
    %330 = vector.broadcast %241 : vector<1x128xf32> to vector<2x128xf32>
    %331 = arith.addf %329, %330 : vector<2x128xf32>
    %cst_221 = arith.constant 0.000000e+00 : f32
    %332 = vector.broadcast %cst_221 : f32 to vector<2x128xf32>
    %333 = arith.maximumf %331, %332 : vector<2x128xf32>
    %334 = arith.truncf %333 : vector<2x128xf32> to vector<2x128xbf16>
    %c0_222 = arith.constant 0 : index
    %c7_223 = arith.constant 7 : index
    %c0_224 = arith.constant 0 : index
    %335 = vector.load %arg4[%c0_222, %c7_223, %c0_224] : memref<2x16x128xbf16, #tpu.memory_space<vmem>>, vector<2x1x128xbf16>
    %336 = vector.shape_cast %335 : vector<2x1x128xbf16> to vector<2x128xbf16>
    %337 = vector.shape_cast %334 : vector<2x128xbf16> to vector<2x1x128xbf16>
    tpu.vector_store %arg4[%c0_222, %c7_223, %c0_224], %337 {strides = array<i32>} : memref<2x16x128xbf16, #tpu.memory_space<vmem>>, vector<2x1x128xbf16>,
    %c8_225 = arith.constant 8 : index
    %c0_226 = arith.constant 0 : index
    %c0_227 = arith.constant 0 : index
    %338 = vector.load %arg5[%c8_225, %c0_226, %c0_227] : memref<16x2x128xf32, #tpu.memory_space<vmem>>, vector<1x2x128xf32>
    %339 = vector.shape_cast %338 : vector<1x2x128xf32> to vector<2x128xf32>
    %340 = vector.broadcast %238 : vector<1x128xf32> to vector<2x128xf32>
    %341 = arith.mulf %339, %340 : vector<2x128xf32>
    %342 = vector.broadcast %241 : vector<1x128xf32> to vector<2x128xf32>
    %343 = arith.addf %341, %342 : vector<2x128xf32>
    %cst_228 = arith.constant 0.000000e+00 : f32
    %344 = vector.broadcast %cst_228 : f32 to vector<2x128xf32>
    %345 = arith.maximumf %343, %344 : vector<2x128xf32>
    %346 = arith.truncf %345 : vector<2x128xf32> to vector<2x128xbf16>
    %c0_229 = arith.constant 0 : index
    %c8_230 = arith.constant 8 : index
    %c0_231 = arith.constant 0 : index
    %347 = vector.load %arg4[%c0_229, %c8_230, %c0_231] : memref<2x16x128xbf16, #tpu.memory_space<vmem>>, vector<2x1x128xbf16>
    %348 = vector.shape_cast %347 : vector<2x1x128xbf16> to vector<2x128xbf16>
    %349 = vector.shape_cast %346 : vector<2x128xbf16> to vector<2x1x128xbf16>
    tpu.vector_store %arg4[%c0_229, %c8_230, %c0_231], %349 {strides = array<i32>} : memref<2x16x128xbf16, #tpu.memory_space<vmem>>, vector<2x1x128xbf16>,
    %c9_232 = arith.constant 9 : index
    %c0_233 = arith.constant 0 : index
    %c0_234 = arith.constant 0 : index
    %350 = vector.load %arg5[%c9_232, %c0_233, %c0_234] : memref<16x2x128xf32, #tpu.memory_space<vmem>>, vector<1x2x128xf32>
    %351 = vector.shape_cast %350 : vector<1x2x128xf32> to vector<2x128xf32>
    %352 = vector.broadcast %238 : vector<1x128xf32> to vector<2x128xf32>
    %353 = arith.mulf %351, %352 : vector<2x128xf32>
    %354 = vector.broadcast %241 : vector<1x128xf32> to vector<2x128xf32>
    %355 = arith.addf %353, %354 : vector<2x128xf32>
    %cst_235 = arith.constant 0.000000e+00 : f32
    %356 = vector.broadcast %cst_235 : f32 to vector<2x128xf32>
    %357 = arith.maximumf %355, %356 : vector<2x128xf32>
    %358 = arith.truncf %357 : vector<2x128xf32> to vector<2x128xbf16>
    %c0_236 = arith.constant 0 : index
    %c9_237 = arith.constant 9 : index
    %c0_238 = arith.constant 0 : index
    %359 = vector.load %arg4[%c0_236, %c9_237, %c0_238] : memref<2x16x128xbf16, #tpu.memory_space<vmem>>, vector<2x1x128xbf16>
    %360 = vector.shape_cast %359 : vector<2x1x128xbf16> to vector<2x128xbf16>
    %361 = vector.shape_cast %358 : vector<2x128xbf16> to vector<2x1x128xbf16>
    tpu.vector_store %arg4[%c0_236, %c9_237, %c0_238], %361 {strides = array<i32>} : memref<2x16x128xbf16, #tpu.memory_space<vmem>>, vector<2x1x128xbf16>,
    %c10_239 = arith.constant 10 : index
    %c0_240 = arith.constant 0 : index
    %c0_241 = arith.constant 0 : index
    %362 = vector.load %arg5[%c10_239, %c0_240, %c0_241] : memref<16x2x128xf32, #tpu.memory_space<vmem>>, vector<1x2x128xf32>
    %363 = vector.shape_cast %362 : vector<1x2x128xf32> to vector<2x128xf32>
    %364 = vector.broadcast %238 : vector<1x128xf32> to vector<2x128xf32>
    %365 = arith.mulf %363, %364 : vector<2x128xf32>
    %366 = vector.broadcast %241 : vector<1x128xf32> to vector<2x128xf32>
    %367 = arith.addf %365, %366 : vector<2x128xf32>
    %cst_242 = arith.constant 0.000000e+00 : f32
    %368 = vector.broadcast %cst_242 : f32 to vector<2x128xf32>
    %369 = arith.maximumf %367, %368 : vector<2x128xf32>
    %370 = arith.truncf %369 : vector<2x128xf32> to vector<2x128xbf16>
    %c0_243 = arith.constant 0 : index
    %c10_244 = arith.constant 10 : index
    %c0_245 = arith.constant 0 : index
    %371 = vector.load %arg4[%c0_243, %c10_244, %c0_245] : memref<2x16x128xbf16, #tpu.memory_space<vmem>>, vector<2x1x128xbf16>
    %372 = vector.shape_cast %371 : vector<2x1x128xbf16> to vector<2x128xbf16>
    %373 = vector.shape_cast %370 : vector<2x128xbf16> to vector<2x1x128xbf16>
    tpu.vector_store %arg4[%c0_243, %c10_244, %c0_245], %373 {strides = array<i32>} : memref<2x16x128xbf16, #tpu.memory_space<vmem>>, vector<2x1x128xbf16>,
    %c11_246 = arith.constant 11 : index
    %c0_247 = arith.constant 0 : index
    %c0_248 = arith.constant 0 : index
    %374 = vector.load %arg5[%c11_246, %c0_247, %c0_248] : memref<16x2x128xf32, #tpu.memory_space<vmem>>, vector<1x2x128xf32>
    %375 = vector.shape_cast %374 : vector<1x2x128xf32> to vector<2x128xf32>
    %376 = vector.broadcast %238 : vector<1x128xf32> to vector<2x128xf32>
    %377 = arith.mulf %375, %376 : vector<2x128xf32>
    %378 = vector.broadcast %241 : vector<1x128xf32> to vector<2x128xf32>
    %379 = arith.addf %377, %378 : vector<2x128xf32>
    %cst_249 = arith.constant 0.000000e+00 : f32
    %380 = vector.broadcast %cst_249 : f32 to vector<2x128xf32>
    %381 = arith.maximumf %379, %380 : vector<2x128xf32>
    %382 = arith.truncf %381 : vector<2x128xf32> to vector<2x128xbf16>
    %c0_250 = arith.constant 0 : index
    %c11_251 = arith.constant 11 : index
    %c0_252 = arith.constant 0 : index
    %383 = vector.load %arg4[%c0_250, %c11_251, %c0_252] : memref<2x16x128xbf16, #tpu.memory_space<vmem>>, vector<2x1x128xbf16>
    %384 = vector.shape_cast %383 : vector<2x1x128xbf16> to vector<2x128xbf16>
    %385 = vector.shape_cast %382 : vector<2x128xbf16> to vector<2x1x128xbf16>
    tpu.vector_store %arg4[%c0_250, %c11_251, %c0_252], %385 {strides = array<i32>} : memref<2x16x128xbf16, #tpu.memory_space<vmem>>, vector<2x1x128xbf16>,
    %c12_253 = arith.constant 12 : index
    %c0_254 = arith.constant 0 : index
    %c0_255 = arith.constant 0 : index
    %386 = vector.load %arg5[%c12_253, %c0_254, %c0_255] : memref<16x2x128xf32, #tpu.memory_space<vmem>>, vector<1x2x128xf32>
    %387 = vector.shape_cast %386 : vector<1x2x128xf32> to vector<2x128xf32>
    %388 = vector.broadcast %238 : vector<1x128xf32> to vector<2x128xf32>
    %389 = arith.mulf %387, %388 : vector<2x128xf32>
    %390 = vector.broadcast %241 : vector<1x128xf32> to vector<2x128xf32>
    %391 = arith.addf %389, %390 : vector<2x128xf32>
    %cst_256 = arith.constant 0.000000e+00 : f32
    %392 = vector.broadcast %cst_256 : f32 to vector<2x128xf32>
    %393 = arith.maximumf %391, %392 : vector<2x128xf32>
    %394 = arith.truncf %393 : vector<2x128xf32> to vector<2x128xbf16>
    %c0_257 = arith.constant 0 : index
    %c12_258 = arith.constant 12 : index
    %c0_259 = arith.constant 0 : index
    %395 = vector.load %arg4[%c0_257, %c12_258, %c0_259] : memref<2x16x128xbf16, #tpu.memory_space<vmem>>, vector<2x1x128xbf16>
    %396 = vector.shape_cast %395 : vector<2x1x128xbf16> to vector<2x128xbf16>
    %397 = vector.shape_cast %394 : vector<2x128xbf16> to vector<2x1x128xbf16>
    tpu.vector_store %arg4[%c0_257, %c12_258, %c0_259], %397 {strides = array<i32>} : memref<2x16x128xbf16, #tpu.memory_space<vmem>>, vector<2x1x128xbf16>,
    %c13_260 = arith.constant 13 : index
    %c0_261 = arith.constant 0 : index
    %c0_262 = arith.constant 0 : index
    %398 = vector.load %arg5[%c13_260, %c0_261, %c0_262] : memref<16x2x128xf32, #tpu.memory_space<vmem>>, vector<1x2x128xf32>
    %399 = vector.shape_cast %398 : vector<1x2x128xf32> to vector<2x128xf32>
    %400 = vector.broadcast %238 : vector<1x128xf32> to vector<2x128xf32>
    %401 = arith.mulf %399, %400 : vector<2x128xf32>
    %402 = vector.broadcast %241 : vector<1x128xf32> to vector<2x128xf32>
    %403 = arith.addf %401, %402 : vector<2x128xf32>
    %cst_263 = arith.constant 0.000000e+00 : f32
    %404 = vector.broadcast %cst_263 : f32 to vector<2x128xf32>
    %405 = arith.maximumf %403, %404 : vector<2x128xf32>
    %406 = arith.truncf %405 : vector<2x128xf32> to vector<2x128xbf16>
    %c0_264 = arith.constant 0 : index
    %c13_265 = arith.constant 13 : index
    %c0_266 = arith.constant 0 : index
    %407 = vector.load %arg4[%c0_264, %c13_265, %c0_266] : memref<2x16x128xbf16, #tpu.memory_space<vmem>>, vector<2x1x128xbf16>
    %408 = vector.shape_cast %407 : vector<2x1x128xbf16> to vector<2x128xbf16>
    %409 = vector.shape_cast %406 : vector<2x128xbf16> to vector<2x1x128xbf16>
    tpu.vector_store %arg4[%c0_264, %c13_265, %c0_266], %409 {strides = array<i32>} : memref<2x16x128xbf16, #tpu.memory_space<vmem>>, vector<2x1x128xbf16>,
    %c14_267 = arith.constant 14 : index
    %c0_268 = arith.constant 0 : index
    %c0_269 = arith.constant 0 : index
    %410 = vector.load %arg5[%c14_267, %c0_268, %c0_269] : memref<16x2x128xf32, #tpu.memory_space<vmem>>, vector<1x2x128xf32>
    %411 = vector.shape_cast %410 : vector<1x2x128xf32> to vector<2x128xf32>
    %412 = vector.broadcast %238 : vector<1x128xf32> to vector<2x128xf32>
    %413 = arith.mulf %411, %412 : vector<2x128xf32>
    %414 = vector.broadcast %241 : vector<1x128xf32> to vector<2x128xf32>
    %415 = arith.addf %413, %414 : vector<2x128xf32>
    %cst_270 = arith.constant 0.000000e+00 : f32
    %416 = vector.broadcast %cst_270 : f32 to vector<2x128xf32>
    %417 = arith.maximumf %415, %416 : vector<2x128xf32>
    %418 = arith.truncf %417 : vector<2x128xf32> to vector<2x128xbf16>
    %c0_271 = arith.constant 0 : index
    %c14_272 = arith.constant 14 : index
    %c0_273 = arith.constant 0 : index
    %419 = vector.load %arg4[%c0_271, %c14_272, %c0_273] : memref<2x16x128xbf16, #tpu.memory_space<vmem>>, vector<2x1x128xbf16>
    %420 = vector.shape_cast %419 : vector<2x1x128xbf16> to vector<2x128xbf16>
    %421 = vector.shape_cast %418 : vector<2x128xbf16> to vector<2x1x128xbf16>
    tpu.vector_store %arg4[%c0_271, %c14_272, %c0_273], %421 {strides = array<i32>} : memref<2x16x128xbf16, #tpu.memory_space<vmem>>, vector<2x1x128xbf16>,
    %c15_274 = arith.constant 15 : index
    %c0_275 = arith.constant 0 : index
    %c0_276 = arith.constant 0 : index
    %422 = vector.load %arg5[%c15_274, %c0_275, %c0_276] : memref<16x2x128xf32, #tpu.memory_space<vmem>>, vector<1x2x128xf32>
    %423 = vector.shape_cast %422 : vector<1x2x128xf32> to vector<2x128xf32>
    %424 = vector.broadcast %238 : vector<1x128xf32> to vector<2x128xf32>
    %425 = arith.mulf %423, %424 : vector<2x128xf32>
    %426 = vector.broadcast %241 : vector<1x128xf32> to vector<2x128xf32>
    %427 = arith.addf %425, %426 : vector<2x128xf32>
    %cst_277 = arith.constant 0.000000e+00 : f32
    %428 = vector.broadcast %cst_277 : f32 to vector<2x128xf32>
    %429 = arith.maximumf %427, %428 : vector<2x128xf32>
    %430 = arith.truncf %429 : vector<2x128xf32> to vector<2x128xbf16>
    %c0_278 = arith.constant 0 : index
    %c15_279 = arith.constant 15 : index
    %c0_280 = arith.constant 0 : index
    %431 = vector.load %arg4[%c0_278, %c15_279, %c0_280] : memref<2x16x128xbf16, #tpu.memory_space<vmem>>, vector<2x1x128xbf16>
    %432 = vector.shape_cast %431 : vector<2x1x128xbf16> to vector<2x128xbf16>
    %433 = vector.shape_cast %430 : vector<2x128xbf16> to vector<2x1x128xbf16>
    tpu.vector_store %arg4[%c0_278, %c15_279, %c0_280], %433 {strides = array<i32>} : memref<2x16x128xbf16, #tpu.memory_space<vmem>>, vector<2x1x128xbf16>,
    return
  }
}

module attributes {stable_mosaic.version = 11 : i64} {
  func.func @kernel(%arg0: i32, %arg1: memref<1x6x6x128xbf16, #tpu.memory_space<vmem>>, %arg2: memref<4x4x128x64xbf16, #tpu.memory_space<vmem>>, %arg3: memref<1x16x4x64xbf16, #tpu.memory_space<vmem>>, %arg4: memref<1x2x64xf32, #tpu.memory_space<vmem>>, %arg5: memref<2x64xf32, #tpu.memory_space<vmem>>) attributes {dimension_semantics = [#tpu.dimension_semantics<parallel>], iteration_bounds = array<i64: 2>, scalar_prefetch = 0 : i64, scratch_operands = 1 : i64, tpu.core_type = #tpu.core_type<tc>, window_params = [{transform_indices = @transform_0, window_bounds = array<i64: 1, 6, 6, 128>}, {pipeline_mode = #tpu.pipeline_mode<synchronous>, transform_indices = @transform_1, window_bounds = array<i64: 4, 4, 128, 64>}, {transform_indices = @transform_2, window_bounds = array<i64: 1, 16, 4, 64>}, {transform_indices = @transform_3, window_bounds = array<i64: 1, 2, 64>}]} {
    %cst = arith.constant 0.000000e+00 : f32
    %0 = vector.broadcast %cst : f32 to vector<2x64xf32>
    %c0 = arith.constant 0 : index
    %c0_0 = arith.constant 0 : index
    %1 = vector.load %arg5[%c0, %c0_0] : memref<2x64xf32, #tpu.memory_space<vmem>>, vector<2x64xf32>
    tpu.vector_store %arg5[%c0, %c0_0], %0 {strides = array<i32>} : memref<2x64xf32, #tpu.memory_space<vmem>>, vector<2x64xf32>,
    %c0_i32 = arith.constant 0 : i32
    %c4_i32 = arith.constant 4 : i32
    %2 = arith.addi %c0_i32, %c4_i32 : i32
    %c1_i32 = arith.constant 1 : i32
    scf.for %arg6 = %c0_i32 to %2 step %c1_i32  : i32 {
      %c1_i32_7 = arith.constant 1 : i32
      %7 = arith.muli %arg6, %c1_i32_7 : i32
      %c0_i32_8 = arith.constant 0 : i32
      %8 = arith.addi %c0_i32_8, %7 : i32
      %c0_i32_9 = arith.constant 0 : i32
      %9 = arith.addi %8, %c0_i32_9 : i32
      %c0_10 = arith.constant 0 : index
      %10 = arith.index_cast %9 : i32 to index
      %c0_11 = arith.constant 0 : index
      %c0_12 = arith.constant 0 : index
      %11 = vector.load %arg1[%c0_10, %10, %c0_11, %c0_12] : memref<1x6x6x128xbf16, #tpu.memory_space<vmem>>, vector<1x1x6x128xbf16>
      %12 = vector.shape_cast %11 : vector<1x1x6x128xbf16> to vector<6x128xbf16>
      %c1_i32_13 = arith.constant 1 : i32
      %13 = arith.addi %8, %c1_i32_13 : i32
      %c0_14 = arith.constant 0 : index
      %14 = arith.index_cast %13 : i32 to index
      %c0_15 = arith.constant 0 : index
      %c0_16 = arith.constant 0 : index
      %15 = vector.load %arg1[%c0_14, %14, %c0_15, %c0_16] : memref<1x6x6x128xbf16, #tpu.memory_space<vmem>>, vector<1x1x6x128xbf16>
      %16 = vector.shape_cast %15 : vector<1x1x6x128xbf16> to vector<6x128xbf16>
      %c2_i32 = arith.constant 2 : i32
      %17 = arith.addi %8, %c2_i32 : i32
      %c0_17 = arith.constant 0 : index
      %18 = arith.index_cast %17 : i32 to index
      %c0_18 = arith.constant 0 : index
      %c0_19 = arith.constant 0 : index
      %19 = vector.load %arg1[%c0_17, %18, %c0_18, %c0_19] : memref<1x6x6x128xbf16, #tpu.memory_space<vmem>>, vector<1x1x6x128xbf16>
      %20 = vector.shape_cast %19 : vector<1x1x6x128xbf16> to vector<6x128xbf16>
      %21 = vector.extract_strided_slice %12 {offsets = [0, 0], sizes = [4, 128], strides = [1, 1]} : vector<6x128xbf16> to vector<4x128xbf16>
      %22 = vector.extract_strided_slice %12 {offsets = [1, 0], sizes = [4, 128], strides = [1, 1]} : vector<6x128xbf16> to vector<4x128xbf16>
      %23 = vector.extract_strided_slice %12 {offsets = [2, 0], sizes = [4, 128], strides = [1, 1]} : vector<6x128xbf16> to vector<4x128xbf16>
      %24 = vector.extract_strided_slice %16 {offsets = [0, 0], sizes = [4, 128], strides = [1, 1]} : vector<6x128xbf16> to vector<4x128xbf16>
      %25 = vector.extract_strided_slice %16 {offsets = [1, 0], sizes = [4, 128], strides = [1, 1]} : vector<6x128xbf16> to vector<4x128xbf16>
      %26 = vector.extract_strided_slice %16 {offsets = [2, 0], sizes = [4, 128], strides = [1, 1]} : vector<6x128xbf16> to vector<4x128xbf16>
      %27 = vector.extract_strided_slice %20 {offsets = [0, 0], sizes = [4, 128], strides = [1, 1]} : vector<6x128xbf16> to vector<4x128xbf16>
      %28 = vector.extract_strided_slice %20 {offsets = [1, 0], sizes = [4, 128], strides = [1, 1]} : vector<6x128xbf16> to vector<4x128xbf16>
      %29 = vector.extract_strided_slice %20 {offsets = [2, 0], sizes = [4, 128], strides = [1, 1]} : vector<6x128xbf16> to vector<4x128xbf16>
      %cst_20 = arith.constant 0.000000e+00 : f32
      %30 = vector.broadcast %cst_20 : f32 to vector<1x64xf32>
      %cst_21 = arith.constant 0.000000e+00 : f32
      %31 = vector.broadcast %cst_21 : f32 to vector<1x64xf32>
      %cst_22 = arith.constant 0.000000e+00 : f32
      %32 = vector.broadcast %cst_22 : f32 to vector<4x64xf32>
      %c0_23 = arith.constant 0 : index
      %c0_24 = arith.constant 0 : index
      %c0_25 = arith.constant 0 : index
      %c0_26 = arith.constant 0 : index
      %33 = vector.load %arg2[%c0_23, %c0_24, %c0_25, %c0_26] : memref<4x4x128x64xbf16, #tpu.memory_space<vmem>>, vector<1x1x128x64xbf16>
      %34 = vector.shape_cast %33 : vector<1x1x128x64xbf16> to vector<128x64xbf16>
      %cst_27 = arith.constant dense<0.000000e+00> : vector<4x64xf32>
      %35 = tpu.matmul %21, %34, %cst_27 {dimension_numbers = #tpu.dot_dimension_numbers<[1], [0], [0], [1], [0, 0, 1, 1], [], []>} : vector<4x128xbf16>, vector<128x64xbf16>, vector<4x64xf32> -> vector<4x64xf32>
      %36 = arith.addf %32, %35 : vector<4x64xf32>
      %c0_28 = arith.constant 0 : index
      %c2 = arith.constant 2 : index
      %c0_29 = arith.constant 0 : index
      %c0_30 = arith.constant 0 : index
      %37 = vector.load %arg2[%c0_28, %c2, %c0_29, %c0_30] : memref<4x4x128x64xbf16, #tpu.memory_space<vmem>>, vector<1x1x128x64xbf16>
      %38 = vector.shape_cast %37 : vector<1x1x128x64xbf16> to vector<128x64xbf16>
      %cst_31 = arith.constant dense<0.000000e+00> : vector<4x64xf32>
      %39 = tpu.matmul %22, %38, %cst_31 {dimension_numbers = #tpu.dot_dimension_numbers<[1], [0], [0], [1], [0, 0, 1, 1], [], []>} : vector<4x128xbf16>, vector<128x64xbf16>, vector<4x64xf32> -> vector<4x64xf32>
      %40 = arith.addf %36, %39 : vector<4x64xf32>
      %c2_32 = arith.constant 2 : index
      %c0_33 = arith.constant 0 : index
      %c0_34 = arith.constant 0 : index
      %c0_35 = arith.constant 0 : index
      %41 = vector.load %arg2[%c2_32, %c0_33, %c0_34, %c0_35] : memref<4x4x128x64xbf16, #tpu.memory_space<vmem>>, vector<1x1x128x64xbf16>
      %42 = vector.shape_cast %41 : vector<1x1x128x64xbf16> to vector<128x64xbf16>
      %cst_36 = arith.constant dense<0.000000e+00> : vector<4x64xf32>
      %43 = tpu.matmul %24, %42, %cst_36 {dimension_numbers = #tpu.dot_dimension_numbers<[1], [0], [0], [1], [0, 0, 1, 1], [], []>} : vector<4x128xbf16>, vector<128x64xbf16>, vector<4x64xf32> -> vector<4x64xf32>
      %44 = arith.addf %40, %43 : vector<4x64xf32>
      %c2_37 = arith.constant 2 : index
      %c2_38 = arith.constant 2 : index
      %c0_39 = arith.constant 0 : index
      %c0_40 = arith.constant 0 : index
      %45 = vector.load %arg2[%c2_37, %c2_38, %c0_39, %c0_40] : memref<4x4x128x64xbf16, #tpu.memory_space<vmem>>, vector<1x1x128x64xbf16>
      %46 = vector.shape_cast %45 : vector<1x1x128x64xbf16> to vector<128x64xbf16>
      %cst_41 = arith.constant dense<0.000000e+00> : vector<4x64xf32>
      %47 = tpu.matmul %25, %46, %cst_41 {dimension_numbers = #tpu.dot_dimension_numbers<[1], [0], [0], [1], [0, 0, 1, 1], [], []>} : vector<4x128xbf16>, vector<128x64xbf16>, vector<4x64xf32> -> vector<4x64xf32>
      %48 = arith.addf %44, %47 : vector<4x64xf32>
      %c0_i32_42 = arith.constant 0 : i32
      %49 = arith.addi %c0_i32_42, %8 : i32
      %cst_43 = arith.constant dense<0.000000e+00> : vector<64xf32>
      %50 = vector.multi_reduction <add>, %48, %cst_43 [0] : vector<4x64xf32> to vector<64xf32>
      %51 = vector.shape_cast %50 : vector<64xf32> to vector<1x64xf32>
      %52 = arith.addf %30, %51 : vector<1x64xf32>
      %53 = arith.mulf %48, %48 : vector<4x64xf32>
      %cst_44 = arith.constant dense<0.000000e+00> : vector<64xf32>
      %54 = vector.multi_reduction <add>, %53, %cst_44 [0] : vector<4x64xf32> to vector<64xf32>
      %55 = vector.shape_cast %54 : vector<64xf32> to vector<1x64xf32>
      %56 = arith.addf %31, %55 : vector<1x64xf32>
      %57 = arith.truncf %48 : vector<4x64xf32> to vector<4x64xbf16>
      %c0_45 = arith.constant 0 : index
      %58 = arith.index_cast %49 : i32 to index
      %c0_46 = arith.constant 0 : index
      %c0_47 = arith.constant 0 : index
      %59 = vector.load %arg3[%c0_45, %58, %c0_46, %c0_47] : memref<1x16x4x64xbf16, #tpu.memory_space<vmem>>, vector<1x1x4x64xbf16>
      %60 = vector.shape_cast %59 : vector<1x1x4x64xbf16> to vector<4x64xbf16>
      %61 = vector.shape_cast %57 : vector<4x64xbf16> to vector<1x1x4x64xbf16>
      tpu.vector_store %arg3[%c0_45, %58, %c0_46, %c0_47], %61 {strides = array<i32>} : memref<1x16x4x64xbf16, #tpu.memory_space<vmem>>, vector<1x1x4x64xbf16>,
      %cst_48 = arith.constant 0.000000e+00 : f32
      %62 = vector.broadcast %cst_48 : f32 to vector<4x64xf32>
      %c0_49 = arith.constant 0 : index
      %c1 = arith.constant 1 : index
      %c0_50 = arith.constant 0 : index
      %c0_51 = arith.constant 0 : index
      %63 = vector.load %arg2[%c0_49, %c1, %c0_50, %c0_51] : memref<4x4x128x64xbf16, #tpu.memory_space<vmem>>, vector<1x1x128x64xbf16>
      %64 = vector.shape_cast %63 : vector<1x1x128x64xbf16> to vector<128x64xbf16>
      %cst_52 = arith.constant dense<0.000000e+00> : vector<4x64xf32>
      %65 = tpu.matmul %22, %64, %cst_52 {dimension_numbers = #tpu.dot_dimension_numbers<[1], [0], [0], [1], [0, 0, 1, 1], [], []>} : vector<4x128xbf16>, vector<128x64xbf16>, vector<4x64xf32> -> vector<4x64xf32>
      %66 = arith.addf %62, %65 : vector<4x64xf32>
      %c0_53 = arith.constant 0 : index
      %c3 = arith.constant 3 : index
      %c0_54 = arith.constant 0 : index
      %c0_55 = arith.constant 0 : index
      %67 = vector.load %arg2[%c0_53, %c3, %c0_54, %c0_55] : memref<4x4x128x64xbf16, #tpu.memory_space<vmem>>, vector<1x1x128x64xbf16>
      %68 = vector.shape_cast %67 : vector<1x1x128x64xbf16> to vector<128x64xbf16>
      %cst_56 = arith.constant dense<0.000000e+00> : vector<4x64xf32>
      %69 = tpu.matmul %23, %68, %cst_56 {dimension_numbers = #tpu.dot_dimension_numbers<[1], [0], [0], [1], [0, 0, 1, 1], [], []>} : vector<4x128xbf16>, vector<128x64xbf16>, vector<4x64xf32> -> vector<4x64xf32>
      %70 = arith.addf %66, %69 : vector<4x64xf32>
      %c2_57 = arith.constant 2 : index
      %c1_58 = arith.constant 1 : index
      %c0_59 = arith.constant 0 : index
      %c0_60 = arith.constant 0 : index
      %71 = vector.load %arg2[%c2_57, %c1_58, %c0_59, %c0_60] : memref<4x4x128x64xbf16, #tpu.memory_space<vmem>>, vector<1x1x128x64xbf16>
      %72 = vector.shape_cast %71 : vector<1x1x128x64xbf16> to vector<128x64xbf16>
      %cst_61 = arith.constant dense<0.000000e+00> : vector<4x64xf32>
      %73 = tpu.matmul %25, %72, %cst_61 {dimension_numbers = #tpu.dot_dimension_numbers<[1], [0], [0], [1], [0, 0, 1, 1], [], []>} : vector<4x128xbf16>, vector<128x64xbf16>, vector<4x64xf32> -> vector<4x64xf32>
      %74 = arith.addf %70, %73 : vector<4x64xf32>
      %c2_62 = arith.constant 2 : index
      %c3_63 = arith.constant 3 : index
      %c0_64 = arith.constant 0 : index
      %c0_65 = arith.constant 0 : index
      %75 = vector.load %arg2[%c2_62, %c3_63, %c0_64, %c0_65] : memref<4x4x128x64xbf16, #tpu.memory_space<vmem>>, vector<1x1x128x64xbf16>
      %76 = vector.shape_cast %75 : vector<1x1x128x64xbf16> to vector<128x64xbf16>
      %cst_66 = arith.constant dense<0.000000e+00> : vector<4x64xf32>
      %77 = tpu.matmul %26, %76, %cst_66 {dimension_numbers = #tpu.dot_dimension_numbers<[1], [0], [0], [1], [0, 0, 1, 1], [], []>} : vector<4x128xbf16>, vector<128x64xbf16>, vector<4x64xf32> -> vector<4x64xf32>
      %78 = arith.addf %74, %77 : vector<4x64xf32>
      %c4_i32_67 = arith.constant 4 : i32
      %79 = arith.addi %c4_i32_67, %8 : i32
      %cst_68 = arith.constant dense<0.000000e+00> : vector<64xf32>
      %80 = vector.multi_reduction <add>, %78, %cst_68 [0] : vector<4x64xf32> to vector<64xf32>
      %81 = vector.shape_cast %80 : vector<64xf32> to vector<1x64xf32>
      %82 = arith.addf %52, %81 : vector<1x64xf32>
      %83 = arith.mulf %78, %78 : vector<4x64xf32>
      %cst_69 = arith.constant dense<0.000000e+00> : vector<64xf32>
      %84 = vector.multi_reduction <add>, %83, %cst_69 [0] : vector<4x64xf32> to vector<64xf32>
      %85 = vector.shape_cast %84 : vector<64xf32> to vector<1x64xf32>
      %86 = arith.addf %56, %85 : vector<1x64xf32>
      %87 = arith.truncf %78 : vector<4x64xf32> to vector<4x64xbf16>
      %c0_70 = arith.constant 0 : index
      %88 = arith.index_cast %79 : i32 to index
      %c0_71 = arith.constant 0 : index
      %c0_72 = arith.constant 0 : index
      %89 = vector.load %arg3[%c0_70, %88, %c0_71, %c0_72] : memref<1x16x4x64xbf16, #tpu.memory_space<vmem>>, vector<1x1x4x64xbf16>
      %90 = vector.shape_cast %89 : vector<1x1x4x64xbf16> to vector<4x64xbf16>
      %91 = vector.shape_cast %87 : vector<4x64xbf16> to vector<1x1x4x64xbf16>
      tpu.vector_store %arg3[%c0_70, %88, %c0_71, %c0_72], %91 {strides = array<i32>} : memref<1x16x4x64xbf16, #tpu.memory_space<vmem>>, vector<1x1x4x64xbf16>,
      %cst_73 = arith.constant 0.000000e+00 : f32
      %92 = vector.broadcast %cst_73 : f32 to vector<4x64xf32>
      %c1_74 = arith.constant 1 : index
      %c0_75 = arith.constant 0 : index
      %c0_76 = arith.constant 0 : index
      %c0_77 = arith.constant 0 : index
      %93 = vector.load %arg2[%c1_74, %c0_75, %c0_76, %c0_77] : memref<4x4x128x64xbf16, #tpu.memory_space<vmem>>, vector<1x1x128x64xbf16>
      %94 = vector.shape_cast %93 : vector<1x1x128x64xbf16> to vector<128x64xbf16>
      %cst_78 = arith.constant dense<0.000000e+00> : vector<4x64xf32>
      %95 = tpu.matmul %24, %94, %cst_78 {dimension_numbers = #tpu.dot_dimension_numbers<[1], [0], [0], [1], [0, 0, 1, 1], [], []>} : vector<4x128xbf16>, vector<128x64xbf16>, vector<4x64xf32> -> vector<4x64xf32>
      %96 = arith.addf %92, %95 : vector<4x64xf32>
      %c1_79 = arith.constant 1 : index
      %c2_80 = arith.constant 2 : index
      %c0_81 = arith.constant 0 : index
      %c0_82 = arith.constant 0 : index
      %97 = vector.load %arg2[%c1_79, %c2_80, %c0_81, %c0_82] : memref<4x4x128x64xbf16, #tpu.memory_space<vmem>>, vector<1x1x128x64xbf16>
      %98 = vector.shape_cast %97 : vector<1x1x128x64xbf16> to vector<128x64xbf16>
      %cst_83 = arith.constant dense<0.000000e+00> : vector<4x64xf32>
      %99 = tpu.matmul %25, %98, %cst_83 {dimension_numbers = #tpu.dot_dimension_numbers<[1], [0], [0], [1], [0, 0, 1, 1], [], []>} : vector<4x128xbf16>, vector<128x64xbf16>, vector<4x64xf32> -> vector<4x64xf32>
      %100 = arith.addf %96, %99 : vector<4x64xf32>
      %c3_84 = arith.constant 3 : index
      %c0_85 = arith.constant 0 : index
      %c0_86 = arith.constant 0 : index
      %c0_87 = arith.constant 0 : index
      %101 = vector.load %arg2[%c3_84, %c0_85, %c0_86, %c0_87] : memref<4x4x128x64xbf16, #tpu.memory_space<vmem>>, vector<1x1x128x64xbf16>
      %102 = vector.shape_cast %101 : vector<1x1x128x64xbf16> to vector<128x64xbf16>
      %cst_88 = arith.constant dense<0.000000e+00> : vector<4x64xf32>
      %103 = tpu.matmul %27, %102, %cst_88 {dimension_numbers = #tpu.dot_dimension_numbers<[1], [0], [0], [1], [0, 0, 1, 1], [], []>} : vector<4x128xbf16>, vector<128x64xbf16>, vector<4x64xf32> -> vector<4x64xf32>
      %104 = arith.addf %100, %103 : vector<4x64xf32>
      %c3_89 = arith.constant 3 : index
      %c2_90 = arith.constant 2 : index
      %c0_91 = arith.constant 0 : index
      %c0_92 = arith.constant 0 : index
      %105 = vector.load %arg2[%c3_89, %c2_90, %c0_91, %c0_92] : memref<4x4x128x64xbf16, #tpu.memory_space<vmem>>, vector<1x1x128x64xbf16>
      %106 = vector.shape_cast %105 : vector<1x1x128x64xbf16> to vector<128x64xbf16>
      %cst_93 = arith.constant dense<0.000000e+00> : vector<4x64xf32>
      %107 = tpu.matmul %28, %106, %cst_93 {dimension_numbers = #tpu.dot_dimension_numbers<[1], [0], [0], [1], [0, 0, 1, 1], [], []>} : vector<4x128xbf16>, vector<128x64xbf16>, vector<4x64xf32> -> vector<4x64xf32>
      %108 = arith.addf %104, %107 : vector<4x64xf32>
      %c8_i32 = arith.constant 8 : i32
      %109 = arith.addi %c8_i32, %8 : i32
      %cst_94 = arith.constant dense<0.000000e+00> : vector<64xf32>
      %110 = vector.multi_reduction <add>, %108, %cst_94 [0] : vector<4x64xf32> to vector<64xf32>
      %111 = vector.shape_cast %110 : vector<64xf32> to vector<1x64xf32>
      %112 = arith.addf %82, %111 : vector<1x64xf32>
      %113 = arith.mulf %108, %108 : vector<4x64xf32>
      %cst_95 = arith.constant dense<0.000000e+00> : vector<64xf32>
      %114 = vector.multi_reduction <add>, %113, %cst_95 [0] : vector<4x64xf32> to vector<64xf32>
      %115 = vector.shape_cast %114 : vector<64xf32> to vector<1x64xf32>
      %116 = arith.addf %86, %115 : vector<1x64xf32>
      %117 = arith.truncf %108 : vector<4x64xf32> to vector<4x64xbf16>
      %c0_96 = arith.constant 0 : index
      %118 = arith.index_cast %109 : i32 to index
      %c0_97 = arith.constant 0 : index
      %c0_98 = arith.constant 0 : index
      %119 = vector.load %arg3[%c0_96, %118, %c0_97, %c0_98] : memref<1x16x4x64xbf16, #tpu.memory_space<vmem>>, vector<1x1x4x64xbf16>
      %120 = vector.shape_cast %119 : vector<1x1x4x64xbf16> to vector<4x64xbf16>
      %121 = vector.shape_cast %117 : vector<4x64xbf16> to vector<1x1x4x64xbf16>
      tpu.vector_store %arg3[%c0_96, %118, %c0_97, %c0_98], %121 {strides = array<i32>} : memref<1x16x4x64xbf16, #tpu.memory_space<vmem>>, vector<1x1x4x64xbf16>,
      %cst_99 = arith.constant 0.000000e+00 : f32
      %122 = vector.broadcast %cst_99 : f32 to vector<4x64xf32>
      %c1_100 = arith.constant 1 : index
      %c1_101 = arith.constant 1 : index
      %c0_102 = arith.constant 0 : index
      %c0_103 = arith.constant 0 : index
      %123 = vector.load %arg2[%c1_100, %c1_101, %c0_102, %c0_103] : memref<4x4x128x64xbf16, #tpu.memory_space<vmem>>, vector<1x1x128x64xbf16>
      %124 = vector.shape_cast %123 : vector<1x1x128x64xbf16> to vector<128x64xbf16>
      %cst_104 = arith.constant dense<0.000000e+00> : vector<4x64xf32>
      %125 = tpu.matmul %25, %124, %cst_104 {dimension_numbers = #tpu.dot_dimension_numbers<[1], [0], [0], [1], [0, 0, 1, 1], [], []>} : vector<4x128xbf16>, vector<128x64xbf16>, vector<4x64xf32> -> vector<4x64xf32>
      %126 = arith.addf %122, %125 : vector<4x64xf32>
      %c1_105 = arith.constant 1 : index
      %c3_106 = arith.constant 3 : index
      %c0_107 = arith.constant 0 : index
      %c0_108 = arith.constant 0 : index
      %127 = vector.load %arg2[%c1_105, %c3_106, %c0_107, %c0_108] : memref<4x4x128x64xbf16, #tpu.memory_space<vmem>>, vector<1x1x128x64xbf16>
      %128 = vector.shape_cast %127 : vector<1x1x128x64xbf16> to vector<128x64xbf16>
      %cst_109 = arith.constant dense<0.000000e+00> : vector<4x64xf32>
      %129 = tpu.matmul %26, %128, %cst_109 {dimension_numbers = #tpu.dot_dimension_numbers<[1], [0], [0], [1], [0, 0, 1, 1], [], []>} : vector<4x128xbf16>, vector<128x64xbf16>, vector<4x64xf32> -> vector<4x64xf32>
      %130 = arith.addf %126, %129 : vector<4x64xf32>
      %c3_110 = arith.constant 3 : index
      %c1_111 = arith.constant 1 : index
      %c0_112 = arith.constant 0 : index
      %c0_113 = arith.constant 0 : index
      %131 = vector.load %arg2[%c3_110, %c1_111, %c0_112, %c0_113] : memref<4x4x128x64xbf16, #tpu.memory_space<vmem>>, vector<1x1x128x64xbf16>
      %132 = vector.shape_cast %131 : vector<1x1x128x64xbf16> to vector<128x64xbf16>
      %cst_114 = arith.constant dense<0.000000e+00> : vector<4x64xf32>
      %133 = tpu.matmul %28, %132, %cst_114 {dimension_numbers = #tpu.dot_dimension_numbers<[1], [0], [0], [1], [0, 0, 1, 1], [], []>} : vector<4x128xbf16>, vector<128x64xbf16>, vector<4x64xf32> -> vector<4x64xf32>
      %134 = arith.addf %130, %133 : vector<4x64xf32>
      %c3_115 = arith.constant 3 : index
      %c3_116 = arith.constant 3 : index
      %c0_117 = arith.constant 0 : index
      %c0_118 = arith.constant 0 : index
      %135 = vector.load %arg2[%c3_115, %c3_116, %c0_117, %c0_118] : memref<4x4x128x64xbf16, #tpu.memory_space<vmem>>, vector<1x1x128x64xbf16>
      %136 = vector.shape_cast %135 : vector<1x1x128x64xbf16> to vector<128x64xbf16>
      %cst_119 = arith.constant dense<0.000000e+00> : vector<4x64xf32>
      %137 = tpu.matmul %29, %136, %cst_119 {dimension_numbers = #tpu.dot_dimension_numbers<[1], [0], [0], [1], [0, 0, 1, 1], [], []>} : vector<4x128xbf16>, vector<128x64xbf16>, vector<4x64xf32> -> vector<4x64xf32>
      %138 = arith.addf %134, %137 : vector<4x64xf32>
      %c12_i32 = arith.constant 12 : i32
      %139 = arith.addi %c12_i32, %8 : i32
      %cst_120 = arith.constant dense<0.000000e+00> : vector<64xf32>
      %140 = vector.multi_reduction <add>, %138, %cst_120 [0] : vector<4x64xf32> to vector<64xf32>
      %141 = vector.shape_cast %140 : vector<64xf32> to vector<1x64xf32>
      %142 = arith.addf %112, %141 : vector<1x64xf32>
      %143 = arith.mulf %138, %138 : vector<4x64xf32>
      %cst_121 = arith.constant dense<0.000000e+00> : vector<64xf32>
      %144 = vector.multi_reduction <add>, %143, %cst_121 [0] : vector<4x64xf32> to vector<64xf32>
      %145 = vector.shape_cast %144 : vector<64xf32> to vector<1x64xf32>
      %146 = arith.addf %116, %145 : vector<1x64xf32>
      %147 = arith.truncf %138 : vector<4x64xf32> to vector<4x64xbf16>
      %c0_122 = arith.constant 0 : index
      %148 = arith.index_cast %139 : i32 to index
      %c0_123 = arith.constant 0 : index
      %c0_124 = arith.constant 0 : index
      %149 = vector.load %arg3[%c0_122, %148, %c0_123, %c0_124] : memref<1x16x4x64xbf16, #tpu.memory_space<vmem>>, vector<1x1x4x64xbf16>
      %150 = vector.shape_cast %149 : vector<1x1x4x64xbf16> to vector<4x64xbf16>
      %151 = vector.shape_cast %147 : vector<4x64xbf16> to vector<1x1x4x64xbf16>
      tpu.vector_store %arg3[%c0_122, %148, %c0_123, %c0_124], %151 {strides = array<i32>} : memref<1x16x4x64xbf16, #tpu.memory_space<vmem>>, vector<1x1x4x64xbf16>,
      %c0_125 = arith.constant 0 : index
      %c0_126 = arith.constant 0 : index
      %152 = vector.load %arg5[%c0_125, %c0_126] : memref<2x64xf32, #tpu.memory_space<vmem>>, vector<1x64xf32>
      %153 = arith.addf %152, %142 : vector<1x64xf32>
      %c0_127 = arith.constant 0 : index
      %c0_128 = arith.constant 0 : index
      %154 = vector.load %arg5[%c0_127, %c0_128] : memref<2x64xf32, #tpu.memory_space<vmem>>, vector<1x64xf32>
      tpu.vector_store %arg5[%c0_127, %c0_128], %153 {strides = array<i32>} : memref<2x64xf32, #tpu.memory_space<vmem>>, vector<1x64xf32>,
      %c1_129 = arith.constant 1 : index
      %c0_130 = arith.constant 0 : index
      %155 = vector.load %arg5[%c1_129, %c0_130] : memref<2x64xf32, #tpu.memory_space<vmem>>, vector<1x64xf32>
      %156 = arith.addf %155, %146 : vector<1x64xf32>
      %c1_131 = arith.constant 1 : index
      %c0_132 = arith.constant 0 : index
      %157 = vector.load %arg5[%c1_131, %c0_132] : memref<2x64xf32, #tpu.memory_space<vmem>>, vector<1x64xf32>
      tpu.vector_store %arg5[%c1_131, %c0_132], %156 {strides = array<i32>} : memref<2x64xf32, #tpu.memory_space<vmem>>, vector<1x64xf32>,
    }
    %c4_i32_1 = arith.constant 4 : i32
    %c0_2 = arith.constant 0 : index
    %c0_3 = arith.constant 0 : index
    %3 = vector.load %arg5[%c0_2, %c0_3] : memref<2x64xf32, #tpu.memory_space<vmem>>, vector<2x64xf32>
    %c0_4 = arith.constant 0 : index
    %c0_5 = arith.constant 0 : index
    %c0_6 = arith.constant 0 : index
    %4 = vector.load %arg4[%c0_4, %c0_5, %c0_6] : memref<1x2x64xf32, #tpu.memory_space<vmem>>, vector<1x2x64xf32>
    %5 = vector.shape_cast %4 : vector<1x2x64xf32> to vector<2x64xf32>
    %6 = vector.shape_cast %3 : vector<2x64xf32> to vector<1x2x64xf32>
    tpu.vector_store %arg4[%c0_4, %c0_5, %c0_6], %6 {strides = array<i32>} : memref<1x2x64xf32, #tpu.memory_space<vmem>>, vector<1x2x64xf32>,
    return
  }
  func.func @transform_0(%arg0: i32) -> (i32, i32, i32, i32) {
    %c0_i32 = arith.constant 0 : i32
    %c0_i32_0 = arith.constant 0 : i32
    %c0_i32_1 = arith.constant 0 : i32
    %c0_i32_2 = arith.constant 0 : i32
    return %arg0, %c0_i32, %c0_i32_0, %c0_i32_1 : i32, i32, i32, i32
  }
  func.func @transform_1(%arg0: i32) -> (i32, i32, i32, i32) {
    %c0_i32 = arith.constant 0 : i32
    %c0_i32_0 = arith.constant 0 : i32
    %c0_i32_1 = arith.constant 0 : i32
    %c0_i32_2 = arith.constant 0 : i32
    %c0_i32_3 = arith.constant 0 : i32
    return %c0_i32, %c0_i32_0, %c0_i32_1, %c0_i32_2 : i32, i32, i32, i32
  }
  func.func @transform_2(%arg0: i32) -> (i32, i32, i32, i32) {
    %c0_i32 = arith.constant 0 : i32
    %c0_i32_0 = arith.constant 0 : i32
    %c0_i32_1 = arith.constant 0 : i32
    %c0_i32_2 = arith.constant 0 : i32
    return %arg0, %c0_i32, %c0_i32_0, %c0_i32_1 : i32, i32, i32, i32
  }
  func.func @transform_3(%arg0: i32) -> (i32, i32, i32) {
    %c0_i32 = arith.constant 0 : i32
    %c0_i32_0 = arith.constant 0 : i32
    %c0_i32_1 = arith.constant 0 : i32
    return %arg0, %c0_i32, %c0_i32_0 : i32, i32, i32
  }
}

module attributes {stable_mosaic.version = 11 : i64} {
  func.func @_bn_act_kernel(%arg0: i32, %arg1: i32, %arg2: memref<1x64x64xbf16, #tpu.memory_space<vmem>>, %arg3: memref<1x1x64xf32, #tpu.memory_space<vmem>>, %arg4: memref<1x1x64xf32, #tpu.memory_space<vmem>>, %arg5: memref<1x64x64xbf16, #tpu.memory_space<vmem>>) attributes {dimension_semantics = [#tpu.dimension_semantics<parallel>, #tpu.dimension_semantics<parallel>], iteration_bounds = array<i64: 2, 1>, scalar_prefetch = 0 : i64, scratch_operands = 0 : i64, tpu.core_type = #tpu.core_type<tc>, window_params = [{transform_indices = @transform_0, window_bounds = array<i64: 1, 64, 64>}, {pipeline_mode = #tpu.pipeline_mode<synchronous>, transform_indices = @transform_1, window_bounds = array<i64: 1, 1, 64>}, {pipeline_mode = #tpu.pipeline_mode<synchronous>, transform_indices = @transform_2, window_bounds = array<i64: 1, 1, 64>}, {transform_indices = @transform_3, window_bounds = array<i64: 1, 64, 64>}]} {
    %c0 = arith.constant 0 : index
    %c0_0 = arith.constant 0 : index
    %c0_1 = arith.constant 0 : index
    %0 = vector.load %arg2[%c0, %c0_0, %c0_1] : memref<1x64x64xbf16, #tpu.memory_space<vmem>>, vector<1x64x64xbf16>
    %1 = arith.extf %0 : vector<1x64x64xbf16> to vector<1x64x64xf32>
    %c0_2 = arith.constant 0 : index
    %c0_3 = arith.constant 0 : index
    %c0_4 = arith.constant 0 : index
    %2 = vector.load %arg3[%c0_2, %c0_3, %c0_4] : memref<1x1x64xf32, #tpu.memory_space<vmem>>, vector<1x1x64xf32>
    %3 = vector.broadcast %2 : vector<1x1x64xf32> to vector<1x64x64xf32>
    %4 = arith.mulf %1, %3 : vector<1x64x64xf32>
    %c0_5 = arith.constant 0 : index
    %c0_6 = arith.constant 0 : index
    %c0_7 = arith.constant 0 : index
    %5 = vector.load %arg4[%c0_5, %c0_6, %c0_7] : memref<1x1x64xf32, #tpu.memory_space<vmem>>, vector<1x1x64xf32>
    %6 = vector.broadcast %5 : vector<1x1x64xf32> to vector<1x64x64xf32>
    %7 = arith.addf %4, %6 : vector<1x64x64xf32>
    %cst = arith.constant 0.000000e+00 : f32
    %8 = vector.broadcast %cst : f32 to vector<1x64x64xf32>
    %9 = arith.maximumf %7, %8 : vector<1x64x64xf32>
    %10 = arith.truncf %9 : vector<1x64x64xf32> to vector<1x64x64xbf16>
    %c0_8 = arith.constant 0 : index
    %c0_9 = arith.constant 0 : index
    %c0_10 = arith.constant 0 : index
    %11 = vector.load %arg5[%c0_8, %c0_9, %c0_10] : memref<1x64x64xbf16, #tpu.memory_space<vmem>>, vector<1x64x64xbf16>
    tpu.vector_store %arg5[%c0_8, %c0_9, %c0_10], %10 {strides = array<i32>} : memref<1x64x64xbf16, #tpu.memory_space<vmem>>, vector<1x64x64xbf16>,
    return
  }
  func.func @transform_0(%arg0: i32, %arg1: i32) -> (i32, i32, i32) {
    %c0_i32 = arith.constant 0 : i32
    %c0_i32_0 = arith.constant 0 : i32
    return %arg0, %arg1, %c0_i32 : i32, i32, i32
  }
  func.func @transform_1(%arg0: i32, %arg1: i32) -> (i32, i32, i32) {
    %c0_i32 = arith.constant 0 : i32
    %c0_i32_0 = arith.constant 0 : i32
    %c0_i32_1 = arith.constant 0 : i32
    %c0_i32_2 = arith.constant 0 : i32
    return %c0_i32, %c0_i32_0, %c0_i32_1 : i32, i32, i32
  }
  func.func @transform_2(%arg0: i32, %arg1: i32) -> (i32, i32, i32) {
    %c0_i32 = arith.constant 0 : i32
    %c0_i32_0 = arith.constant 0 : i32
    %c0_i32_1 = arith.constant 0 : i32
    %c0_i32_2 = arith.constant 0 : i32
    return %c0_i32, %c0_i32_0, %c0_i32_1 : i32, i32, i32
  }
  func.func @transform_3(%arg0: i32, %arg1: i32) -> (i32, i32, i32) {
    %c0_i32 = arith.constant 0 : i32
    %c0_i32_0 = arith.constant 0 : i32
    return %arg0, %arg1, %c0_i32 : i32, i32, i32
  }
}

module attributes {stable_mosaic.version = 11 : i64} {
  func.func @kernel(%arg0: i32, %arg1: memref<1x10x10x64xbf16, #tpu.memory_space<vmem>>, %arg2: memref<4x4x64x32xbf16, #tpu.memory_space<vmem>>, %arg3: memref<1x32x8x32xbf16, #tpu.memory_space<vmem>>, %arg4: memref<1x2x32xf32, #tpu.memory_space<vmem>>, %arg5: memref<2x32xf32, #tpu.memory_space<vmem>>) attributes {dimension_semantics = [#tpu.dimension_semantics<parallel>], iteration_bounds = array<i64: 2>, scalar_prefetch = 0 : i64, scratch_operands = 1 : i64, tpu.core_type = #tpu.core_type<tc>, window_params = [{transform_indices = @transform_0, window_bounds = array<i64: 1, 10, 10, 64>}, {pipeline_mode = #tpu.pipeline_mode<synchronous>, transform_indices = @transform_1, window_bounds = array<i64: 4, 4, 64, 32>}, {transform_indices = @transform_2, window_bounds = array<i64: 1, 32, 8, 32>}, {transform_indices = @transform_3, window_bounds = array<i64: 1, 2, 32>}]} {
    %cst = arith.constant 0.000000e+00 : f32
    %0 = vector.broadcast %cst : f32 to vector<2x32xf32>
    %c0 = arith.constant 0 : index
    %c0_0 = arith.constant 0 : index
    %1 = vector.load %arg5[%c0, %c0_0] : memref<2x32xf32, #tpu.memory_space<vmem>>, vector<2x32xf32>
    tpu.vector_store %arg5[%c0, %c0_0], %0 {strides = array<i32>} : memref<2x32xf32, #tpu.memory_space<vmem>>, vector<2x32xf32>,
    %c0_i32 = arith.constant 0 : i32
    %c8_i32 = arith.constant 8 : i32
    %2 = arith.addi %c0_i32, %c8_i32 : i32
    %c1_i32 = arith.constant 1 : i32
    scf.for %arg6 = %c0_i32 to %2 step %c1_i32  : i32 {
      %c1_i32_7 = arith.constant 1 : i32
      %7 = arith.muli %arg6, %c1_i32_7 : i32
      %c0_i32_8 = arith.constant 0 : i32
      %8 = arith.addi %c0_i32_8, %7 : i32
      %c0_i32_9 = arith.constant 0 : i32
      %9 = arith.addi %8, %c0_i32_9 : i32
      %c0_10 = arith.constant 0 : index
      %10 = arith.index_cast %9 : i32 to index
      %c0_11 = arith.constant 0 : index
      %c0_12 = arith.constant 0 : index
      %11 = vector.load %arg1[%c0_10, %10, %c0_11, %c0_12] : memref<1x10x10x64xbf16, #tpu.memory_space<vmem>>, vector<1x1x10x64xbf16>
      %12 = vector.shape_cast %11 : vector<1x1x10x64xbf16> to vector<10x64xbf16>
      %c1_i32_13 = arith.constant 1 : i32
      %13 = arith.addi %8, %c1_i32_13 : i32
      %c0_14 = arith.constant 0 : index
      %14 = arith.index_cast %13 : i32 to index
      %c0_15 = arith.constant 0 : index
      %c0_16 = arith.constant 0 : index
      %15 = vector.load %arg1[%c0_14, %14, %c0_15, %c0_16] : memref<1x10x10x64xbf16, #tpu.memory_space<vmem>>, vector<1x1x10x64xbf16>
      %16 = vector.shape_cast %15 : vector<1x1x10x64xbf16> to vector<10x64xbf16>
      %c2_i32 = arith.constant 2 : i32
      %17 = arith.addi %8, %c2_i32 : i32
      %c0_17 = arith.constant 0 : index
      %18 = arith.index_cast %17 : i32 to index
      %c0_18 = arith.constant 0 : index
      %c0_19 = arith.constant 0 : index
      %19 = vector.load %arg1[%c0_17, %18, %c0_18, %c0_19] : memref<1x10x10x64xbf16, #tpu.memory_space<vmem>>, vector<1x1x10x64xbf16>
      %20 = vector.shape_cast %19 : vector<1x1x10x64xbf16> to vector<10x64xbf16>
      %21 = vector.extract_strided_slice %12 {offsets = [0, 0], sizes = [8, 64], strides = [1, 1]} : vector<10x64xbf16> to vector<8x64xbf16>
      %22 = vector.extract_strided_slice %12 {offsets = [1, 0], sizes = [8, 64], strides = [1, 1]} : vector<10x64xbf16> to vector<8x64xbf16>
      %23 = vector.extract_strided_slice %12 {offsets = [2, 0], sizes = [8, 64], strides = [1, 1]} : vector<10x64xbf16> to vector<8x64xbf16>
      %24 = vector.extract_strided_slice %16 {offsets = [0, 0], sizes = [8, 64], strides = [1, 1]} : vector<10x64xbf16> to vector<8x64xbf16>
      %25 = vector.extract_strided_slice %16 {offsets = [1, 0], sizes = [8, 64], strides = [1, 1]} : vector<10x64xbf16> to vector<8x64xbf16>
      %26 = vector.extract_strided_slice %16 {offsets = [2, 0], sizes = [8, 64], strides = [1, 1]} : vector<10x64xbf16> to vector<8x64xbf16>
      %27 = vector.extract_strided_slice %20 {offsets = [0, 0], sizes = [8, 64], strides = [1, 1]} : vector<10x64xbf16> to vector<8x64xbf16>
      %28 = vector.extract_strided_slice %20 {offsets = [1, 0], sizes = [8, 64], strides = [1, 1]} : vector<10x64xbf16> to vector<8x64xbf16>
      %29 = vector.extract_strided_slice %20 {offsets = [2, 0], sizes = [8, 64], strides = [1, 1]} : vector<10x64xbf16> to vector<8x64xbf16>
      %cst_20 = arith.constant 0.000000e+00 : f32
      %30 = vector.broadcast %cst_20 : f32 to vector<1x32xf32>
      %cst_21 = arith.constant 0.000000e+00 : f32
      %31 = vector.broadcast %cst_21 : f32 to vector<1x32xf32>
      %cst_22 = arith.constant 0.000000e+00 : f32
      %32 = vector.broadcast %cst_22 : f32 to vector<8x32xf32>
      %c0_23 = arith.constant 0 : index
      %c0_24 = arith.constant 0 : index
      %c0_25 = arith.constant 0 : index
      %c0_26 = arith.constant 0 : index
      %33 = vector.load %arg2[%c0_23, %c0_24, %c0_25, %c0_26] : memref<4x4x64x32xbf16, #tpu.memory_space<vmem>>, vector<1x1x64x32xbf16>
      %34 = vector.shape_cast %33 : vector<1x1x64x32xbf16> to vector<64x32xbf16>
      %cst_27 = arith.constant dense<0.000000e+00> : vector<8x32xf32>
      %35 = tpu.matmul %21, %34, %cst_27 {dimension_numbers = #tpu.dot_dimension_numbers<[1], [0], [0], [1], [0, 0, 1, 1], [], []>} : vector<8x64xbf16>, vector<64x32xbf16>, vector<8x32xf32> -> vector<8x32xf32>
      %36 = arith.addf %32, %35 : vector<8x32xf32>
      %c0_28 = arith.constant 0 : index
      %c2 = arith.constant 2 : index
      %c0_29 = arith.constant 0 : index
      %c0_30 = arith.constant 0 : index
      %37 = vector.load %arg2[%c0_28, %c2, %c0_29, %c0_30] : memref<4x4x64x32xbf16, #tpu.memory_space<vmem>>, vector<1x1x64x32xbf16>
      %38 = vector.shape_cast %37 : vector<1x1x64x32xbf16> to vector<64x32xbf16>
      %cst_31 = arith.constant dense<0.000000e+00> : vector<8x32xf32>
      %39 = tpu.matmul %22, %38, %cst_31 {dimension_numbers = #tpu.dot_dimension_numbers<[1], [0], [0], [1], [0, 0, 1, 1], [], []>} : vector<8x64xbf16>, vector<64x32xbf16>, vector<8x32xf32> -> vector<8x32xf32>
      %40 = arith.addf %36, %39 : vector<8x32xf32>
      %c2_32 = arith.constant 2 : index
      %c0_33 = arith.constant 0 : index
      %c0_34 = arith.constant 0 : index
      %c0_35 = arith.constant 0 : index
      %41 = vector.load %arg2[%c2_32, %c0_33, %c0_34, %c0_35] : memref<4x4x64x32xbf16, #tpu.memory_space<vmem>>, vector<1x1x64x32xbf16>
      %42 = vector.shape_cast %41 : vector<1x1x64x32xbf16> to vector<64x32xbf16>
      %cst_36 = arith.constant dense<0.000000e+00> : vector<8x32xf32>
      %43 = tpu.matmul %24, %42, %cst_36 {dimension_numbers = #tpu.dot_dimension_numbers<[1], [0], [0], [1], [0, 0, 1, 1], [], []>} : vector<8x64xbf16>, vector<64x32xbf16>, vector<8x32xf32> -> vector<8x32xf32>
      %44 = arith.addf %40, %43 : vector<8x32xf32>
      %c2_37 = arith.constant 2 : index
      %c2_38 = arith.constant 2 : index
      %c0_39 = arith.constant 0 : index
      %c0_40 = arith.constant 0 : index
      %45 = vector.load %arg2[%c2_37, %c2_38, %c0_39, %c0_40] : memref<4x4x64x32xbf16, #tpu.memory_space<vmem>>, vector<1x1x64x32xbf16>
      %46 = vector.shape_cast %45 : vector<1x1x64x32xbf16> to vector<64x32xbf16>
      %cst_41 = arith.constant dense<0.000000e+00> : vector<8x32xf32>
      %47 = tpu.matmul %25, %46, %cst_41 {dimension_numbers = #tpu.dot_dimension_numbers<[1], [0], [0], [1], [0, 0, 1, 1], [], []>} : vector<8x64xbf16>, vector<64x32xbf16>, vector<8x32xf32> -> vector<8x32xf32>
      %48 = arith.addf %44, %47 : vector<8x32xf32>
      %c0_i32_42 = arith.constant 0 : i32
      %49 = arith.addi %c0_i32_42, %8 : i32
      %cst_43 = arith.constant dense<0.000000e+00> : vector<32xf32>
      %50 = vector.multi_reduction <add>, %48, %cst_43 [0] : vector<8x32xf32> to vector<32xf32>
      %51 = vector.shape_cast %50 : vector<32xf32> to vector<1x32xf32>
      %52 = arith.addf %30, %51 : vector<1x32xf32>
      %53 = arith.mulf %48, %48 : vector<8x32xf32>
      %cst_44 = arith.constant dense<0.000000e+00> : vector<32xf32>
      %54 = vector.multi_reduction <add>, %53, %cst_44 [0] : vector<8x32xf32> to vector<32xf32>
      %55 = vector.shape_cast %54 : vector<32xf32> to vector<1x32xf32>
      %56 = arith.addf %31, %55 : vector<1x32xf32>
      %57 = arith.truncf %48 : vector<8x32xf32> to vector<8x32xbf16>
      %c0_45 = arith.constant 0 : index
      %58 = arith.index_cast %49 : i32 to index
      %c0_46 = arith.constant 0 : index
      %c0_47 = arith.constant 0 : index
      %59 = vector.load %arg3[%c0_45, %58, %c0_46, %c0_47] : memref<1x32x8x32xbf16, #tpu.memory_space<vmem>>, vector<1x1x8x32xbf16>
      %60 = vector.shape_cast %59 : vector<1x1x8x32xbf16> to vector<8x32xbf16>
      %61 = vector.shape_cast %57 : vector<8x32xbf16> to vector<1x1x8x32xbf16>
      tpu.vector_store %arg3[%c0_45, %58, %c0_46, %c0_47], %61 {strides = array<i32>} : memref<1x32x8x32xbf16, #tpu.memory_space<vmem>>, vector<1x1x8x32xbf16>,
      %cst_48 = arith.constant 0.000000e+00 : f32
      %62 = vector.broadcast %cst_48 : f32 to vector<8x32xf32>
      %c0_49 = arith.constant 0 : index
      %c1 = arith.constant 1 : index
      %c0_50 = arith.constant 0 : index
      %c0_51 = arith.constant 0 : index
      %63 = vector.load %arg2[%c0_49, %c1, %c0_50, %c0_51] : memref<4x4x64x32xbf16, #tpu.memory_space<vmem>>, vector<1x1x64x32xbf16>
      %64 = vector.shape_cast %63 : vector<1x1x64x32xbf16> to vector<64x32xbf16>
      %cst_52 = arith.constant dense<0.000000e+00> : vector<8x32xf32>
      %65 = tpu.matmul %22, %64, %cst_52 {dimension_numbers = #tpu.dot_dimension_numbers<[1], [0], [0], [1], [0, 0, 1, 1], [], []>} : vector<8x64xbf16>, vector<64x32xbf16>, vector<8x32xf32> -> vector<8x32xf32>
      %66 = arith.addf %62, %65 : vector<8x32xf32>
      %c0_53 = arith.constant 0 : index
      %c3 = arith.constant 3 : index
      %c0_54 = arith.constant 0 : index
      %c0_55 = arith.constant 0 : index
      %67 = vector.load %arg2[%c0_53, %c3, %c0_54, %c0_55] : memref<4x4x64x32xbf16, #tpu.memory_space<vmem>>, vector<1x1x64x32xbf16>
      %68 = vector.shape_cast %67 : vector<1x1x64x32xbf16> to vector<64x32xbf16>
      %cst_56 = arith.constant dense<0.000000e+00> : vector<8x32xf32>
      %69 = tpu.matmul %23, %68, %cst_56 {dimension_numbers = #tpu.dot_dimension_numbers<[1], [0], [0], [1], [0, 0, 1, 1], [], []>} : vector<8x64xbf16>, vector<64x32xbf16>, vector<8x32xf32> -> vector<8x32xf32>
      %70 = arith.addf %66, %69 : vector<8x32xf32>
      %c2_57 = arith.constant 2 : index
      %c1_58 = arith.constant 1 : index
      %c0_59 = arith.constant 0 : index
      %c0_60 = arith.constant 0 : index
      %71 = vector.load %arg2[%c2_57, %c1_58, %c0_59, %c0_60] : memref<4x4x64x32xbf16, #tpu.memory_space<vmem>>, vector<1x1x64x32xbf16>
      %72 = vector.shape_cast %71 : vector<1x1x64x32xbf16> to vector<64x32xbf16>
      %cst_61 = arith.constant dense<0.000000e+00> : vector<8x32xf32>
      %73 = tpu.matmul %25, %72, %cst_61 {dimension_numbers = #tpu.dot_dimension_numbers<[1], [0], [0], [1], [0, 0, 1, 1], [], []>} : vector<8x64xbf16>, vector<64x32xbf16>, vector<8x32xf32> -> vector<8x32xf32>
      %74 = arith.addf %70, %73 : vector<8x32xf32>
      %c2_62 = arith.constant 2 : index
      %c3_63 = arith.constant 3 : index
      %c0_64 = arith.constant 0 : index
      %c0_65 = arith.constant 0 : index
      %75 = vector.load %arg2[%c2_62, %c3_63, %c0_64, %c0_65] : memref<4x4x64x32xbf16, #tpu.memory_space<vmem>>, vector<1x1x64x32xbf16>
      %76 = vector.shape_cast %75 : vector<1x1x64x32xbf16> to vector<64x32xbf16>
      %cst_66 = arith.constant dense<0.000000e+00> : vector<8x32xf32>
      %77 = tpu.matmul %26, %76, %cst_66 {dimension_numbers = #tpu.dot_dimension_numbers<[1], [0], [0], [1], [0, 0, 1, 1], [], []>} : vector<8x64xbf16>, vector<64x32xbf16>, vector<8x32xf32> -> vector<8x32xf32>
      %78 = arith.addf %74, %77 : vector<8x32xf32>
      %c8_i32_67 = arith.constant 8 : i32
      %79 = arith.addi %c8_i32_67, %8 : i32
      %cst_68 = arith.constant dense<0.000000e+00> : vector<32xf32>
      %80 = vector.multi_reduction <add>, %78, %cst_68 [0] : vector<8x32xf32> to vector<32xf32>
      %81 = vector.shape_cast %80 : vector<32xf32> to vector<1x32xf32>
      %82 = arith.addf %52, %81 : vector<1x32xf32>
      %83 = arith.mulf %78, %78 : vector<8x32xf32>
      %cst_69 = arith.constant dense<0.000000e+00> : vector<32xf32>
      %84 = vector.multi_reduction <add>, %83, %cst_69 [0] : vector<8x32xf32> to vector<32xf32>
      %85 = vector.shape_cast %84 : vector<32xf32> to vector<1x32xf32>
      %86 = arith.addf %56, %85 : vector<1x32xf32>
      %87 = arith.truncf %78 : vector<8x32xf32> to vector<8x32xbf16>
      %c0_70 = arith.constant 0 : index
      %88 = arith.index_cast %79 : i32 to index
      %c0_71 = arith.constant 0 : index
      %c0_72 = arith.constant 0 : index
      %89 = vector.load %arg3[%c0_70, %88, %c0_71, %c0_72] : memref<1x32x8x32xbf16, #tpu.memory_space<vmem>>, vector<1x1x8x32xbf16>
      %90 = vector.shape_cast %89 : vector<1x1x8x32xbf16> to vector<8x32xbf16>
      %91 = vector.shape_cast %87 : vector<8x32xbf16> to vector<1x1x8x32xbf16>
      tpu.vector_store %arg3[%c0_70, %88, %c0_71, %c0_72], %91 {strides = array<i32>} : memref<1x32x8x32xbf16, #tpu.memory_space<vmem>>, vector<1x1x8x32xbf16>,
      %cst_73 = arith.constant 0.000000e+00 : f32
      %92 = vector.broadcast %cst_73 : f32 to vector<8x32xf32>
      %c1_74 = arith.constant 1 : index
      %c0_75 = arith.constant 0 : index
      %c0_76 = arith.constant 0 : index
      %c0_77 = arith.constant 0 : index
      %93 = vector.load %arg2[%c1_74, %c0_75, %c0_76, %c0_77] : memref<4x4x64x32xbf16, #tpu.memory_space<vmem>>, vector<1x1x64x32xbf16>
      %94 = vector.shape_cast %93 : vector<1x1x64x32xbf16> to vector<64x32xbf16>
      %cst_78 = arith.constant dense<0.000000e+00> : vector<8x32xf32>
      %95 = tpu.matmul %24, %94, %cst_78 {dimension_numbers = #tpu.dot_dimension_numbers<[1], [0], [0], [1], [0, 0, 1, 1], [], []>} : vector<8x64xbf16>, vector<64x32xbf16>, vector<8x32xf32> -> vector<8x32xf32>
      %96 = arith.addf %92, %95 : vector<8x32xf32>
      %c1_79 = arith.constant 1 : index
      %c2_80 = arith.constant 2 : index
      %c0_81 = arith.constant 0 : index
      %c0_82 = arith.constant 0 : index
      %97 = vector.load %arg2[%c1_79, %c2_80, %c0_81, %c0_82] : memref<4x4x64x32xbf16, #tpu.memory_space<vmem>>, vector<1x1x64x32xbf16>
      %98 = vector.shape_cast %97 : vector<1x1x64x32xbf16> to vector<64x32xbf16>
      %cst_83 = arith.constant dense<0.000000e+00> : vector<8x32xf32>
      %99 = tpu.matmul %25, %98, %cst_83 {dimension_numbers = #tpu.dot_dimension_numbers<[1], [0], [0], [1], [0, 0, 1, 1], [], []>} : vector<8x64xbf16>, vector<64x32xbf16>, vector<8x32xf32> -> vector<8x32xf32>
      %100 = arith.addf %96, %99 : vector<8x32xf32>
      %c3_84 = arith.constant 3 : index
      %c0_85 = arith.constant 0 : index
      %c0_86 = arith.constant 0 : index
      %c0_87 = arith.constant 0 : index
      %101 = vector.load %arg2[%c3_84, %c0_85, %c0_86, %c0_87] : memref<4x4x64x32xbf16, #tpu.memory_space<vmem>>, vector<1x1x64x32xbf16>
      %102 = vector.shape_cast %101 : vector<1x1x64x32xbf16> to vector<64x32xbf16>
      %cst_88 = arith.constant dense<0.000000e+00> : vector<8x32xf32>
      %103 = tpu.matmul %27, %102, %cst_88 {dimension_numbers = #tpu.dot_dimension_numbers<[1], [0], [0], [1], [0, 0, 1, 1], [], []>} : vector<8x64xbf16>, vector<64x32xbf16>, vector<8x32xf32> -> vector<8x32xf32>
      %104 = arith.addf %100, %103 : vector<8x32xf32>
      %c3_89 = arith.constant 3 : index
      %c2_90 = arith.constant 2 : index
      %c0_91 = arith.constant 0 : index
      %c0_92 = arith.constant 0 : index
      %105 = vector.load %arg2[%c3_89, %c2_90, %c0_91, %c0_92] : memref<4x4x64x32xbf16, #tpu.memory_space<vmem>>, vector<1x1x64x32xbf16>
      %106 = vector.shape_cast %105 : vector<1x1x64x32xbf16> to vector<64x32xbf16>
      %cst_93 = arith.constant dense<0.000000e+00> : vector<8x32xf32>
      %107 = tpu.matmul %28, %106, %cst_93 {dimension_numbers = #tpu.dot_dimension_numbers<[1], [0], [0], [1], [0, 0, 1, 1], [], []>} : vector<8x64xbf16>, vector<64x32xbf16>, vector<8x32xf32> -> vector<8x32xf32>
      %108 = arith.addf %104, %107 : vector<8x32xf32>
      %c16_i32 = arith.constant 16 : i32
      %109 = arith.addi %c16_i32, %8 : i32
      %cst_94 = arith.constant dense<0.000000e+00> : vector<32xf32>
      %110 = vector.multi_reduction <add>, %108, %cst_94 [0] : vector<8x32xf32> to vector<32xf32>
      %111 = vector.shape_cast %110 : vector<32xf32> to vector<1x32xf32>
      %112 = arith.addf %82, %111 : vector<1x32xf32>
      %113 = arith.mulf %108, %108 : vector<8x32xf32>
      %cst_95 = arith.constant dense<0.000000e+00> : vector<32xf32>
      %114 = vector.multi_reduction <add>, %113, %cst_95 [0] : vector<8x32xf32> to vector<32xf32>
      %115 = vector.shape_cast %114 : vector<32xf32> to vector<1x32xf32>
      %116 = arith.addf %86, %115 : vector<1x32xf32>
      %117 = arith.truncf %108 : vector<8x32xf32> to vector<8x32xbf16>
      %c0_96 = arith.constant 0 : index
      %118 = arith.index_cast %109 : i32 to index
      %c0_97 = arith.constant 0 : index
      %c0_98 = arith.constant 0 : index
      %119 = vector.load %arg3[%c0_96, %118, %c0_97, %c0_98] : memref<1x32x8x32xbf16, #tpu.memory_space<vmem>>, vector<1x1x8x32xbf16>
      %120 = vector.shape_cast %119 : vector<1x1x8x32xbf16> to vector<8x32xbf16>
      %121 = vector.shape_cast %117 : vector<8x32xbf16> to vector<1x1x8x32xbf16>
      tpu.vector_store %arg3[%c0_96, %118, %c0_97, %c0_98], %121 {strides = array<i32>} : memref<1x32x8x32xbf16, #tpu.memory_space<vmem>>, vector<1x1x8x32xbf16>,
      %cst_99 = arith.constant 0.000000e+00 : f32
      %122 = vector.broadcast %cst_99 : f32 to vector<8x32xf32>
      %c1_100 = arith.constant 1 : index
      %c1_101 = arith.constant 1 : index
      %c0_102 = arith.constant 0 : index
      %c0_103 = arith.constant 0 : index
      %123 = vector.load %arg2[%c1_100, %c1_101, %c0_102, %c0_103] : memref<4x4x64x32xbf16, #tpu.memory_space<vmem>>, vector<1x1x64x32xbf16>
      %124 = vector.shape_cast %123 : vector<1x1x64x32xbf16> to vector<64x32xbf16>
      %cst_104 = arith.constant dense<0.000000e+00> : vector<8x32xf32>
      %125 = tpu.matmul %25, %124, %cst_104 {dimension_numbers = #tpu.dot_dimension_numbers<[1], [0], [0], [1], [0, 0, 1, 1], [], []>} : vector<8x64xbf16>, vector<64x32xbf16>, vector<8x32xf32> -> vector<8x32xf32>
      %126 = arith.addf %122, %125 : vector<8x32xf32>
      %c1_105 = arith.constant 1 : index
      %c3_106 = arith.constant 3 : index
      %c0_107 = arith.constant 0 : index
      %c0_108 = arith.constant 0 : index
      %127 = vector.load %arg2[%c1_105, %c3_106, %c0_107, %c0_108] : memref<4x4x64x32xbf16, #tpu.memory_space<vmem>>, vector<1x1x64x32xbf16>
      %128 = vector.shape_cast %127 : vector<1x1x64x32xbf16> to vector<64x32xbf16>
      %cst_109 = arith.constant dense<0.000000e+00> : vector<8x32xf32>
      %129 = tpu.matmul %26, %128, %cst_109 {dimension_numbers = #tpu.dot_dimension_numbers<[1], [0], [0], [1], [0, 0, 1, 1], [], []>} : vector<8x64xbf16>, vector<64x32xbf16>, vector<8x32xf32> -> vector<8x32xf32>
      %130 = arith.addf %126, %129 : vector<8x32xf32>
      %c3_110 = arith.constant 3 : index
      %c1_111 = arith.constant 1 : index
      %c0_112 = arith.constant 0 : index
      %c0_113 = arith.constant 0 : index
      %131 = vector.load %arg2[%c3_110, %c1_111, %c0_112, %c0_113] : memref<4x4x64x32xbf16, #tpu.memory_space<vmem>>, vector<1x1x64x32xbf16>
      %132 = vector.shape_cast %131 : vector<1x1x64x32xbf16> to vector<64x32xbf16>
      %cst_114 = arith.constant dense<0.000000e+00> : vector<8x32xf32>
      %133 = tpu.matmul %28, %132, %cst_114 {dimension_numbers = #tpu.dot_dimension_numbers<[1], [0], [0], [1], [0, 0, 1, 1], [], []>} : vector<8x64xbf16>, vector<64x32xbf16>, vector<8x32xf32> -> vector<8x32xf32>
      %134 = arith.addf %130, %133 : vector<8x32xf32>
      %c3_115 = arith.constant 3 : index
      %c3_116 = arith.constant 3 : index
      %c0_117 = arith.constant 0 : index
      %c0_118 = arith.constant 0 : index
      %135 = vector.load %arg2[%c3_115, %c3_116, %c0_117, %c0_118] : memref<4x4x64x32xbf16, #tpu.memory_space<vmem>>, vector<1x1x64x32xbf16>
      %136 = vector.shape_cast %135 : vector<1x1x64x32xbf16> to vector<64x32xbf16>
      %cst_119 = arith.constant dense<0.000000e+00> : vector<8x32xf32>
      %137 = tpu.matmul %29, %136, %cst_119 {dimension_numbers = #tpu.dot_dimension_numbers<[1], [0], [0], [1], [0, 0, 1, 1], [], []>} : vector<8x64xbf16>, vector<64x32xbf16>, vector<8x32xf32> -> vector<8x32xf32>
      %138 = arith.addf %134, %137 : vector<8x32xf32>
      %c24_i32 = arith.constant 24 : i32
      %139 = arith.addi %c24_i32, %8 : i32
      %cst_120 = arith.constant dense<0.000000e+00> : vector<32xf32>
      %140 = vector.multi_reduction <add>, %138, %cst_120 [0] : vector<8x32xf32> to vector<32xf32>
      %141 = vector.shape_cast %140 : vector<32xf32> to vector<1x32xf32>
      %142 = arith.addf %112, %141 : vector<1x32xf32>
      %143 = arith.mulf %138, %138 : vector<8x32xf32>
      %cst_121 = arith.constant dense<0.000000e+00> : vector<32xf32>
      %144 = vector.multi_reduction <add>, %143, %cst_121 [0] : vector<8x32xf32> to vector<32xf32>
      %145 = vector.shape_cast %144 : vector<32xf32> to vector<1x32xf32>
      %146 = arith.addf %116, %145 : vector<1x32xf32>
      %147 = arith.truncf %138 : vector<8x32xf32> to vector<8x32xbf16>
      %c0_122 = arith.constant 0 : index
      %148 = arith.index_cast %139 : i32 to index
      %c0_123 = arith.constant 0 : index
      %c0_124 = arith.constant 0 : index
      %149 = vector.load %arg3[%c0_122, %148, %c0_123, %c0_124] : memref<1x32x8x32xbf16, #tpu.memory_space<vmem>>, vector<1x1x8x32xbf16>
      %150 = vector.shape_cast %149 : vector<1x1x8x32xbf16> to vector<8x32xbf16>
      %151 = vector.shape_cast %147 : vector<8x32xbf16> to vector<1x1x8x32xbf16>
      tpu.vector_store %arg3[%c0_122, %148, %c0_123, %c0_124], %151 {strides = array<i32>} : memref<1x32x8x32xbf16, #tpu.memory_space<vmem>>, vector<1x1x8x32xbf16>,
      %c0_125 = arith.constant 0 : index
      %c0_126 = arith.constant 0 : index
      %152 = vector.load %arg5[%c0_125, %c0_126] : memref<2x32xf32, #tpu.memory_space<vmem>>, vector<1x32xf32>
      %153 = arith.addf %152, %142 : vector<1x32xf32>
      %c0_127 = arith.constant 0 : index
      %c0_128 = arith.constant 0 : index
      %154 = vector.load %arg5[%c0_127, %c0_128] : memref<2x32xf32, #tpu.memory_space<vmem>>, vector<1x32xf32>
      tpu.vector_store %arg5[%c0_127, %c0_128], %153 {strides = array<i32>} : memref<2x32xf32, #tpu.memory_space<vmem>>, vector<1x32xf32>,
      %c1_129 = arith.constant 1 : index
      %c0_130 = arith.constant 0 : index
      %155 = vector.load %arg5[%c1_129, %c0_130] : memref<2x32xf32, #tpu.memory_space<vmem>>, vector<1x32xf32>
      %156 = arith.addf %155, %146 : vector<1x32xf32>
      %c1_131 = arith.constant 1 : index
      %c0_132 = arith.constant 0 : index
      %157 = vector.load %arg5[%c1_131, %c0_132] : memref<2x32xf32, #tpu.memory_space<vmem>>, vector<1x32xf32>
      tpu.vector_store %arg5[%c1_131, %c0_132], %156 {strides = array<i32>} : memref<2x32xf32, #tpu.memory_space<vmem>>, vector<1x32xf32>,
    }
    %c8_i32_1 = arith.constant 8 : i32
    %c0_2 = arith.constant 0 : index
    %c0_3 = arith.constant 0 : index
    %3 = vector.load %arg5[%c0_2, %c0_3] : memref<2x32xf32, #tpu.memory_space<vmem>>, vector<2x32xf32>
    %c0_4 = arith.constant 0 : index
    %c0_5 = arith.constant 0 : index
    %c0_6 = arith.constant 0 : index
    %4 = vector.load %arg4[%c0_4, %c0_5, %c0_6] : memref<1x2x32xf32, #tpu.memory_space<vmem>>, vector<1x2x32xf32>
    %5 = vector.shape_cast %4 : vector<1x2x32xf32> to vector<2x32xf32>
    %6 = vector.shape_cast %3 : vector<2x32xf32> to vector<1x2x32xf32>
    tpu.vector_store %arg4[%c0_4, %c0_5, %c0_6], %6 {strides = array<i32>} : memref<1x2x32xf32, #tpu.memory_space<vmem>>, vector<1x2x32xf32>,
    return
  }
  func.func @transform_0(%arg0: i32) -> (i32, i32, i32, i32) {
    %c0_i32 = arith.constant 0 : i32
    %c0_i32_0 = arith.constant 0 : i32
    %c0_i32_1 = arith.constant 0 : i32
    %c0_i32_2 = arith.constant 0 : i32
    return %arg0, %c0_i32, %c0_i32_0, %c0_i32_1 : i32, i32, i32, i32
  }
  func.func @transform_1(%arg0: i32) -> (i32, i32, i32, i32) {
    %c0_i32 = arith.constant 0 : i32
    %c0_i32_0 = arith.constant 0 : i32
    %c0_i32_1 = arith.constant 0 : i32
    %c0_i32_2 = arith.constant 0 : i32
    %c0_i32_3 = arith.constant 0 : i32
    return %c0_i32, %c0_i32_0, %c0_i32_1, %c0_i32_2 : i32, i32, i32, i32
  }
  func.func @transform_2(%arg0: i32) -> (i32, i32, i32, i32) {
    %c0_i32 = arith.constant 0 : i32
    %c0_i32_0 = arith.constant 0 : i32
    %c0_i32_1 = arith.constant 0 : i32
    %c0_i32_2 = arith.constant 0 : i32
    return %arg0, %c0_i32, %c0_i32_0, %c0_i32_1 : i32, i32, i32, i32
  }
  func.func @transform_3(%arg0: i32) -> (i32, i32, i32) {
    %c0_i32 = arith.constant 0 : i32
    %c0_i32_0 = arith.constant 0 : i32
    %c0_i32_1 = arith.constant 0 : i32
    return %arg0, %c0_i32, %c0_i32_0 : i32, i32, i32
  }
}

module attributes {stable_mosaic.version = 11 : i64} {
  func.func @_bn_act_kernel(%arg0: i32, %arg1: i32, %arg2: memref<1x128x32xbf16, #tpu.memory_space<vmem>>, %arg3: memref<1x1x32xf32, #tpu.memory_space<vmem>>, %arg4: memref<1x1x32xf32, #tpu.memory_space<vmem>>, %arg5: memref<1x128x32xbf16, #tpu.memory_space<vmem>>) attributes {dimension_semantics = [#tpu.dimension_semantics<parallel>, #tpu.dimension_semantics<parallel>], iteration_bounds = array<i64: 2, 2>, scalar_prefetch = 0 : i64, scratch_operands = 0 : i64, tpu.core_type = #tpu.core_type<tc>, window_params = [{transform_indices = @transform_0, window_bounds = array<i64: 1, 128, 32>}, {pipeline_mode = #tpu.pipeline_mode<synchronous>, transform_indices = @transform_1, window_bounds = array<i64: 1, 1, 32>}, {pipeline_mode = #tpu.pipeline_mode<synchronous>, transform_indices = @transform_2, window_bounds = array<i64: 1, 1, 32>}, {transform_indices = @transform_3, window_bounds = array<i64: 1, 128, 32>}]} {
    %c0 = arith.constant 0 : index
    %c0_0 = arith.constant 0 : index
    %c0_1 = arith.constant 0 : index
    %0 = vector.load %arg2[%c0, %c0_0, %c0_1] : memref<1x128x32xbf16, #tpu.memory_space<vmem>>, vector<1x128x32xbf16>
    %1 = arith.extf %0 : vector<1x128x32xbf16> to vector<1x128x32xf32>
    %c0_2 = arith.constant 0 : index
    %c0_3 = arith.constant 0 : index
    %c0_4 = arith.constant 0 : index
    %2 = vector.load %arg3[%c0_2, %c0_3, %c0_4] : memref<1x1x32xf32, #tpu.memory_space<vmem>>, vector<1x1x32xf32>
    %3 = vector.broadcast %2 : vector<1x1x32xf32> to vector<1x128x32xf32>
    %4 = arith.mulf %1, %3 : vector<1x128x32xf32>
    %c0_5 = arith.constant 0 : index
    %c0_6 = arith.constant 0 : index
    %c0_7 = arith.constant 0 : index
    %5 = vector.load %arg4[%c0_5, %c0_6, %c0_7] : memref<1x1x32xf32, #tpu.memory_space<vmem>>, vector<1x1x32xf32>
    %6 = vector.broadcast %5 : vector<1x1x32xf32> to vector<1x128x32xf32>
    %7 = arith.addf %4, %6 : vector<1x128x32xf32>
    %cst = arith.constant 0.000000e+00 : f32
    %8 = vector.broadcast %cst : f32 to vector<1x128x32xf32>
    %9 = arith.maximumf %7, %8 : vector<1x128x32xf32>
    %10 = arith.truncf %9 : vector<1x128x32xf32> to vector<1x128x32xbf16>
    %c0_8 = arith.constant 0 : index
    %c0_9 = arith.constant 0 : index
    %c0_10 = arith.constant 0 : index
    %11 = vector.load %arg5[%c0_8, %c0_9, %c0_10] : memref<1x128x32xbf16, #tpu.memory_space<vmem>>, vector<1x128x32xbf16>
    tpu.vector_store %arg5[%c0_8, %c0_9, %c0_10], %10 {strides = array<i32>} : memref<1x128x32xbf16, #tpu.memory_space<vmem>>, vector<1x128x32xbf16>,
    return
  }
  func.func @transform_0(%arg0: i32, %arg1: i32) -> (i32, i32, i32) {
    %c0_i32 = arith.constant 0 : i32
    %c0_i32_0 = arith.constant 0 : i32
    return %arg0, %arg1, %c0_i32 : i32, i32, i32
  }
  func.func @transform_1(%arg0: i32, %arg1: i32) -> (i32, i32, i32) {
    %c0_i32 = arith.constant 0 : i32
    %c0_i32_0 = arith.constant 0 : i32
    %c0_i32_1 = arith.constant 0 : i32
    %c0_i32_2 = arith.constant 0 : i32
    return %c0_i32, %c0_i32_0, %c0_i32_1 : i32, i32, i32
  }
  func.func @transform_2(%arg0: i32, %arg1: i32) -> (i32, i32, i32) {
    %c0_i32 = arith.constant 0 : i32
    %c0_i32_0 = arith.constant 0 : i32
    %c0_i32_1 = arith.constant 0 : i32
    %c0_i32_2 = arith.constant 0 : i32
    return %c0_i32, %c0_i32_0, %c0_i32_1 : i32, i32, i32
  }
  func.func @transform_3(%arg0: i32, %arg1: i32) -> (i32, i32, i32) {
    %c0_i32 = arith.constant 0 : i32
    %c0_i32_0 = arith.constant 0 : i32
    return %arg0, %arg1, %c0_i32 : i32, i32, i32
  }
}

module attributes {stable_mosaic.version = 11 : i64} {
  func.func @kernel(%arg0: i32, %arg1: memref<1x18x18x32xbf16, #tpu.memory_space<vmem>>, %arg2: memref<4x4x32x16xbf16, #tpu.memory_space<vmem>>, %arg3: memref<1x64x16x16xbf16, #tpu.memory_space<vmem>>, %arg4: memref<1x2x16xf32, #tpu.memory_space<vmem>>, %arg5: memref<2x16xf32, #tpu.memory_space<vmem>>) attributes {dimension_semantics = [#tpu.dimension_semantics<parallel>], iteration_bounds = array<i64: 2>, scalar_prefetch = 0 : i64, scratch_operands = 1 : i64, tpu.core_type = #tpu.core_type<tc>, window_params = [{transform_indices = @transform_0, window_bounds = array<i64: 1, 18, 18, 32>}, {pipeline_mode = #tpu.pipeline_mode<synchronous>, transform_indices = @transform_1, window_bounds = array<i64: 4, 4, 32, 16>}, {transform_indices = @transform_2, window_bounds = array<i64: 1, 64, 16, 16>}, {transform_indices = @transform_3, window_bounds = array<i64: 1, 2, 16>}]} {
    %cst = arith.constant 0.000000e+00 : f32
    %0 = vector.broadcast %cst : f32 to vector<2x16xf32>
    %c0 = arith.constant 0 : index
    %c0_0 = arith.constant 0 : index
    %1 = vector.load %arg5[%c0, %c0_0] : memref<2x16xf32, #tpu.memory_space<vmem>>, vector<2x16xf32>
    tpu.vector_store %arg5[%c0, %c0_0], %0 {strides = array<i32>} : memref<2x16xf32, #tpu.memory_space<vmem>>, vector<2x16xf32>,
    %c0_i32 = arith.constant 0 : i32
    %c16_i32 = arith.constant 16 : i32
    %2 = arith.addi %c0_i32, %c16_i32 : i32
    %c1_i32 = arith.constant 1 : i32
    scf.for %arg6 = %c0_i32 to %2 step %c1_i32  : i32 {
      %c1_i32_7 = arith.constant 1 : i32
      %7 = arith.muli %arg6, %c1_i32_7 : i32
      %c0_i32_8 = arith.constant 0 : i32
      %8 = arith.addi %c0_i32_8, %7 : i32
      %c0_i32_9 = arith.constant 0 : i32
      %9 = arith.addi %8, %c0_i32_9 : i32
      %c0_10 = arith.constant 0 : index
      %10 = arith.index_cast %9 : i32 to index
      %c0_11 = arith.constant 0 : index
      %c0_12 = arith.constant 0 : index
      %11 = vector.load %arg1[%c0_10, %10, %c0_11, %c0_12] : memref<1x18x18x32xbf16, #tpu.memory_space<vmem>>, vector<1x1x18x32xbf16>
      %12 = vector.shape_cast %11 : vector<1x1x18x32xbf16> to vector<18x32xbf16>
      %c1_i32_13 = arith.constant 1 : i32
      %13 = arith.addi %8, %c1_i32_13 : i32
      %c0_14 = arith.constant 0 : index
      %14 = arith.index_cast %13 : i32 to index
      %c0_15 = arith.constant 0 : index
      %c0_16 = arith.constant 0 : index
      %15 = vector.load %arg1[%c0_14, %14, %c0_15, %c0_16] : memref<1x18x18x32xbf16, #tpu.memory_space<vmem>>, vector<1x1x18x32xbf16>
      %16 = vector.shape_cast %15 : vector<1x1x18x32xbf16> to vector<18x32xbf16>
      %c2_i32 = arith.constant 2 : i32
      %17 = arith.addi %8, %c2_i32 : i32
      %c0_17 = arith.constant 0 : index
      %18 = arith.index_cast %17 : i32 to index
      %c0_18 = arith.constant 0 : index
      %c0_19 = arith.constant 0 : index
      %19 = vector.load %arg1[%c0_17, %18, %c0_18, %c0_19] : memref<1x18x18x32xbf16, #tpu.memory_space<vmem>>, vector<1x1x18x32xbf16>
      %20 = vector.shape_cast %19 : vector<1x1x18x32xbf16> to vector<18x32xbf16>
      %21 = vector.extract_strided_slice %12 {offsets = [0, 0], sizes = [16, 32], strides = [1, 1]} : vector<18x32xbf16> to vector<16x32xbf16>
      %22 = vector.extract_strided_slice %12 {offsets = [1, 0], sizes = [16, 32], strides = [1, 1]} : vector<18x32xbf16> to vector<16x32xbf16>
      %23 = vector.extract_strided_slice %12 {offsets = [2, 0], sizes = [16, 32], strides = [1, 1]} : vector<18x32xbf16> to vector<16x32xbf16>
      %24 = vector.extract_strided_slice %16 {offsets = [0, 0], sizes = [16, 32], strides = [1, 1]} : vector<18x32xbf16> to vector<16x32xbf16>
      %25 = vector.extract_strided_slice %16 {offsets = [1, 0], sizes = [16, 32], strides = [1, 1]} : vector<18x32xbf16> to vector<16x32xbf16>
      %26 = vector.extract_strided_slice %16 {offsets = [2, 0], sizes = [16, 32], strides = [1, 1]} : vector<18x32xbf16> to vector<16x32xbf16>
      %27 = vector.extract_strided_slice %20 {offsets = [0, 0], sizes = [16, 32], strides = [1, 1]} : vector<18x32xbf16> to vector<16x32xbf16>
      %28 = vector.extract_strided_slice %20 {offsets = [1, 0], sizes = [16, 32], strides = [1, 1]} : vector<18x32xbf16> to vector<16x32xbf16>
      %29 = vector.extract_strided_slice %20 {offsets = [2, 0], sizes = [16, 32], strides = [1, 1]} : vector<18x32xbf16> to vector<16x32xbf16>
      %cst_20 = arith.constant 0.000000e+00 : f32
      %30 = vector.broadcast %cst_20 : f32 to vector<1x16xf32>
      %cst_21 = arith.constant 0.000000e+00 : f32
      %31 = vector.broadcast %cst_21 : f32 to vector<1x16xf32>
      %cst_22 = arith.constant 0.000000e+00 : f32
      %32 = vector.broadcast %cst_22 : f32 to vector<16x16xf32>
      %c0_23 = arith.constant 0 : index
      %c0_24 = arith.constant 0 : index
      %c0_25 = arith.constant 0 : index
      %c0_26 = arith.constant 0 : index
      %33 = vector.load %arg2[%c0_23, %c0_24, %c0_25, %c0_26] : memref<4x4x32x16xbf16, #tpu.memory_space<vmem>>, vector<1x1x32x16xbf16>
      %34 = vector.shape_cast %33 : vector<1x1x32x16xbf16> to vector<32x16xbf16>
      %cst_27 = arith.constant dense<0.000000e+00> : vector<16x16xf32>
      %35 = tpu.matmul %21, %34, %cst_27 {dimension_numbers = #tpu.dot_dimension_numbers<[1], [0], [0], [1], [0, 0, 1, 1], [], []>} : vector<16x32xbf16>, vector<32x16xbf16>, vector<16x16xf32> -> vector<16x16xf32>
      %36 = arith.addf %32, %35 : vector<16x16xf32>
      %c0_28 = arith.constant 0 : index
      %c2 = arith.constant 2 : index
      %c0_29 = arith.constant 0 : index
      %c0_30 = arith.constant 0 : index
      %37 = vector.load %arg2[%c0_28, %c2, %c0_29, %c0_30] : memref<4x4x32x16xbf16, #tpu.memory_space<vmem>>, vector<1x1x32x16xbf16>
      %38 = vector.shape_cast %37 : vector<1x1x32x16xbf16> to vector<32x16xbf16>
      %cst_31 = arith.constant dense<0.000000e+00> : vector<16x16xf32>
      %39 = tpu.matmul %22, %38, %cst_31 {dimension_numbers = #tpu.dot_dimension_numbers<[1], [0], [0], [1], [0, 0, 1, 1], [], []>} : vector<16x32xbf16>, vector<32x16xbf16>, vector<16x16xf32> -> vector<16x16xf32>
      %40 = arith.addf %36, %39 : vector<16x16xf32>
      %c2_32 = arith.constant 2 : index
      %c0_33 = arith.constant 0 : index
      %c0_34 = arith.constant 0 : index
      %c0_35 = arith.constant 0 : index
      %41 = vector.load %arg2[%c2_32, %c0_33, %c0_34, %c0_35] : memref<4x4x32x16xbf16, #tpu.memory_space<vmem>>, vector<1x1x32x16xbf16>
      %42 = vector.shape_cast %41 : vector<1x1x32x16xbf16> to vector<32x16xbf16>
      %cst_36 = arith.constant dense<0.000000e+00> : vector<16x16xf32>
      %43 = tpu.matmul %24, %42, %cst_36 {dimension_numbers = #tpu.dot_dimension_numbers<[1], [0], [0], [1], [0, 0, 1, 1], [], []>} : vector<16x32xbf16>, vector<32x16xbf16>, vector<16x16xf32> -> vector<16x16xf32>
      %44 = arith.addf %40, %43 : vector<16x16xf32>
      %c2_37 = arith.constant 2 : index
      %c2_38 = arith.constant 2 : index
      %c0_39 = arith.constant 0 : index
      %c0_40 = arith.constant 0 : index
      %45 = vector.load %arg2[%c2_37, %c2_38, %c0_39, %c0_40] : memref<4x4x32x16xbf16, #tpu.memory_space<vmem>>, vector<1x1x32x16xbf16>
      %46 = vector.shape_cast %45 : vector<1x1x32x16xbf16> to vector<32x16xbf16>
      %cst_41 = arith.constant dense<0.000000e+00> : vector<16x16xf32>
      %47 = tpu.matmul %25, %46, %cst_41 {dimension_numbers = #tpu.dot_dimension_numbers<[1], [0], [0], [1], [0, 0, 1, 1], [], []>} : vector<16x32xbf16>, vector<32x16xbf16>, vector<16x16xf32> -> vector<16x16xf32>
      %48 = arith.addf %44, %47 : vector<16x16xf32>
      %c0_i32_42 = arith.constant 0 : i32
      %49 = arith.addi %c0_i32_42, %8 : i32
      %cst_43 = arith.constant dense<0.000000e+00> : vector<16xf32>
      %50 = vector.multi_reduction <add>, %48, %cst_43 [0] : vector<16x16xf32> to vector<16xf32>
      %51 = vector.shape_cast %50 : vector<16xf32> to vector<1x16xf32>
      %52 = arith.addf %30, %51 : vector<1x16xf32>
      %53 = arith.mulf %48, %48 : vector<16x16xf32>
      %cst_44 = arith.constant dense<0.000000e+00> : vector<16xf32>
      %54 = vector.multi_reduction <add>, %53, %cst_44 [0] : vector<16x16xf32> to vector<16xf32>
      %55 = vector.shape_cast %54 : vector<16xf32> to vector<1x16xf32>
      %56 = arith.addf %31, %55 : vector<1x16xf32>
      %57 = arith.truncf %48 : vector<16x16xf32> to vector<16x16xbf16>
      %c0_45 = arith.constant 0 : index
      %58 = arith.index_cast %49 : i32 to index
      %c0_46 = arith.constant 0 : index
      %c0_47 = arith.constant 0 : index
      %59 = vector.load %arg3[%c0_45, %58, %c0_46, %c0_47] : memref<1x64x16x16xbf16, #tpu.memory_space<vmem>>, vector<1x1x16x16xbf16>
      %60 = vector.shape_cast %59 : vector<1x1x16x16xbf16> to vector<16x16xbf16>
      %61 = vector.shape_cast %57 : vector<16x16xbf16> to vector<1x1x16x16xbf16>
      tpu.vector_store %arg3[%c0_45, %58, %c0_46, %c0_47], %61 {strides = array<i32>} : memref<1x64x16x16xbf16, #tpu.memory_space<vmem>>, vector<1x1x16x16xbf16>,
      %cst_48 = arith.constant 0.000000e+00 : f32
      %62 = vector.broadcast %cst_48 : f32 to vector<16x16xf32>
      %c0_49 = arith.constant 0 : index
      %c1 = arith.constant 1 : index
      %c0_50 = arith.constant 0 : index
      %c0_51 = arith.constant 0 : index
      %63 = vector.load %arg2[%c0_49, %c1, %c0_50, %c0_51] : memref<4x4x32x16xbf16, #tpu.memory_space<vmem>>, vector<1x1x32x16xbf16>
      %64 = vector.shape_cast %63 : vector<1x1x32x16xbf16> to vector<32x16xbf16>
      %cst_52 = arith.constant dense<0.000000e+00> : vector<16x16xf32>
      %65 = tpu.matmul %22, %64, %cst_52 {dimension_numbers = #tpu.dot_dimension_numbers<[1], [0], [0], [1], [0, 0, 1, 1], [], []>} : vector<16x32xbf16>, vector<32x16xbf16>, vector<16x16xf32> -> vector<16x16xf32>
      %66 = arith.addf %62, %65 : vector<16x16xf32>
      %c0_53 = arith.constant 0 : index
      %c3 = arith.constant 3 : index
      %c0_54 = arith.constant 0 : index
      %c0_55 = arith.constant 0 : index
      %67 = vector.load %arg2[%c0_53, %c3, %c0_54, %c0_55] : memref<4x4x32x16xbf16, #tpu.memory_space<vmem>>, vector<1x1x32x16xbf16>
      %68 = vector.shape_cast %67 : vector<1x1x32x16xbf16> to vector<32x16xbf16>
      %cst_56 = arith.constant dense<0.000000e+00> : vector<16x16xf32>
      %69 = tpu.matmul %23, %68, %cst_56 {dimension_numbers = #tpu.dot_dimension_numbers<[1], [0], [0], [1], [0, 0, 1, 1], [], []>} : vector<16x32xbf16>, vector<32x16xbf16>, vector<16x16xf32> -> vector<16x16xf32>
      %70 = arith.addf %66, %69 : vector<16x16xf32>
      %c2_57 = arith.constant 2 : index
      %c1_58 = arith.constant 1 : index
      %c0_59 = arith.constant 0 : index
      %c0_60 = arith.constant 0 : index
      %71 = vector.load %arg2[%c2_57, %c1_58, %c0_59, %c0_60] : memref<4x4x32x16xbf16, #tpu.memory_space<vmem>>, vector<1x1x32x16xbf16>
      %72 = vector.shape_cast %71 : vector<1x1x32x16xbf16> to vector<32x16xbf16>
      %cst_61 = arith.constant dense<0.000000e+00> : vector<16x16xf32>
      %73 = tpu.matmul %25, %72, %cst_61 {dimension_numbers = #tpu.dot_dimension_numbers<[1], [0], [0], [1], [0, 0, 1, 1], [], []>} : vector<16x32xbf16>, vector<32x16xbf16>, vector<16x16xf32> -> vector<16x16xf32>
      %74 = arith.addf %70, %73 : vector<16x16xf32>
      %c2_62 = arith.constant 2 : index
      %c3_63 = arith.constant 3 : index
      %c0_64 = arith.constant 0 : index
      %c0_65 = arith.constant 0 : index
      %75 = vector.load %arg2[%c2_62, %c3_63, %c0_64, %c0_65] : memref<4x4x32x16xbf16, #tpu.memory_space<vmem>>, vector<1x1x32x16xbf16>
      %76 = vector.shape_cast %75 : vector<1x1x32x16xbf16> to vector<32x16xbf16>
      %cst_66 = arith.constant dense<0.000000e+00> : vector<16x16xf32>
      %77 = tpu.matmul %26, %76, %cst_66 {dimension_numbers = #tpu.dot_dimension_numbers<[1], [0], [0], [1], [0, 0, 1, 1], [], []>} : vector<16x32xbf16>, vector<32x16xbf16>, vector<16x16xf32> -> vector<16x16xf32>
      %78 = arith.addf %74, %77 : vector<16x16xf32>
      %c16_i32_67 = arith.constant 16 : i32
      %79 = arith.addi %c16_i32_67, %8 : i32
      %cst_68 = arith.constant dense<0.000000e+00> : vector<16xf32>
      %80 = vector.multi_reduction <add>, %78, %cst_68 [0] : vector<16x16xf32> to vector<16xf32>
      %81 = vector.shape_cast %80 : vector<16xf32> to vector<1x16xf32>
      %82 = arith.addf %52, %81 : vector<1x16xf32>
      %83 = arith.mulf %78, %78 : vector<16x16xf32>
      %cst_69 = arith.constant dense<0.000000e+00> : vector<16xf32>
      %84 = vector.multi_reduction <add>, %83, %cst_69 [0] : vector<16x16xf32> to vector<16xf32>
      %85 = vector.shape_cast %84 : vector<16xf32> to vector<1x16xf32>
      %86 = arith.addf %56, %85 : vector<1x16xf32>
      %87 = arith.truncf %78 : vector<16x16xf32> to vector<16x16xbf16>
      %c0_70 = arith.constant 0 : index
      %88 = arith.index_cast %79 : i32 to index
      %c0_71 = arith.constant 0 : index
      %c0_72 = arith.constant 0 : index
      %89 = vector.load %arg3[%c0_70, %88, %c0_71, %c0_72] : memref<1x64x16x16xbf16, #tpu.memory_space<vmem>>, vector<1x1x16x16xbf16>
      %90 = vector.shape_cast %89 : vector<1x1x16x16xbf16> to vector<16x16xbf16>
      %91 = vector.shape_cast %87 : vector<16x16xbf16> to vector<1x1x16x16xbf16>
      tpu.vector_store %arg3[%c0_70, %88, %c0_71, %c0_72], %91 {strides = array<i32>} : memref<1x64x16x16xbf16, #tpu.memory_space<vmem>>, vector<1x1x16x16xbf16>,
      %cst_73 = arith.constant 0.000000e+00 : f32
      %92 = vector.broadcast %cst_73 : f32 to vector<16x16xf32>
      %c1_74 = arith.constant 1 : index
      %c0_75 = arith.constant 0 : index
      %c0_76 = arith.constant 0 : index
      %c0_77 = arith.constant 0 : index
      %93 = vector.load %arg2[%c1_74, %c0_75, %c0_76, %c0_77] : memref<4x4x32x16xbf16, #tpu.memory_space<vmem>>, vector<1x1x32x16xbf16>
      %94 = vector.shape_cast %93 : vector<1x1x32x16xbf16> to vector<32x16xbf16>
      %cst_78 = arith.constant dense<0.000000e+00> : vector<16x16xf32>
      %95 = tpu.matmul %24, %94, %cst_78 {dimension_numbers = #tpu.dot_dimension_numbers<[1], [0], [0], [1], [0, 0, 1, 1], [], []>} : vector<16x32xbf16>, vector<32x16xbf16>, vector<16x16xf32> -> vector<16x16xf32>
      %96 = arith.addf %92, %95 : vector<16x16xf32>
      %c1_79 = arith.constant 1 : index
      %c2_80 = arith.constant 2 : index
      %c0_81 = arith.constant 0 : index
      %c0_82 = arith.constant 0 : index
      %97 = vector.load %arg2[%c1_79, %c2_80, %c0_81, %c0_82] : memref<4x4x32x16xbf16, #tpu.memory_space<vmem>>, vector<1x1x32x16xbf16>
      %98 = vector.shape_cast %97 : vector<1x1x32x16xbf16> to vector<32x16xbf16>
      %cst_83 = arith.constant dense<0.000000e+00> : vector<16x16xf32>
      %99 = tpu.matmul %25, %98, %cst_83 {dimension_numbers = #tpu.dot_dimension_numbers<[1], [0], [0], [1], [0, 0, 1, 1], [], []>} : vector<16x32xbf16>, vector<32x16xbf16>, vector<16x16xf32> -> vector<16x16xf32>
      %100 = arith.addf %96, %99 : vector<16x16xf32>
      %c3_84 = arith.constant 3 : index
      %c0_85 = arith.constant 0 : index
      %c0_86 = arith.constant 0 : index
      %c0_87 = arith.constant 0 : index
      %101 = vector.load %arg2[%c3_84, %c0_85, %c0_86, %c0_87] : memref<4x4x32x16xbf16, #tpu.memory_space<vmem>>, vector<1x1x32x16xbf16>
      %102 = vector.shape_cast %101 : vector<1x1x32x16xbf16> to vector<32x16xbf16>
      %cst_88 = arith.constant dense<0.000000e+00> : vector<16x16xf32>
      %103 = tpu.matmul %27, %102, %cst_88 {dimension_numbers = #tpu.dot_dimension_numbers<[1], [0], [0], [1], [0, 0, 1, 1], [], []>} : vector<16x32xbf16>, vector<32x16xbf16>, vector<16x16xf32> -> vector<16x16xf32>
      %104 = arith.addf %100, %103 : vector<16x16xf32>
      %c3_89 = arith.constant 3 : index
      %c2_90 = arith.constant 2 : index
      %c0_91 = arith.constant 0 : index
      %c0_92 = arith.constant 0 : index
      %105 = vector.load %arg2[%c3_89, %c2_90, %c0_91, %c0_92] : memref<4x4x32x16xbf16, #tpu.memory_space<vmem>>, vector<1x1x32x16xbf16>
      %106 = vector.shape_cast %105 : vector<1x1x32x16xbf16> to vector<32x16xbf16>
      %cst_93 = arith.constant dense<0.000000e+00> : vector<16x16xf32>
      %107 = tpu.matmul %28, %106, %cst_93 {dimension_numbers = #tpu.dot_dimension_numbers<[1], [0], [0], [1], [0, 0, 1, 1], [], []>} : vector<16x32xbf16>, vector<32x16xbf16>, vector<16x16xf32> -> vector<16x16xf32>
      %108 = arith.addf %104, %107 : vector<16x16xf32>
      %c32_i32 = arith.constant 32 : i32
      %109 = arith.addi %c32_i32, %8 : i32
      %cst_94 = arith.constant dense<0.000000e+00> : vector<16xf32>
      %110 = vector.multi_reduction <add>, %108, %cst_94 [0] : vector<16x16xf32> to vector<16xf32>
      %111 = vector.shape_cast %110 : vector<16xf32> to vector<1x16xf32>
      %112 = arith.addf %82, %111 : vector<1x16xf32>
      %113 = arith.mulf %108, %108 : vector<16x16xf32>
      %cst_95 = arith.constant dense<0.000000e+00> : vector<16xf32>
      %114 = vector.multi_reduction <add>, %113, %cst_95 [0] : vector<16x16xf32> to vector<16xf32>
      %115 = vector.shape_cast %114 : vector<16xf32> to vector<1x16xf32>
      %116 = arith.addf %86, %115 : vector<1x16xf32>
      %117 = arith.truncf %108 : vector<16x16xf32> to vector<16x16xbf16>
      %c0_96 = arith.constant 0 : index
      %118 = arith.index_cast %109 : i32 to index
      %c0_97 = arith.constant 0 : index
      %c0_98 = arith.constant 0 : index
      %119 = vector.load %arg3[%c0_96, %118, %c0_97, %c0_98] : memref<1x64x16x16xbf16, #tpu.memory_space<vmem>>, vector<1x1x16x16xbf16>
      %120 = vector.shape_cast %119 : vector<1x1x16x16xbf16> to vector<16x16xbf16>
      %121 = vector.shape_cast %117 : vector<16x16xbf16> to vector<1x1x16x16xbf16>
      tpu.vector_store %arg3[%c0_96, %118, %c0_97, %c0_98], %121 {strides = array<i32>} : memref<1x64x16x16xbf16, #tpu.memory_space<vmem>>, vector<1x1x16x16xbf16>,
      %cst_99 = arith.constant 0.000000e+00 : f32
      %122 = vector.broadcast %cst_99 : f32 to vector<16x16xf32>
      %c1_100 = arith.constant 1 : index
      %c1_101 = arith.constant 1 : index
      %c0_102 = arith.constant 0 : index
      %c0_103 = arith.constant 0 : index
      %123 = vector.load %arg2[%c1_100, %c1_101, %c0_102, %c0_103] : memref<4x4x32x16xbf16, #tpu.memory_space<vmem>>, vector<1x1x32x16xbf16>
      %124 = vector.shape_cast %123 : vector<1x1x32x16xbf16> to vector<32x16xbf16>
      %cst_104 = arith.constant dense<0.000000e+00> : vector<16x16xf32>
      %125 = tpu.matmul %25, %124, %cst_104 {dimension_numbers = #tpu.dot_dimension_numbers<[1], [0], [0], [1], [0, 0, 1, 1], [], []>} : vector<16x32xbf16>, vector<32x16xbf16>, vector<16x16xf32> -> vector<16x16xf32>
      %126 = arith.addf %122, %125 : vector<16x16xf32>
      %c1_105 = arith.constant 1 : index
      %c3_106 = arith.constant 3 : index
      %c0_107 = arith.constant 0 : index
      %c0_108 = arith.constant 0 : index
      %127 = vector.load %arg2[%c1_105, %c3_106, %c0_107, %c0_108] : memref<4x4x32x16xbf16, #tpu.memory_space<vmem>>, vector<1x1x32x16xbf16>
      %128 = vector.shape_cast %127 : vector<1x1x32x16xbf16> to vector<32x16xbf16>
      %cst_109 = arith.constant dense<0.000000e+00> : vector<16x16xf32>
      %129 = tpu.matmul %26, %128, %cst_109 {dimension_numbers = #tpu.dot_dimension_numbers<[1], [0], [0], [1], [0, 0, 1, 1], [], []>} : vector<16x32xbf16>, vector<32x16xbf16>, vector<16x16xf32> -> vector<16x16xf32>
      %130 = arith.addf %126, %129 : vector<16x16xf32>
      %c3_110 = arith.constant 3 : index
      %c1_111 = arith.constant 1 : index
      %c0_112 = arith.constant 0 : index
      %c0_113 = arith.constant 0 : index
      %131 = vector.load %arg2[%c3_110, %c1_111, %c0_112, %c0_113] : memref<4x4x32x16xbf16, #tpu.memory_space<vmem>>, vector<1x1x32x16xbf16>
      %132 = vector.shape_cast %131 : vector<1x1x32x16xbf16> to vector<32x16xbf16>
      %cst_114 = arith.constant dense<0.000000e+00> : vector<16x16xf32>
      %133 = tpu.matmul %28, %132, %cst_114 {dimension_numbers = #tpu.dot_dimension_numbers<[1], [0], [0], [1], [0, 0, 1, 1], [], []>} : vector<16x32xbf16>, vector<32x16xbf16>, vector<16x16xf32> -> vector<16x16xf32>
      %134 = arith.addf %130, %133 : vector<16x16xf32>
      %c3_115 = arith.constant 3 : index
      %c3_116 = arith.constant 3 : index
      %c0_117 = arith.constant 0 : index
      %c0_118 = arith.constant 0 : index
      %135 = vector.load %arg2[%c3_115, %c3_116, %c0_117, %c0_118] : memref<4x4x32x16xbf16, #tpu.memory_space<vmem>>, vector<1x1x32x16xbf16>
      %136 = vector.shape_cast %135 : vector<1x1x32x16xbf16> to vector<32x16xbf16>
      %cst_119 = arith.constant dense<0.000000e+00> : vector<16x16xf32>
      %137 = tpu.matmul %29, %136, %cst_119 {dimension_numbers = #tpu.dot_dimension_numbers<[1], [0], [0], [1], [0, 0, 1, 1], [], []>} : vector<16x32xbf16>, vector<32x16xbf16>, vector<16x16xf32> -> vector<16x16xf32>
      %138 = arith.addf %134, %137 : vector<16x16xf32>
      %c48_i32 = arith.constant 48 : i32
      %139 = arith.addi %c48_i32, %8 : i32
      %cst_120 = arith.constant dense<0.000000e+00> : vector<16xf32>
      %140 = vector.multi_reduction <add>, %138, %cst_120 [0] : vector<16x16xf32> to vector<16xf32>
      %141 = vector.shape_cast %140 : vector<16xf32> to vector<1x16xf32>
      %142 = arith.addf %112, %141 : vector<1x16xf32>
      %143 = arith.mulf %138, %138 : vector<16x16xf32>
      %cst_121 = arith.constant dense<0.000000e+00> : vector<16xf32>
      %144 = vector.multi_reduction <add>, %143, %cst_121 [0] : vector<16x16xf32> to vector<16xf32>
      %145 = vector.shape_cast %144 : vector<16xf32> to vector<1x16xf32>
      %146 = arith.addf %116, %145 : vector<1x16xf32>
      %147 = arith.truncf %138 : vector<16x16xf32> to vector<16x16xbf16>
      %c0_122 = arith.constant 0 : index
      %148 = arith.index_cast %139 : i32 to index
      %c0_123 = arith.constant 0 : index
      %c0_124 = arith.constant 0 : index
      %149 = vector.load %arg3[%c0_122, %148, %c0_123, %c0_124] : memref<1x64x16x16xbf16, #tpu.memory_space<vmem>>, vector<1x1x16x16xbf16>
      %150 = vector.shape_cast %149 : vector<1x1x16x16xbf16> to vector<16x16xbf16>
      %151 = vector.shape_cast %147 : vector<16x16xbf16> to vector<1x1x16x16xbf16>
      tpu.vector_store %arg3[%c0_122, %148, %c0_123, %c0_124], %151 {strides = array<i32>} : memref<1x64x16x16xbf16, #tpu.memory_space<vmem>>, vector<1x1x16x16xbf16>,
      %c0_125 = arith.constant 0 : index
      %c0_126 = arith.constant 0 : index
      %152 = vector.load %arg5[%c0_125, %c0_126] : memref<2x16xf32, #tpu.memory_space<vmem>>, vector<1x16xf32>
      %153 = arith.addf %152, %142 : vector<1x16xf32>
      %c0_127 = arith.constant 0 : index
      %c0_128 = arith.constant 0 : index
      %154 = vector.load %arg5[%c0_127, %c0_128] : memref<2x16xf32, #tpu.memory_space<vmem>>, vector<1x16xf32>
      tpu.vector_store %arg5[%c0_127, %c0_128], %153 {strides = array<i32>} : memref<2x16xf32, #tpu.memory_space<vmem>>, vector<1x16xf32>,
      %c1_129 = arith.constant 1 : index
      %c0_130 = arith.constant 0 : index
      %155 = vector.load %arg5[%c1_129, %c0_130] : memref<2x16xf32, #tpu.memory_space<vmem>>, vector<1x16xf32>
      %156 = arith.addf %155, %146 : vector<1x16xf32>
      %c1_131 = arith.constant 1 : index
      %c0_132 = arith.constant 0 : index
      %157 = vector.load %arg5[%c1_131, %c0_132] : memref<2x16xf32, #tpu.memory_space<vmem>>, vector<1x16xf32>
      tpu.vector_store %arg5[%c1_131, %c0_132], %156 {strides = array<i32>} : memref<2x16xf32, #tpu.memory_space<vmem>>, vector<1x16xf32>,
    }
    %c16_i32_1 = arith.constant 16 : i32
    %c0_2 = arith.constant 0 : index
    %c0_3 = arith.constant 0 : index
    %3 = vector.load %arg5[%c0_2, %c0_3] : memref<2x16xf32, #tpu.memory_space<vmem>>, vector<2x16xf32>
    %c0_4 = arith.constant 0 : index
    %c0_5 = arith.constant 0 : index
    %c0_6 = arith.constant 0 : index
    %4 = vector.load %arg4[%c0_4, %c0_5, %c0_6] : memref<1x2x16xf32, #tpu.memory_space<vmem>>, vector<1x2x16xf32>
    %5 = vector.shape_cast %4 : vector<1x2x16xf32> to vector<2x16xf32>
    %6 = vector.shape_cast %3 : vector<2x16xf32> to vector<1x2x16xf32>
    tpu.vector_store %arg4[%c0_4, %c0_5, %c0_6], %6 {strides = array<i32>} : memref<1x2x16xf32, #tpu.memory_space<vmem>>, vector<1x2x16xf32>,
    return
  }
  func.func @transform_0(%arg0: i32) -> (i32, i32, i32, i32) {
    %c0_i32 = arith.constant 0 : i32
    %c0_i32_0 = arith.constant 0 : i32
    %c0_i32_1 = arith.constant 0 : i32
    %c0_i32_2 = arith.constant 0 : i32
    return %arg0, %c0_i32, %c0_i32_0, %c0_i32_1 : i32, i32, i32, i32
  }
  func.func @transform_1(%arg0: i32) -> (i32, i32, i32, i32) {
    %c0_i32 = arith.constant 0 : i32
    %c0_i32_0 = arith.constant 0 : i32
    %c0_i32_1 = arith.constant 0 : i32
    %c0_i32_2 = arith.constant 0 : i32
    %c0_i32_3 = arith.constant 0 : i32
    return %c0_i32, %c0_i32_0, %c0_i32_1, %c0_i32_2 : i32, i32, i32, i32
  }
  func.func @transform_2(%arg0: i32) -> (i32, i32, i32, i32) {
    %c0_i32 = arith.constant 0 : i32
    %c0_i32_0 = arith.constant 0 : i32
    %c0_i32_1 = arith.constant 0 : i32
    %c0_i32_2 = arith.constant 0 : i32
    return %arg0, %c0_i32, %c0_i32_0, %c0_i32_1 : i32, i32, i32, i32
  }
  func.func @transform_3(%arg0: i32) -> (i32, i32, i32) {
    %c0_i32 = arith.constant 0 : i32
    %c0_i32_0 = arith.constant 0 : i32
    %c0_i32_1 = arith.constant 0 : i32
    return %arg0, %c0_i32, %c0_i32_0 : i32, i32, i32
  }
}

module attributes {stable_mosaic.version = 11 : i64} {
  func.func @_bn_act_kernel(%arg0: i32, %arg1: i32, %arg2: memref<1x128x16xbf16, #tpu.memory_space<vmem>>, %arg3: memref<1x1x16xf32, #tpu.memory_space<vmem>>, %arg4: memref<1x1x16xf32, #tpu.memory_space<vmem>>, %arg5: memref<1x128x16xbf16, #tpu.memory_space<vmem>>) attributes {dimension_semantics = [#tpu.dimension_semantics<parallel>, #tpu.dimension_semantics<parallel>], iteration_bounds = array<i64: 2, 8>, scalar_prefetch = 0 : i64, scratch_operands = 0 : i64, tpu.core_type = #tpu.core_type<tc>, window_params = [{transform_indices = @transform_0, window_bounds = array<i64: 1, 128, 16>}, {pipeline_mode = #tpu.pipeline_mode<synchronous>, transform_indices = @transform_1, window_bounds = array<i64: 1, 1, 16>}, {pipeline_mode = #tpu.pipeline_mode<synchronous>, transform_indices = @transform_2, window_bounds = array<i64: 1, 1, 16>}, {transform_indices = @transform_3, window_bounds = array<i64: 1, 128, 16>}]} {
    %c0 = arith.constant 0 : index
    %c0_0 = arith.constant 0 : index
    %c0_1 = arith.constant 0 : index
    %0 = vector.load %arg2[%c0, %c0_0, %c0_1] : memref<1x128x16xbf16, #tpu.memory_space<vmem>>, vector<1x128x16xbf16>
    %1 = arith.extf %0 : vector<1x128x16xbf16> to vector<1x128x16xf32>
    %c0_2 = arith.constant 0 : index
    %c0_3 = arith.constant 0 : index
    %c0_4 = arith.constant 0 : index
    %2 = vector.load %arg3[%c0_2, %c0_3, %c0_4] : memref<1x1x16xf32, #tpu.memory_space<vmem>>, vector<1x1x16xf32>
    %3 = vector.broadcast %2 : vector<1x1x16xf32> to vector<1x128x16xf32>
    %4 = arith.mulf %1, %3 : vector<1x128x16xf32>
    %c0_5 = arith.constant 0 : index
    %c0_6 = arith.constant 0 : index
    %c0_7 = arith.constant 0 : index
    %5 = vector.load %arg4[%c0_5, %c0_6, %c0_7] : memref<1x1x16xf32, #tpu.memory_space<vmem>>, vector<1x1x16xf32>
    %6 = vector.broadcast %5 : vector<1x1x16xf32> to vector<1x128x16xf32>
    %7 = arith.addf %4, %6 : vector<1x128x16xf32>
    %cst = arith.constant 0.000000e+00 : f32
    %8 = vector.broadcast %cst : f32 to vector<1x128x16xf32>
    %9 = arith.maximumf %7, %8 : vector<1x128x16xf32>
    %10 = arith.truncf %9 : vector<1x128x16xf32> to vector<1x128x16xbf16>
    %c0_8 = arith.constant 0 : index
    %c0_9 = arith.constant 0 : index
    %c0_10 = arith.constant 0 : index
    %11 = vector.load %arg5[%c0_8, %c0_9, %c0_10] : memref<1x128x16xbf16, #tpu.memory_space<vmem>>, vector<1x128x16xbf16>
    tpu.vector_store %arg5[%c0_8, %c0_9, %c0_10], %10 {strides = array<i32>} : memref<1x128x16xbf16, #tpu.memory_space<vmem>>, vector<1x128x16xbf16>,
    return
  }
  func.func @transform_0(%arg0: i32, %arg1: i32) -> (i32, i32, i32) {
    %c0_i32 = arith.constant 0 : i32
    %c0_i32_0 = arith.constant 0 : i32
    return %arg0, %arg1, %c0_i32 : i32, i32, i32
  }
  func.func @transform_1(%arg0: i32, %arg1: i32) -> (i32, i32, i32) {
    %c0_i32 = arith.constant 0 : i32
    %c0_i32_0 = arith.constant 0 : i32
    %c0_i32_1 = arith.constant 0 : i32
    %c0_i32_2 = arith.constant 0 : i32
    return %c0_i32, %c0_i32_0, %c0_i32_1 : i32, i32, i32
  }
  func.func @transform_2(%arg0: i32, %arg1: i32) -> (i32, i32, i32) {
    %c0_i32 = arith.constant 0 : i32
    %c0_i32_0 = arith.constant 0 : i32
    %c0_i32_1 = arith.constant 0 : i32
    %c0_i32_2 = arith.constant 0 : i32
    return %c0_i32, %c0_i32_0, %c0_i32_1 : i32, i32, i32
  }
  func.func @transform_3(%arg0: i32, %arg1: i32) -> (i32, i32, i32) {
    %c0_i32 = arith.constant 0 : i32
    %c0_i32_0 = arith.constant 0 : i32
    return %arg0, %arg1, %c0_i32 : i32, i32, i32
  }
}

module attributes {stable_mosaic.version = 11 : i64} {
  func.func @kernel(%arg0: i32, %arg1: memref<1x34x34x16xbf16, #tpu.memory_space<vmem>>, %arg2: memref<4x4x16x3xbf16, #tpu.memory_space<vmem>>, %arg3: memref<1x128x32x3xf32, #tpu.memory_space<vmem>>) attributes {dimension_semantics = [#tpu.dimension_semantics<parallel>], iteration_bounds = array<i64: 2>, scalar_prefetch = 0 : i64, scratch_operands = 0 : i64, tpu.core_type = #tpu.core_type<tc>, window_params = [{transform_indices = @transform_0, window_bounds = array<i64: 1, 34, 34, 16>}, {pipeline_mode = #tpu.pipeline_mode<synchronous>, transform_indices = @transform_1, window_bounds = array<i64: 4, 4, 16, 3>}, {transform_indices = @transform_2, window_bounds = array<i64: 1, 128, 32, 3>}]} {
    %c0_i32 = arith.constant 0 : i32
    %c32_i32 = arith.constant 32 : i32
    %0 = arith.addi %c0_i32, %c32_i32 : i32
    %c1_i32 = arith.constant 1 : i32
    scf.for %arg4 = %c0_i32 to %0 step %c1_i32  : i32 {
      %c1_i32_1 = arith.constant 1 : i32
      %1 = arith.muli %arg4, %c1_i32_1 : i32
      %c0_i32_2 = arith.constant 0 : i32
      %2 = arith.addi %c0_i32_2, %1 : i32
      %c0_i32_3 = arith.constant 0 : i32
      %3 = arith.addi %2, %c0_i32_3 : i32
      %c0 = arith.constant 0 : index
      %4 = arith.index_cast %3 : i32 to index
      %c0_4 = arith.constant 0 : index
      %c0_5 = arith.constant 0 : index
      %5 = vector.load %arg1[%c0, %4, %c0_4, %c0_5] : memref<1x34x34x16xbf16, #tpu.memory_space<vmem>>, vector<1x1x34x16xbf16>
      %6 = vector.shape_cast %5 : vector<1x1x34x16xbf16> to vector<34x16xbf16>
      %c1_i32_6 = arith.constant 1 : i32
      %7 = arith.addi %2, %c1_i32_6 : i32
      %c0_7 = arith.constant 0 : index
      %8 = arith.index_cast %7 : i32 to index
      %c0_8 = arith.constant 0 : index
      %c0_9 = arith.constant 0 : index
      %9 = vector.load %arg1[%c0_7, %8, %c0_8, %c0_9] : memref<1x34x34x16xbf16, #tpu.memory_space<vmem>>, vector<1x1x34x16xbf16>
      %10 = vector.shape_cast %9 : vector<1x1x34x16xbf16> to vector<34x16xbf16>
      %c2_i32 = arith.constant 2 : i32
      %11 = arith.addi %2, %c2_i32 : i32
      %c0_10 = arith.constant 0 : index
      %12 = arith.index_cast %11 : i32 to index
      %c0_11 = arith.constant 0 : index
      %c0_12 = arith.constant 0 : index
      %13 = vector.load %arg1[%c0_10, %12, %c0_11, %c0_12] : memref<1x34x34x16xbf16, #tpu.memory_space<vmem>>, vector<1x1x34x16xbf16>
      %14 = vector.shape_cast %13 : vector<1x1x34x16xbf16> to vector<34x16xbf16>
      %15 = vector.extract_strided_slice %6 {offsets = [0, 0], sizes = [32, 16], strides = [1, 1]} : vector<34x16xbf16> to vector<32x16xbf16>
      %16 = vector.extract_strided_slice %6 {offsets = [1, 0], sizes = [32, 16], strides = [1, 1]} : vector<34x16xbf16> to vector<32x16xbf16>
      %17 = vector.extract_strided_slice %6 {offsets = [2, 0], sizes = [32, 16], strides = [1, 1]} : vector<34x16xbf16> to vector<32x16xbf16>
      %18 = vector.extract_strided_slice %10 {offsets = [0, 0], sizes = [32, 16], strides = [1, 1]} : vector<34x16xbf16> to vector<32x16xbf16>
      %19 = vector.extract_strided_slice %10 {offsets = [1, 0], sizes = [32, 16], strides = [1, 1]} : vector<34x16xbf16> to vector<32x16xbf16>
      %20 = vector.extract_strided_slice %10 {offsets = [2, 0], sizes = [32, 16], strides = [1, 1]} : vector<34x16xbf16> to vector<32x16xbf16>
      %21 = vector.extract_strided_slice %14 {offsets = [0, 0], sizes = [32, 16], strides = [1, 1]} : vector<34x16xbf16> to vector<32x16xbf16>
      %22 = vector.extract_strided_slice %14 {offsets = [1, 0], sizes = [32, 16], strides = [1, 1]} : vector<34x16xbf16> to vector<32x16xbf16>
      %23 = vector.extract_strided_slice %14 {offsets = [2, 0], sizes = [32, 16], strides = [1, 1]} : vector<34x16xbf16> to vector<32x16xbf16>
      %cst = arith.constant 0.000000e+00 : f32
      %24 = vector.broadcast %cst : f32 to vector<32x3xf32>
      %c0_13 = arith.constant 0 : index
      %c0_14 = arith.constant 0 : index
      %c0_15 = arith.constant 0 : index
      %c0_16 = arith.constant 0 : index
      %25 = vector.load %arg2[%c0_13, %c0_14, %c0_15, %c0_16] : memref<4x4x16x3xbf16, #tpu.memory_space<vmem>>, vector<1x1x16x3xbf16>
      %26 = vector.shape_cast %25 : vector<1x1x16x3xbf16> to vector<16x3xbf16>
      %cst_17 = arith.constant dense<0.000000e+00> : vector<32x3xf32>
      %27 = tpu.matmul %15, %26, %cst_17 {dimension_numbers = #tpu.dot_dimension_numbers<[1], [0], [0], [1], [0, 0, 1, 1], [], []>} : vector<32x16xbf16>, vector<16x3xbf16>, vector<32x3xf32> -> vector<32x3xf32>
      %28 = arith.addf %24, %27 : vector<32x3xf32>
      %c0_18 = arith.constant 0 : index
      %c2 = arith.constant 2 : index
      %c0_19 = arith.constant 0 : index
      %c0_20 = arith.constant 0 : index
      %29 = vector.load %arg2[%c0_18, %c2, %c0_19, %c0_20] : memref<4x4x16x3xbf16, #tpu.memory_space<vmem>>, vector<1x1x16x3xbf16>
      %30 = vector.shape_cast %29 : vector<1x1x16x3xbf16> to vector<16x3xbf16>
      %cst_21 = arith.constant dense<0.000000e+00> : vector<32x3xf32>
      %31 = tpu.matmul %16, %30, %cst_21 {dimension_numbers = #tpu.dot_dimension_numbers<[1], [0], [0], [1], [0, 0, 1, 1], [], []>} : vector<32x16xbf16>, vector<16x3xbf16>, vector<32x3xf32> -> vector<32x3xf32>
      %32 = arith.addf %28, %31 : vector<32x3xf32>
      %c2_22 = arith.constant 2 : index
      %c0_23 = arith.constant 0 : index
      %c0_24 = arith.constant 0 : index
      %c0_25 = arith.constant 0 : index
      %33 = vector.load %arg2[%c2_22, %c0_23, %c0_24, %c0_25] : memref<4x4x16x3xbf16, #tpu.memory_space<vmem>>, vector<1x1x16x3xbf16>
      %34 = vector.shape_cast %33 : vector<1x1x16x3xbf16> to vector<16x3xbf16>
      %cst_26 = arith.constant dense<0.000000e+00> : vector<32x3xf32>
      %35 = tpu.matmul %18, %34, %cst_26 {dimension_numbers = #tpu.dot_dimension_numbers<[1], [0], [0], [1], [0, 0, 1, 1], [], []>} : vector<32x16xbf16>, vector<16x3xbf16>, vector<32x3xf32> -> vector<32x3xf32>
      %36 = arith.addf %32, %35 : vector<32x3xf32>
      %c2_27 = arith.constant 2 : index
      %c2_28 = arith.constant 2 : index
      %c0_29 = arith.constant 0 : index
      %c0_30 = arith.constant 0 : index
      %37 = vector.load %arg2[%c2_27, %c2_28, %c0_29, %c0_30] : memref<4x4x16x3xbf16, #tpu.memory_space<vmem>>, vector<1x1x16x3xbf16>
      %38 = vector.shape_cast %37 : vector<1x1x16x3xbf16> to vector<16x3xbf16>
      %cst_31 = arith.constant dense<0.000000e+00> : vector<32x3xf32>
      %39 = tpu.matmul %19, %38, %cst_31 {dimension_numbers = #tpu.dot_dimension_numbers<[1], [0], [0], [1], [0, 0, 1, 1], [], []>} : vector<32x16xbf16>, vector<16x3xbf16>, vector<32x3xf32> -> vector<32x3xf32>
      %40 = arith.addf %36, %39 : vector<32x3xf32>
      %c0_i32_32 = arith.constant 0 : i32
      %41 = arith.addi %c0_i32_32, %2 : i32
      %42 = math.tanh %40 : vector<32x3xf32>
      %c0_33 = arith.constant 0 : index
      %43 = arith.index_cast %41 : i32 to index
      %c0_34 = arith.constant 0 : index
      %c0_35 = arith.constant 0 : index
      %44 = vector.load %arg3[%c0_33, %43, %c0_34, %c0_35] : memref<1x128x32x3xf32, #tpu.memory_space<vmem>>, vector<1x1x32x3xf32>
      %45 = vector.shape_cast %44 : vector<1x1x32x3xf32> to vector<32x3xf32>
      %46 = vector.shape_cast %42 : vector<32x3xf32> to vector<1x1x32x3xf32>
      tpu.vector_store %arg3[%c0_33, %43, %c0_34, %c0_35], %46 {strides = array<i32>} : memref<1x128x32x3xf32, #tpu.memory_space<vmem>>, vector<1x1x32x3xf32>,
      %cst_36 = arith.constant 0.000000e+00 : f32
      %47 = vector.broadcast %cst_36 : f32 to vector<32x3xf32>
      %c0_37 = arith.constant 0 : index
      %c1 = arith.constant 1 : index
      %c0_38 = arith.constant 0 : index
      %c0_39 = arith.constant 0 : index
      %48 = vector.load %arg2[%c0_37, %c1, %c0_38, %c0_39] : memref<4x4x16x3xbf16, #tpu.memory_space<vmem>>, vector<1x1x16x3xbf16>
      %49 = vector.shape_cast %48 : vector<1x1x16x3xbf16> to vector<16x3xbf16>
      %cst_40 = arith.constant dense<0.000000e+00> : vector<32x3xf32>
      %50 = tpu.matmul %16, %49, %cst_40 {dimension_numbers = #tpu.dot_dimension_numbers<[1], [0], [0], [1], [0, 0, 1, 1], [], []>} : vector<32x16xbf16>, vector<16x3xbf16>, vector<32x3xf32> -> vector<32x3xf32>
      %51 = arith.addf %47, %50 : vector<32x3xf32>
      %c0_41 = arith.constant 0 : index
      %c3 = arith.constant 3 : index
      %c0_42 = arith.constant 0 : index
      %c0_43 = arith.constant 0 : index
      %52 = vector.load %arg2[%c0_41, %c3, %c0_42, %c0_43] : memref<4x4x16x3xbf16, #tpu.memory_space<vmem>>, vector<1x1x16x3xbf16>
      %53 = vector.shape_cast %52 : vector<1x1x16x3xbf16> to vector<16x3xbf16>
      %cst_44 = arith.constant dense<0.000000e+00> : vector<32x3xf32>
      %54 = tpu.matmul %17, %53, %cst_44 {dimension_numbers = #tpu.dot_dimension_numbers<[1], [0], [0], [1], [0, 0, 1, 1], [], []>} : vector<32x16xbf16>, vector<16x3xbf16>, vector<32x3xf32> -> vector<32x3xf32>
      %55 = arith.addf %51, %54 : vector<32x3xf32>
      %c2_45 = arith.constant 2 : index
      %c1_46 = arith.constant 1 : index
      %c0_47 = arith.constant 0 : index
      %c0_48 = arith.constant 0 : index
      %56 = vector.load %arg2[%c2_45, %c1_46, %c0_47, %c0_48] : memref<4x4x16x3xbf16, #tpu.memory_space<vmem>>, vector<1x1x16x3xbf16>
      %57 = vector.shape_cast %56 : vector<1x1x16x3xbf16> to vector<16x3xbf16>
      %cst_49 = arith.constant dense<0.000000e+00> : vector<32x3xf32>
      %58 = tpu.matmul %19, %57, %cst_49 {dimension_numbers = #tpu.dot_dimension_numbers<[1], [0], [0], [1], [0, 0, 1, 1], [], []>} : vector<32x16xbf16>, vector<16x3xbf16>, vector<32x3xf32> -> vector<32x3xf32>
      %59 = arith.addf %55, %58 : vector<32x3xf32>
      %c2_50 = arith.constant 2 : index
      %c3_51 = arith.constant 3 : index
      %c0_52 = arith.constant 0 : index
      %c0_53 = arith.constant 0 : index
      %60 = vector.load %arg2[%c2_50, %c3_51, %c0_52, %c0_53] : memref<4x4x16x3xbf16, #tpu.memory_space<vmem>>, vector<1x1x16x3xbf16>
      %61 = vector.shape_cast %60 : vector<1x1x16x3xbf16> to vector<16x3xbf16>
      %cst_54 = arith.constant dense<0.000000e+00> : vector<32x3xf32>
      %62 = tpu.matmul %20, %61, %cst_54 {dimension_numbers = #tpu.dot_dimension_numbers<[1], [0], [0], [1], [0, 0, 1, 1], [], []>} : vector<32x16xbf16>, vector<16x3xbf16>, vector<32x3xf32> -> vector<32x3xf32>
      %63 = arith.addf %59, %62 : vector<32x3xf32>
      %c32_i32_55 = arith.constant 32 : i32
      %64 = arith.addi %c32_i32_55, %2 : i32
      %65 = math.tanh %63 : vector<32x3xf32>
      %c0_56 = arith.constant 0 : index
      %66 = arith.index_cast %64 : i32 to index
      %c0_57 = arith.constant 0 : index
      %c0_58 = arith.constant 0 : index
      %67 = vector.load %arg3[%c0_56, %66, %c0_57, %c0_58] : memref<1x128x32x3xf32, #tpu.memory_space<vmem>>, vector<1x1x32x3xf32>
      %68 = vector.shape_cast %67 : vector<1x1x32x3xf32> to vector<32x3xf32>
      %69 = vector.shape_cast %65 : vector<32x3xf32> to vector<1x1x32x3xf32>
      tpu.vector_store %arg3[%c0_56, %66, %c0_57, %c0_58], %69 {strides = array<i32>} : memref<1x128x32x3xf32, #tpu.memory_space<vmem>>, vector<1x1x32x3xf32>,
      %cst_59 = arith.constant 0.000000e+00 : f32
      %70 = vector.broadcast %cst_59 : f32 to vector<32x3xf32>
      %c1_60 = arith.constant 1 : index
      %c0_61 = arith.constant 0 : index
      %c0_62 = arith.constant 0 : index
      %c0_63 = arith.constant 0 : index
      %71 = vector.load %arg2[%c1_60, %c0_61, %c0_62, %c0_63] : memref<4x4x16x3xbf16, #tpu.memory_space<vmem>>, vector<1x1x16x3xbf16>
      %72 = vector.shape_cast %71 : vector<1x1x16x3xbf16> to vector<16x3xbf16>
      %cst_64 = arith.constant dense<0.000000e+00> : vector<32x3xf32>
      %73 = tpu.matmul %18, %72, %cst_64 {dimension_numbers = #tpu.dot_dimension_numbers<[1], [0], [0], [1], [0, 0, 1, 1], [], []>} : vector<32x16xbf16>, vector<16x3xbf16>, vector<32x3xf32> -> vector<32x3xf32>
      %74 = arith.addf %70, %73 : vector<32x3xf32>
      %c1_65 = arith.constant 1 : index
      %c2_66 = arith.constant 2 : index
      %c0_67 = arith.constant 0 : index
      %c0_68 = arith.constant 0 : index
      %75 = vector.load %arg2[%c1_65, %c2_66, %c0_67, %c0_68] : memref<4x4x16x3xbf16, #tpu.memory_space<vmem>>, vector<1x1x16x3xbf16>
      %76 = vector.shape_cast %75 : vector<1x1x16x3xbf16> to vector<16x3xbf16>
      %cst_69 = arith.constant dense<0.000000e+00> : vector<32x3xf32>
      %77 = tpu.matmul %19, %76, %cst_69 {dimension_numbers = #tpu.dot_dimension_numbers<[1], [0], [0], [1], [0, 0, 1, 1], [], []>} : vector<32x16xbf16>, vector<16x3xbf16>, vector<32x3xf32> -> vector<32x3xf32>
      %78 = arith.addf %74, %77 : vector<32x3xf32>
      %c3_70 = arith.constant 3 : index
      %c0_71 = arith.constant 0 : index
      %c0_72 = arith.constant 0 : index
      %c0_73 = arith.constant 0 : index
      %79 = vector.load %arg2[%c3_70, %c0_71, %c0_72, %c0_73] : memref<4x4x16x3xbf16, #tpu.memory_space<vmem>>, vector<1x1x16x3xbf16>
      %80 = vector.shape_cast %79 : vector<1x1x16x3xbf16> to vector<16x3xbf16>
      %cst_74 = arith.constant dense<0.000000e+00> : vector<32x3xf32>
      %81 = tpu.matmul %21, %80, %cst_74 {dimension_numbers = #tpu.dot_dimension_numbers<[1], [0], [0], [1], [0, 0, 1, 1], [], []>} : vector<32x16xbf16>, vector<16x3xbf16>, vector<32x3xf32> -> vector<32x3xf32>
      %82 = arith.addf %78, %81 : vector<32x3xf32>
      %c3_75 = arith.constant 3 : index
      %c2_76 = arith.constant 2 : index
      %c0_77 = arith.constant 0 : index
      %c0_78 = arith.constant 0 : index
      %83 = vector.load %arg2[%c3_75, %c2_76, %c0_77, %c0_78] : memref<4x4x16x3xbf16, #tpu.memory_space<vmem>>, vector<1x1x16x3xbf16>
      %84 = vector.shape_cast %83 : vector<1x1x16x3xbf16> to vector<16x3xbf16>
      %cst_79 = arith.constant dense<0.000000e+00> : vector<32x3xf32>
      %85 = tpu.matmul %22, %84, %cst_79 {dimension_numbers = #tpu.dot_dimension_numbers<[1], [0], [0], [1], [0, 0, 1, 1], [], []>} : vector<32x16xbf16>, vector<16x3xbf16>, vector<32x3xf32> -> vector<32x3xf32>
      %86 = arith.addf %82, %85 : vector<32x3xf32>
      %c64_i32 = arith.constant 64 : i32
      %87 = arith.addi %c64_i32, %2 : i32
      %88 = math.tanh %86 : vector<32x3xf32>
      %c0_80 = arith.constant 0 : index
      %89 = arith.index_cast %87 : i32 to index
      %c0_81 = arith.constant 0 : index
      %c0_82 = arith.constant 0 : index
      %90 = vector.load %arg3[%c0_80, %89, %c0_81, %c0_82] : memref<1x128x32x3xf32, #tpu.memory_space<vmem>>, vector<1x1x32x3xf32>
      %91 = vector.shape_cast %90 : vector<1x1x32x3xf32> to vector<32x3xf32>
      %92 = vector.shape_cast %88 : vector<32x3xf32> to vector<1x1x32x3xf32>
      tpu.vector_store %arg3[%c0_80, %89, %c0_81, %c0_82], %92 {strides = array<i32>} : memref<1x128x32x3xf32, #tpu.memory_space<vmem>>, vector<1x1x32x3xf32>,
      %cst_83 = arith.constant 0.000000e+00 : f32
      %93 = vector.broadcast %cst_83 : f32 to vector<32x3xf32>
      %c1_84 = arith.constant 1 : index
      %c1_85 = arith.constant 1 : index
      %c0_86 = arith.constant 0 : index
      %c0_87 = arith.constant 0 : index
      %94 = vector.load %arg2[%c1_84, %c1_85, %c0_86, %c0_87] : memref<4x4x16x3xbf16, #tpu.memory_space<vmem>>, vector<1x1x16x3xbf16>
      %95 = vector.shape_cast %94 : vector<1x1x16x3xbf16> to vector<16x3xbf16>
      %cst_88 = arith.constant dense<0.000000e+00> : vector<32x3xf32>
      %96 = tpu.matmul %19, %95, %cst_88 {dimension_numbers = #tpu.dot_dimension_numbers<[1], [0], [0], [1], [0, 0, 1, 1], [], []>} : vector<32x16xbf16>, vector<16x3xbf16>, vector<32x3xf32> -> vector<32x3xf32>
      %97 = arith.addf %93, %96 : vector<32x3xf32>
      %c1_89 = arith.constant 1 : index
      %c3_90 = arith.constant 3 : index
      %c0_91 = arith.constant 0 : index
      %c0_92 = arith.constant 0 : index
      %98 = vector.load %arg2[%c1_89, %c3_90, %c0_91, %c0_92] : memref<4x4x16x3xbf16, #tpu.memory_space<vmem>>, vector<1x1x16x3xbf16>
      %99 = vector.shape_cast %98 : vector<1x1x16x3xbf16> to vector<16x3xbf16>
      %cst_93 = arith.constant dense<0.000000e+00> : vector<32x3xf32>
      %100 = tpu.matmul %20, %99, %cst_93 {dimension_numbers = #tpu.dot_dimension_numbers<[1], [0], [0], [1], [0, 0, 1, 1], [], []>} : vector<32x16xbf16>, vector<16x3xbf16>, vector<32x3xf32> -> vector<32x3xf32>
      %101 = arith.addf %97, %100 : vector<32x3xf32>
      %c3_94 = arith.constant 3 : index
      %c1_95 = arith.constant 1 : index
      %c0_96 = arith.constant 0 : index
      %c0_97 = arith.constant 0 : index
      %102 = vector.load %arg2[%c3_94, %c1_95, %c0_96, %c0_97] : memref<4x4x16x3xbf16, #tpu.memory_space<vmem>>, vector<1x1x16x3xbf16>
      %103 = vector.shape_cast %102 : vector<1x1x16x3xbf16> to vector<16x3xbf16>
      %cst_98 = arith.constant dense<0.000000e+00> : vector<32x3xf32>
      %104 = tpu.matmul %22, %103, %cst_98 {dimension_numbers = #tpu.dot_dimension_numbers<[1], [0], [0], [1], [0, 0, 1, 1], [], []>} : vector<32x16xbf16>, vector<16x3xbf16>, vector<32x3xf32> -> vector<32x3xf32>
      %105 = arith.addf %101, %104 : vector<32x3xf32>
      %c3_99 = arith.constant 3 : index
      %c3_100 = arith.constant 3 : index
      %c0_101 = arith.constant 0 : index
      %c0_102 = arith.constant 0 : index
      %106 = vector.load %arg2[%c3_99, %c3_100, %c0_101, %c0_102] : memref<4x4x16x3xbf16, #tpu.memory_space<vmem>>, vector<1x1x16x3xbf16>
      %107 = vector.shape_cast %106 : vector<1x1x16x3xbf16> to vector<16x3xbf16>
      %cst_103 = arith.constant dense<0.000000e+00> : vector<32x3xf32>
      %108 = tpu.matmul %23, %107, %cst_103 {dimension_numbers = #tpu.dot_dimension_numbers<[1], [0], [0], [1], [0, 0, 1, 1], [], []>} : vector<32x16xbf16>, vector<16x3xbf16>, vector<32x3xf32> -> vector<32x3xf32>
      %109 = arith.addf %105, %108 : vector<32x3xf32>
      %c96_i32 = arith.constant 96 : i32
      %110 = arith.addi %c96_i32, %2 : i32
      %111 = math.tanh %109 : vector<32x3xf32>
      %c0_104 = arith.constant 0 : index
      %112 = arith.index_cast %110 : i32 to index
      %c0_105 = arith.constant 0 : index
      %c0_106 = arith.constant 0 : index
      %113 = vector.load %arg3[%c0_104, %112, %c0_105, %c0_106] : memref<1x128x32x3xf32, #tpu.memory_space<vmem>>, vector<1x1x32x3xf32>
      %114 = vector.shape_cast %113 : vector<1x1x32x3xf32> to vector<32x3xf32>
      %115 = vector.shape_cast %111 : vector<32x3xf32> to vector<1x1x32x3xf32>
      tpu.vector_store %arg3[%c0_104, %112, %c0_105, %c0_106], %115 {strides = array<i32>} : memref<1x128x32x3xf32, #tpu.memory_space<vmem>>, vector<1x1x32x3xf32>,
    }
    %c32_i32_0 = arith.constant 32 : i32
    return
  }
  func.func @transform_0(%arg0: i32) -> (i32, i32, i32, i32) {
    %c0_i32 = arith.constant 0 : i32
    %c0_i32_0 = arith.constant 0 : i32
    %c0_i32_1 = arith.constant 0 : i32
    %c0_i32_2 = arith.constant 0 : i32
    return %arg0, %c0_i32, %c0_i32_0, %c0_i32_1 : i32, i32, i32, i32
  }
  func.func @transform_1(%arg0: i32) -> (i32, i32, i32, i32) {
    %c0_i32 = arith.constant 0 : i32
    %c0_i32_0 = arith.constant 0 : i32
    %c0_i32_1 = arith.constant 0 : i32
    %c0_i32_2 = arith.constant 0 : i32
    %c0_i32_3 = arith.constant 0 : i32
    return %c0_i32, %c0_i32_0, %c0_i32_1, %c0_i32_2 : i32, i32, i32, i32
  }
  func.func @transform_2(%arg0: i32) -> (i32, i32, i32, i32) {
    %c0_i32 = arith.constant 0 : i32
    %c0_i32_0 = arith.constant 0 : i32
    %c0_i32_1 = arith.constant 0 : i32
    %c0_i32_2 = arith.constant 0 : i32
    return %arg0, %c0_i32, %c0_i32_0, %c0_i32_1 : i32, i32, i32, i32
  }
}

</mosaic_0001>

<bundles_post_ra>
// kernel: generator_forward.10
= control target key start
LH: loop header
LB: loop body
LE: loop exit
PB: predicated region body
PF: predicated region fallthrough
CT: control target
= control target key end

     0   :  { %s510_s12 = smov 0   ;;  %s512_s13 = smov 0   ;;  %s564_s0 = inlined_call_operand.vmem [shape: bf16[2,64,64], index: 0, kind: input, shape index: {}]   ;;  %s565_s1 = inlined_call_operand.vmem [shape: f32[1,1,64], index: 1, kind: input, shape index: {}]   ;;  %s566_s2 = inlined_call_operand.vmem [shape: f32[1,1,64], index: 2, kind: input, shape index: {}]   ;;  %s567_s3 = inlined_call_operand.vmem [shape: bf16[2,64,64], index: 3, kind: output, shape index: {}]  }
   0x1   :  { %s514_s14 = smov 0  }
   0x2 LB: > { %s25_s15 = sadd.s32 1, %s484_s13  ;;  %p396_p0 = scmp.ge.s32.totalorder %s488_s14, 1  ;;  %s488_s14 = sphi %s514_s14, %s13_s14   ;;  %s484_s13 = sphi %s512_s13, %s569_s13   ;;  %s480_s12 = sphi %s510_s12, %s568_s12  }
   0x3   : > { %p27_p1 = scmp.ge.s32.totalorder %s25_s15, 2  ;;  %p158_p2 = scmp.lt.s32.totalorder %s488_s14, 3 }
   0x5   : > { %s571_s15 = smov (%p27_p1, %s25_s15), 0  ;;  %p159_p3 = pnand %p396_p0, %p158_p2 }
   0x6   : > { %p191_p4 = scmp.lt.s32.totalorder (!%p159_p3), %s480_s12, 1  ;;  %v401_v0 = vld [vmem:[%s565_s1] ss:$0 sm:$0xff] (!%p159_p3)  ;;  %vm296_vm0 = vcmask (!%p159_p3), 519168  }
   0x7   : > { %162 = sbr.rel (%p159_p3) target bundleno = 32 (0x20), region = 32  ;;  %v402_v9 = vld [vmem:[%s566_s2] ss:$0 sm:$0xff] (!%p159_p3) }
   0xe   : > { %s573_s12 = smov (!%p191_p4, %s480_s12), 1 }
   0xf   : > { %s413_s16 = sshll.u32 %s573_s12, 5 }
  0x10   : > { %s198_s19 = scalar_lea.vmem %s564_s0, %s413_s16  ;;  %s208_s26 = scalar_lea.vmem %s567_s3, %s413_s16 }
  0x11   : > { %v424_v1 = vld [vmem:[%s198_s19] sm:$0xff]   ;;  %v439_v2 = vld [vmem:[%s198_s19 + $0x8] sm:$0xff]   ;;  %v440_v3 = vld [vmem:[%s198_s19 + $0x10] sm:$0xff]  }
  0x12   : > { %v425_v4 = vunpack.c.l.bf16 %v424_v1  ;;  %v426_v5 = vunpack.c.h.bf16 %v424_v1  ;;  %v429_v6 = vunpack.c.l.bf16 %v439_v2  ;;  %v430_v7 = vunpack.c.h.bf16 %v439_v2  ;;  %v441_v8 = vld [vmem:[%s198_s19 + $0x18] sm:$0xff]  }
  0x13   : > { %v433_v10 = vunpack.c.l.bf16 %v440_v3  ;;  %v434_v11 = vunpack.c.h.bf16 %v440_v3  ;;  %v437_v12 = vunpack.c.l.bf16 %v441_v8  ;;  %v438_v13 = vunpack.c.h.bf16 %v441_v8 }
  0x14   : > { %v233_v14 = vmul.f32 %v425_v4, %v401_v0  ;;  %v234_v15 = vmul.f32 %v426_v5, %v401_v0  ;;  %v235_v16 = vmul.f32 %v429_v6, %v401_v0  ;;  %v236_v17 = vmul.f32 %v430_v7, %v401_v0 }
  0x15   : > { %v237_v18 = vmul.f32 %v433_v10, %v401_v0  ;;  %v238_v19 = vmul.f32 %v434_v11, %v401_v0  ;;  %v239_v20 = vmul.f32 %v437_v12, %v401_v0  ;;  %v240_v21 = vmul.f32 %v438_v13, %v401_v0 }
  0x16   : > { %v248_v22 = vadd.f32 %v402_v9, %v233_v14  ;;  %v249_v23 = vadd.f32 %v402_v9, %v234_v15  ;;  %v250_v24 = vadd.f32 %v402_v9, %v235_v16  ;;  %v251_v25 = vadd.f32 %v402_v9, %v236_v17 }
  0x17   : > { %v252_v26 = vadd.f32 %v402_v9, %v237_v18  ;;  %v253_v27 = vadd.f32 %v402_v9, %v238_v19  ;;  %v254_v28 = vadd.f32 %v402_v9, %v239_v20  ;;  %v255_v29 = vadd.f32 %v402_v9, %v240_v21 }
  0x18   : > { %v256_v30 = vmax.f32 %v248_v22, 0.0  ;;  %v257_v31 = vmax.f32 %v249_v23, 0.0  ;;  %v258_v32 = vmax.f32 %v250_v24, 0.0  ;;  %v259_v33 = vmax.f32 %v251_v25, 0.0 }
  0x19   : > { %v260_v34 = vmax.f32 %v252_v26, 0.0  ;;  %v261_v35 = vmax.f32 %v253_v27, 0.0  ;;  %v262_v36 = vmax.f32 %v254_v28, 0.0  ;;  %v263_v37 = vmax.f32 %v255_v29, 0.0 }
  0x1a   : > { %v415_v38 = vpack.c.bf16 %v256_v30, %v256_v30  ;;  %v416_v39 = vpack.c.bf16 %v257_v31, %v257_v31  ;;  %v417_v40 = vpack.c.bf16 %v258_v32, %v258_v32  ;;  %v418_v41 = vpack.c.bf16 %v259_v33, %v259_v33 }
  0x1b   : > { %v419_v42 = vpack.c.bf16 %v260_v34, %v260_v34  ;;  %v420_v43 = vpack.c.bf16 %v261_v35, %v261_v35  ;;  %v421_v44 = vpack.c.bf16 %v262_v36, %v262_v36  ;;  %v422_v45 = vpack.c.bf16 %v263_v37, %v263_v37 }
  0x1c   : > { %297 = vst.msk [vmem:[%s208_s26] sm:$0xf] %vm296_vm0, %v415_v38  ;;  %298 = vst.msk [vmem:[%s208_s26 + $0x4] sm:$0xf] %vm296_vm0, %v416_v39 }
  0x1d   : > { %299 = vst.msk [vmem:[%s208_s26 + $0x8] sm:$0xf] %vm296_vm0, %v417_v40  ;;  %300 = vst.msk [vmem:[%s208_s26 + $0xc] sm:$0xf] %vm296_vm0, %v418_v41 }
  0x1e   : > { %301 = vst.msk [vmem:[%s208_s26 + $0x10] sm:$0xf] %vm296_vm0, %v419_v42  ;;  %302 = vst.msk [vmem:[%s208_s26 + $0x14] sm:$0xf] %vm296_vm0, %v420_v43 }
  0x1f   : > { %303 = vst.msk [vmem:[%s208_s26 + $0x18] sm:$0xf] %vm296_vm0, %v421_v44  ;;  %304 = vst.msk [vmem:[%s208_s26 + $0x1c] sm:$0xf] %vm296_vm0, %v422_v45 }
  0x20 PF: > { %s13_s14 = sadd.s32 1, %s488_s14   ;;  %s568_s12 = smov %s484_s13 }
  0x21   : > { %p10_p5 = scmp.ge.s32.totalorder %s13_s14, 4   ;;  %s569_s13 = smov %s571_s15 }
  0x23   :  { %12 = sbr.rel (!%p10_p5) target bundleno = 2 (0x2), region = 62 }

// kernel: generator_forward.8
= control target key start
LH: loop header
LB: loop body
LE: loop exit
PB: predicated region body
PF: predicated region fallthrough
CT: control target
= control target key end

     0   :  { %9 = vsyncpa [#allocation4], 0  ;;  %s3245_s0 = inlined_call_operand.vmem [shape: bf16[2,32], index: 0, kind: input, shape index: {}]   ;;  %s3246_s1 = inlined_call_operand.vmem [shape: bf16[16,32,128], index: 1, kind: input, shape index: {}]   ;;  %s3247_s2 = inlined_call_operand.hbm [shape: f32[1,128], index: 2, kind: input, shape index: {}]   ;;  %s3248_s3 = inlined_call_operand.hbm [shape: f32[1,128], index: 3, kind: input, shape index: {}]   ;;  %s3249_s4 = inlined_call_operand.vmem [shape: bf16[2,16,128], index: 4, kind: output, shape index: {}]  }
   0x1   :  { %10 = vsyncpa [#allocation6], 0  ;;  %s2497_s15 = smov [#allocation3]   ;;  %s2498_s17 = smov [#allocation5]  }
   0x2   :  { %s21_s16 = sshll.u32 %s2497_s15, 4  ;;  %s31_s18 = sshll.u32 %s2498_s17, 4  ;;  %s22_s16 = int_to_ptr.vmem [resolvable:$true] %s21_s16  ;;  %s32_s18 = int_to_ptr.vmem [resolvable:$true] %s31_s18 }
   0x3   :  { %s2449_s21 = scalar_lea.hbm %s3247_s2, 16 }
   0x4   :  { %p2450_p0 = scmp.ne.s32.totalorder %s3247_s2, %s2449_s21  ;;  %p2453_p1 = scmp.lt.u32.totalorder %s2449_s21, %s3247_s2 }
   0x6   :  { %p2455_p2 = pnand %p2453_p1, %p2450_p0 }
   0x8   :  { %2458 = shalt.err (!%p2455_p2)
}
   0x9   :  { %s2459_s26 = scalar_lea.vmem %s22_s16, 16  ;;  %s2463_s27 = scalar_lea.vmem %s22_s16, 32 }
   0xa   :  { %p2460_p3 = scmp.ne.s32.totalorder %s22_s16, %s2459_s26  ;;  %p2464_p4 = scmp.lt.s32.totalorder %s22_s16, %s22_s16 }
   0xb   :  { %p2465_p5 = scmp.lt.s32.totalorder %s2463_s27, %s2459_s26 }
   0xd   :  { %p2466_p6 = por %p2465_p5, %p2464_p4 }
   0xf   :  { %p2467_p7 = pnand %p2466_p6, %p2460_p3 }
  0x11   :  { %2470 = shalt.err (!%p2467_p7)
}
  0x12   :  { %24 = dma.hbm_to_vmem [thread:$0]  %s3247_s2, 16, %s22_s16, [#allocation4]  }
  0x13   :  { %s2471_s6 = scalar_lea.hbm %s3248_s3, 16 }
  0x14   :  { %p2472_p8 = scmp.ne.s32.totalorder %s3248_s3, %s2471_s6  ;;  %p2475_p9 = scmp.lt.u32.totalorder %s2471_s6, %s3248_s3 }
  0x16   :  { %p2477_p10 = pnand %p2475_p9, %p2472_p8 }
  0x18   :  { %2480 = shalt.err (!%p2477_p10)
}
  0x19   :  { %s2481_s11 = scalar_lea.vmem %s32_s18, 16  ;;  %s2485_s12 = scalar_lea.vmem %s32_s18, 32 }
  0x1a   :  { %p2482_p11 = scmp.ne.s32.totalorder %s32_s18, %s2481_s11  ;;  %p2486_p12 = scmp.lt.s32.totalorder %s32_s18, %s32_s18 }
  0x1b   :  { %p2487_p13 = scmp.lt.s32.totalorder %s2485_s12, %s2481_s11 }
  0x1d   :  { %p2488_p0 = por %p2487_p13, %p2486_p12 }
  0x1f   :  { %p2489_p1 = pnand %p2488_p0, %p2482_p11 }
  0x21   :  { %2492 = shalt.err (!%p2489_p1)
}
  0x22   :  { %34 = dma.hbm_to_vmem [thread:$0]  %s3248_s3, 16, %s32_s18, [#allocation6]  }
  0x23   :  { %2493 = dma.done.wait [#allocation4], 16  }
  0x24   :  { %2494 = vsyncadd [#allocation4], 4294967280 }
  0x25   :  { %2495 = dma.done.wait [#allocation6], 16  }
  0x26   :  { %2496 = vsyncadd [#allocation6], 4294967280  ;;  %v2499_v0 = vmov 0.0   ;;  %vm2500_vm0 = vmmov 0   ;;  %v2415_v1 = vld [vmem:[%s3246_s1] sm:$0xff]   ;;  %v2416_v2 = vld [vmem:[%s3246_s1 + $0x10] sm:$0xff]  }
  0x27   :  { %2281 = vmatprep.subr.bf16.mxu0 %v2499_v0  ;;  %2289 = vmatprep.subr.bf16.mxu1 %v2499_v0  ;;  %v2417_v3 = vld [vmem:[%s3246_s1 + $0x8] sm:$0xff]   ;;  %v2418_v4 = vld [vmem:[%s3246_s1 + $0x18] sm:$0xff]   ;;  %v42_v5 = vld [vmem:[%s3245_s0] sm:$0x1]  ;;  %vm59_vm1 = vcmask 261120   ;;  %vm104_vm2 = vcmask 1041408  }
  0x28   :  { %2285 = vmatprep.mubr.msk.bf16.mxu0 %vm2500_vm0, %v2499_v0  ;;  %2293 = vmatprep.mubr.msk.bf16.mxu1 %vm2500_vm0, %v2499_v0  ;;  %v122_v6 = vld [vmem:[%s3245_s0] sm:$0x1]  ;;  %v2420_v8 = vld [vmem:[%s3246_s1 + $0x30] sm:$0xff]   ;;  %v2421_v9 = vld [vmem:[%s3246_s1 + $0x28] sm:$0xff]   ;;  %vm1387_vm3 = vcmask 1040384   ;;  %vm1484_vm5 = vcmask 1041409  }
  0x29   :  { %2282 = vmatpush3.bf16.msra.mxu0 %v2415_v1  ;;  %2290 = vmatpush3.bf16.msra.mxu1 %v2416_v2  ;;  %v2419_v7 = vld [vmem:[%s3246_s1 + $0x20] sm:$0xff]   ;;  %v2422_v10 = vld [vmem:[%s3246_s1 + $0x38] sm:$0xff]   ;;  %v2424_v14 = vld [vmem:[%s3246_s1 + $0x50] sm:$0xff]   ;;  %vm1388_vm4 = vsmask.f32 256  ;;  %vm1581_vm7 = vcmask 1042434  }
  0x2a   :  { %2283 = vmatprep.subr.bf16.mxu0 %v2499_v0  ;;  %2291 = vmatprep.subr.bf16.mxu1 %v2499_v0  ;;  %v202_v11 = vld [vmem:[%s3245_s0] sm:$0x1]  ;;  %v2425_v15 = vld [vmem:[%s3246_s1 + $0x48] sm:$0xff]   ;;  %v2426_v16 = vld [vmem:[%s3246_s1 + $0x58] sm:$0xff]   ;;  %vm1485_vm6 = vsmask.f32 1280 }
  0x2b   :  { %v282_v12 = vld [vmem:[%s3245_s0] sm:$0x1]  ;;  %v2428_v20 = vld [vmem:[%s3246_s1 + $0x70] sm:$0xff]   ;;  %v2429_v21 = vld [vmem:[%s3246_s1 + $0x68] sm:$0xff]   ;;  %vm1582_vm8 = vsmask.f32 2304 }
  0x2c   :  { %v2423_v13 = vld [vmem:[%s3246_s1 + $0x40] sm:$0xff]   ;;  %v2430_v22 = vld [vmem:[%s3246_s1 + $0x78] sm:$0xff]   ;;  %v2432_v26 = vld [vmem:[%s3246_s1 + $0x90] sm:$0xff]   ;;  %vm1678_vm9 = vcmask 1043459   ;;  %vm1679_vm10 = vsmask.f32 3328 }
  0x2d   :  { %2284 = vmatpush3.bf16.msra.mxu0 %v2417_v3  ;;  %2292 = vmatpush3.bf16.msra.mxu1 %v2418_v4  ;;  %v362_v17 = vld [vmem:[%s3245_s0] sm:$0x1]  ;;  %v2433_v27 = vld [vmem:[%s3246_s1 + $0x88] sm:$0xff]   ;;  %v2434_v28 = vld [vmem:[%s3246_s1 + $0x98] sm:$0xff]   ;;  %vm1436_vm11 = vsmask.f32 7938 }
  0x2e   :  { %2297 = vmatprep.subr.bf16.mxu0 %v2499_v0  ;;  %2305 = vmatprep.subr.bf16.mxu1 %v2499_v0  ;;  %v442_v18 = vld [vmem:[%s3245_s0] sm:$0x1]  ;;  %v2436_v32 = vld [vmem:[%s3246_s1 + $0xb0] sm:$0xff]   ;;  %v2437_v33 = vld [vmem:[%s3246_s1 + $0xa8] sm:$0xff]   ;;  %vm1533_vm12 = vsmask.f32 7942 }
  0x2f   :  { %v2427_v19 = vld [vmem:[%s3246_s1 + $0x60] sm:$0xff]   ;;  %v2438_v34 = vld [vmem:[%s3246_s1 + $0xb8] sm:$0xff]   ;;  %v2440_v38 = vld [vmem:[%s3246_s1 + $0xd0] sm:$0xff]   ;;  %vm1630_vm15 = vsmask.f32 7946 }
  0x30   :  { %2286 = vmatmul.mubr.msk.bf16.vlgmr.msra.gmra.mrb[0].mxu0 %vm59_vm1, %v42_v5  ;;  %2294 = vmatmul.mubr.msk.bf16.vlgmr.msra.gmra.mrb[0].mxu1 %vm59_vm1, %v122_v6  ;;  %v522_v23 = vld [vmem:[%s3245_s0] sm:$0x1]  ;;  %v2441_v39 = vld [vmem:[%s3246_s1 + $0xc8] sm:$0xff]   ;;  %v2442_v40 = vld [vmem:[%s3246_s1 + $0xd8] sm:$0xff]  }
  0x31   :  { %2298 = vmatpush3.bf16.msra.mxu0 %v2419_v7  ;;  %2306 = vmatpush3.bf16.msra.mxu1 %v2420_v8  ;;  %v602_v24 = vld [vmem:[%s3245_s0] sm:$0x1]  ;;  %v2444_v44 = vld [vmem:[%s3246_s1 + $0xf0] sm:$0xff]   ;;  %v2445_v45 = vld [vmem:[%s3246_s1 + $0xe8] sm:$0xff]  }
  0x32   :  { %2299 = vmatprep.subr.bf16.mxu0 %v2499_v0  ;;  %2307 = vmatprep.subr.bf16.mxu1 %v2499_v0  ;;  %v2431_v25 = vld [vmem:[%s3246_s1 + $0x80] sm:$0xff]   ;;  %v2446_v46 = vld [vmem:[%s3246_s1 + $0xf8] sm:$0xff]   ;;  %vm2865_vm13 = vmand %vm1387_vm3, %vm1388_vm4 }
  0x33   :  { %2301 = vmatprep.mubr.msk.bf16.mxu0 %vm2500_vm0, %v2499_v0  ;;  %2309 = vmatprep.mubr.msk.bf16.mxu1 %vm2500_vm0, %v2499_v0  ;;  %v682_v29 = vld [vmem:[%s3245_s0] sm:$0x1]  ;;  %vm2876_vm14 = vmand %vm1484_vm5, %vm1485_vm6 }
  0x34   :  { %v2435_v30 = vld [vmem:[%s3246_s1 + $0xa0] sm:$0xff]   ;;  %vm2955_vm4 = vmand %vm1387_vm3, %vm1436_vm11 }
  0x35   :  { %2300 = vmatpush3.bf16.msra.mxu0 %v2421_v9  ;;  %2308 = vmatpush3.bf16.msra.mxu1 %v2422_v10  ;;  %v762_v31 = vld [vmem:[%s3245_s0] sm:$0x1]  ;;  %vm2972_vm3 = vmand %vm1484_vm5, %vm1533_vm12 }
  0x36   :  { %2313 = vmatprep.subr.bf16.mxu0 %v2499_v0  ;;  %2321 = vmatprep.subr.bf16.mxu1 %v2499_v0  ;;  %v842_v35 = vld [vmem:[%s3245_s0] sm:$0x1]  ;;  %vm3026_vm5 = vmand %vm1581_vm7, %vm1630_vm15 }
  0x37   :  { %v2439_v36 = vld [vmem:[%s3246_s1 + $0xc0] sm:$0xff]  }
  0x38   :  { %2302 = vmatmul.mubr.msk.bf16.vlgmr.msra.gmra.mrb[4].mxu0 %vm59_vm1, %v202_v11  ;;  %2310 = vmatmul.mubr.msk.bf16.vlgmr.msra.gmra.mrb[4].mxu1 %vm59_vm1, %v282_v12  ;;  %v922_v37 = vld [vmem:[%s3245_s0] sm:$0x1] }
  0x39   :  { %2314 = vmatpush3.bf16.msra.mxu0 %v2423_v13  ;;  %2322 = vmatpush3.bf16.msra.mxu1 %v2424_v14  ;;  %v1002_v41 = vld [vmem:[%s3245_s0] sm:$0x1] }
  0x3a   :  { %2315 = vmatprep.subr.bf16.mxu0 %v2499_v0  ;;  %2323 = vmatprep.subr.bf16.mxu1 %v2499_v0  ;;  %v2443_v42 = vld [vmem:[%s3246_s1 + $0xe0] sm:$0xff]  }
  0x3b   :  { %2317 = vmatprep.mubr.msk.bf16.mxu0 %vm2500_vm0, %v2499_v0  ;;  %2325 = vmatprep.mubr.msk.bf16.mxu1 %vm2500_vm0, %v2499_v0  ;;  %v1082_v43 = vld [vmem:[%s3245_s0] sm:$0x1] }
  0x3c   :  { %v1162_v47 = vld [vmem:[%s3245_s0] sm:$0x1] }
  0x3d   :  { %2316 = vmatpush3.bf16.msra.mxu0 %v2425_v15  ;;  %2324 = vmatpush3.bf16.msra.mxu1 %v2426_v16  ;;  %v1242_v48 = vld [vmem:[%s3245_s0] sm:$0x1] }
  0x3e   :  { %2329 = vmatprep.subr.bf16.mxu0 %v2499_v0  ;;  %2337 = vmatprep.subr.bf16.mxu1 %v2499_v0 }
  0x40   :  { %2318 = vmatmul.mubr.msk.bf16.vlgmr.msra.gmra.mrb[8].mxu0 %vm59_vm1, %v362_v17  ;;  %2326 = vmatmul.mubr.msk.bf16.vlgmr.msra.gmra.mrb[8].mxu1 %vm59_vm1, %v442_v18 }
  0x41   :  { %2330 = vmatpush3.bf16.msra.mxu0 %v2427_v19  ;;  %2338 = vmatpush3.bf16.msra.mxu1 %v2428_v20 }
  0x42   :  { %2331 = vmatprep.subr.bf16.mxu0 %v2499_v0  ;;  %2339 = vmatprep.subr.bf16.mxu1 %v2499_v0 }
  0x43   :  { %2333 = vmatprep.mubr.msk.bf16.mxu0 %vm2500_vm0, %v2499_v0  ;;  %2341 = vmatprep.mubr.msk.bf16.mxu1 %vm2500_vm0, %v2499_v0 }
  0x45   :  { %2332 = vmatpush3.bf16.msra.mxu0 %v2429_v21  ;;  %2340 = vmatpush3.bf16.msra.mxu1 %v2430_v22 }
  0x46   :  { %2345 = vmatprep.subr.bf16.mxu0 %v2499_v0  ;;  %2353 = vmatprep.subr.bf16.mxu1 %v2499_v0 }
  0x48   :  { %2334 = vmatmul.mubr.msk.bf16.vlgmr.msra.gmra.mrb[12].mxu0 %vm59_vm1, %v522_v23  ;;  %2342 = vmatmul.mubr.msk.bf16.vlgmr.msra.gmra.mrb[12].mxu1 %vm59_vm1, %v602_v24 }
  0x49   :  { %2346 = vmatpush3.bf16.msra.mxu0 %v2431_v25  ;;  %2354 = vmatpush3.bf16.msra.mxu1 %v2432_v26 }
  0x4a   :  { %2347 = vmatprep.subr.bf16.mxu0 %v2499_v0  ;;  %2355 = vmatprep.subr.bf16.mxu1 %v2499_v0 }
  0x4b   :  { %2349 = vmatprep.mubr.msk.bf16.mxu0 %vm2500_vm0, %v2499_v0  ;;  %2357 = vmatprep.mubr.msk.bf16.mxu1 %vm2500_vm0, %v2499_v0 }
  0x4d   :  { %2348 = vmatpush3.bf16.msra.mxu0 %v2433_v27  ;;  %2356 = vmatpush3.bf16.msra.mxu1 %v2434_v28 }
  0x4e   :  { %2361 = vmatprep.subr.bf16.mxu0 %v2499_v0  ;;  %2369 = vmatprep.subr.bf16.mxu1 %v2499_v0 }
  0x50   :  { %2350 = vmatmul.mubr.msk.bf16.vlgmr.msra.gmra.mrb[16].mxu0 %vm59_vm1, %v682_v29  ;;  %2358 = vmatmul.mubr.msk.bf16.vlgmr.msra.gmra.mrb[16].mxu1 %vm59_vm1, %v762_v31 }
  0x51   :  { %2362 = vmatpush3.bf16.msra.mxu0 %v2435_v30  ;;  %2370 = vmatpush3.bf16.msra.mxu1 %v2436_v32 }
  0x52   :  { %2363 = vmatprep.subr.bf16.mxu0 %v2499_v0  ;;  %2371 = vmatprep.subr.bf16.mxu1 %v2499_v0 }
  0x53   :  { %2365 = vmatprep.mubr.msk.bf16.mxu0 %vm2500_vm0, %v2499_v0  ;;  %2373 = vmatprep.mubr.msk.bf16.mxu1 %vm2500_vm0, %v2499_v0 }
  0x55   :  { %2364 = vmatpush3.bf16.msra.mxu0 %v2437_v33  ;;  %2372 = vmatpush3.bf16.msra.mxu1 %v2438_v34 }
  0x56   :  { %2377 = vmatprep.subr.bf16.mxu0 %v2499_v0  ;;  %2385 = vmatprep.subr.bf16.mxu1 %v2499_v0 }
  0x58   :  { %2366 = vmatmul.mubr.msk.bf16.vlgmr.msra.gmra.mrb[20].mxu0 %vm59_vm1, %v842_v35  ;;  %2374 = vmatmul.mubr.msk.bf16.vlgmr.msra.gmra.mrb[20].mxu1 %vm59_vm1, %v922_v37 }
  0x59   :  { %2378 = vmatpush3.bf16.msra.mxu0 %v2439_v36  ;;  %2386 = vmatpush3.bf16.msra.mxu1 %v2440_v38 }
  0x5a   :  { %2379 = vmatprep.subr.bf16.mxu0 %v2499_v0  ;;  %2387 = vmatprep.subr.bf16.mxu1 %v2499_v0 }
  0x5b   :  { %2381 = vmatprep.mubr.msk.bf16.mxu0 %vm2500_vm0, %v2499_v0  ;;  %2389 = vmatprep.mubr.msk.bf16.mxu1 %vm2500_vm0, %v2499_v0 }
  0x5d   :  { %2380 = vmatpush3.bf16.msra.mxu0 %v2441_v39  ;;  %2388 = vmatpush3.bf16.msra.mxu1 %v2442_v40 }
  0x5e   :  { %2393 = vmatprep.subr.bf16.mxu0 %v2499_v0  ;;  %2401 = vmatprep.subr.bf16.mxu1 %v2499_v0 }
  0x60   :  { %2382 = vmatmul.mubr.msk.bf16.vlgmr.msra.gmra.mrb[24].mxu0 %vm59_vm1, %v1002_v41  ;;  %2390 = vmatmul.mubr.msk.bf16.vlgmr.msra.gmra.mrb[24].mxu1 %vm59_vm1, %v1082_v43 }
  0x61   :  { %2394 = vmatpush3.bf16.msra.mxu0 %v2443_v42  ;;  %2402 = vmatpush3.bf16.msra.mxu1 %v2444_v44 }
  0x62   :  { %2395 = vmatprep.subr.bf16.mxu0 %v2499_v0  ;;  %2403 = vmatprep.subr.bf16.mxu1 %v2499_v0 }
  0x63   :  { %2397 = vmatprep.mubr.msk.bf16.mxu0 %vm2500_vm0, %v2499_v0  ;;  %2405 = vmatprep.mubr.msk.bf16.mxu1 %vm2500_vm0, %v2499_v0  ;;  %vm2915_vm0 = vmand %vm1581_vm7, %vm1582_vm8 }
  0x65   :  { %2396 = vmatpush3.bf16.msra.mxu0 %v2445_v45  ;;  %2404 = vmatpush3.bf16.msra.mxu1 %v2446_v46 }
  0x68   :  { %2398 = vmatmul.mubr.msk.bf16.vlgmr.msra.gmra.mrb[28].mxu0 %vm59_vm1, %v1162_v47  ;;  %2406 = vmatmul.mubr.msk.bf16.vlgmr.msra.gmra.mrb[28].mxu1 %vm59_vm1, %v1242_v48  ;;  %vm1727_vm1 = vsmask.f32 7950 }
  0x69   :  { %vm3048_vm6 = vmand %vm1678_vm9, %vm1727_vm1 }
 0x103   :  { %v97_v49 = vpop.f32.mrb[0].mxu0  ;;  %v177_v52 = vpop.f32.mrb[0].mxu1 }
 0x104   :  { %103 = vst [vmem:[#allocation2] sm:$0x3] %v97_v49  ;;  %v105_v50 = vsel %vm104_vm2, %v97_v49, 0.0  ;;  %v113_v51 = vmul.f32 %v97_v49, %v97_v49  ;;  %v2287_v53 = vpop.f32.mrb[1].mxu0  ;;  %184 = vst [vmem:[#allocation2 + $0x2] sm:$0x3] %v177_v52  ;;  %v193_v56 = vmul.f32 %v177_v52, %v177_v52 }
 0x105   :  { %v106_v54 = vrot.slane %v105_v50, 4  ;;  %v185_v55 = vsel %vm104_vm2, %v177_v52, 0.0  ;;  %v2295_v57 = vpop.f32.mrb[1].mxu1  ;;  %v100_v58 = vpop.f32.mrb[2].mxu0 }
 0x106   :  { %v114_v59 = vsel %vm104_vm2, %v113_v51, 0.0  ;;  %v186_v60 = vrot.slane %v185_v55, 4  ;;  %v180_v61 = vpop.f32.mrb[2].mxu1  ;;  %v2288_v62 = vpop.f32.mrb[3].mxu0  ;;  %v194_v1 = vsel %vm104_vm2, %v193_v56, 0.0 }
 0x107   :  { %v107_v63 = vadd.f32 %v106_v54, %v105_v50  ;;  %v115_v0 = vrot.slane %v114_v59, 4  ;;  %v2296_v2 = vpop.f32.mrb[3].mxu1  ;;  %v195_v4 = vrot.slane %v194_v1, 4 }
 0x108   :  { %v187_v3 = vadd.f32 %v186_v60, %v185_v55 }
 0x109   :  { %v108_v5 = vrot.slane %v107_v63, 2  ;;  %v116_v6 = vadd.f32 %v115_v0, %v114_v59  ;;  %v196_v8 = vadd.f32 %v195_v4, %v194_v1 }
 0x10a   :  { %v188_v7 = vrot.slane %v187_v3, 2 }
 0x10b   :  { %v109_v9 = vadd.f32 %v108_v5, %v107_v63  ;;  %v117_v10 = vrot.slane %v116_v6, 2  ;;  %v257_v11 = vpop.f32.mrb[4].mxu0  ;;  %v197_v13 = vrot.slane %v196_v8, 2  ;;  %v337_v16 = vpop.f32.mrb[4].mxu1 }
 0x10c   :  { %v189_v12 = vadd.f32 %v188_v7, %v187_v3  ;;  %264 = vst [vmem:[#allocation2 + $0x4] sm:$0x3] %v257_v11  ;;  %v265_v14 = vsel %vm104_vm2, %v257_v11, 0.0  ;;  %v273_v15 = vmul.f32 %v257_v11, %v257_v11  ;;  %v2303_v17 = vpop.f32.mrb[5].mxu0  ;;  %344 = vst [vmem:[#allocation2 + $0x6] sm:$0x3] %v337_v16  ;;  %v353_v38 = vmul.f32 %v337_v16, %v337_v16 }
 0x10d   :  { %v110_v18 = vrot.slane %v109_v9, 1  ;;  %v118_v19 = vadd.f32 %v117_v10, %v116_v6  ;;  %v266_v20 = vrot.slane %v265_v14, 4  ;;  %v345_v21 = vsel %vm104_vm2, %v337_v16, 0.0  ;;  %v2311_v22 = vpop.f32.mrb[5].mxu1  ;;  %v260_v23 = vpop.f32.mrb[6].mxu0 }
 0x10e   :  { %v190_v24 = vrot.slane %v189_v12, 1  ;;  %v198_v25 = vadd.f32 %v197_v13, %v196_v8  ;;  %v274_v26 = vsel %vm104_vm2, %v273_v15, 0.0  ;;  %v346_v27 = vrot.slane %v345_v21, 4  ;;  %v340_v28 = vpop.f32.mrb[6].mxu1  ;;  %v2304_v29 = vpop.f32.mrb[7].mxu0 }
 0x10f   :  { %v111_v30 = vadd.f32 %v110_v18, %v109_v9  ;;  %v119_v31 = vrot.slane %v118_v19, 1  ;;  %v267_v32 = vadd.f32 %v266_v20, %v265_v14  ;;  %v275_v33 = vrot.slane %v274_v26, 4  ;;  %v2312_v34 = vpop.f32.mrb[7].mxu1 }
 0x110   :  { %v191_v35 = vadd.f32 %v190_v24, %v189_v12  ;;  %v199_v36 = vrot.slane %v198_v25, 1  ;;  %v347_v37 = vadd.f32 %v346_v27, %v345_v21  ;;  %v354_v45 = vsel %vm104_vm2, %v353_v38, 0.0 }
 0x111   :  { %v120_v39 = vadd.f32 %v119_v31, %v118_v19  ;;  %v268_v40 = vrot.slane %v267_v32, 2  ;;  %v276_v41 = vadd.f32 %v275_v33, %v274_v26  ;;  %v355_v48 = vrot.slane %v354_v45, 4 }
 0x112   :  { %v192_v42 = vadd.f32 %v191_v35, %v111_v30  ;;  %v200_v43 = vadd.f32 %v199_v36, %v198_v25  ;;  %v348_v44 = vrot.slane %v347_v37, 2 }
 0x113   :  { %v269_v46 = vadd.f32 %v268_v40, %v267_v32  ;;  %v277_v47 = vrot.slane %v276_v41, 2  ;;  %v417_v49 = vpop.f32.mrb[8].mxu0  ;;  %v497_v54 = vpop.f32.mrb[8].mxu1  ;;  %v356_v58 = vadd.f32 %v355_v48, %v354_v45 }
 0x114   :  { %v201_v50 = vadd.f32 %v200_v43, %v120_v39  ;;  %v349_v51 = vadd.f32 %v348_v44, %v347_v37  ;;  %424 = vst [vmem:[#allocation2 + $0x8] sm:$0x3] %v417_v49  ;;  %v425_v52 = vsel %vm104_vm2, %v417_v49, 0.0  ;;  %v433_v53 = vmul.f32 %v417_v49, %v417_v49  ;;  %v2319_v55 = vpop.f32.mrb[9].mxu0  ;;  %504 = vst [vmem:[#allocation2 + $0xa] sm:$0x3] %v497_v54 }
 0x115   :  { %v270_v56 = vrot.slane %v269_v46, 1  ;;  %v278_v57 = vadd.f32 %v277_v47, %v276_v41  ;;  %v426_v59 = vrot.slane %v425_v52, 4  ;;  %v2327_v60 = vpop.f32.mrb[9].mxu1  ;;  %v420_v61 = vpop.f32.mrb[10].mxu0  ;;  %v505_v0 = vsel %vm104_vm2, %v497_v54, 0.0 }
 0x116   :  { %v350_v62 = vrot.slane %v349_v51, 1  ;;  %v434_v63 = vsel %vm104_vm2, %v433_v53, 0.0  ;;  %v513_v1 = vmul.f32 %v497_v54, %v497_v54  ;;  %v500_v2 = vpop.f32.mrb[10].mxu1  ;;  %v2320_v3 = vpop.f32.mrb[11].mxu0  ;;  %v357_v6 = vrot.slane %v356_v58, 2 }
 0x117   :  { %v271_v4 = vadd.f32 %v270_v56, %v269_v46  ;;  %v279_v5 = vrot.slane %v278_v57, 1  ;;  %v427_v7 = vadd.f32 %v426_v59, %v425_v52  ;;  %v2328_v8 = vpop.f32.mrb[11].mxu1  ;;  %v435_v10 = vrot.slane %v434_v63, 4 }
 0x118   :  { %v351_v9 = vadd.f32 %v350_v62, %v349_v51  ;;  %v506_v11 = vrot.slane %v505_v0, 4  ;;  %v514_v12 = vsel %vm104_vm2, %v513_v1, 0.0  ;;  %v358_v15 = vadd.f32 %v357_v6, %v356_v58 }
 0x119   :  { %v272_v13 = vadd.f32 %v271_v4, %v192_v42  ;;  %v280_v14 = vadd.f32 %v279_v5, %v278_v57  ;;  %v428_v16 = vrot.slane %v427_v7, 2  ;;  %v436_v17 = vadd.f32 %v435_v10, %v434_v63 }
 0x11a   :  { %v507_v18 = vadd.f32 %v506_v11, %v505_v0  ;;  %v515_v19 = vrot.slane %v514_v12, 4  ;;  %v359_v22 = vrot.slane %v358_v15, 1 }
 0x11b   :  { %v281_v20 = vadd.f32 %v280_v14, %v201_v50  ;;  %v352_v21 = vadd.f32 %v351_v9, %v272_v13  ;;  %v429_v23 = vadd.f32 %v428_v16, %v427_v7  ;;  %v577_v24 = vpop.f32.mrb[12].mxu0  ;;  %v437_v25 = vrot.slane %v436_v17, 2  ;;  %v657_v29 = vpop.f32.mrb[12].mxu1 }
 0x11c   :  { %v508_v26 = vrot.slane %v507_v18, 2  ;;  %v516_v27 = vadd.f32 %v515_v19, %v514_v12  ;;  %584 = vst [vmem:[#allocation2 + $0xc] sm:$0x3] %v577_v24  ;;  %v585_v28 = vsel %vm104_vm2, %v577_v24, 0.0  ;;  %v360_v30 = vadd.f32 %v359_v22, %v358_v15  ;;  %664 = vst [vmem:[#allocation2 + $0xe] sm:$0x3] %v657_v29 }
 0x11d   :  { %v430_v31 = vrot.slane %v429_v23, 1  ;;  %v586_v32 = vrot.slane %v585_v28, 4  ;;  %v593_v33 = vmul.f32 %v577_v24, %v577_v24  ;;  %v2335_v34 = vpop.f32.mrb[13].mxu0  ;;  %v2343_v35 = vpop.f32.mrb[13].mxu1  ;;  %v438_v36 = vadd.f32 %v437_v25, %v436_v17 }
 0x11e   :  { %v509_v37 = vadd.f32 %v508_v26, %v507_v18  ;;  %v517_v38 = vrot.slane %v516_v27, 2  ;;  %v665_v39 = vsel %vm104_vm2, %v657_v29, 0.0  ;;  %v580_v40 = vpop.f32.mrb[14].mxu0  ;;  %v660_v41 = vpop.f32.mrb[14].mxu1  ;;  %v361_v42 = vadd.f32 %v360_v30, %v281_v20 }
 0x11f   :  { %v431_v43 = vadd.f32 %v430_v31, %v429_v23  ;;  %v587_v44 = vadd.f32 %v586_v32, %v585_v28  ;;  %v594_v45 = vsel %vm104_vm2, %v593_v33, 0.0  ;;  %v2336_v46 = vpop.f32.mrb[15].mxu0  ;;  %v2344_v47 = vpop.f32.mrb[15].mxu1  ;;  %v439_v48 = vrot.slane %v438_v36, 1 }
 0x120   :  { %v510_v49 = vrot.slane %v509_v37, 1  ;;  %v518_v50 = vadd.f32 %v517_v38, %v516_v27  ;;  %v595_v51 = vrot.slane %v594_v45, 4  ;;  %v666_v54 = vrot.slane %v665_v39, 4 }
 0x121   :  { %v432_v52 = vadd.f32 %v431_v43, %v352_v21  ;;  %v588_v53 = vrot.slane %v587_v44, 2  ;;  %v673_v55 = vmul.f32 %v657_v29, %v657_v29  ;;  %v440_v56 = vadd.f32 %v439_v48, %v438_v36 }
 0x122   :  { %v511_v57 = vadd.f32 %v510_v49, %v509_v37  ;;  %v519_v58 = vrot.slane %v518_v50, 1  ;;  %v596_v59 = vadd.f32 %v595_v51, %v594_v45  ;;  %v667_v61 = vadd.f32 %v666_v54, %v665_v39 }
 0x123   :  { %v589_v60 = vadd.f32 %v588_v53, %v587_v44  ;;  %v674_v62 = vsel %vm104_vm2, %v673_v55, 0.0  ;;  %v737_v63 = vpop.f32.mrb[16].mxu0  ;;  %v441_v0 = vadd.f32 %v440_v56, %v361_v42  ;;  %v817_v4 = vpop.f32.mrb[16].mxu1 }
 0x124   :  { %v512_v1 = vadd.f32 %v511_v57, %v432_v52  ;;  %v520_v2 = vadd.f32 %v519_v58, %v518_v50  ;;  %v597_v3 = vrot.slane %v596_v59, 2  ;;  %744 = vst [vmem:[#allocation2 + $0x10] sm:$0x3] %v737_v63  ;;  %v2351_v5 = vpop.f32.mrb[17].mxu0  ;;  %v668_v7 = vrot.slane %v667_v61, 2  ;;  %v2359_v10 = vpop.f32.mrb[17].mxu1 }
 0x125   :  { %v590_v6 = vrot.slane %v589_v60, 1  ;;  %v675_v8 = vrot.slane %v674_v62, 4  ;;  %v745_v9 = vsel %vm104_vm2, %v737_v63, 0.0  ;;  %824 = vst [vmem:[#allocation2 + $0x12] sm:$0x3] %v817_v4  ;;  %v740_v11 = vpop.f32.mrb[18].mxu0  ;;  %v753_v15 = vmul.f32 %v737_v63, %v737_v63 }
 0x126   :  { %v521_v12 = vadd.f32 %v520_v2, %v441_v0  ;;  %v598_v13 = vadd.f32 %v597_v3, %v596_v59  ;;  %v746_v14 = vrot.slane %v745_v9, 4  ;;  %v820_v16 = vpop.f32.mrb[18].mxu1  ;;  %v2352_v17 = vpop.f32.mrb[19].mxu0  ;;  %v669_v19 = vadd.f32 %v668_v7, %v667_v61 }
 0x127   :  { %v591_v18 = vadd.f32 %v590_v6, %v589_v60  ;;  %v676_v20 = vadd.f32 %v675_v8, %v674_v62  ;;  %v825_v21 = vsel %vm104_vm2, %v817_v4, 0.0  ;;  %v2360_v22 = vpop.f32.mrb[19].mxu1  ;;  %v754_v25 = vsel %vm104_vm2, %v753_v15, 0.0 }
 0x128   :  { %v599_v23 = vrot.slane %v598_v13, 1  ;;  %v747_v24 = vadd.f32 %v746_v14, %v745_v9  ;;  %v826_v26 = vrot.slane %v825_v21, 4  ;;  %v670_v28 = vrot.slane %v669_v19, 1 }
 0x129   :  { %v592_v27 = vadd.f32 %v591_v18, %v512_v1  ;;  %v677_v29 = vrot.slane %v676_v20, 2  ;;  %v755_v30 = vrot.slane %v754_v25, 4  ;;  %v833_v34 = vmul.f32 %v817_v4, %v817_v4 }
 0x12a   :  { %v600_v31 = vadd.f32 %v599_v23, %v598_v13  ;;  %v748_v32 = vrot.slane %v747_v24, 2  ;;  %v827_v33 = vadd.f32 %v826_v26, %v825_v21  ;;  %v671_v35 = vadd.f32 %v670_v28, %v669_v19 }
 0x12b   :  { %v678_v36 = vadd.f32 %v677_v29, %v676_v20  ;;  %v756_v37 = vadd.f32 %v755_v30, %v754_v25  ;;  %v897_v38 = vpop.f32.mrb[20].mxu0  ;;  %v834_v42 = vsel %vm104_vm2, %v833_v34, 0.0  ;;  %v977_v43 = vpop.f32.mrb[20].mxu1 }
 0x12c   :  { %v601_v39 = vadd.f32 %v600_v31, %v521_v12  ;;  %v749_v40 = vadd.f32 %v748_v32, %v747_v24  ;;  %v828_v41 = vrot.slane %v827_v33, 2  ;;  %904 = vst [vmem:[#allocation2 + $0x14] sm:$0x3] %v897_v38  ;;  %v2367_v44 = vpop.f32.mrb[21].mxu0  ;;  %v672_v45 = vadd.f32 %v671_v35, %v592_v27  ;;  %984 = vst [vmem:[#allocation2 + $0x16] sm:$0x3] %v977_v43 }
 0x12d   :  { %v679_v46 = vrot.slane %v678_v36, 1  ;;  %v757_v47 = vrot.slane %v756_v37, 2  ;;  %v835_v48 = vrot.slane %v834_v42, 4  ;;  %v2375_v49 = vpop.f32.mrb[21].mxu1  ;;  %v900_v50 = vpop.f32.mrb[22].mxu0  ;;  %v905_v53 = vsel %vm104_vm2, %v897_v38, 0.0 }
 0x12e   :  { %v750_v51 = vrot.slane %v749_v40, 1  ;;  %v829_v52 = vadd.f32 %v828_v41, %v827_v33  ;;  %v913_v54 = vmul.f32 %v897_v38, %v897_v38  ;;  %v980_v55 = vpop.f32.mrb[22].mxu1  ;;  %v2368_v56 = vpop.f32.mrb[23].mxu0  ;;  %v906_v60 = vrot.slane %v905_v53, 4 }
 0x12f   :  { %v680_v57 = vadd.f32 %v679_v46, %v678_v36  ;;  %v758_v58 = vadd.f32 %v757_v47, %v756_v37  ;;  %v836_v59 = vadd.f32 %v835_v48, %v834_v42  ;;  %v2376_v61 = vpop.f32.mrb[23].mxu1  ;;  %v985_v1 = vsel %vm104_vm2, %v977_v43, 0.0 }
 0x130   :  { %v751_v62 = vadd.f32 %v750_v51, %v749_v40  ;;  %v830_v63 = vrot.slane %v829_v52, 1  ;;  %v914_v0 = vsel %vm104_vm2, %v913_v54, 0.0  ;;  %v907_v5 = vadd.f32 %v906_v60, %v905_v53 }
 0x131   :  { %v681_v2 = vadd.f32 %v680_v57, %v601_v39  ;;  %v759_v3 = vrot.slane %v758_v58, 1  ;;  %v837_v4 = vrot.slane %v836_v59, 2  ;;  %v915_v8 = vrot.slane %v914_v0, 4 }
 0x132   :  { %v752_v6 = vadd.f32 %v751_v62, %v672_v45  ;;  %v831_v7 = vadd.f32 %v830_v63, %v829_v52  ;;  %v986_v9 = vrot.slane %v985_v1, 4  ;;  %v908_v12 = vrot.slane %v907_v5, 2 }
 0x133   :  { %v760_v10 = vadd.f32 %v759_v3, %v758_v58  ;;  %v838_v11 = vadd.f32 %v837_v4, %v836_v59  ;;  %v993_v13 = vmul.f32 %v977_v43, %v977_v43  ;;  %v1057_v14 = vpop.f32.mrb[24].mxu0  ;;  %v916_v16 = vadd.f32 %v915_v8, %v914_v0  ;;  %v1137_v19 = vpop.f32.mrb[24].mxu1 }
 0x134   :  { %v832_v15 = vadd.f32 %v831_v7, %v752_v6  ;;  %v987_v17 = vadd.f32 %v986_v9, %v985_v1  ;;  %1064 = vst [vmem:[#allocation2 + $0x18] sm:$0x3] %v1057_v14  ;;  %v1065_v18 = vsel %vm104_vm2, %v1057_v14, 0.0  ;;  %v2383_v20 = vpop.f32.mrb[25].mxu0  ;;  %v909_v23 = vadd.f32 %v908_v12, %v907_v5  ;;  %1144 = vst [vmem:[#allocation2 + $0x1a] sm:$0x3] %v1137_v19 }
 0x135   :  { %v761_v21 = vadd.f32 %v760_v10, %v681_v2  ;;  %v839_v22 = vrot.slane %v838_v11, 1  ;;  %v994_v24 = vsel %vm104_vm2, %v993_v13, 0.0  ;;  %v2391_v25 = vpop.f32.mrb[25].mxu1  ;;  %v1060_v26 = vpop.f32.mrb[26].mxu0  ;;  %v917_v27 = vrot.slane %v916_v16, 2 }
 0x136   :  { %v988_v28 = vrot.slane %v987_v17, 2  ;;  %v995_v29 = vrot.slane %v994_v24, 4  ;;  %v1066_v30 = vrot.slane %v1065_v18, 4  ;;  %v1140_v31 = vpop.f32.mrb[26].mxu1  ;;  %v2384_v32 = vpop.f32.mrb[27].mxu0  ;;  %v910_v34 = vrot.slane %v909_v23, 1 }
 0x137   :  { %v840_v33 = vadd.f32 %v839_v22, %v838_v11  ;;  %v1073_v35 = vmul.f32 %v1057_v14, %v1057_v14  ;;  %v1145_v36 = vsel %vm104_vm2, %v1137_v19, 0.0  ;;  %v2392_v37 = vpop.f32.mrb[27].mxu1  ;;  %v918_v38 = vadd.f32 %v917_v27, %v916_v16 }
 0x138   :  { %v989_v39 = vadd.f32 %v988_v28, %v987_v17  ;;  %v996_v40 = vadd.f32 %v995_v29, %v994_v24  ;;  %v1067_v41 = vadd.f32 %v1066_v30, %v1065_v18  ;;  %v911_v43 = vadd.f32 %v910_v34, %v909_v23 }
 0x139   :  { %v841_v42 = vadd.f32 %v840_v33, %v761_v21  ;;  %v1074_v44 = vsel %vm104_vm2, %v1073_v35, 0.0  ;;  %v1146_v45 = vrot.slane %v1145_v36, 4  ;;  %v919_v46 = vrot.slane %v918_v38, 1 }
 0x13a   :  { %v990_v47 = vrot.slane %v989_v39, 1  ;;  %v997_v48 = vrot.slane %v996_v40, 2  ;;  %v1068_v49 = vrot.slane %v1067_v41, 2  ;;  %v912_v50 = vadd.f32 %v911_v43, %v832_v15 }
 0x13b   :  { %v1075_v51 = vrot.slane %v1074_v44, 4  ;;  %v1147_v52 = vadd.f32 %v1146_v45, %v1145_v36  ;;  %v1153_v53 = vmul.f32 %v1137_v19, %v1137_v19  ;;  %v1217_v54 = vpop.f32.mrb[28].mxu0  ;;  %v920_v55 = vadd.f32 %v919_v46, %v918_v38  ;;  %v1297_v59 = vpop.f32.mrb[28].mxu1 }
 0x13c   :  { %v991_v56 = vadd.f32 %v990_v47, %v989_v39  ;;  %v998_v57 = vadd.f32 %v997_v48, %v996_v40  ;;  %v1069_v58 = vadd.f32 %v1068_v49, %v1067_v41  ;;  %1224 = vst [vmem:[#allocation2 + $0x1c] sm:$0x3] %v1217_v54  ;;  %v2399_v60 = vpop.f32.mrb[29].mxu0  ;;  %v1225_v0 = vsel %vm104_vm2, %v1217_v54, 0.0  ;;  %1304 = vst [vmem:[#allocation2 + $0x1e] sm:$0x3] %v1297_v59 }
 0x13d   :  { %v1076_v61 = vadd.f32 %v1075_v51, %v1074_v44  ;;  %v1148_v62 = vrot.slane %v1147_v52, 2  ;;  %v1154_v63 = vsel %vm104_vm2, %v1153_v53, 0.0  ;;  %v2407_v1 = vpop.f32.mrb[29].mxu1  ;;  %v1220_v2 = vpop.f32.mrb[30].mxu0  ;;  %v921_v3 = vadd.f32 %v920_v55, %v841_v42 }
 0x13e   :  { %v992_v4 = vadd.f32 %v991_v56, %v912_v50  ;;  %v999_v5 = vrot.slane %v998_v57, 1  ;;  %v1070_v6 = vrot.slane %v1069_v58, 1  ;;  %v1300_v7 = vpop.f32.mrb[30].mxu1  ;;  %v2400_v8 = vpop.f32.mrb[31].mxu0  ;;  %v1155_v11 = vrot.slane %v1154_v63, 4 }
 0x13f   :  { %v1077_v9 = vrot.slane %v1076_v61, 2  ;;  %v1149_v10 = vadd.f32 %v1148_v62, %v1147_v52  ;;  %v1226_v12 = vrot.slane %v1225_v0, 4  ;;  %v2408_v13 = vpop.f32.mrb[31].mxu1  ;;  %v1233_v16 = vmul.f32 %v1217_v54, %v1217_v54 }
 0x140   :  { %v1000_v14 = vadd.f32 %v999_v5, %v998_v57  ;;  %v1071_v15 = vadd.f32 %v1070_v6, %v1069_v58  ;;  %v1305_v17 = vsel %vm104_vm2, %v1297_v59, 0.0  ;;  %v1156_v20 = vadd.f32 %v1155_v11, %v1154_v63  ;;  %v1328_v11 = vld [vmem:[#allocation3] sm:$0x1] }
 0x141   :  { %v1078_v18 = vadd.f32 %v1077_v9, %v1076_v61  ;;  %v1150_v19 = vrot.slane %v1149_v10, 1  ;;  %v1227_v21 = vadd.f32 %v1226_v12, %v1225_v0  ;;  %v1234_v24 = vsel %vm104_vm2, %v1233_v16, 0.0 }
 0x142   :  { %v1001_v22 = vadd.f32 %v1000_v14, %v921_v3  ;;  %v1072_v23 = vadd.f32 %v1071_v15, %v992_v4  ;;  %v1306_v25 = vrot.slane %v1305_v17, 4  ;;  %v1157_v28 = vrot.slane %v1156_v20, 2 }
 0x143   :  { %v1079_v26 = vrot.slane %v1078_v18, 1  ;;  %v1151_v27 = vadd.f32 %v1150_v19, %v1149_v10  ;;  %v1228_v29 = vrot.slane %v1227_v21, 2  ;;  %v1235_v30 = vrot.slane %v1234_v24, 4 }
 0x144   :  { %v1307_v31 = vadd.f32 %v1306_v25, %v1305_v17  ;;  %v1313_v32 = vmul.f32 %v1297_v59, %v1297_v59  ;;  %v1158_v35 = vadd.f32 %v1157_v28, %v1156_v20  ;;  %v1337_v5 = vlaneseq  ;;  %v1332_v17 = vld [vmem:[#allocation5] sm:$0x1]  ;;  %v1335_v20 = vld [vmem:[#allocation2] sm:$0x3]  ;;  %v1590_v28 = vld [vmem:[#allocation2 + $0xa] sm:$0x3] }
 0x145   :  { %v1080_v33 = vadd.f32 %v1079_v26, %v1078_v18  ;;  %v1152_v34 = vadd.f32 %v1151_v27, %v1072_v23  ;;  %v1229_v36 = vadd.f32 %v1228_v29, %v1227_v21  ;;  %v1236_v37 = vadd.f32 %v1235_v30, %v1234_v24  ;;  %v1396_v21 = vld [vmem:[#allocation2 + $0x2] sm:$0x3]  ;;  %v1493_v23 = vld [vmem:[#allocation2 + $0x6] sm:$0x3]  ;;  %v1541_v24 = vld [vmem:[#allocation2 + $0x8] sm:$0x3] }
 0x146   :  { %v1308_v38 = vrot.slane %v1307_v31, 2  ;;  %v1314_v39 = vsel %vm104_vm2, %v1313_v32, 0.0  ;;  %v1159_v41 = vrot.slane %v1158_v35, 1  ;;  %v1338_v6 = vshrl.u32 %v1337_v5, 7  ;;  %v1638_v29 = vld [vmem:[#allocation2 + $0xc] sm:$0x3]  ;;  %vm2940_vm2 = vmand %vm1678_vm9, %vm1679_vm10 }
 0x147   :  { %v1081_v40 = vadd.f32 %v1080_v33, %v1001_v22  ;;  %v1230_v42 = vrot.slane %v1229_v36, 1  ;;  %v1315_v43 = vrot.slane %v1314_v39, 4  ;;  %v1237_v44 = vrot.slane %v1236_v37, 2  ;;  %v1444_v22 = vld [vmem:[#allocation2 + $0x4] sm:$0x3] }
 0x148   :  { %v1309_v45 = vadd.f32 %v1308_v38, %v1307_v31  ;;  %v1160_v46 = vadd.f32 %v1159_v41, %v1158_v35  ;;  %v2501_v7 = vmov 1966171168   ;;  %v2502_v9 = vmov 286326784   ;;  %v1687_v30 = vld [vmem:[#allocation2 + $0xe] sm:$0x3] }
 0x149   :  { %v1231_v47 = vadd.f32 %v1230_v42, %v1229_v36  ;;  %v1316_v48 = vadd.f32 %v1315_v43, %v1314_v39  ;;  %v1238_v49 = vadd.f32 %v1237_v44, %v1236_v37  ;;  %v1354_v8 = vunpack.c.l.s4 %v2501_v7  ;;  %v1735_v35 = vld [vmem:[#allocation2 + $0x10] sm:$0x3]  ;;  %v1781_v36 = vld [vmem:[#allocation2 + $0x12] sm:$0x3]  ;;  %v1827_v37 = vld [vmem:[#allocation2 + $0x14] sm:$0x3] }
 0x14a   :  { %v1310_v50 = vrot.slane %v1309_v45, 1  ;;  %v1161_v51 = vadd.f32 %v1160_v46, %v1081_v40  ;;  %v1372_v10 = vunpack.c.l.s4 %v2502_v9  ;;  %v1339_v12 = vsub.s32 0, %v1338_v6 }
 0x14b   :  { %v1232_v52 = vadd.f32 %v1231_v47, %v1152_v34  ;;  %v1317_v53 = vrot.slane %v1316_v48, 2  ;;  %v1239_v54 = vrot.slane %v1238_v49, 1  ;;  %v1355_v15 = vunpack.c.0.s8 %v1354_v8 }
 0x14c   :  { %v1311_v55 = vadd.f32 %v1310_v50, %v1309_v45  ;;  %v1373_v16 = vunpack.c.0.s8 %v1372_v10 }
 0x14d   :  { %v1318_v56 = vadd.f32 %v1317_v53, %v1316_v48  ;;  %v1240_v57 = vadd.f32 %v1239_v54, %v1238_v49  ;;  %v2810_v26 = vsub.s32 %v1355_v15, %v1338_v6  ;;  %v1919_v15 = vld [vmem:[#allocation2 + $0x18] sm:$0x3] }
 0x14e   :  { %v1312_v58 = vadd.f32 %v1311_v55, %v1232_v52  ;;  %v2812_v27 = vsub.s32 %v1373_v16, %v1338_v6  ;;  %v1965_v16 = vld [vmem:[#allocation2 + $0x1a] sm:$0x3] }
 0x14f   :  { %v1319_v59 = vrot.slane %v1318_v56, 1  ;;  %v1241_v60 = vadd.f32 %v1240_v57, %v1161_v51 }
 0x150   :  { %v1323_v61 = vmul.f32 0.03125, %v1312_v58 }
 0x151   :  { %v1320_v62 = vadd.f32 %v1319_v59, %v1318_v56 }
 0x152   :  { %v1325_v0 = vmul.f32 %v1323_v61, %v1323_v61 }
 0x153   :  { %v1321_v63 = vadd.f32 %v1320_v62, %v1241_v60 }
 0x155   :  { %v1324_v1 = vmul.f32 0.03125, %v1321_v63 }
 0x157   :  { %v1326_v2 = vsub.f32 %v1324_v1, %v1325_v0 }
 0x159   :  { %v1327_v3 = vmax.f32 %v1326_v2, 0.0 }
 0x15b   :  { %v1329_v4 = vadd.f32 1e-05, %v1327_v3 }
 0x15d   :  { %2447 = vrsqrt.f32 %v1329_v4 }
 0x167   :  { %v2448_v13 = vpop.eup %2447 }
 0x168   :  { %v1331_v14 = vmul.f32 %v2448_v13, %v1328_v11 }
 0x16a   :  { %v1333_v18 = vmul.f32 %v1331_v14, %v1323_v61  ;;  %v2808_v19 = vrot.slane %v1331_v14, %v1339_v12  ;;  %v1873_v14 = vld [vmem:[#allocation2 + $0x16] sm:$0x3] }
 0x16c   :  { %v1334_v25 = vsub.f32 %v1332_v17, %v1333_v18  ;;  %v1342_v31 = vmul.f32 %v2808_v19, %v1335_v20  ;;  %v1397_v32 = vmul.f32 %v1396_v21, %v2808_v19  ;;  %v1445_v33 = vmul.f32 %v1444_v22, %v2808_v19 }
 0x16d   :  { %v1494_v34 = vmul.f32 %v1493_v23, %v2808_v19  ;;  %v1542_v39 = vmul.f32 %v1541_v24, %v2808_v19  ;;  %v1591_v40 = vmul.f32 %v1590_v28, %v2808_v19  ;;  %v1639_v41 = vmul.f32 %v1638_v29, %v2808_v19 }
 0x16e   :  { %v2818_v38 = vrot.slane %v1334_v25, %v1339_v12  ;;  %v1688_v42 = vmul.f32 %v1687_v30, %v2808_v19  ;;  %v2825_v43 = vmul.f32 %v1735_v35, %v2808_v19  ;;  %v2828_v44 = vmul.f32 %v1781_v36, %v2808_v19 }
 0x16f   :  { %v2831_v45 = vmul.f32 %v1827_v37, %v2808_v19  ;;  %v2855_v23 = vmul.f32 %v1873_v14, %v2808_v19  ;;  %v2858_v24 = vmul.f32 %v1919_v15, %v2808_v19  ;;  %v2861_v25 = vmul.f32 %v1965_v16, %v2808_v19 }
 0x170   :  { %v1349_v46 = vadd.f32 %v2818_v38, %v1342_v31  ;;  %v1398_v47 = vadd.f32 %v1397_v32, %v2818_v38  ;;  %v1446_v48 = vadd.f32 %v1445_v33, %v2818_v38  ;;  %v1495_v49 = vadd.f32 %v1494_v34, %v2818_v38  ;;  %v1390_v33 = vld [vmem:[%s3249_s4] sm:$0x1] }
 0x171   :  { %v1543_v50 = vadd.f32 %v1542_v39, %v2818_v38  ;;  %v1592_v51 = vadd.f32 %v1591_v40, %v2818_v38  ;;  %v1640_v52 = vadd.f32 %v1639_v41, %v2818_v38  ;;  %v1689_v53 = vadd.f32 %v1688_v42, %v2818_v38  ;;  %v1487_v42 = vld [vmem:[%s3249_s4] sm:$0x2] }
 0x172   :  { %v1350_v54 = vmax.f32 %v1349_v46, 0.0  ;;  %v1399_v55 = vmax.f32 %v1398_v47, 0.0  ;;  %v1447_v56 = vmax.f32 %v1446_v48, 0.0  ;;  %v1496_v57 = vmax.f32 %v1495_v49, 0.0  ;;  %v1393_v48 = vld [vmem:[%s3249_s4 + $0x8] sm:$0x1] }
 0x173   :  { %v1544_v58 = vmax.f32 %v1543_v50, 0.0  ;;  %v1593_v59 = vmax.f32 %v1592_v51, 0.0  ;;  %v1641_v60 = vmax.f32 %v1640_v52, 0.0  ;;  %v1690_v61 = vmax.f32 %v1689_v53, 0.0 }
 0x174   :  { %v1351_v62 = vpack.c.bf16 %v1350_v54, %v1350_v54  ;;  %v1400_v63 = vpack.c.bf16 %v1399_v55, %v1399_v55  ;;  %v1448_v0 = vpack.c.bf16 %v1447_v56, %v1447_v56  ;;  %v1497_v1 = vpack.c.bf16 %v1496_v57, %v1496_v57  ;;  %v1490_v56 = vld [vmem:[%s3249_s4 + $0x8] sm:$0x2] }
 0x175   :  { %v1545_v2 = vpack.c.bf16 %v1544_v58, %v1544_v58  ;;  %v1594_v3 = vpack.c.bf16 %v1593_v59, %v1593_v59  ;;  %v1642_v4 = vpack.c.bf16 %v1641_v60, %v1641_v60  ;;  %v1691_v5 = vpack.c.bf16 %v1690_v61, %v1690_v61 }
 0x176   :  { %v1359_v6 = vrot.slane %v1351_v62, %v2810_v26  ;;  %v1408_v7 = vrot.slane %v1400_v63, %v2810_v26  ;;  %v1456_v8 = vrot.slane %v1448_v0, %v2810_v26  ;;  %v1505_v9 = vrot.slane %v1497_v1, %v2810_v26  ;;  %v1584_v1 = vld [vmem:[%s3249_s4] sm:$0x4] }
 0x177   :  { %v1553_v10 = vrot.slane %v1545_v2, %v2810_v26  ;;  %v1602_v11 = vrot.slane %v1594_v3, %v2810_v26  ;;  %v1650_v12 = vrot.slane %v1642_v4, %v2810_v26  ;;  %v1699_v13 = vrot.slane %v1691_v5, %v2810_v26 }
 0x178   :  { %v1366_v17 = vrot.slane %v1359_v6, %v2810_v26  ;;  %v1415_v18 = vrot.slane %v1408_v7, %v2810_v26  ;;  %v1463_v20 = vrot.slane %v1456_v8, %v2810_v26  ;;  %v1512_v21 = vrot.slane %v1505_v9, %v2810_v26  ;;  %v1587_v6 = vld [vmem:[%s3249_s4 + $0x8] sm:$0x4] }
 0x179   :  { %v1560_v22 = vrot.slane %v1553_v10, %v2810_v26  ;;  %v1609_v37 = vrot.slane %v1602_v11, %v2810_v26  ;;  %v1657_v46 = vrot.slane %v1650_v12, %v2810_v26  ;;  %v2885_v47 = vrot.slane %v1699_v13, %v2810_v26  ;;  %v1681_v13 = vld [vmem:[%s3249_s4] sm:$0x8] }
 0x17a   :  { %v1368_v28 = vunpack.i.h.s16 %v1366_v17  ;;  %v2217_v29 = vpack.i.b16 %v1366_v17, %v1366_v17  ;;  %v1417_v30 = vunpack.i.h.s16 %v1415_v18  ;;  %v2218_v31 = vpack.i.b16 %v1415_v18, %v1415_v18 }
 0x17b   :  { %v1465_v34 = vunpack.i.h.s16 %v1463_v20  ;;  %v2219_v35 = vpack.i.b16 %v1463_v20, %v1463_v20  ;;  %v1514_v36 = vunpack.i.h.s16 %v1512_v21  ;;  %v2220_v52 = vpack.i.b16 %v1512_v21, %v1512_v21 }
 0x17c   :  { %v1370_v39 = vpack.i.b16 %v1368_v28, %v1368_v28  ;;  %v1377_v40 = vrot.slane %v2217_v29, %v2812_v27  ;;  %v2890_v49 = vpack.i.b16 %v1417_v30, %v1417_v30  ;;  %v1426_v55 = vrot.slane %v2218_v31, %v2812_v27  ;;  %v1684_v29 = vld [vmem:[%s3249_s4 + $0x8] sm:$0x8] }
 0x17d   :  { %v1467_v50 = vpack.i.b16 %v1465_v34, %v1465_v34  ;;  %v1474_v51 = vrot.slane %v2219_v35, %v2812_v27  ;;  %v1562_v57 = vunpack.i.h.s16 %v1560_v22  ;;  %v2906_v60 = vpack.i.b16 %v1514_v36, %v1514_v36 }
 0x17e   :  { %v1384_v53 = vrot.slane %v1370_v39, %v2812_v27  ;;  %v1391_v54 = vsel %vm2865_vm13, %v1377_v40, %v1390_v33  ;;  %v2221_v61 = vpack.i.b16 %v1560_v22, %v1560_v22  ;;  %v1611_v2 = vunpack.i.h.s16 %v1609_v37 }
 0x17f   :  { %1392 = vst [vmem:[%s3249_s4] sm:$0x1] %v1391_v54  ;;  %v1481_v58 = vrot.slane %v1467_v50, %v2812_v27  ;;  %v1488_v59 = vsel %vm2876_vm14, %v1474_v51, %v1487_v42  ;;  %v1564_v63 = vpack.i.b16 %v1562_v57, %v1562_v57  ;;  %v2222_v3 = vpack.i.b16 %v1609_v37, %v1609_v37 }
 0x180   :  { %v1394_v62 = vsel %vm2865_vm13, %v1384_v53, %v1393_v48  ;;  %1489 = vst [vmem:[%s3249_s4] sm:$0x2] %v1488_v59  ;;  %v1571_v5 = vrot.slane %v2221_v61, %v2812_v27  ;;  %v1659_v7 = vunpack.i.h.s16 %v1657_v46  ;;  %v2223_v8 = vpack.i.b16 %v1657_v46, %v1657_v46 }
 0x181   :  { %1395 = vst [vmem:[%s3249_s4 + $0x8] sm:$0x1] %v1394_v62  ;;  %v1491_v4 = vsel %vm2876_vm14, %v1481_v58, %v1490_v56  ;;  %v1433_v9 = vrot.slane %v2890_v49, %v2812_v27  ;;  %v1523_v10 = vrot.slane %v2220_v52, %v2812_v27  ;;  %v1578_v11 = vrot.slane %v1564_v63, %v2812_v27 }
 0x182   :  { %1492 = vst [vmem:[%s3249_s4 + $0x8] sm:$0x2] %v1491_v4  ;;  %v1708_v14 = vunpack.i.h.s16 %v2885_v47  ;;  %v1530_v15 = vrot.slane %v2906_v60, %v2812_v27  ;;  %v1585_v16 = vsel %vm2915_vm0, %v1571_v5, %v1584_v1  ;;  %v1661_v17 = vpack.i.b16 %v1659_v7, %v1659_v7 }
 0x183   :  { %v1668_v18 = vrot.slane %v2223_v8, %v2812_v27  ;;  %1586 = vst [vmem:[%s3249_s4] sm:$0x4] %v1585_v16  ;;  %v1588_v21 = vsel %vm2915_vm0, %v1578_v11, %v1587_v6  ;;  %v1613_v22 = vpack.i.b16 %v1611_v2, %v1611_v2  ;;  %v1620_v28 = vrot.slane %v2222_v3, %v2812_v27 }
 0x184   :  { %v1737_v30 = vadd.f32 %v2825_v43, %v2818_v38  ;;  %1589 = vst [vmem:[%s3249_s4 + $0x8] sm:$0x4] %v1588_v21  ;;  %v1675_v33 = vrot.slane %v1661_v17, %v2812_v27  ;;  %v2224_v35 = vpack.i.b16 %v2885_v47, %v2885_v47  ;;  %v1783_v43 = vadd.f32 %v2828_v44, %v2818_v38 }
 0x185   :  { %v1682_v34 = vsel %vm2940_vm2, %v1668_v18, %v1681_v13  ;;  %v1710_v37 = vpack.i.b16 %v1708_v14, %v1708_v14  ;;  %v1829_v40 = vadd.f32 %v2831_v45, %v2818_v38  ;;  %v1875_v42 = vadd.f32 %v2855_v23, %v2818_v38 }
 0x186   :  { %v1438_v36 = vld [vmem:[%s3249_s4] sm:$0x1]  ;;  %1683 = vst [vmem:[%s3249_s4] sm:$0x8] %v1682_v34  ;;  %v1738_v39 = vmax.f32 %v1737_v30, 0.0  ;;  %v1685_v47 = vsel %vm2940_vm2, %v1675_v33, %v1684_v29  ;;  %v1784_v48 = vmax.f32 %v1783_v43, 0.0  ;;  %v1921_v49 = vadd.f32 %v2858_v24, %v2818_v38 }
 0x187   :  { %v1439_v46 = vsel %vm2955_vm4, %v1426_v55, %v1438_v36  ;;  %v1535_v44 = vld [vmem:[%s3249_s4] sm:$0x2]  ;;  %1686 = vst [vmem:[%s3249_s4 + $0x8] sm:$0x8] %v1685_v47  ;;  %v1830_v51 = vmax.f32 %v1829_v40, 0.0  ;;  %v1876_v52 = vmax.f32 %v1875_v42, 0.0  ;;  %v1967_v57 = vadd.f32 %v2861_v25, %v2818_v38 }
 0x188   :  { %1440 = vst [vmem:[%s3249_s4] sm:$0x1] %v1439_v46  ;;  %v1441_v45 = vld [vmem:[%s3249_s4 + $0x8] sm:$0x1]  ;;  %v1536_v23 = vsel %vm2972_vm3, %v1523_v10, %v1535_v44  ;;  %v1739_v50 = vpack.c.bf16 %v1738_v39, %v1738_v39  ;;  %v1785_v55 = vpack.c.bf16 %v1784_v48, %v1784_v48  ;;  %v1922_v56 = vmax.f32 %v1921_v49, 0.0  ;;  %v1778_v43 = vld [vmem:[%s3249_s4 + $0xc] sm:$0x1] }
 0x189   :  { %v1442_v24 = vsel %vm2955_vm4, %v1433_v9, %v1441_v45  ;;  %1537 = vst [vmem:[%s3249_s4] sm:$0x2] %v1536_v23  ;;  %v1538_v53 = vld [vmem:[%s3249_s4 + $0x8] sm:$0x2]  ;;  %v1831_v60 = vpack.c.bf16 %v1830_v51, %v1830_v51  ;;  %v1877_v61 = vpack.c.bf16 %v1876_v52, %v1876_v52  ;;  %v1627_v62 = vrot.slane %v1613_v22, %v2812_v27  ;;  %v1775_v22 = vld [vmem:[%s3249_s4 + $0x4] sm:$0x1] }
 0x18a   :  { %1443 = vst [vmem:[%s3249_s4 + $0x8] sm:$0x1] %v1442_v24  ;;  %v1539_v58 = vsel %vm2972_vm3, %v1530_v15, %v1538_v53  ;;  %v1747_v59 = vrot.slane %v1739_v50, %v2810_v26  ;;  %v1632_v25 = vld [vmem:[%s3249_s4] sm:$0x4]  ;;  %v1717_v63 = vrot.slane %v2224_v35, %v2812_v27  ;;  %v1793_v2 = vrot.slane %v1785_v55, %v2810_v26  ;;  %v2011_v40 = vld [vmem:[#allocation2 + $0x1c] sm:$0x3] }
 0x18b   :  { %1540 = vst [vmem:[%s3249_s4 + $0x8] sm:$0x2] %v1539_v58  ;;  %v1923_v3 = vpack.c.bf16 %v1922_v56, %v1922_v56  ;;  %v1633_v4 = vsel %vm3026_vm5, %v1620_v28, %v1632_v25  ;;  %v1635_v5 = vld [vmem:[%s3249_s4 + $0x8] sm:$0x4]  ;;  %v1724_v6 = vrot.slane %v1710_v37, %v2812_v27  ;;  %v1839_v8 = vrot.slane %v1831_v60, %v2810_v26  ;;  %v1867_v47 = vld [vmem:[%s3249_s4 + $0x4] sm:$0x2] }
 0x18c   :  { %v1754_v7 = vrot.slane %v1747_v59, %v2810_v26  ;;  %1634 = vst [vmem:[%s3249_s4] sm:$0x4] %v1633_v4  ;;  %v1636_v9 = vsel %vm3026_vm5, %v1627_v62, %v1635_v5  ;;  %v1885_v11 = vrot.slane %v1877_v61, %v2810_v26  ;;  %v1968_v14 = vmax.f32 %v1967_v57, 0.0  ;;  %v1870_v45 = vld [vmem:[%s3249_s4 + $0xc] sm:$0x2]  ;;  %v1959_v58 = vld [vmem:[%s3249_s4 + $0x4] sm:$0x4] }
 0x18d   :  { %v1729_v10 = vld [vmem:[%s3249_s4] sm:$0x8]  ;;  %v1931_v13 = vrot.slane %v1923_v3, %v2810_v26  ;;  %1637 = vst [vmem:[%s3249_s4 + $0x8] sm:$0x4] %v1636_v9  ;;  %v1846_v18 = vrot.slane %v1839_v8, %v2810_v26  ;;  %v1800_v28 = vrot.slane %v1793_v2, %v2810_v26  ;;  %v2012_v50 = vmul.f32 %v2011_v40, %v2808_v19  ;;  %v2057_v59 = vld [vmem:[#allocation2 + $0x1e] sm:$0x3] }
 0x18e   :  { %v1730_v15 = vsel %vm3048_vm6, %v1717_v63, %v1729_v10  ;;  %v1756_v16 = vunpack.i.h.s16 %v1754_v7  ;;  %v2225_v17 = vpack.i.b16 %v1754_v7, %v1754_v7  ;;  %v1732_v21 = vld [vmem:[%s3249_s4 + $0x8] sm:$0x8]  ;;  %v1892_v37 = vrot.slane %v1885_v11, %v2810_v26  ;;  %v1962_v62 = vld [vmem:[%s3249_s4 + $0xc] sm:$0x4] }
 0x18f   :  { %1731 = vst [vmem:[%s3249_s4] sm:$0x8] %v1730_v15  ;;  %v1938_v29 = vrot.slane %v1931_v13, %v2810_v26  ;;  %v1733_v30 = vsel %vm3048_vm6, %v1724_v6, %v1732_v21  ;;  %v1848_v35 = vunpack.i.h.s16 %v1846_v18  ;;  %v2227_v36 = vpack.i.b16 %v1846_v18, %v1846_v18 }
 0x190   :  { %v1758_v33 = vpack.i.b16 %v1756_v16, %v1756_v16  ;;  %v1765_v34 = vrot.slane %v2225_v17, %v2812_v27  ;;  %1734 = vst [vmem:[%s3249_s4 + $0x8] sm:$0x8] %v1733_v30  ;;  %v1969_v39 = vpack.c.bf16 %v1968_v14, %v1968_v14  ;;  %v1802_v48 = vunpack.i.h.s16 %v1800_v28 }
 0x191   :  { %v1850_v44 = vpack.i.b16 %v1848_v35, %v1848_v35  ;;  %v1857_v49 = vrot.slane %v2227_v36, %v2812_v27  ;;  %v1940_v23 = vunpack.i.h.s16 %v1938_v29  ;;  %v2226_v52 = vpack.i.b16 %v1800_v28, %v1800_v28 }
 0x192   :  { %v1772_v42 = vrot.slane %v1758_v33, %v2812_v27  ;;  %v1776_v46 = vsel %vm2865_vm13, %v1765_v34, %v1775_v22  ;;  %v2229_v53 = vpack.i.b16 %v1938_v29, %v1938_v29  ;;  %v1894_v56 = vunpack.i.h.s16 %v1892_v37 }
 0x193   :  { %1777 = vst [vmem:[%s3249_s4 + $0x4] sm:$0x1] %v1776_v46  ;;  %v1864_v24 = vrot.slane %v1850_v44, %v2812_v27  ;;  %v1868_v55 = vsel %vm2876_vm14, %v1857_v49, %v1867_v47  ;;  %v1942_v57 = vpack.i.b16 %v1940_v23, %v1940_v23  ;;  %v1977_v32 = vrot.slane %v1969_v39, %v2810_v26  ;;  %v2051_v44 = vld [vmem:[%s3249_s4 + $0x4] sm:$0x8]  ;;  %v2054_v23 = vld [vmem:[%s3249_s4 + $0xc] sm:$0x8] }
 0x194   :  { %v1779_v51 = vsel %vm2865_vm13, %v1772_v42, %v1778_v43  ;;  %1869 = vst [vmem:[%s3249_s4 + $0x4] sm:$0x2] %v1868_v55  ;;  %v1949_v61 = vrot.slane %v2229_v53, %v2812_v27  ;;  %v2013_v25 = vadd.f32 %v2012_v50, %v2818_v38  ;;  %v2058_v63 = vmul.f32 %v2057_v59, %v2808_v19 }
 0x195   :  { %1780 = vst [vmem:[%s3249_s4 + $0xc] sm:$0x1] %v1779_v51  ;;  %v1871_v60 = vsel %vm2876_vm14, %v1864_v24, %v1870_v45  ;;  %v1804_v2 = vpack.i.b16 %v1802_v48, %v1802_v48  ;;  %v1956_v3 = vrot.slane %v1942_v57, %v2812_v27  ;;  %v1984_v41 = vrot.slane %v1977_v32, %v2810_v26 }
 0x196   :  { %1872 = vst [vmem:[%s3249_s4 + $0xc] sm:$0x2] %v1871_v60  ;;  %v2228_v4 = vpack.i.b16 %v1892_v37, %v1892_v37  ;;  %v1960_v5 = vsel %vm2915_vm0, %v1949_v61, %v1959_v58  ;;  %v2014_v6 = vmax.f32 %v2013_v25, 0.0  ;;  %v2059_v7 = vadd.f32 %v2058_v63, %v2818_v38 }
 0x197   :  { %v1811_v8 = vrot.slane %v2226_v52, %v2812_v27  ;;  %v1896_v9 = vpack.i.b16 %v1894_v56, %v1894_v56  ;;  %1961 = vst [vmem:[%s3249_s4 + $0x4] sm:$0x4] %v1960_v5  ;;  %v1963_v19 = vsel %vm2915_vm0, %v1956_v3, %v1962_v62  ;;  %v1986_v10 = vunpack.i.h.s16 %v1984_v41 }
 0x198   :  { %1964 = vst [vmem:[%s3249_s4 + $0xc] sm:$0x4] %v1963_v19  ;;  %v2015_v38 = vpack.c.bf16 %v2014_v6, %v2014_v6  ;;  %v2060_v13 = vmax.f32 %v2059_v7, 0.0  ;;  %v1818_v14 = vrot.slane %v1804_v2, %v2812_v27  ;;  %v2230_v16 = vpack.i.b16 %v1984_v41, %v1984_v41 }
 0x199   :  { %v1903_v17 = vrot.slane %v2228_v4, %v2812_v27  ;;  %v1988_v18 = vpack.i.b16 %v1986_v10, %v1986_v10  ;;  %v1910_v29 = vrot.slane %v1896_v9, %v2812_v27 }
 0x19a   :  { %v1821_v11 = vld [vmem:[%s3249_s4 + $0x4] sm:$0x1]  ;;  %v2023_v21 = vrot.slane %v2015_v38, %v2810_v26  ;;  %v2061_v22 = vpack.c.bf16 %v2060_v13, %v2060_v13  ;;  %v1995_v36 = vrot.slane %v2230_v16, %v2812_v27 }
 0x19b   :  { %v1822_v15 = vsel %vm2955_vm4, %v1811_v8, %v1821_v11  ;;  %v1913_v30 = vld [vmem:[%s3249_s4 + $0x4] sm:$0x2]  ;;  %v2002_v37 = vrot.slane %v1988_v18, %v2812_v27 }
 0x19c   :  { %1823 = vst [vmem:[%s3249_s4 + $0x4] sm:$0x1] %v1822_v15  ;;  %v1824_v0 = vld [vmem:[%s3249_s4 + $0xc] sm:$0x1]  ;;  %v1914_v33 = vsel %vm2972_vm3, %v1903_v17, %v1913_v30  ;;  %v2030_v20 = vrot.slane %v2023_v21, %v2810_v26  ;;  %v2069_v35 = vrot.slane %v2061_v22, %v2810_v26 }
 0x19d   :  { %v1825_v28 = vsel %vm2955_vm4, %v1818_v14, %v1824_v0  ;;  %v1916_v34 = vld [vmem:[%s3249_s4 + $0xc] sm:$0x2]  ;;  %1915 = vst [vmem:[%s3249_s4 + $0x4] sm:$0x2] %v1914_v33 }
 0x19e   :  { %1826 = vst [vmem:[%s3249_s4 + $0xc] sm:$0x1] %v1825_v28  ;;  %v1917_v43 = vsel %vm2972_vm3, %v1910_v29, %v1916_v34  ;;  %v2005_v39 = vld [vmem:[%s3249_s4 + $0x4] sm:$0x4]  ;;  %v2032_v40 = vunpack.i.h.s16 %v2030_v20  ;;  %v2231_v42 = vpack.i.b16 %v2030_v20, %v2030_v20  ;;  %v2076_v47 = vrot.slane %v2069_v35, %v2810_v26 }
 0x19f   :  { %1918 = vst [vmem:[%s3249_s4 + $0xc] sm:$0x2] %v1917_v43  ;;  %v2006_v46 = vsel %vm3026_vm5, %v1995_v36, %v2005_v39  ;;  %v2008_v31 = vld [vmem:[%s3249_s4 + $0xc] sm:$0x4] }
 0x1a0   :  { %2007 = vst [vmem:[%s3249_s4 + $0x4] sm:$0x4] %v2006_v46  ;;  %v2009_v48 = vsel %vm3026_vm5, %v2002_v37, %v2008_v31  ;;  %v2034_v49 = vpack.i.b16 %v2032_v40, %v2032_v40  ;;  %v2041_v45 = vrot.slane %v2231_v42, %v2812_v27  ;;  %v2078_v54 = vunpack.i.h.s16 %v2076_v47 }
 0x1a1   :  { %2010 = vst [vmem:[%s3249_s4 + $0xc] sm:$0x4] %v2009_v48  ;;  %v2232_v52 = vpack.i.b16 %v2076_v47, %v2076_v47 }
 0x1a2   :  { %v2048_v26 = vrot.slane %v2034_v49, %v2812_v27  ;;  %v2052_v50 = vsel %vm2940_vm2, %v2041_v45, %v2051_v44  ;;  %v2080_v24 = vpack.i.b16 %v2078_v54, %v2078_v54 }
 0x1a3   :  { %2053 = vst [vmem:[%s3249_s4 + $0x4] sm:$0x8] %v2052_v50  ;;  %v2087_v53 = vrot.slane %v2232_v52, %v2812_v27 }
 0x1a4   :  { %v2055_v51 = vsel %vm2940_vm2, %v2048_v26, %v2054_v23  ;;  %v2094_v56 = vrot.slane %v2080_v24, %v2812_v27 }
 0x1a5   :  { %2056 = vst [vmem:[%s3249_s4 + $0xc] sm:$0x8] %v2055_v51 }
 0x1aa   :  { %v2097_v55 = vld [vmem:[%s3249_s4 + $0x4] sm:$0x8] }
 0x1ab   :  { %v2098_v57 = vsel %vm3048_vm6, %v2087_v53, %v2097_v55 }
 0x1ac   :  { %2099 = vst [vmem:[%s3249_s4 + $0x4] sm:$0x8] %v2098_v57  ;;  %v2100_v12 = vld [vmem:[%s3249_s4 + $0xc] sm:$0x8] }
 0x1ad   :  { %v2101_v58 = vsel %vm3048_vm6, %v2094_v56, %v2100_v12 }
 0x1ae   :  { %2102 = vst [vmem:[%s3249_s4 + $0xc] sm:$0x8] %v2101_v58 }
 0x1af   :  { %2107 = vsyncpa [#allocation4], 1 }
 0x1b0   :  { %2108 = vsyncpa [#allocation6], 1 }

// kernel: generator_forward.9
= control target key start
LH: loop header
LB: loop body
LE: loop exit
PB: predicated region body
PF: predicated region fallthrough
CT: control target
= control target key end

     0   :  { %s3232_s12 = smov 0   ;;  %s3867_s0 = inlined_call_operand.vmem [shape: bf16[2,6,6,128], index: 0, kind: input, shape index: {}]   ;;  %s3868_s1 = inlined_call_operand.vmem [shape: bf16[4,4,128,64], index: 1, kind: input, shape index: {}]   ;;  %s3869_s2 = inlined_call_operand.vmem [shape: bf16[2,16,4,64], index: 2, kind: output, shape index: {0}]   ;;  %s3870_s3 = inlined_call_operand.vmem [shape: f32[2,2,64], index: 3, kind: output, shape index: {1}]  }
   0x1 LB: > { %s2135_s13 = sadd.s32 4294967295, %s3203_s12   ;;  %p2139_p0 = scmp.ge.s32.totalorder %s3203_s12, 1  ;;  %s3203_s12 = sphi %s3232_s12, %s14_s12  }
   0x2   : > { %p140_p1 = scmp.lt.s32.totalorder %s3203_s12, 3 }
   0x4   : > { %p141_p2 = pnand %p2139_p0, %p140_p1 }
   0x5   : > { %p168_p3 = scmp.lt.s32.totalorder (!%p141_p2), %s2135_s13, 1  ;;  %vm183_vm0 = vcmask (!%p141_p2), 517120   ;;  %v3209_v0 = vmov (!%p141_p2), 0.0   ;;  %s3256_s26 = smov (!%p141_p2), 0  }
   0x6   : > { %144 = sbr.rel (%p141_p2) target bundleno = 516 (0x204), region = 28  ;;  %184 = vst.msk [vmem:[#allocation2] sm:$0x3] (!%p141_p2), %vm183_vm0, %v3209_v0 }
   0xd   : > { %s3872_s13 = smov (!%p168_p3, %s2135_s13), 1 }
   0xe   : > { %s3042_s14 = smul.u32 24, %s3872_s13  ;;  %s2529_s15 = sshll.u32 %s3872_s13, 5 }
   0xf   : > { %s3244_s18 = scalar_lea.vmem %s3869_s2, %s2529_s15  ;;  %s2143_s19 = sshll.u32 %s3872_s13, 1 }
  0x10   : > { %s3249_s22 = scalar_lea.vmem %s3867_s0, %s3042_s14  ;;  %s3254_s25 = scalar_lea.vmem %s3870_s3, %s2143_s19 }
  0x11 LB: >> { %v3062_v1 = vld [vmem:[%s3868_s1 + $0x80] sm:$0xff]   ;;  %v3210_v2 = vmov 0.0   ;;  %v3064_v4 = vld [vmem:[%s3868_s1 + $0x88] sm:$0xff]   ;;  %vm3211_vm1 = vmmov 0   ;;  %v3066_v6 = vld [vmem:[%s3868_s1 + $0x90] sm:$0xff]   ;;  %s2144_s15 = sshll.u32 %s3207_s26, 2  ;;  %s3207_s26 = sphi %s3256_s26, %s190_s26  }
  0x12   : >> { %2674 = vmatprep.subr.bf16.mxu0 %v3210_v2  ;;  %2754 = vmatprep.subr.bf16.mxu1 %v3210_v2  ;;  %v3063_v3 = vld [vmem:[%s3868_s1 + $0xc0] sm:$0xff]   ;;  %v3065_v5 = vld [vmem:[%s3868_s1 + $0xc8] sm:$0xff]   ;;  %v3067_v7 = vld [vmem:[%s3868_s1 + $0xd0] sm:$0xff]   ;;  %s3299_s19 = scalar_lea.vmem %s3249_s22, %s2144_s15  ;;  %s2231_s30 = sshll.u32 %s3207_s26, 1  ;;  %vm645_vm2 = vcmask 519168   ;;  %vm2018_vm3 = vcmask 516096  }
  0x13   : >> { %2675 = vmatpush3.bf16.msra.mxu0 %v3062_v1  ;;  %2690 = vmatprep.mubr.msk.bf16.mxu0 %vm3211_vm1, %v3210_v2  ;;  %v3068_v8 = vld [vmem:[%s3868_s1 + $0x98] sm:$0xff]   ;;  %v3070_v10 = vld [vmem:[%s3868_s1 + $0xa0] sm:$0xff]   ;;  %v3072_v14 = vld [vmem:[%s3868_s1 + $0xa8] sm:$0xff]   ;;  %s3841_s4 = scalar_lea.vmem %s3244_s18, %s2231_s30  ;;  %s190_s26 = sadd.s32 1, %s3207_s26  }
  0x14   : >> { %2755 = vmatpush3.bf16.msra.mxu1 %v3063_v3  ;;  %2676 = vmatprep.subr.bf16.mxu0 %v3210_v2  ;;  %v3069_v9 = vld [vmem:[%s3868_s1 + $0xd8] sm:$0xff]   ;;  %v3071_v11 = vld [vmem:[%s3868_s1 + $0xe0] sm:$0xff]   ;;  %v3073_v15 = vld [vmem:[%s3868_s1 + $0xe8] sm:$0xff]   ;;  %p187_p4 = scmp.ge.s32.totalorder %s190_s26, 4  }
  0x15   : >> { %2756 = vmatprep.subr.bf16.mxu1 %v3210_v2  ;;  %2770 = vmatprep.mubr.msk.bf16.mxu1 %vm3211_vm1, %v3210_v2  ;;  %v3310_v12 = vld [vmem:[%s3299_s19] sm:$0x7]  ;;  %v3074_v17 = vld [vmem:[%s3868_s1 + $0xb0] sm:$0xff]   ;;  %v3076_v21 = vld [vmem:[%s3868_s1 + $0xb8] sm:$0xff]  }
  0x16   : >> { %v2165_v13 = vcombine.low %v3310_v12, %v3310_v12  ;;  %v3075_v18 = vld [vmem:[%s3868_s1 + $0xf0] sm:$0xff]   ;;  %v3077_v22 = vld [vmem:[%s3868_s1 + $0xf8] sm:$0xff]   ;;  %v3079_v24 = vld [vmem:[%s3868_s1] sm:$0xff]  }
  0x17   : >> { %2677 = vmatpush3.bf16.msra.mxu0 %v3064_v4  ;;  %v3080_v26 = vld [vmem:[%s3868_s1 + $0x40] sm:$0xff]   ;;  %v3081_v27 = vld [vmem:[%s3868_s1 + $0x8] sm:$0xff]   ;;  %v3083_v29 = vld [vmem:[%s3868_s1 + $0x10] sm:$0xff]  }
  0x18   : >> { %2757 = vmatpush3.bf16.msra.mxu1 %v3065_v5  ;;  %2678 = vmatprep.subr.bf16.mxu0 %v3210_v2  ;;  %v241_v16 = vshll.u32 %v2165_v13, 16  ;;  %v239_v19 = vshrl.u32 %v2165_v13, 16  ;;  %v701_v25 = vrot.slane %v2165_v13, 1  ;;  %v3082_v28 = vld [vmem:[%s3868_s1 + $0x48] sm:$0xff]   ;;  %v3084_v30 = vld [vmem:[%s3868_s1 + $0x50] sm:$0xff]   ;;  %v3085_v31 = vld [vmem:[%s3868_s1 + $0x18] sm:$0xff]  }
  0x19   : >> { %2758 = vmatprep.subr.bf16.mxu1 %v3210_v2  ;;  %v3086_v32 = vld [vmem:[%s3868_s1 + $0x58] sm:$0xff]   ;;  %v3087_v33 = vld [vmem:[%s3868_s1 + $0x20] sm:$0xff]   ;;  %v3089_v35 = vld [vmem:[%s3868_s1 + $0x28] sm:$0xff]  }
  0x1a   : >> { %v243_v20 = vrot.slane %v241_v16, 1  ;;  %v3088_v34 = vld [vmem:[%s3868_s1 + $0x60] sm:$0xff]   ;;  %v3090_v36 = vld [vmem:[%s3868_s1 + $0x68] sm:$0xff]   ;;  %v3091_v37 = vld [vmem:[%s3868_s1 + $0x30] sm:$0xff]  }
  0x1b   : >> { %2679 = vmatpush3.bf16.msra.mxu0 %v3066_v6  ;;  %v3092_v38 = vld [vmem:[%s3868_s1 + $0x70] sm:$0xff]   ;;  %v3093_v39 = vld [vmem:[%s3868_s1 + $0x38] sm:$0xff]   ;;  %v3095_v41 = vld [vmem:[%s3868_s1 + $0x200] sm:$0xff]  }
  0x1c   : >> { %2759 = vmatpush3.bf16.msra.mxu1 %v3067_v7  ;;  %2680 = vmatprep.subr.bf16.mxu0 %v3210_v2  ;;  %v244_v23 = vor.u32 %v243_v20, %v239_v19  ;;  %v3094_v40 = vld [vmem:[%s3868_s1 + $0x78] sm:$0xff]   ;;  %v3096_v42 = vld [vmem:[%s3868_s1 + $0x240] sm:$0xff]   ;;  %v3097_v43 = vld [vmem:[%s3868_s1 + $0x208] sm:$0xff]  }
  0x1d   : >> { %2760 = vmatprep.subr.bf16.mxu1 %v3210_v2  ;;  %v3098_v44 = vld [vmem:[%s3868_s1 + $0x248] sm:$0xff]   ;;  %v3099_v45 = vld [vmem:[%s3868_s1 + $0x210] sm:$0xff]   ;;  %v3101_v47 = vld [vmem:[%s3868_s1 + $0x218] sm:$0xff]  }
  0x1e   : >> { %v3100_v46 = vld [vmem:[%s3868_s1 + $0x250] sm:$0xff]   ;;  %v3102_v48 = vld [vmem:[%s3868_s1 + $0x258] sm:$0xff]   ;;  %v3103_v49 = vld [vmem:[%s3868_s1 + $0x220] sm:$0xff]  }
  0x1f   : >> { %2681 = vmatpush3.bf16.msra.mxu0 %v3068_v8  ;;  %v3104_v50 = vld [vmem:[%s3868_s1 + $0x260] sm:$0xff]   ;;  %v3105_v52 = vld [vmem:[%s3868_s1 + $0x228] sm:$0xff]   ;;  %v3107_v55 = vld [vmem:[%s3868_s1 + $0x230] sm:$0xff]  }
  0x20   : >> { %2761 = vmatpush3.bf16.msra.mxu1 %v3069_v9  ;;  %2682 = vmatprep.subr.bf16.mxu0 %v3210_v2  ;;  %v3451_v51 = vld [vmem:[%s3299_s19 + $0x4] sm:$0x7]  ;;  %v3106_v54 = vld [vmem:[%s3868_s1 + $0x268] sm:$0xff]   ;;  %v3108_v57 = vld [vmem:[%s3868_s1 + $0x270] sm:$0xff]  }
  0x21   : >> { %2762 = vmatprep.subr.bf16.mxu1 %v3210_v2  ;;  %v3459_v53 = vcombine.low %v3451_v51, %v3451_v51  ;;  %v3109_v58 = vld [vmem:[%s3868_s1 + $0x238] sm:$0xff]   ;;  %v3112_v62 = vld [vmem:[%s3868_s1 + $0x280] sm:$0xff]   ;;  %v3114_v1 = vld [vmem:[%s3868_s1 + $0x288] sm:$0xff]  }
  0x22   : >> { %v3110_v61 = vld [vmem:[%s3868_s1 + $0x278] sm:$0xff]   ;;  %v3113_v0 = vld [vmem:[%s3868_s1 + $0x2c0] sm:$0xff]   ;;  %v3115_v3 = vld [vmem:[%s3868_s1 + $0x2c8] sm:$0xff]  }
  0x23   : >> { %2683 = vmatpush3.bf16.msra.mxu0 %v3070_v10  ;;  %v551_v56 = vshll.u32 %v3459_v53, 16  ;;  %v549_v59 = vshrl.u32 %v3459_v53, 16  ;;  %v3116_v4 = vld [vmem:[%s3868_s1 + $0x290] sm:$0xff]   ;;  %v3118_v6 = vld [vmem:[%s3868_s1 + $0x298] sm:$0xff]   ;;  %v3120_v8 = vld [vmem:[%s3868_s1 + $0x2a0] sm:$0xff]   ;;  %v1002_v16 = vrot.slane %v3459_v53, 1 }
  0x24   : >> { %2763 = vmatpush3.bf16.msra.mxu1 %v3071_v11  ;;  %2684 = vmatprep.subr.bf16.mxu0 %v3210_v2  ;;  %v3117_v5 = vld [vmem:[%s3868_s1 + $0x2d0] sm:$0xff]   ;;  %v3119_v7 = vld [vmem:[%s3868_s1 + $0x2d8] sm:$0xff]   ;;  %v3121_v9 = vld [vmem:[%s3868_s1 + $0x2e0] sm:$0xff]  }
  0x25   : >> { %2764 = vmatprep.subr.bf16.mxu1 %v3210_v2  ;;  %v553_v60 = vrot.slane %v551_v56, 1  ;;  %v3122_v10 = vld [vmem:[%s3868_s1 + $0x2a8] sm:$0xff]   ;;  %v3125_v13 = vld [vmem:[%s3868_s1 + $0x2f0] sm:$0xff]   ;;  %v3167_v56 = vld [vmem:[%s3868_s1 + $0x358] sm:$0xff]  }
  0x26   : >> { %v3123_v11 = vld [vmem:[%s3868_s1 + $0x2e8] sm:$0xff]  }
  0x27   : >> { %2685 = vmatpush3.bf16.msra.mxu0 %v3072_v14  ;;  %v3487_v63 = vor.u32 %v553_v60, %v549_v59  ;;  %v3126_v14 = vld [vmem:[%s3868_s1 + $0x2b8] sm:$0xff]   ;;  %v3130_v19 = vld [vmem:[%s3868_s1 + $0x188] sm:$0xff]  }
  0x28   : >> { %2765 = vmatpush3.bf16.msra.mxu1 %v3073_v15  ;;  %2686 = vmatprep.subr.bf16.mxu0 %v3210_v2  ;;  %v3127_v15 = vld [vmem:[%s3868_s1 + $0x2f8] sm:$0xff]   ;;  %v3131_v20 = vld [vmem:[%s3868_s1 + $0x1c8] sm:$0xff]  }
  0x29   : >> { %2766 = vmatprep.subr.bf16.mxu1 %v3210_v2  ;;  %v3163_v53 = vld [vmem:[%s3868_s1 + $0x348] sm:$0xff]  }
  0x2a   : >> { %v2148_v59 = vld [vmem:[%s3299_s19 + $0x8] sm:$0x7] }
  0x2b   : >> { %2687 = vmatpush3.bf16.msra.mxu0 %v3074_v17  ;;  %v3128_v17 = vld [vmem:[%s3868_s1 + $0x180] sm:$0xff]   ;;  %v3170_v60 = vld [vmem:[%s3868_s1 + $0x328] sm:$0xff]  }
  0x2c   : >> { %2767 = vmatpush3.bf16.msra.mxu1 %v3075_v18  ;;  %2688 = vmatprep.subr.bf16.mxu0 %v3210_v2  ;;  %v3129_v18 = vld [vmem:[%s3868_s1 + $0x1c0] sm:$0xff]  }
  0x2d   : >> { %2768 = vmatprep.subr.bf16.mxu1 %v3210_v2 }
  0x2f   : >> { %2689 = vmatpush3.bf16.msra.mxu0 %v3076_v21  ;;  %v3132_v21 = vld [vmem:[%s3868_s1 + $0x190] sm:$0xff]  }
  0x30   : >> { %2769 = vmatpush3.bf16.msra.mxu1 %v3077_v22  ;;  %2694 = vmatprep.subr.bf16.mxu0 %v3210_v2  ;;  %v3133_v22 = vld [vmem:[%s3868_s1 + $0x1d0] sm:$0xff]  }
  0x31   : >> { %2774 = vmatprep.subr.bf16.mxu1 %v3210_v2 }
  0x32   : >> { %2691 = vmatmul.mubr.bf16.vlgmr.msra.gmra.mrb[0].mxu0 %v244_v23 }
  0x33   : >> { %2695 = vmatpush3.bf16.msra.mxu0 %v3079_v24  ;;  %2771 = vmatmul.mubr.bf16.vlgmr.msra.gmra.mrb[0].mxu1 %v701_v25  ;;  %v3135_v24 = vld [vmem:[%s3868_s1 + $0x1d8] sm:$0xff]   ;;  %v3136_v25 = vld [vmem:[%s3868_s1 + $0x1a0] sm:$0xff]  }
  0x34   : >> { %2775 = vmatpush3.bf16.msra.mxu1 %v3080_v26  ;;  %2696 = vmatprep.subr.bf16.mxu0 %v3210_v2  ;;  %v3137_v26 = vld [vmem:[%s3868_s1 + $0x1e0] sm:$0xff]  }
  0x35   : >> { %2776 = vmatprep.subr.bf16.mxu1 %v3210_v2  ;;  %2710 = vmatprep.mubr.msk.bf16.mxu0 %vm3211_vm1, %v3210_v2 }
  0x36   : >> { %2790 = vmatprep.mubr.msk.bf16.mxu1 %vm3211_vm1, %v3210_v2 }
  0x37   : >> { %2697 = vmatpush3.bf16.msra.mxu0 %v3081_v27  ;;  %v3138_v27 = vld [vmem:[%s3868_s1 + $0x1a8] sm:$0xff]  }
  0x38   : >> { %2777 = vmatpush3.bf16.msra.mxu1 %v3082_v28  ;;  %2698 = vmatprep.subr.bf16.mxu0 %v3210_v2  ;;  %v3139_v28 = vld [vmem:[%s3868_s1 + $0x1e8] sm:$0xff]  }
  0x39   : >> { %2778 = vmatprep.subr.bf16.mxu1 %v3210_v2 }
  0x3b   : >> { %2699 = vmatpush3.bf16.msra.mxu0 %v3083_v29  ;;  %v3140_v29 = vld [vmem:[%s3868_s1 + $0x1b0] sm:$0xff]  }
  0x3c   : >> { %2779 = vmatpush3.bf16.msra.mxu1 %v3084_v30  ;;  %2700 = vmatprep.subr.bf16.mxu0 %v3210_v2  ;;  %v3141_v30 = vld [vmem:[%s3868_s1 + $0x1f0] sm:$0xff]  }
  0x3d   : >> { %2780 = vmatprep.subr.bf16.mxu1 %v3210_v2 }
  0x3f   : >> { %2701 = vmatpush3.bf16.msra.mxu0 %v3085_v31  ;;  %v3142_v31 = vld [vmem:[%s3868_s1 + $0x1b8] sm:$0xff]  }
  0x40   : >> { %2781 = vmatpush3.bf16.msra.mxu1 %v3086_v32  ;;  %2702 = vmatprep.subr.bf16.mxu0 %v3210_v2  ;;  %v3143_v32 = vld [vmem:[%s3868_s1 + $0x1f8] sm:$0xff]  }
  0x41   : >> { %2782 = vmatprep.subr.bf16.mxu1 %v3210_v2 }
  0x43   : >> { %2703 = vmatpush3.bf16.msra.mxu0 %v3087_v33  ;;  %v3144_v33 = vld [vmem:[%s3868_s1 + $0x100] sm:$0xff]  }
  0x44   : >> { %2783 = vmatpush3.bf16.msra.mxu1 %v3088_v34  ;;  %2704 = vmatprep.subr.bf16.mxu0 %v3210_v2  ;;  %v3145_v34 = vld [vmem:[%s3868_s1 + $0x140] sm:$0xff]  }
  0x45   : >> { %2784 = vmatprep.subr.bf16.mxu1 %v3210_v2 }
  0x47   : >> { %2705 = vmatpush3.bf16.msra.mxu0 %v3089_v35  ;;  %v3146_v35 = vld [vmem:[%s3868_s1 + $0x108] sm:$0xff]  }
  0x48   : >> { %2785 = vmatpush3.bf16.msra.mxu1 %v3090_v36  ;;  %2706 = vmatprep.subr.bf16.mxu0 %v3210_v2  ;;  %v3147_v36 = vld [vmem:[%s3868_s1 + $0x148] sm:$0xff]  }
  0x49   : >> { %2786 = vmatprep.subr.bf16.mxu1 %v3210_v2 }
  0x4b   : >> { %2707 = vmatpush3.bf16.msra.mxu0 %v3091_v37  ;;  %v3148_v37 = vld [vmem:[%s3868_s1 + $0x110] sm:$0xff]  }
  0x4c   : >> { %2787 = vmatpush3.bf16.msra.mxu1 %v3092_v38  ;;  %2708 = vmatprep.subr.bf16.mxu0 %v3210_v2  ;;  %v3149_v38 = vld [vmem:[%s3868_s1 + $0x150] sm:$0xff]  }
  0x4d   : >> { %2788 = vmatprep.subr.bf16.mxu1 %v3210_v2 }
  0x4f   : >> { %2709 = vmatpush3.bf16.msra.mxu0 %v3093_v39  ;;  %v3150_v39 = vld [vmem:[%s3868_s1 + $0x118] sm:$0xff]  }
  0x50   : >> { %2789 = vmatpush3.bf16.msra.mxu1 %v3094_v40  ;;  %2714 = vmatprep.subr.bf16.mxu0 %v3210_v2  ;;  %v3151_v40 = vld [vmem:[%s3868_s1 + $0x158] sm:$0xff]  }
  0x51   : >> { %2794 = vmatprep.subr.bf16.mxu1 %v3210_v2 }
  0x52   : >> { %2711 = vmatmul.mubr.bf16.vlgmr.msra.gmra.mrb[0].mxu0 %v3310_v12  ;;  %v3124_v12 = vld [vmem:[%s3868_s1 + $0x2b0] sm:$0xff]  }
  0x53   : >> { %2715 = vmatpush3.bf16.msra.mxu0 %v3095_v41  ;;  %2791 = vmatmul.mubr.bf16.vlgmr.msra.gmra.mrb[0].mxu1 %v244_v23  ;;  %v3134_v23 = vld [vmem:[%s3868_s1 + $0x198] sm:$0xff]   ;;  %v3152_v41 = vld [vmem:[%s3868_s1 + $0x120] sm:$0xff]  }
  0x54   : >> { %2795 = vmatpush3.bf16.msra.mxu1 %v3096_v42  ;;  %2716 = vmatprep.subr.bf16.mxu0 %v3210_v2  ;;  %v3153_v42 = vld [vmem:[%s3868_s1 + $0x160] sm:$0xff]  }
  0x55   : >> { %2796 = vmatprep.subr.bf16.mxu1 %v3210_v2  ;;  %2730 = vmatprep.mubr.msk.bf16.mxu0 %vm3211_vm1, %v3210_v2 }
  0x56   : >> { %2810 = vmatprep.mubr.msk.bf16.mxu1 %vm3211_vm1, %v3210_v2 }
  0x57   : >> { %2717 = vmatpush3.bf16.msra.mxu0 %v3097_v43  ;;  %v3154_v43 = vld [vmem:[%s3868_s1 + $0x128] sm:$0xff]  }
  0x58   : >> { %2797 = vmatpush3.bf16.msra.mxu1 %v3098_v44  ;;  %2718 = vmatprep.subr.bf16.mxu0 %v3210_v2  ;;  %v3155_v44 = vld [vmem:[%s3868_s1 + $0x168] sm:$0xff]  }
  0x59   : >> { %2798 = vmatprep.subr.bf16.mxu1 %v3210_v2 }
  0x5b   : >> { %2719 = vmatpush3.bf16.msra.mxu0 %v3099_v45  ;;  %v3156_v45 = vld [vmem:[%s3868_s1 + $0x130] sm:$0xff]  }
  0x5c   : >> { %2799 = vmatpush3.bf16.msra.mxu1 %v3100_v46  ;;  %2720 = vmatprep.subr.bf16.mxu0 %v3210_v2  ;;  %v3157_v46 = vld [vmem:[%s3868_s1 + $0x170] sm:$0xff]  }
  0x5d   : >> { %2800 = vmatprep.subr.bf16.mxu1 %v3210_v2 }
  0x5f   : >> { %2721 = vmatpush3.bf16.msra.mxu0 %v3101_v47  ;;  %v3158_v47 = vld [vmem:[%s3868_s1 + $0x138] sm:$0xff]  }
  0x60   : >> { %2801 = vmatpush3.bf16.msra.mxu1 %v3102_v48  ;;  %2722 = vmatprep.subr.bf16.mxu0 %v3210_v2  ;;  %v3159_v48 = vld [vmem:[%s3868_s1 + $0x178] sm:$0xff]  }
  0x61   : >> { %2802 = vmatprep.subr.bf16.mxu1 %v3210_v2 }
  0x63   : >> { %2723 = vmatpush3.bf16.msra.mxu0 %v3103_v49  ;;  %v3160_v49 = vld [vmem:[%s3868_s1 + $0x300] sm:$0xff]  }
  0x64   : >> { %2803 = vmatpush3.bf16.msra.mxu1 %v3104_v50  ;;  %2724 = vmatprep.subr.bf16.mxu0 %v3210_v2  ;;  %v3161_v50 = vld [vmem:[%s3868_s1 + $0x340] sm:$0xff]  }
  0x65   : >> { %2804 = vmatprep.subr.bf16.mxu1 %v3210_v2 }
  0x67   : >> { %2725 = vmatpush3.bf16.msra.mxu0 %v3105_v52  ;;  %v3162_v52 = vld [vmem:[%s3868_s1 + $0x308] sm:$0xff]  }
  0x68   : >> { %2805 = vmatpush3.bf16.msra.mxu1 %v3106_v54  ;;  %2726 = vmatprep.subr.bf16.mxu0 %v3210_v2  ;;  %v3165_v54 = vld [vmem:[%s3868_s1 + $0x350] sm:$0xff]  }
  0x69   : >> { %2806 = vmatprep.subr.bf16.mxu1 %v3210_v2 }
  0x6b   : >> { %2727 = vmatpush3.bf16.msra.mxu0 %v3107_v55  ;;  %v3166_v55 = vld [vmem:[%s3868_s1 + $0x318] sm:$0xff]  }
  0x6c   : >> { %2807 = vmatpush3.bf16.msra.mxu1 %v3108_v57  ;;  %2728 = vmatprep.subr.bf16.mxu0 %v3210_v2  ;;  %v3168_v57 = vld [vmem:[%s3868_s1 + $0x320] sm:$0xff]  }
  0x6d   : >> { %2808 = vmatprep.subr.bf16.mxu1 %v3210_v2 }
  0x6f   : >> { %2729 = vmatpush3.bf16.msra.mxu0 %v3109_v58  ;;  %v3169_v58 = vld [vmem:[%s3868_s1 + $0x360] sm:$0xff]  }
  0x70   : >> { %2809 = vmatpush3.bf16.msra.mxu1 %v3110_v61  ;;  %2734 = vmatprep.subr.bf16.mxu0 %v3210_v2  ;;  %v3745_v61 = vcombine.low %v2148_v59, %v2148_v59 }
  0x71   : >> { %2814 = vmatprep.subr.bf16.mxu1 %v3210_v2 }
  0x72   : >> { %2731 = vmatmul.mubr.bf16.vlgmr.msra.gmra.mrb[0].mxu0 %v3451_v51 }
  0x73   : >> { %2735 = vmatpush3.bf16.msra.mxu0 %v3112_v62  ;;  %2811 = vmatmul.mubr.bf16.vlgmr.msra.gmra.mrb[0].mxu1 %v3487_v63  ;;  %v3171_v62 = vld [vmem:[%s3868_s1 + $0x368] sm:$0xff]  }
  0x74   : >> { %2815 = vmatpush3.bf16.msra.mxu1 %v3113_v0  ;;  %2736 = vmatprep.subr.bf16.mxu0 %v3210_v2  ;;  %v1454_v0 = vshll.u32 %v3745_v61, 16 }
  0x75   : >> { %2816 = vmatprep.subr.bf16.mxu1 %v3210_v2  ;;  %2750 = vmatprep.mubr.msk.bf16.mxu0 %vm3211_vm1, %v3210_v2 }
  0x76   : >> { %2830 = vmatprep.mubr.msk.bf16.mxu1 %vm3211_vm1, %v3210_v2 }
  0x77   : >> { %2737 = vmatpush3.bf16.msra.mxu0 %v3114_v1  ;;  %v3173_v1 = vld [vmem:[%s3868_s1 + $0x370] sm:$0xff]  }
  0x78   : >> { %2817 = vmatpush3.bf16.msra.mxu1 %v3115_v3  ;;  %2738 = vmatprep.subr.bf16.mxu0 %v3210_v2  ;;  %v3174_v3 = vld [vmem:[%s3868_s1 + $0x338] sm:$0xff]  }
  0x79   : >> { %2818 = vmatprep.subr.bf16.mxu1 %v3210_v2 }
  0x7b   : >> { %2739 = vmatpush3.bf16.msra.mxu0 %v3116_v4  ;;  %v1452_v4 = vshrl.u32 %v3745_v61, 16 }
  0x7c   : >> { %2819 = vmatpush3.bf16.msra.mxu1 %v3117_v5  ;;  %2740 = vmatprep.subr.bf16.mxu0 %v3210_v2  ;;  %v1456_v5 = vrot.slane %v1454_v0, 1 }
  0x7d   : >> { %2820 = vmatprep.subr.bf16.mxu1 %v3210_v2 }
  0x7f   : >> { %2741 = vmatpush3.bf16.msra.mxu0 %v3118_v6  ;;  %v3175_v6 = vld [vmem:[%s3868_s1 + $0x378] sm:$0xff]  }
  0x80   : >> { %2821 = vmatpush3.bf16.msra.mxu1 %v3119_v7  ;;  %2742 = vmatprep.subr.bf16.mxu0 %v3210_v2  ;;  %v3177_v7 = vld [vmem:[%s3868_s1 + $0x380] sm:$0xff]  }
  0x81   : >> { %2822 = vmatprep.subr.bf16.mxu1 %v3210_v2 }
  0x83   : >> { %2743 = vmatpush3.bf16.msra.mxu0 %v3120_v8  ;;  %v1457_v8 = vor.u32 %v1456_v5, %v1452_v4 }
  0x84   : >> { %2823 = vmatpush3.bf16.msra.mxu1 %v3121_v9  ;;  %2744 = vmatprep.subr.bf16.mxu0 %v3210_v2  ;;  %v3178_v9 = vld [vmem:[%s3868_s1 + $0x3c0] sm:$0xff]  }
  0x85   : >> { %2824 = vmatprep.subr.bf16.mxu1 %v3210_v2 }
  0x87   : >> { %2745 = vmatpush3.bf16.msra.mxu0 %v3122_v10  ;;  %v3179_v10 = vld [vmem:[%s3868_s1 + $0x388] sm:$0xff]  }
  0x88   : >> { %2825 = vmatpush3.bf16.msra.mxu1 %v3123_v11  ;;  %2746 = vmatprep.subr.bf16.mxu0 %v3210_v2  ;;  %v3180_v11 = vld [vmem:[%s3868_s1 + $0x3c8] sm:$0xff]  }
  0x89   : >> { %2826 = vmatprep.subr.bf16.mxu1 %v3210_v2 }
  0x8b   : >> { %2747 = vmatpush3.bf16.msra.mxu0 %v3124_v12  ;;  %v3181_v12 = vld [vmem:[%s3868_s1 + $0x390] sm:$0xff]  }
  0x8c   : >> { %2827 = vmatpush3.bf16.msra.mxu1 %v3125_v13  ;;  %2748 = vmatprep.subr.bf16.mxu0 %v3210_v2  ;;  %v3182_v13 = vld [vmem:[%s3868_s1 + $0x3d0] sm:$0xff]  }
  0x8d   : >> { %2828 = vmatprep.subr.bf16.mxu1 %v3210_v2 }
  0x8f   : >> { %2749 = vmatpush3.bf16.msra.mxu0 %v3126_v14  ;;  %v3183_v14 = vld [vmem:[%s3868_s1 + $0x398] sm:$0xff]  }
  0x90   : >> { %2829 = vmatpush3.bf16.msra.mxu1 %v3127_v15  ;;  %2834 = vmatprep.subr.bf16.mxu0 %v3210_v2  ;;  %v3184_v15 = vld [vmem:[%s3868_s1 + $0x3d8] sm:$0xff]  }
  0x91   : >> { %2914 = vmatprep.subr.bf16.mxu1 %v3210_v2 }
  0x92   : >> { %2751 = vmatmul.mubr.bf16.vlgmr.msra.gmra.mrb[0].mxu0 %v3487_v63 }
  0x93   : >> { %2831 = vmatmul.mubr.bf16.vlgmr.msra.gmra.mrb[0].mxu1 %v1002_v16  ;;  %2835 = vmatpush3.bf16.msra.mxu0 %v3128_v17  ;;  %v3186_v17 = vld [vmem:[%s3868_s1 + $0x3e0] sm:$0xff]  }
  0x94   : >> { %2915 = vmatpush3.bf16.msra.mxu1 %v3129_v18  ;;  %2836 = vmatprep.subr.bf16.mxu0 %v3210_v2  ;;  %v3187_v18 = vld [vmem:[%s3868_s1 + $0x3a8] sm:$0xff]  }
  0x95   : >> { %2916 = vmatprep.subr.bf16.mxu1 %v3210_v2  ;;  %2850 = vmatprep.mubr.msk.bf16.mxu0 %vm3211_vm1, %v3210_v2 }
  0x96   : >> { %2930 = vmatprep.mubr.msk.bf16.mxu1 %vm3211_vm1, %v3210_v2 }
  0x97   : >> { %2837 = vmatpush3.bf16.msra.mxu0 %v3130_v19  ;;  %v3188_v19 = vld [vmem:[%s3868_s1 + $0x3e8] sm:$0xff]  }
  0x98   : >> { %2917 = vmatpush3.bf16.msra.mxu1 %v3131_v20  ;;  %2838 = vmatprep.subr.bf16.mxu0 %v3210_v2  ;;  %v3189_v20 = vld [vmem:[%s3868_s1 + $0x3b0] sm:$0xff]  }
  0x99   : >> { %2918 = vmatprep.subr.bf16.mxu1 %v3210_v2 }
  0x9b   : >> { %2839 = vmatpush3.bf16.msra.mxu0 %v3132_v21  ;;  %v3190_v21 = vld [vmem:[%s3868_s1 + $0x3f0] sm:$0xff]  }
  0x9c   : >> { %2919 = vmatpush3.bf16.msra.mxu1 %v3133_v22  ;;  %2840 = vmatprep.subr.bf16.mxu0 %v3210_v2  ;;  %v3191_v22 = vld [vmem:[%s3868_s1 + $0x3b8] sm:$0xff]  }
  0x9d   : >> { %2920 = vmatprep.subr.bf16.mxu1 %v3210_v2 }
  0x9f   : >> { %2841 = vmatpush3.bf16.msra.mxu0 %v3134_v23  ;;  %v3192_v23 = vld [vmem:[%s3868_s1 + $0x3f8] sm:$0xff]  }
  0xa0   : >> { %2921 = vmatpush3.bf16.msra.mxu1 %v3135_v24  ;;  %2842 = vmatprep.subr.bf16.mxu0 %v3210_v2  ;;  %v1903_v24 = vrot.slane %v3745_v61, 1 }
  0xa1   : >> { %2922 = vmatprep.subr.bf16.mxu1 %v3210_v2 }
  0xa3   : >> { %2843 = vmatpush3.bf16.msra.mxu0 %v3136_v25 }
  0xa4   : >> { %2923 = vmatpush3.bf16.msra.mxu1 %v3137_v26  ;;  %2844 = vmatprep.subr.bf16.mxu0 %v3210_v2 }
  0xa5   : >> { %2924 = vmatprep.subr.bf16.mxu1 %v3210_v2 }
  0xa7   : >> { %2845 = vmatpush3.bf16.msra.mxu0 %v3138_v27 }
  0xa8   : >> { %2925 = vmatpush3.bf16.msra.mxu1 %v3139_v28  ;;  %2846 = vmatprep.subr.bf16.mxu0 %v3210_v2 }
  0xa9   : >> { %2926 = vmatprep.subr.bf16.mxu1 %v3210_v2 }
  0xab   : >> { %2847 = vmatpush3.bf16.msra.mxu0 %v3140_v29 }
  0xac   : >> { %2927 = vmatpush3.bf16.msra.mxu1 %v3141_v30  ;;  %2848 = vmatprep.subr.bf16.mxu0 %v3210_v2 }
  0xad   : >> { %2928 = vmatprep.subr.bf16.mxu1 %v3210_v2 }
  0xaf   : >> { %2849 = vmatpush3.bf16.msra.mxu0 %v3142_v31 }
  0xb0   : >> { %2929 = vmatpush3.bf16.msra.mxu1 %v3143_v32  ;;  %2854 = vmatprep.subr.bf16.mxu0 %v3210_v2 }
  0xb1   : >> { %2934 = vmatprep.subr.bf16.mxu1 %v3210_v2 }
  0xb2   : >> { %2851 = vmatmul.mubr.bf16.vlgmr.msra.gmra.mrb[4].mxu0 %v3487_v63 }
  0xb3   : >> { %2855 = vmatpush3.bf16.msra.mxu0 %v3144_v33  ;;  %2931 = vmatmul.mubr.bf16.vlgmr.msra.gmra.mrb[4].mxu1 %v1002_v16  ;;  %v3185_v16 = vld [vmem:[%s3868_s1 + $0x3a0] sm:$0xff]  }
  0xb4   : >> { %2935 = vmatpush3.bf16.msra.mxu1 %v3145_v34  ;;  %2856 = vmatprep.subr.bf16.mxu0 %v3210_v2 }
  0xb5   : >> { %2936 = vmatprep.subr.bf16.mxu1 %v3210_v2  ;;  %2870 = vmatprep.mubr.msk.bf16.mxu0 %vm3211_vm1, %v3210_v2 }
  0xb6   : >> { %2950 = vmatprep.mubr.msk.bf16.mxu1 %vm3211_vm1, %v3210_v2 }
  0xb7   : >> { %2857 = vmatpush3.bf16.msra.mxu0 %v3146_v35 }
  0xb8   : >> { %2937 = vmatpush3.bf16.msra.mxu1 %v3147_v36  ;;  %2858 = vmatprep.subr.bf16.mxu0 %v3210_v2 }
  0xb9   : >> { %2938 = vmatprep.subr.bf16.mxu1 %v3210_v2 }
  0xbb   : >> { %2859 = vmatpush3.bf16.msra.mxu0 %v3148_v37 }
  0xbc   : >> { %2939 = vmatpush3.bf16.msra.mxu1 %v3149_v38  ;;  %2860 = vmatprep.subr.bf16.mxu0 %v3210_v2 }
  0xbd   : >> { %2940 = vmatprep.subr.bf16.mxu1 %v3210_v2 }
  0xbf   : >> { %2861 = vmatpush3.bf16.msra.mxu0 %v3150_v39 }
  0xc0   : >> { %2941 = vmatpush3.bf16.msra.mxu1 %v3151_v40  ;;  %2862 = vmatprep.subr.bf16.mxu0 %v3210_v2 }
  0xc1   : >> { %2942 = vmatprep.subr.bf16.mxu1 %v3210_v2 }
  0xc3   : >> { %2863 = vmatpush3.bf16.msra.mxu0 %v3152_v41 }
  0xc4   : >> { %2943 = vmatpush3.bf16.msra.mxu1 %v3153_v42  ;;  %2864 = vmatprep.subr.bf16.mxu0 %v3210_v2 }
  0xc5   : >> { %2944 = vmatprep.subr.bf16.mxu1 %v3210_v2 }
  0xc7   : >> { %2865 = vmatpush3.bf16.msra.mxu0 %v3154_v43 }
  0xc8   : >> { %2945 = vmatpush3.bf16.msra.mxu1 %v3155_v44  ;;  %2866 = vmatprep.subr.bf16.mxu0 %v3210_v2 }
  0xc9   : >> { %2946 = vmatprep.subr.bf16.mxu1 %v3210_v2 }
  0xcb   : >> { %2867 = vmatpush3.bf16.msra.mxu0 %v3156_v45 }
  0xcc   : >> { %2947 = vmatpush3.bf16.msra.mxu1 %v3157_v46  ;;  %2868 = vmatprep.subr.bf16.mxu0 %v3210_v2 }
  0xcd   : >> { %2948 = vmatprep.subr.bf16.mxu1 %v3210_v2 }
  0xcf   : >> { %2869 = vmatpush3.bf16.msra.mxu0 %v3158_v47 }
  0xd0   : >> { %2949 = vmatpush3.bf16.msra.mxu1 %v3159_v48  ;;  %2874 = vmatprep.subr.bf16.mxu0 %v3210_v2 }
  0xd1   : >> { %2954 = vmatprep.subr.bf16.mxu1 %v3210_v2 }
  0xd2   : >> { %2871 = vmatmul.mubr.bf16.vlgmr.msra.gmra.mrb[4].mxu0 %v3451_v51  ;;  %v3164_v51 = vld [vmem:[%s3868_s1 + $0x310] sm:$0xff]  }
  0xd3   : >> { %2875 = vmatpush3.bf16.msra.mxu0 %v3160_v49  ;;  %2951 = vmatmul.mubr.bf16.vlgmr.msra.gmra.mrb[4].mxu1 %v3487_v63  ;;  %v3172_v63 = vld [vmem:[%s3868_s1 + $0x330] sm:$0xff]  }
  0xd4   : >> { %2955 = vmatpush3.bf16.msra.mxu1 %v3161_v50  ;;  %2876 = vmatprep.subr.bf16.mxu0 %v3210_v2 }
  0xd5   : >> { %2956 = vmatprep.subr.bf16.mxu1 %v3210_v2  ;;  %2890 = vmatprep.mubr.msk.bf16.mxu0 %vm3211_vm1, %v3210_v2 }
  0xd6   : >> { %2970 = vmatprep.mubr.msk.bf16.mxu1 %vm3211_vm1, %v3210_v2 }
  0xd7   : >> { %2877 = vmatpush3.bf16.msra.mxu0 %v3162_v52 }
  0xd8   : >> { %2957 = vmatpush3.bf16.msra.mxu1 %v3163_v53  ;;  %2878 = vmatprep.subr.bf16.mxu0 %v3210_v2 }
  0xd9   : >> { %2958 = vmatprep.subr.bf16.mxu1 %v3210_v2 }
  0xdb   : >> { %2879 = vmatpush3.bf16.msra.mxu0 %v3164_v51 }
  0xdc   : >> { %2959 = vmatpush3.bf16.msra.mxu1 %v3165_v54  ;;  %2880 = vmatprep.subr.bf16.mxu0 %v3210_v2 }
  0xdd   : >> { %2960 = vmatprep.subr.bf16.mxu1 %v3210_v2 }
  0xdf   : >> { %2881 = vmatpush3.bf16.msra.mxu0 %v3166_v55 }
  0xe0   : >> { %2961 = vmatpush3.bf16.msra.mxu1 %v3167_v56  ;;  %2882 = vmatprep.subr.bf16.mxu0 %v3210_v2 }
  0xe1   : >> { %2962 = vmatprep.subr.bf16.mxu1 %v3210_v2 }
  0xe3   : >> { %2883 = vmatpush3.bf16.msra.mxu0 %v3168_v57 }
  0xe4   : >> { %2963 = vmatpush3.bf16.msra.mxu1 %v3169_v58  ;;  %2884 = vmatprep.subr.bf16.mxu0 %v3210_v2 }
  0xe5   : >> { %2964 = vmatprep.subr.bf16.mxu1 %v3210_v2 }
  0xe7   : >> { %2885 = vmatpush3.bf16.msra.mxu0 %v3170_v60 }
  0xe8   : >> { %2965 = vmatpush3.bf16.msra.mxu1 %v3171_v62  ;;  %2886 = vmatprep.subr.bf16.mxu0 %v3210_v2 }
  0xe9   : >> { %2966 = vmatprep.subr.bf16.mxu1 %v3210_v2 }
  0xeb   : >> { %2887 = vmatpush3.bf16.msra.mxu0 %v3172_v63 }
  0xec   : >> { %2967 = vmatpush3.bf16.msra.mxu1 %v3173_v1  ;;  %2888 = vmatprep.subr.bf16.mxu0 %v3210_v2 }
  0xed   : >> { %2968 = vmatprep.subr.bf16.mxu1 %v3210_v2 }
  0xef   : >> { %2889 = vmatpush3.bf16.msra.mxu0 %v3174_v3 }
  0xf0   : >> { %2969 = vmatpush3.bf16.msra.mxu1 %v3175_v6  ;;  %2894 = vmatprep.subr.bf16.mxu0 %v3210_v2 }
  0xf1   : >> { %2974 = vmatprep.subr.bf16.mxu1 %v3210_v2 }
  0xf2   : >> { %2891 = vmatmul.mubr.bf16.vlgmr.msra.gmra.mrb[4].mxu0 %v2148_v59 }
  0xf3   : >> { %2895 = vmatpush3.bf16.msra.mxu0 %v3177_v7  ;;  %2971 = vmatmul.mubr.bf16.vlgmr.msra.gmra.mrb[4].mxu1 %v1457_v8 }
  0xf4   : >> { %2975 = vmatpush3.bf16.msra.mxu1 %v3178_v9  ;;  %2896 = vmatprep.subr.bf16.mxu0 %v3210_v2 }
  0xf5   : >> { %2976 = vmatprep.subr.bf16.mxu1 %v3210_v2  ;;  %2910 = vmatprep.mubr.msk.bf16.mxu0 %vm3211_vm1, %v3210_v2 }
  0xf6   : >> { %2990 = vmatprep.mubr.msk.bf16.mxu1 %vm3211_vm1, %v3210_v2 }
  0xf7   : >> { %2897 = vmatpush3.bf16.msra.mxu0 %v3179_v10 }
  0xf8   : >> { %2977 = vmatpush3.bf16.msra.mxu1 %v3180_v11  ;;  %2898 = vmatprep.subr.bf16.mxu0 %v3210_v2 }
  0xf9   : >> { %2978 = vmatprep.subr.bf16.mxu1 %v3210_v2 }
  0xfb   : >> { %2899 = vmatpush3.bf16.msra.mxu0 %v3181_v12 }
  0xfc   : >> { %2979 = vmatpush3.bf16.msra.mxu1 %v3182_v13  ;;  %2900 = vmatprep.subr.bf16.mxu0 %v3210_v2 }
  0xfd   : >> { %2980 = vmatprep.subr.bf16.mxu1 %v3210_v2 }
  0xff   : >> { %2901 = vmatpush3.bf16.msra.mxu0 %v3183_v14 }
 0x100   : >> { %2981 = vmatpush3.bf16.msra.mxu1 %v3184_v15  ;;  %2902 = vmatprep.subr.bf16.mxu0 %v3210_v2 }
 0x101   : >> { %2982 = vmatprep.subr.bf16.mxu1 %v3210_v2 }
 0x103   : >> { %2903 = vmatpush3.bf16.msra.mxu0 %v3185_v16 }
 0x104   : >> { %2983 = vmatpush3.bf16.msra.mxu1 %v3186_v17  ;;  %2904 = vmatprep.subr.bf16.mxu0 %v3210_v2 }
 0x105   : >> { %2984 = vmatprep.subr.bf16.mxu1 %v3210_v2 }
 0x107   : >> { %2905 = vmatpush3.bf16.msra.mxu0 %v3187_v18 }
 0x108   : >> { %2985 = vmatpush3.bf16.msra.mxu1 %v3188_v19  ;;  %2906 = vmatprep.subr.bf16.mxu0 %v3210_v2 }
 0x109   : >> { %2986 = vmatprep.subr.bf16.mxu1 %v3210_v2 }
 0x10b   : >> { %2907 = vmatpush3.bf16.msra.mxu0 %v3189_v20 }
 0x10c   : >> { %2987 = vmatpush3.bf16.msra.mxu1 %v3190_v21  ;;  %2908 = vmatprep.subr.bf16.mxu0 %v3210_v2 }
 0x10d   : >> { %2988 = vmatprep.subr.bf16.mxu1 %v3210_v2 }
 0x10f   : >> { %2909 = vmatpush3.bf16.msra.mxu0 %v3191_v22 }
 0x110   : >> { %2989 = vmatpush3.bf16.msra.mxu1 %v3192_v23 }
 0x112   : >> { %2911 = vmatmul.mubr.bf16.vlgmr.msra.gmra.mrb[4].mxu0 %v1457_v8 }
 0x113   : >> { %2991 = vmatmul.mubr.bf16.vlgmr.msra.gmra.mrb[4].mxu1 %v1903_v24 }
 0x165   : >> { %v638_v25 = vpop.f32.mrb[0].mxu0 }
 0x166   : >> { %v646_v26 = vsel %vm645_vm2, %v638_v25, 0.0  ;;  %v654_v27 = vmul.f32 %v638_v25, %v638_v25  ;;  %v663_v28 = vpack.c.bf16 %v638_v25, %v638_v25  ;;  %v1086_v29 = vpop.f32.mrb[0].mxu1  ;;  %v2752_v30 = vpop.f32.mrb[1].mxu0 }
 0x167   : >> { %v647_v2 = vrot.slane %v646_v26, 4  ;;  %v1094_v31 = vsel %vm645_vm2, %v1086_v29, 0.0  ;;  %v1102_v32 = vmul.f32 %v1086_v29, %v1086_v29  ;;  %v1111_v33 = vpack.c.bf16 %v1086_v29, %v1086_v29  ;;  %v2832_v34 = vpop.f32.mrb[1].mxu1  ;;  %v641_v35 = vpop.f32.mrb[2].mxu0 }
 0x168   : >> { %v655_v36 = vsel %vm645_vm2, %v654_v27, 0.0  ;;  %666 = vst.msk [vmem:[%s3841_s4] sm:$0x3] %vm183_vm0, %v663_v28  ;;  %v1095_v37 = vrot.slane %v1094_v31, 4  ;;  %v1089_v38 = vpop.f32.mrb[2].mxu1  ;;  %v2753_v39 = vpop.f32.mrb[3].mxu0 }
 0x169   : >> { %v648_v40 = vadd.f32 %v647_v2, %v646_v26  ;;  %v656_v41 = vrot.slane %v655_v36, 4  ;;  %v1103_v42 = vsel %vm645_vm2, %v1102_v32, 0.0  ;;  %2329 = vst.msk [vmem:[%s3841_s4 + $0x8] sm:$0x3] %vm183_vm0, %v1111_v33  ;;  %v2833_v43 = vpop.f32.mrb[3].mxu1 }
 0x16a   : >> { %v1096_v44 = vadd.f32 %v1095_v37, %v1094_v31  ;;  %v1104_v45 = vrot.slane %v1103_v42, 4 }
 0x16b   : >> { %v649_v46 = vrot.slane %v648_v40, 2  ;;  %v657_v47 = vadd.f32 %v656_v41, %v655_v36 }
 0x16c   : >> { %v1097_v48 = vrot.slane %v1096_v44, 2  ;;  %v1105_v49 = vadd.f32 %v1104_v45, %v1103_v42  ;;  %v2016_v42 = vld [vmem:[#allocation2] sm:$0x1] }
 0x16d   : >> { %v650_v50 = vadd.f32 %v649_v46, %v648_v40  ;;  %v658_v52 = vrot.slane %v657_v47, 2  ;;  %v2020_v46 = vld [vmem:[#allocation2 + $0x1] sm:$0x1] }
 0x16e   : >> { %v1098_v53 = vadd.f32 %v1097_v48, %v1096_v44  ;;  %v1106_v51 = vrot.slane %v1105_v49, 2 }
 0x16f   : >> { %v651_v54 = vrot.slane %v650_v50, 1  ;;  %v659_v55 = vadd.f32 %v658_v52, %v657_v47 }
 0x170   : >> { %v1099_v56 = vrot.slane %v1098_v53, 1  ;;  %v1107_v57 = vadd.f32 %v1106_v51, %v1105_v49 }
 0x171   : >> { %v652_v58 = vadd.f32 %v651_v54, %v650_v50  ;;  %v660_v59 = vrot.slane %v659_v55, 1 }
 0x172   : >> { %v1100_v60 = vadd.f32 %v1099_v56, %v1098_v53  ;;  %v1108_v61 = vrot.slane %v1107_v57, 1 }
 0x173   : >> { %v661_v62 = vadd.f32 %v660_v59, %v659_v55 }
 0x174   : >> { %v1101_v63 = vadd.f32 %v1100_v60, %v652_v58  ;;  %v1109_v0 = vadd.f32 %v1108_v61, %v1107_v57 }
 0x176   : >> { %v1110_v1 = vadd.f32 %v1109_v0, %v661_v62 }
 0x1e5   : >> { %v1541_v3 = vpop.f32.mrb[4].mxu0 }
 0x1e6   : >> { %v1549_v4 = vsel %vm645_vm2, %v1541_v3, 0.0  ;;  %v1557_v5 = vmul.f32 %v1541_v3, %v1541_v3  ;;  %v1566_v6 = vpack.c.bf16 %v1541_v3, %v1541_v3  ;;  %v1987_v7 = vpop.f32.mrb[4].mxu1  ;;  %v2912_v8 = vpop.f32.mrb[5].mxu0 }
 0x1e7   : >> { %v1550_v9 = vrot.slane %v1549_v4, 4  ;;  %v1995_v10 = vsel %vm645_vm2, %v1987_v7, 0.0  ;;  %v2003_v11 = vmul.f32 %v1987_v7, %v1987_v7  ;;  %v2012_v12 = vpack.c.bf16 %v1987_v7, %v1987_v7  ;;  %v2992_v13 = vpop.f32.mrb[5].mxu1  ;;  %v1544_v14 = vpop.f32.mrb[6].mxu0 }
 0x1e8   : >> { %v1558_v15 = vsel %vm645_vm2, %v1557_v5, 0.0  ;;  %2428 = vst.msk [vmem:[%s3841_s4 + $0x10] sm:$0x3] %vm183_vm0, %v1566_v6  ;;  %v1996_v16 = vrot.slane %v1995_v10, 4  ;;  %v1990_v17 = vpop.f32.mrb[6].mxu1  ;;  %v2913_v18 = vpop.f32.mrb[7].mxu0 }
 0x1e9   : >> { %v1551_v19 = vadd.f32 %v1550_v9, %v1549_v4  ;;  %v1559_v20 = vrot.slane %v1558_v15, 4  ;;  %v2004_v21 = vsel %vm645_vm2, %v2003_v11, 0.0  ;;  %2526 = vst.msk [vmem:[%s3841_s4 + $0x18] sm:$0x3] %vm183_vm0, %v2012_v12  ;;  %v2993_v22 = vpop.f32.mrb[7].mxu1 }
 0x1ea   : >> { %v1997_v23 = vadd.f32 %v1996_v16, %v1995_v10  ;;  %v2005_v24 = vrot.slane %v2004_v21, 4 }
 0x1eb   : >> { %v1552_v25 = vrot.slane %v1551_v19, 2  ;;  %v1560_v26 = vadd.f32 %v1559_v20, %v1558_v15 }
 0x1ec   : >> { %v1998_v27 = vrot.slane %v1997_v23, 2  ;;  %v2006_v28 = vadd.f32 %v2005_v24, %v2004_v21 }
 0x1ed   : >> { %v1553_v29 = vadd.f32 %v1552_v25, %v1551_v19  ;;  %v1561_v30 = vrot.slane %v1560_v26, 2 }
 0x1ee   : >> { %v1999_v2 = vadd.f32 %v1998_v27, %v1997_v23  ;;  %v2007_v31 = vrot.slane %v2006_v28, 2 }
 0x1ef   : >> { %v1554_v32 = vrot.slane %v1553_v29, 1  ;;  %v1562_v33 = vadd.f32 %v1561_v30, %v1560_v26 }
 0x1f0   : >> { %v2000_v34 = vrot.slane %v1999_v2, 1  ;;  %v2008_v35 = vadd.f32 %v2007_v31, %v2006_v28 }
 0x1f1   : >> { %v1555_v36 = vadd.f32 %v1554_v32, %v1553_v29  ;;  %v1563_v37 = vrot.slane %v1562_v33, 1 }
 0x1f2   : >> { %v2009_v38 = vrot.slane %v2008_v35, 1  ;;  %v2001_v41 = vadd.f32 %v2000_v34, %v1999_v2 }
 0x1f3   : >> { %v1556_v39 = vadd.f32 %v1555_v36, %v1101_v63  ;;  %v1564_v40 = vadd.f32 %v1563_v37, %v1562_v33 }
 0x1f4   : >> { %v2010_v45 = vadd.f32 %v2009_v38, %v2008_v35 }
 0x1f5   : >> { %v1565_v43 = vadd.f32 %v1564_v40, %v1110_v1  ;;  %v2002_v44 = vadd.f32 %v2001_v41, %v1556_v39  ;;  %189 = sbr.rel (!%p187_p4) target bundleno = 17 (0x11), region = 99 }
 0x1f7   : >> { %v2011_v47 = vadd.f32 %v2010_v45, %v1565_v43  ;;  %v2017_v48 = vadd.f32 %v2016_v42, %v2002_v44 }
 0x1f9   : >> { %2019 = vst.msk [vmem:[#allocation2] sm:$0x1] %vm2018_vm3, %v2017_v48  ;;  %v2021_v49 = vadd.f32 %v2020_v46, %v2011_v47 }
 0x1fb   : >> { %2022 = vst.msk [vmem:[#allocation2 + $0x1] sm:$0x1] %vm2018_vm3, %v2021_v49 }
 0x202   : > { %v2023_v50 = vld [vmem:[#allocation2] sm:$0x3] }
 0x203   : > { %2024 = vst.msk [vmem:[%s3254_s25] sm:$0x3] %vm183_vm0, %v2023_v50 }
 0x204 PF: > { %s14_s12 = sadd.s32 1, %s3203_s12  }
 0x205   : > { %p11_p5 = scmp.ge.s32.totalorder %s14_s12, 4  }
 0x207   :  { %13 = sbr.rel (!%p11_p5) target bundleno = 1 (0x1), region = 110 }

// kernel: generator_forward.11
= control target key start
LH: loop header
LB: loop body
LE: loop exit
PB: predicated region body
PF: predicated region fallthrough
CT: control target
= control target key end

     0   :  { %s2335_s12 = smov 0   ;;  %s2722_s0 = inlined_call_operand.vmem [shape: bf16[2,10,10,64], index: 0, kind: input, shape index: {}]   ;;  %s2723_s1 = inlined_call_operand.vmem [shape: bf16[4,4,64,32], index: 1, kind: input, shape index: {}]   ;;  %s2724_s2 = inlined_call_operand.vmem [shape: bf16[2,32,8,32], index: 2, kind: output, shape index: {0}]   ;;  %s2725_s3 = inlined_call_operand.vmem [shape: f32[2,2,32], index: 3, kind: output, shape index: {1}]  }
   0x1 LB: > { %s1658_s13 = sadd.s32 4294967295, %s2306_s12   ;;  %p1662_p0 = scmp.ge.s32.totalorder %s2306_s12, 1  ;;  %s2306_s12 = sphi %s2335_s12, %s14_s12  }
   0x2   : > { %p140_p1 = scmp.lt.s32.totalorder %s2306_s12, 3 }
   0x4   : > { %p141_p2 = pnand %p1662_p0, %p140_p1 }
   0x5   : > { %p168_p3 = scmp.lt.s32.totalorder (!%p141_p2), %s1658_s13, 1  ;;  %vm183_vm0 = vcmask (!%p141_p2), 254976   ;;  %v2312_v0 = vmov (!%p141_p2), 0.0   ;;  %s2359_s26 = smov (!%p141_p2), 0  }
   0x6   : > { %144 = sbr.rel (%p141_p2) target bundleno = 388 (0x184), region = 28  ;;  %184 = vst.msk [vmem:[#allocation2] sm:$0x3] (!%p141_p2), %vm183_vm0, %v2312_v0 }
   0xd   : > { %s2727_s13 = smov (!%p168_p3, %s1658_s13), 1 }
   0xe   : > { %s2209_s14 = smul.u32 80, %s2727_s13  ;;  %s1887_s15 = sshll.u32 %s2727_s13, 7 }
   0xf   : > { %s2347_s18 = scalar_lea.vmem %s2724_s2, %s1887_s15  ;;  %s1666_s19 = sshll.u32 %s2727_s13, 1 }
  0x10   : > { %s2352_s22 = scalar_lea.vmem %s2722_s0, %s2209_s14  ;;  %s2357_s25 = scalar_lea.vmem %s2725_s3, %s1666_s19 }
  0x11 LB: >> { %v2229_v1 = vld [vmem:[%s2723_s1 + $0x40] sm:$0xff]   ;;  %v2313_v2 = vmov 0.0   ;;  %v2231_v4 = vld [vmem:[%s2723_s1 + $0x48] sm:$0xff]   ;;  %vm2314_vm1 = vmmov 0   ;;  %s1888_s6 = sshll.u32 %s2310_s26, 3  ;;  %v2233_v6 = vld [vmem:[%s2723_s1 + $0x50] sm:$0xff]   ;;  %s2310_s26 = sphi %s2359_s26, %s190_s26  }
  0x12   : >> { %1969 = vmatprep.subr.bf16.mxu0 %v2313_v2  ;;  %2017 = vmatprep.subr.bf16.mxu1 %v2313_v2  ;;  %v2230_v3 = vld [vmem:[%s2723_s1 + $0x60] sm:$0xff]   ;;  %v2232_v5 = vld [vmem:[%s2723_s1 + $0x68] sm:$0xff]   ;;  %s2386_s9 = scalar_lea.vmem %s2352_s22, %s1888_s6  ;;  %v2234_v7 = vld [vmem:[%s2723_s1 + $0x70] sm:$0xff]   ;;  %vm261_vm2 = vcmask 523264   ;;  %s1721_s28 = sshll.u32 %s2310_s26, 2  ;;  %vm538_vm3 = vcmask 261120  }
  0x13   : >> { %1970 = vmatpush3.bf16.msra.mxu0 %v2229_v1  ;;  %1977 = vmatprep.mubr.msk.bf16.mxu0 %vm2314_vm1, %v2313_v2  ;;  %v194_v8 = vld [vmem:[%s2386_s9] sm:$0xf]  ;;  %v195_v9 = vld [vmem:[%s2386_s9 + $0x4] sm:$0x1]  ;;  %v2235_v11 = vld [vmem:[%s2723_s1 + $0x58] sm:$0xff]   ;;  %s2696_s29 = scalar_lea.vmem %s2347_s18, %s1721_s28  ;;  %vm559_vm4 = vcmask 257024  }
  0x14   : >> { %2018 = vmatpush3.bf16.msra.mxu1 %v2230_v3  ;;  %1971 = vmatprep.subr.bf16.mxu0 %v2313_v2  ;;  %v1683_v10 = vcombine.low %v194_v8, %v195_v9  ;;  %v2236_v12 = vld [vmem:[%s2723_s1 + $0x78] sm:$0xff]   ;;  %v2238_v16 = vld [vmem:[%s2723_s1] sm:$0xff]   ;;  %v2240_v20 = vld [vmem:[%s2723_s1 + $0x8] sm:$0xff]   ;;  %vm1541_vm5 = vcmask 253952   ;;  %s190_s26 = sadd.s32 1, %s2310_s26  }
  0x15   : >> { %2019 = vmatprep.subr.bf16.mxu1 %v2313_v2  ;;  %2025 = vmatprep.mubr.msk.bf16.mxu1 %vm2314_vm1, %v2313_v2  ;;  %v2239_v19 = vld [vmem:[%s2723_s1 + $0x20] sm:$0xff]   ;;  %v2241_v21 = vld [vmem:[%s2723_s1 + $0x28] sm:$0xff]   ;;  %v2242_v22 = vld [vmem:[%s2723_s1 + $0x10] sm:$0xff]   ;;  %p187_p4 = scmp.ge.s32.totalorder %s190_s26, 8  }
  0x16   : >> { %v231_v13 = vshrl.u32 %v1683_v10, 16  ;;  %v233_v14 = vshll.u32 %v1683_v10, 16  ;;  %v579_v17 = vrot.slane %v1683_v10, 1  ;;  %v2243_v23 = vld [vmem:[%s2723_s1 + $0x30] sm:$0xff]   ;;  %v2244_v24 = vld [vmem:[%s2723_s1 + $0x18] sm:$0xff]   ;;  %v2246_v26 = vld [vmem:[%s2723_s1 + $0x100] sm:$0xff]  }
  0x17   : >> { %1972 = vmatpush3.bf16.msra.mxu0 %v2231_v4  ;;  %v2245_v25 = vld [vmem:[%s2723_s1 + $0x38] sm:$0xff]   ;;  %v2247_v27 = vld [vmem:[%s2723_s1 + $0x120] sm:$0xff]   ;;  %v2451_v28 = vld [vmem:[%s2386_s9 + $0x8] sm:$0xf] }
  0x18   : >> { %2020 = vmatpush3.bf16.msra.mxu1 %v2232_v5  ;;  %1973 = vmatprep.subr.bf16.mxu0 %v2313_v2  ;;  %v235_v15 = vrot.slane %v233_v14, 1  ;;  %v1671_v29 = vld [vmem:[%s2386_s9 + $0xc] sm:$0x1]  ;;  %v2250_v33 = vld [vmem:[%s2723_s1 + $0x110] sm:$0xff]   ;;  %v2252_v36 = vld [vmem:[%s2723_s1 + $0x118] sm:$0xff]  }
  0x19   : >> { %2021 = vmatprep.subr.bf16.mxu1 %v2313_v2  ;;  %v2248_v30 = vld [vmem:[%s2723_s1 + $0x108] sm:$0xff]   ;;  %v2462_v31 = vcombine.low %v2451_v28, %v1671_v29  ;;  %v2251_v35 = vld [vmem:[%s2723_s1 + $0x130] sm:$0xff]   ;;  %v2253_v39 = vld [vmem:[%s2723_s1 + $0x138] sm:$0xff]  }
  0x1a   : >> { %v236_v18 = vor.u32 %v235_v15, %v231_v13  ;;  %v2249_v32 = vld [vmem:[%s2723_s1 + $0x128] sm:$0xff]   ;;  %v2255_v40 = vld [vmem:[%s2723_s1 + $0x140] sm:$0xff]   ;;  %v2259_v45 = vld [vmem:[%s2723_s1 + $0x150] sm:$0xff]  }
  0x1b   : >> { %1974 = vmatpush3.bf16.msra.mxu0 %v2233_v6  ;;  %v466_v34 = vshll.u32 %v2462_v31, 16  ;;  %v464_v37 = vshrl.u32 %v2462_v31, 16  ;;  %v2256_v42 = vld [vmem:[%s2723_s1 + $0x160] sm:$0xff]   ;;  %v2257_v43 = vld [vmem:[%s2723_s1 + $0x148] sm:$0xff]   ;;  %v2260_v46 = vld [vmem:[%s2723_s1 + $0x170] sm:$0xff]   ;;  %v794_v49 = vrot.slane %v2462_v31, 1 }
  0x1c   : >> { %2022 = vmatpush3.bf16.msra.mxu1 %v2234_v7  ;;  %1975 = vmatprep.subr.bf16.mxu0 %v2313_v2  ;;  %v2258_v44 = vld [vmem:[%s2723_s1 + $0x168] sm:$0xff]   ;;  %v2261_v47 = vld [vmem:[%s2723_s1 + $0x158] sm:$0xff]   ;;  %v2263_v50 = vld [vmem:[%s2723_s1 + $0xc0] sm:$0xff]  }
  0x1d   : >> { %2023 = vmatprep.subr.bf16.mxu1 %v2313_v2  ;;  %v468_v38 = vrot.slane %v466_v34, 1  ;;  %v2262_v48 = vld [vmem:[%s2723_s1 + $0x178] sm:$0xff]   ;;  %v2264_v51 = vld [vmem:[%s2723_s1 + $0xe0] sm:$0xff]   ;;  %v2265_v52 = vld [vmem:[%s2723_s1 + $0xc8] sm:$0xff]  }
  0x1e   : >> { %v2266_v53 = vld [vmem:[%s2723_s1 + $0xe8] sm:$0xff]   ;;  %v2267_v54 = vld [vmem:[%s2723_s1 + $0xd0] sm:$0xff]   ;;  %v2269_v56 = vld [vmem:[%s2723_s1 + $0xd8] sm:$0xff]  }
  0x1f   : >> { %1976 = vmatpush3.bf16.msra.mxu0 %v2235_v11  ;;  %v2494_v41 = vor.u32 %v468_v38, %v464_v37  ;;  %v2268_v55 = vld [vmem:[%s2723_s1 + $0xf0] sm:$0xff]   ;;  %v2270_v57 = vld [vmem:[%s2723_s1 + $0xf8] sm:$0xff]   ;;  %v2271_v58 = vld [vmem:[%s2723_s1 + $0x80] sm:$0xff]  }
  0x20   : >> { %2024 = vmatpush3.bf16.msra.mxu1 %v2236_v12  ;;  %1981 = vmatprep.subr.bf16.mxu0 %v2313_v2  ;;  %v2272_v59 = vld [vmem:[%s2723_s1 + $0xa0] sm:$0xff]   ;;  %v2273_v60 = vld [vmem:[%s2723_s1 + $0x88] sm:$0xff]   ;;  %v2275_v62 = vld [vmem:[%s2723_s1 + $0x90] sm:$0xff]  }
  0x21   : >> { %2029 = vmatprep.subr.bf16.mxu1 %v2313_v2  ;;  %v2274_v61 = vld [vmem:[%s2723_s1 + $0xa8] sm:$0xff]   ;;  %v2276_v63 = vld [vmem:[%s2723_s1 + $0xb0] sm:$0xff]   ;;  %v2277_v0 = vld [vmem:[%s2723_s1 + $0x98] sm:$0xff]  }
  0x22   : >> { %1978 = vmatmul.mubr.msk.bf16.vlgmr.msra.gmra.mrb[0].mxu0 %vm261_vm2, %v236_v18  ;;  %v2278_v1 = vld [vmem:[%s2723_s1 + $0xb8] sm:$0xff]   ;;  %v2279_v3 = vld [vmem:[%s2723_s1 + $0x180] sm:$0xff]   ;;  %v1673_v5 = vld [vmem:[%s2386_s9 + $0x10] sm:$0xf] }
  0x23   : >> { %1982 = vmatpush3.bf16.msra.mxu0 %v2238_v16  ;;  %2026 = vmatmul.mubr.msk.bf16.vlgmr.msra.gmra.mrb[0].mxu1 %vm261_vm2, %v579_v17  ;;  %v2280_v4 = vld [vmem:[%s2723_s1 + $0x1a0] sm:$0xff]   ;;  %v1674_v6 = vld [vmem:[%s2386_s9 + $0x14] sm:$0x1]  ;;  %v2281_v7 = vld [vmem:[%s2723_s1 + $0x188] sm:$0xff]  }
  0x24   : >> { %2030 = vmatpush3.bf16.msra.mxu1 %v2239_v19  ;;  %1983 = vmatprep.subr.bf16.mxu0 %v2313_v2  ;;  %v2282_v9 = vld [vmem:[%s2723_s1 + $0x1a8] sm:$0xff]   ;;  %v2283_v10 = vld [vmem:[%s2723_s1 + $0x190] sm:$0xff]   ;;  %v2285_v13 = vld [vmem:[%s2723_s1 + $0x198] sm:$0xff]  }
  0x25   : >> { %2031 = vmatprep.subr.bf16.mxu1 %v2313_v2  ;;  %1989 = vmatprep.mubr.msk.bf16.mxu0 %vm2314_vm1, %v2313_v2  ;;  %v2284_v12 = vld [vmem:[%s2723_s1 + $0x1b0] sm:$0xff]   ;;  %v2286_v16 = vld [vmem:[%s2723_s1 + $0x1b8] sm:$0xff]   ;;  %v2288_v17 = vld [vmem:[%s2723_s1 + $0x1c0] sm:$0xff]  }
  0x26   : >> { %2037 = vmatprep.mubr.msk.bf16.mxu1 %vm2314_vm1, %v2313_v2  ;;  %v2289_v19 = vld [vmem:[%s2723_s1 + $0x1e0] sm:$0xff]  }
  0x27   : >> { %1984 = vmatpush3.bf16.msra.mxu0 %v2240_v20  ;;  %v2290_v20 = vld [vmem:[%s2723_s1 + $0x1c8] sm:$0xff]  }
  0x28   : >> { %2032 = vmatpush3.bf16.msra.mxu1 %v2241_v21  ;;  %1985 = vmatprep.subr.bf16.mxu0 %v2313_v2  ;;  %v2291_v21 = vld [vmem:[%s2723_s1 + $0x1e8] sm:$0xff]  }
  0x29   : >> { %2033 = vmatprep.subr.bf16.mxu1 %v2313_v2 }
  0x2b   : >> { %1986 = vmatpush3.bf16.msra.mxu0 %v2242_v22  ;;  %v2292_v22 = vld [vmem:[%s2723_s1 + $0x1d0] sm:$0xff]  }
  0x2c   : >> { %2034 = vmatpush3.bf16.msra.mxu1 %v2243_v23  ;;  %1987 = vmatprep.subr.bf16.mxu0 %v2313_v2  ;;  %v2293_v23 = vld [vmem:[%s2723_s1 + $0x1f0] sm:$0xff]  }
  0x2d   : >> { %2035 = vmatprep.subr.bf16.mxu1 %v2313_v2 }
  0x2f   : >> { %1988 = vmatpush3.bf16.msra.mxu0 %v2244_v24  ;;  %v2294_v24 = vld [vmem:[%s2723_s1 + $0x1d8] sm:$0xff]  }
  0x30   : >> { %2036 = vmatpush3.bf16.msra.mxu1 %v2245_v25  ;;  %1993 = vmatprep.subr.bf16.mxu0 %v2313_v2  ;;  %v2295_v25 = vld [vmem:[%s2723_s1 + $0x1f8] sm:$0xff]  }
  0x31   : >> { %2041 = vmatprep.subr.bf16.mxu1 %v2313_v2 }
  0x32   : >> { %1990 = vmatmul.mubr.msk.bf16.vlgmr.msra.gmra.mrb[0].mxu0 %vm261_vm2, %v194_v8  ;;  %v1823_v8 = vcombine.low %v1673_v5, %v1674_v6 }
  0x33   : >> { %1994 = vmatpush3.bf16.msra.mxu0 %v2246_v26  ;;  %2038 = vmatmul.mubr.msk.bf16.vlgmr.msra.gmra.mrb[0].mxu1 %vm261_vm2, %v236_v18 }
  0x34   : >> { %2042 = vmatpush3.bf16.msra.mxu1 %v2247_v27  ;;  %1995 = vmatprep.subr.bf16.mxu0 %v2313_v2  ;;  %v1125_v11 = vshll.u32 %v1823_v8, 16  ;;  %v1123_v14 = vshrl.u32 %v1823_v8, 16  ;;  %v1448_v26 = vrot.slane %v1823_v8, 1 }
  0x35   : >> { %2043 = vmatprep.subr.bf16.mxu1 %v2313_v2  ;;  %2001 = vmatprep.mubr.msk.bf16.mxu0 %vm2314_vm1, %v2313_v2 }
  0x36   : >> { %2049 = vmatprep.mubr.msk.bf16.mxu1 %vm2314_vm1, %v2313_v2  ;;  %v1127_v15 = vrot.slane %v1125_v11, 1 }
  0x37   : >> { %1996 = vmatpush3.bf16.msra.mxu0 %v2248_v30 }
  0x38   : >> { %2044 = vmatpush3.bf16.msra.mxu1 %v2249_v32  ;;  %1997 = vmatprep.subr.bf16.mxu0 %v2313_v2  ;;  %v1128_v18 = vor.u32 %v1127_v15, %v1123_v14 }
  0x39   : >> { %2045 = vmatprep.subr.bf16.mxu1 %v2313_v2 }
  0x3b   : >> { %1998 = vmatpush3.bf16.msra.mxu0 %v2250_v33 }
  0x3c   : >> { %2046 = vmatpush3.bf16.msra.mxu1 %v2251_v35  ;;  %1999 = vmatprep.subr.bf16.mxu0 %v2313_v2 }
  0x3d   : >> { %2047 = vmatprep.subr.bf16.mxu1 %v2313_v2 }
  0x3f   : >> { %2000 = vmatpush3.bf16.msra.mxu0 %v2252_v36 }
  0x40   : >> { %2048 = vmatpush3.bf16.msra.mxu1 %v2253_v39  ;;  %2005 = vmatprep.subr.bf16.mxu0 %v2313_v2 }
  0x41   : >> { %2053 = vmatprep.subr.bf16.mxu1 %v2313_v2 }
  0x42   : >> { %2002 = vmatmul.mubr.msk.bf16.vlgmr.msra.gmra.mrb[0].mxu0 %vm261_vm2, %v2451_v28 }
  0x43   : >> { %2006 = vmatpush3.bf16.msra.mxu0 %v2255_v40  ;;  %2050 = vmatmul.mubr.msk.bf16.vlgmr.msra.gmra.mrb[0].mxu1 %vm261_vm2, %v2494_v41 }
  0x44   : >> { %2054 = vmatpush3.bf16.msra.mxu1 %v2256_v42  ;;  %2007 = vmatprep.subr.bf16.mxu0 %v2313_v2 }
  0x45   : >> { %2055 = vmatprep.subr.bf16.mxu1 %v2313_v2  ;;  %2013 = vmatprep.mubr.msk.bf16.mxu0 %vm2314_vm1, %v2313_v2 }
  0x46   : >> { %2061 = vmatprep.mubr.msk.bf16.mxu1 %vm2314_vm1, %v2313_v2 }
  0x47   : >> { %2008 = vmatpush3.bf16.msra.mxu0 %v2257_v43 }
  0x48   : >> { %2056 = vmatpush3.bf16.msra.mxu1 %v2258_v44  ;;  %2009 = vmatprep.subr.bf16.mxu0 %v2313_v2 }
  0x49   : >> { %2057 = vmatprep.subr.bf16.mxu1 %v2313_v2 }
  0x4b   : >> { %2010 = vmatpush3.bf16.msra.mxu0 %v2259_v45 }
  0x4c   : >> { %2058 = vmatpush3.bf16.msra.mxu1 %v2260_v46  ;;  %2011 = vmatprep.subr.bf16.mxu0 %v2313_v2 }
  0x4d   : >> { %2059 = vmatprep.subr.bf16.mxu1 %v2313_v2 }
  0x4f   : >> { %2012 = vmatpush3.bf16.msra.mxu0 %v2261_v47 }
  0x50   : >> { %2060 = vmatpush3.bf16.msra.mxu1 %v2262_v48  ;;  %2065 = vmatprep.subr.bf16.mxu0 %v2313_v2 }
  0x51   : >> { %2113 = vmatprep.subr.bf16.mxu1 %v2313_v2 }
  0x52   : >> { %2014 = vmatmul.mubr.msk.bf16.vlgmr.msra.gmra.mrb[0].mxu0 %vm261_vm2, %v2494_v41 }
  0x53   : >> { %2062 = vmatmul.mubr.msk.bf16.vlgmr.msra.gmra.mrb[0].mxu1 %vm261_vm2, %v794_v49  ;;  %2066 = vmatpush3.bf16.msra.mxu0 %v2263_v50 }
  0x54   : >> { %2114 = vmatpush3.bf16.msra.mxu1 %v2264_v51  ;;  %2067 = vmatprep.subr.bf16.mxu0 %v2313_v2 }
  0x55   : >> { %2115 = vmatprep.subr.bf16.mxu1 %v2313_v2  ;;  %2073 = vmatprep.mubr.msk.bf16.mxu0 %vm2314_vm1, %v2313_v2 }
  0x56   : >> { %2121 = vmatprep.mubr.msk.bf16.mxu1 %vm2314_vm1, %v2313_v2 }
  0x57   : >> { %2068 = vmatpush3.bf16.msra.mxu0 %v2265_v52 }
  0x58   : >> { %2116 = vmatpush3.bf16.msra.mxu1 %v2266_v53  ;;  %2069 = vmatprep.subr.bf16.mxu0 %v2313_v2 }
  0x59   : >> { %2117 = vmatprep.subr.bf16.mxu1 %v2313_v2 }
  0x5b   : >> { %2070 = vmatpush3.bf16.msra.mxu0 %v2267_v54 }
  0x5c   : >> { %2118 = vmatpush3.bf16.msra.mxu1 %v2268_v55  ;;  %2071 = vmatprep.subr.bf16.mxu0 %v2313_v2 }
  0x5d   : >> { %2119 = vmatprep.subr.bf16.mxu1 %v2313_v2 }
  0x5f   : >> { %2072 = vmatpush3.bf16.msra.mxu0 %v2269_v56 }
  0x60   : >> { %2120 = vmatpush3.bf16.msra.mxu1 %v2270_v57  ;;  %2077 = vmatprep.subr.bf16.mxu0 %v2313_v2 }
  0x61   : >> { %2125 = vmatprep.subr.bf16.mxu1 %v2313_v2 }
  0x62   : >> { %2074 = vmatmul.mubr.msk.bf16.vlgmr.msra.gmra.mrb[4].mxu0 %vm261_vm2, %v2494_v41 }
  0x63   : >> { %2078 = vmatpush3.bf16.msra.mxu0 %v2271_v58  ;;  %2122 = vmatmul.mubr.msk.bf16.vlgmr.msra.gmra.mrb[4].mxu1 %vm261_vm2, %v794_v49 }
  0x64   : >> { %2126 = vmatpush3.bf16.msra.mxu1 %v2272_v59  ;;  %2079 = vmatprep.subr.bf16.mxu0 %v2313_v2 }
  0x65   : >> { %2127 = vmatprep.subr.bf16.mxu1 %v2313_v2  ;;  %2085 = vmatprep.mubr.msk.bf16.mxu0 %vm2314_vm1, %v2313_v2 }
  0x66   : >> { %2133 = vmatprep.mubr.msk.bf16.mxu1 %vm2314_vm1, %v2313_v2 }
  0x67   : >> { %2080 = vmatpush3.bf16.msra.mxu0 %v2273_v60 }
  0x68   : >> { %2128 = vmatpush3.bf16.msra.mxu1 %v2274_v61  ;;  %2081 = vmatprep.subr.bf16.mxu0 %v2313_v2 }
  0x69   : >> { %2129 = vmatprep.subr.bf16.mxu1 %v2313_v2 }
  0x6b   : >> { %2082 = vmatpush3.bf16.msra.mxu0 %v2275_v62 }
  0x6c   : >> { %2130 = vmatpush3.bf16.msra.mxu1 %v2276_v63  ;;  %2083 = vmatprep.subr.bf16.mxu0 %v2313_v2 }
  0x6d   : >> { %2131 = vmatprep.subr.bf16.mxu1 %v2313_v2 }
  0x6f   : >> { %2084 = vmatpush3.bf16.msra.mxu0 %v2277_v0 }
  0x70   : >> { %2132 = vmatpush3.bf16.msra.mxu1 %v2278_v1  ;;  %2089 = vmatprep.subr.bf16.mxu0 %v2313_v2 }
  0x71   : >> { %2137 = vmatprep.subr.bf16.mxu1 %v2313_v2 }
  0x72   : >> { %2086 = vmatmul.mubr.msk.bf16.vlgmr.msra.gmra.mrb[4].mxu0 %vm261_vm2, %v2451_v28 }
  0x73   : >> { %2090 = vmatpush3.bf16.msra.mxu0 %v2279_v3  ;;  %2134 = vmatmul.mubr.msk.bf16.vlgmr.msra.gmra.mrb[4].mxu1 %vm261_vm2, %v2494_v41 }
  0x74   : >> { %2138 = vmatpush3.bf16.msra.mxu1 %v2280_v4  ;;  %2091 = vmatprep.subr.bf16.mxu0 %v2313_v2 }
  0x75   : >> { %2139 = vmatprep.subr.bf16.mxu1 %v2313_v2  ;;  %2097 = vmatprep.mubr.msk.bf16.mxu0 %vm2314_vm1, %v2313_v2 }
  0x76   : >> { %2145 = vmatprep.mubr.msk.bf16.mxu1 %vm2314_vm1, %v2313_v2 }
  0x77   : >> { %2092 = vmatpush3.bf16.msra.mxu0 %v2281_v7 }
  0x78   : >> { %2140 = vmatpush3.bf16.msra.mxu1 %v2282_v9  ;;  %2093 = vmatprep.subr.bf16.mxu0 %v2313_v2 }
  0x79   : >> { %2141 = vmatprep.subr.bf16.mxu1 %v2313_v2 }
  0x7b   : >> { %2094 = vmatpush3.bf16.msra.mxu0 %v2283_v10 }
  0x7c   : >> { %2142 = vmatpush3.bf16.msra.mxu1 %v2284_v12  ;;  %2095 = vmatprep.subr.bf16.mxu0 %v2313_v2 }
  0x7d   : >> { %2143 = vmatprep.subr.bf16.mxu1 %v2313_v2 }
  0x7f   : >> { %2096 = vmatpush3.bf16.msra.mxu0 %v2285_v13 }
  0x80   : >> { %2144 = vmatpush3.bf16.msra.mxu1 %v2286_v16  ;;  %2101 = vmatprep.subr.bf16.mxu0 %v2313_v2 }
  0x81   : >> { %2149 = vmatprep.subr.bf16.mxu1 %v2313_v2 }
  0x82   : >> { %2098 = vmatmul.mubr.msk.bf16.vlgmr.msra.gmra.mrb[4].mxu0 %vm261_vm2, %v1673_v5 }
  0x83   : >> { %2102 = vmatpush3.bf16.msra.mxu0 %v2288_v17  ;;  %2146 = vmatmul.mubr.msk.bf16.vlgmr.msra.gmra.mrb[4].mxu1 %vm261_vm2, %v1128_v18 }
  0x84   : >> { %2150 = vmatpush3.bf16.msra.mxu1 %v2289_v19  ;;  %2103 = vmatprep.subr.bf16.mxu0 %v2313_v2 }
  0x85   : >> { %2151 = vmatprep.subr.bf16.mxu1 %v2313_v2  ;;  %2109 = vmatprep.mubr.msk.bf16.mxu0 %vm2314_vm1, %v2313_v2 }
  0x86   : >> { %2157 = vmatprep.mubr.msk.bf16.mxu1 %vm2314_vm1, %v2313_v2 }
  0x87   : >> { %2104 = vmatpush3.bf16.msra.mxu0 %v2290_v20 }
  0x88   : >> { %2152 = vmatpush3.bf16.msra.mxu1 %v2291_v21  ;;  %2105 = vmatprep.subr.bf16.mxu0 %v2313_v2 }
  0x89   : >> { %2153 = vmatprep.subr.bf16.mxu1 %v2313_v2 }
  0x8b   : >> { %2106 = vmatpush3.bf16.msra.mxu0 %v2292_v22 }
  0x8c   : >> { %2154 = vmatpush3.bf16.msra.mxu1 %v2293_v23  ;;  %2107 = vmatprep.subr.bf16.mxu0 %v2313_v2 }
  0x8d   : >> { %2155 = vmatprep.subr.bf16.mxu1 %v2313_v2 }
  0x8f   : >> { %2108 = vmatpush3.bf16.msra.mxu0 %v2294_v24 }
  0x90   : >> { %2156 = vmatpush3.bf16.msra.mxu1 %v2295_v25 }
  0x92   : >> { %2110 = vmatmul.mubr.msk.bf16.vlgmr.msra.gmra.mrb[4].mxu0 %vm261_vm2, %v1128_v18 }
  0x93   : >> { %2158 = vmatmul.mubr.msk.bf16.vlgmr.msra.gmra.mrb[4].mxu1 %vm261_vm2, %v1448_v26 }
 0x125   : >> { %v531_v27 = vpop.f32.mrb[0].mxu0 }
 0x126   : >> { %v539_v28 = vsel %vm538_vm3, %v531_v27, 0.0  ;;  %v547_v29 = vmul.f32 %v531_v27, %v531_v27  ;;  %v556_v30 = vpack.c.bf16 %v531_v27, %v531_v27  ;;  %v856_v31 = vpop.f32.mrb[0].mxu1  ;;  %v2015_v2 = vpop.f32.mrb[1].mxu0 }
 0x127   : >> { %v540_v32 = vrot.slane %v539_v28, 4  ;;  %v864_v33 = vsel %vm538_vm3, %v856_v31, 0.0  ;;  %v872_v34 = vmul.f32 %v856_v31, %v856_v31  ;;  %v881_v35 = vpack.c.bf16 %v856_v31, %v856_v31  ;;  %v2063_v36 = vpop.f32.mrb[1].mxu1  ;;  %v534_v37 = vpop.f32.mrb[2].mxu0 }
 0x128   : >> { %v548_v38 = vsel %vm538_vm3, %v547_v29, 0.0  ;;  %560 = vst.msk [vmem:[%s2696_s29] sm:$0xf] %vm559_vm4, %v556_v30  ;;  %v865_v39 = vrot.slane %v864_v33, 4  ;;  %v859_v40 = vpop.f32.mrb[2].mxu1  ;;  %v2016_v41 = vpop.f32.mrb[3].mxu0 }
 0x129   : >> { %v541_v42 = vadd.f32 %v540_v32, %v539_v28  ;;  %v549_v43 = vrot.slane %v548_v38, 4  ;;  %v873_v44 = vsel %vm538_vm3, %v872_v34, 0.0  ;;  %1775 = vst.msk [vmem:[%s2696_s29 + $0x20] sm:$0xf] %vm559_vm4, %v881_v35  ;;  %v2064_v45 = vpop.f32.mrb[3].mxu1 }
 0x12a   : >> { %v866_v46 = vadd.f32 %v865_v39, %v864_v33  ;;  %v874_v47 = vrot.slane %v873_v44, 4 }
 0x12b   : >> { %v542_v48 = vrot.slane %v541_v42, 2  ;;  %v550_v49 = vadd.f32 %v549_v43, %v548_v38 }
 0x12c   : >> { %v867_v50 = vrot.slane %v866_v46, 2  ;;  %v875_v51 = vadd.f32 %v874_v47, %v873_v44  ;;  %v1539_v44 = vld [vmem:[#allocation2] sm:$0x1] }
 0x12d   : >> { %v543_v52 = vadd.f32 %v542_v48, %v541_v42  ;;  %v551_v53 = vrot.slane %v550_v49, 2  ;;  %v1543_v48 = vld [vmem:[#allocation2 + $0x1] sm:$0x1] }
 0x12e   : >> { %v868_v54 = vadd.f32 %v867_v50, %v866_v46  ;;  %v876_v55 = vrot.slane %v875_v51, 2 }
 0x12f   : >> { %v544_v56 = vrot.slane %v543_v52, 1  ;;  %v552_v57 = vadd.f32 %v551_v53, %v550_v49 }
 0x130   : >> { %v869_v58 = vrot.slane %v868_v54, 1  ;;  %v877_v59 = vadd.f32 %v876_v55, %v875_v51 }
 0x131   : >> { %v545_v60 = vadd.f32 %v544_v56, %v543_v52  ;;  %v553_v61 = vrot.slane %v552_v57, 1 }
 0x132   : >> { %v870_v62 = vadd.f32 %v869_v58, %v868_v54  ;;  %v878_v63 = vrot.slane %v877_v59, 1 }
 0x133   : >> { %v554_v0 = vadd.f32 %v553_v61, %v552_v57 }
 0x134   : >> { %v871_v1 = vadd.f32 %v870_v62, %v545_v60  ;;  %v879_v3 = vadd.f32 %v878_v63, %v877_v59 }
 0x136   : >> { %v880_v4 = vadd.f32 %v879_v3, %v554_v0 }
 0x165   : >> { %v1190_v5 = vpop.f32.mrb[4].mxu0 }
 0x166   : >> { %v1198_v6 = vsel %vm538_vm3, %v1190_v5, 0.0  ;;  %v1206_v7 = vmul.f32 %v1190_v5, %v1190_v5  ;;  %v1215_v8 = vpack.c.bf16 %v1190_v5, %v1190_v5  ;;  %v1510_v9 = vpop.f32.mrb[4].mxu1  ;;  %v2111_v10 = vpop.f32.mrb[5].mxu0 }
 0x167   : >> { %v1199_v11 = vrot.slane %v1198_v6, 4  ;;  %v1518_v12 = vsel %vm538_vm3, %v1510_v9, 0.0  ;;  %v1526_v13 = vmul.f32 %v1510_v9, %v1510_v9  ;;  %v1535_v14 = vpack.c.bf16 %v1510_v9, %v1510_v9  ;;  %v2159_v15 = vpop.f32.mrb[5].mxu1  ;;  %v1193_v16 = vpop.f32.mrb[6].mxu0 }
 0x168   : >> { %v1207_v17 = vsel %vm538_vm3, %v1206_v7, 0.0  ;;  %1830 = vst.msk [vmem:[%s2696_s29 + $0x40] sm:$0xf] %vm559_vm4, %v1215_v8  ;;  %v1519_v18 = vrot.slane %v1518_v12, 4  ;;  %v1513_v19 = vpop.f32.mrb[6].mxu1  ;;  %v2112_v20 = vpop.f32.mrb[7].mxu0 }
 0x169   : >> { %v1200_v21 = vadd.f32 %v1199_v11, %v1198_v6  ;;  %v1208_v22 = vrot.slane %v1207_v17, 4  ;;  %v1527_v23 = vsel %vm538_vm3, %v1526_v13, 0.0  ;;  %1884 = vst.msk [vmem:[%s2696_s29 + $0x60] sm:$0xf] %vm559_vm4, %v1535_v14  ;;  %v2160_v24 = vpop.f32.mrb[7].mxu1 }
 0x16a   : >> { %v1520_v25 = vadd.f32 %v1519_v18, %v1518_v12  ;;  %v1528_v26 = vrot.slane %v1527_v23, 4 }
 0x16b   : >> { %v1201_v27 = vrot.slane %v1200_v21, 2  ;;  %v1209_v28 = vadd.f32 %v1208_v22, %v1207_v17 }
 0x16c   : >> { %v1521_v29 = vrot.slane %v1520_v25, 2  ;;  %v1529_v30 = vadd.f32 %v1528_v26, %v1527_v23 }
 0x16d   : >> { %v1202_v31 = vadd.f32 %v1201_v27, %v1200_v21  ;;  %v1210_v2 = vrot.slane %v1209_v28, 2 }
 0x16e   : >> { %v1522_v32 = vadd.f32 %v1521_v29, %v1520_v25  ;;  %v1530_v33 = vrot.slane %v1529_v30, 2 }
 0x16f   : >> { %v1203_v34 = vrot.slane %v1202_v31, 1  ;;  %v1211_v35 = vadd.f32 %v1210_v2, %v1209_v28 }
 0x170   : >> { %v1523_v36 = vrot.slane %v1522_v32, 1  ;;  %v1531_v37 = vadd.f32 %v1530_v33, %v1529_v30 }
 0x171   : >> { %v1204_v38 = vadd.f32 %v1203_v34, %v1202_v31  ;;  %v1212_v39 = vrot.slane %v1211_v35, 1 }
 0x172   : >> { %v1532_v40 = vrot.slane %v1531_v37, 1  ;;  %v1524_v43 = vadd.f32 %v1523_v36, %v1522_v32 }
 0x173   : >> { %v1205_v41 = vadd.f32 %v1204_v38, %v871_v1  ;;  %v1213_v42 = vadd.f32 %v1212_v39, %v1211_v35 }
 0x174   : >> { %v1533_v47 = vadd.f32 %v1532_v40, %v1531_v37 }
 0x175   : >> { %v1214_v45 = vadd.f32 %v1213_v42, %v880_v4  ;;  %v1525_v46 = vadd.f32 %v1524_v43, %v1205_v41  ;;  %189 = sbr.rel (!%p187_p4) target bundleno = 17 (0x11), region = 99 }
 0x177   : >> { %v1534_v49 = vadd.f32 %v1533_v47, %v1214_v45  ;;  %v1540_v50 = vadd.f32 %v1539_v44, %v1525_v46 }
 0x179   : >> { %1542 = vst.msk [vmem:[#allocation2] sm:$0x1] %vm1541_vm5, %v1540_v50  ;;  %v1544_v51 = vadd.f32 %v1543_v48, %v1534_v49 }
 0x17b   : >> { %1545 = vst.msk [vmem:[#allocation2 + $0x1] sm:$0x1] %vm1541_vm5, %v1544_v51 }
 0x182   : > { %v1546_v52 = vld [vmem:[#allocation2] sm:$0x3] }
 0x183   : > { %1547 = vst.msk [vmem:[%s2357_s25] sm:$0x3] %vm183_vm0, %v1546_v52 }
 0x184 PF: > { %s14_s12 = sadd.s32 1, %s2306_s12  }
 0x185   : > { %p11_p5 = scmp.ge.s32.totalorder %s14_s12, 4  }
 0x187   :  { %13 = sbr.rel (!%p11_p5) target bundleno = 1 (0x1), region = 110 }

// kernel: generator_forward.12
= control target key start
LH: loop header
LB: loop body
LE: loop exit
PB: predicated region body
PF: predicated region fallthrough
CT: control target
= control target key end

     0   :  { %s661_s12 = smov 0   ;;  %s663_s13 = smov 0   ;;  %s805_s0 = inlined_call_operand.vmem [shape: bf16[2,256,32], index: 0, kind: input, shape index: {}]   ;;  %s806_s1 = inlined_call_operand.vmem [shape: f32[1,1,32], index: 1, kind: input, shape index: {}]   ;;  %s807_s2 = inlined_call_operand.vmem [shape: f32[1,1,32], index: 2, kind: input, shape index: {}]   ;;  %s808_s3 = inlined_call_operand.vmem [shape: bf16[2,256,32], index: 3, kind: output, shape index: {}]  }
   0x1   :  { %s665_s14 = smov 0   ;;  %s667_s15 = smov 0  }
   0x2   :  { %s669_s16 = smov 0  }
   0x3 LB: > { %s22_s17 = sadd.s32 1, %s631_s14  ;;  %s25_s18 = sadd.s32 1, %s635_s15  ;;  %s639_s16 = sphi %s669_s16, %s13_s16   ;;  %s635_s15 = sphi %s667_s15, %s812_s15   ;;  %s631_s14 = sphi %s665_s14, %s811_s14   ;;  %s627_s13 = sphi %s663_s13, %s810_s13   ;;  %s623_s12 = sphi %s661_s12, %s809_s12  }
   0x4   : > { %p23_p0 = scmp.ge.s32.totalorder %s22_s17, 2  ;;  %p479_p1 = scmp.ge.s32.totalorder %s639_s16, 1 }
   0x5   : > { %p158_p2 = scmp.lt.s32.totalorder %s639_s16, 5 }
   0x6   : > { %s814_s17 = smov (%p23_p0, %s22_s17), 0  ;;  %s816_s18 = smov (!%p23_p0, %s25_s18), %s635_s15 }
   0x7   : > { %p159_p3 = pnand %p479_p1, %p158_p2  ;;  %p27_p4 = scmp.ge.s32.totalorder %s816_s18, 2 }
   0x8   : > { %s480_s19 = sshll.u32 (!%p159_p3), %s623_s12, 4  ;;  %p191_p5 = scmp.lt.s32.totalorder (!%p159_p3), %s627_s13, 1  ;;  %v704_v0 = vld [vmem:[%s806_s1] ss:$0 sm:$0xff] (!%p159_p3)  ;;  %vm368_vm0 = vcmask (!%p159_p3), 257024  }
   0x9   : > { %s818_s18 = smov (%p27_p4, %s816_s18), 0  ;;  %162 = sbr.rel (%p159_p3) target bundleno = 46 (0x2e), region = 32 }
   0xa   : > { %p193_p6 = scmp.lt.s32.totalorder (!%p159_p3), %s480_s19, 31  ;;  %v713_v9 = vld [vmem:[%s807_s2] ss:$0 sm:$0xff] (!%p159_p3) }
  0x10   : > { %s820_s13 = smov (!%p191_p5, %s627_s13), 1  ;;  %s822_s19 = smov (!%p193_p6, %s480_s19), 31 }
  0x11   : > { %s481_s20 = sshll.u32 %s820_s13, 5 }
  0x12   : > { %s691_s21 = sadd.s32 %s481_s20, %s822_s19 }
  0x13   : > { %s482_s22 = sshll.u32 %s691_s21, 2 }
  0x14   : > { %s699_s25 = scalar_lea.vmem %s805_s0, %s482_s22  ;;  %s736_s5 = scalar_lea.vmem %s808_s3, %s482_s22 }
  0x15   : > { %v523_v1 = vld [vmem:[%s699_s25] sm:$0xff]   ;;  %v554_v2 = vld [vmem:[%s699_s25 + $0x8] sm:$0xff]   ;;  %v555_v3 = vld [vmem:[%s699_s25 + $0x10] sm:$0xff]  }
  0x16   : > { %v524_v4 = vunpack.c.l.bf16 %v523_v1  ;;  %v525_v5 = vunpack.c.h.bf16 %v523_v1  ;;  %v528_v6 = vunpack.c.l.bf16 %v554_v2  ;;  %v529_v7 = vunpack.c.h.bf16 %v554_v2  ;;  %v556_v8 = vld [vmem:[%s699_s25 + $0x18] sm:$0xff]   ;;  %v557_v38 = vld [vmem:[%s699_s25 + $0x20] sm:$0xff]   ;;  %v558_v39 = vld [vmem:[%s699_s25 + $0x28] sm:$0xff]  }
  0x17   : > { %v532_v10 = vunpack.c.l.bf16 %v555_v3  ;;  %v533_v11 = vunpack.c.h.bf16 %v555_v3  ;;  %v536_v12 = vunpack.c.l.bf16 %v556_v8  ;;  %v537_v13 = vunpack.c.h.bf16 %v556_v8  ;;  %v559_v44 = vld [vmem:[%s699_s25 + $0x30] sm:$0xff]   ;;  %v560_v45 = vld [vmem:[%s699_s25 + $0x38] sm:$0xff]  }
  0x18   : > { %v249_v14 = vmul.f32 %v524_v4, %v704_v0  ;;  %v250_v15 = vmul.f32 %v525_v5, %v704_v0  ;;  %v251_v16 = vmul.f32 %v528_v6, %v704_v0  ;;  %v252_v17 = vmul.f32 %v529_v7, %v704_v0 }
  0x19   : > { %v253_v18 = vmul.f32 %v532_v10, %v704_v0  ;;  %v254_v19 = vmul.f32 %v533_v11, %v704_v0  ;;  %v255_v20 = vmul.f32 %v536_v12, %v704_v0  ;;  %v256_v21 = vmul.f32 %v537_v13, %v704_v0 }
  0x1a   : > { %v272_v22 = vadd.f32 %v713_v9, %v249_v14  ;;  %v273_v23 = vadd.f32 %v713_v9, %v250_v15  ;;  %v274_v24 = vadd.f32 %v713_v9, %v251_v16  ;;  %v275_v25 = vadd.f32 %v713_v9, %v252_v17 }
  0x1b   : > { %v276_v26 = vadd.f32 %v713_v9, %v253_v18  ;;  %v277_v27 = vadd.f32 %v713_v9, %v254_v19  ;;  %v278_v28 = vadd.f32 %v713_v9, %v255_v20  ;;  %v279_v29 = vadd.f32 %v713_v9, %v256_v21 }
  0x1c   : > { %v288_v30 = vmax.f32 %v272_v22, 0.0  ;;  %v289_v31 = vmax.f32 %v273_v23, 0.0  ;;  %v290_v32 = vmax.f32 %v274_v24, 0.0  ;;  %v291_v33 = vmax.f32 %v275_v25, 0.0 }
  0x1d   : > { %v292_v34 = vmax.f32 %v276_v26, 0.0  ;;  %v293_v35 = vmax.f32 %v277_v27, 0.0  ;;  %v294_v36 = vmax.f32 %v278_v28, 0.0  ;;  %v295_v37 = vmax.f32 %v279_v29, 0.0 }
  0x1e   : > { %v506_v40 = vpack.c.bf16 %v288_v30, %v288_v30  ;;  %v507_v41 = vpack.c.bf16 %v289_v31, %v289_v31  ;;  %v508_v42 = vpack.c.bf16 %v290_v32, %v290_v32  ;;  %v509_v43 = vpack.c.bf16 %v291_v33, %v291_v33 }
  0x1f   : > { %v510_v46 = vpack.c.bf16 %v292_v34, %v292_v34  ;;  %v511_v47 = vpack.c.bf16 %v293_v35, %v293_v35  ;;  %v512_v48 = vpack.c.bf16 %v294_v36, %v294_v36  ;;  %v513_v49 = vpack.c.bf16 %v295_v37, %v295_v37 }
  0x20   : > { %369 = vst.msk [vmem:[%s736_s5] sm:$0xf] %vm368_vm0, %v506_v40  ;;  %370 = vst.msk [vmem:[%s736_s5 + $0x4] sm:$0xf] %vm368_vm0, %v507_v41  ;;  %v540_v50 = vunpack.c.l.bf16 %v557_v38  ;;  %v541_v51 = vunpack.c.h.bf16 %v557_v38  ;;  %v544_v52 = vunpack.c.l.bf16 %v558_v39  ;;  %v545_v53 = vunpack.c.h.bf16 %v558_v39 }
  0x21   : > { %371 = vst.msk [vmem:[%s736_s5 + $0x8] sm:$0xf] %vm368_vm0, %v508_v42  ;;  %372 = vst.msk [vmem:[%s736_s5 + $0xc] sm:$0xf] %vm368_vm0, %v509_v43  ;;  %v548_v54 = vunpack.c.l.bf16 %v559_v44  ;;  %v549_v55 = vunpack.c.h.bf16 %v559_v44  ;;  %v552_v56 = vunpack.c.l.bf16 %v560_v45  ;;  %v553_v57 = vunpack.c.h.bf16 %v560_v45 }
  0x22   : > { %373 = vst.msk [vmem:[%s736_s5 + $0x10] sm:$0xf] %vm368_vm0, %v510_v46  ;;  %374 = vst.msk [vmem:[%s736_s5 + $0x14] sm:$0xf] %vm368_vm0, %v511_v47  ;;  %v257_v58 = vmul.f32 %v540_v50, %v704_v0  ;;  %v258_v59 = vmul.f32 %v541_v51, %v704_v0  ;;  %v259_v60 = vmul.f32 %v544_v52, %v704_v0 }
  0x23   : > { %375 = vst.msk [vmem:[%s736_s5 + $0x18] sm:$0xf] %vm368_vm0, %v512_v48  ;;  %376 = vst.msk [vmem:[%s736_s5 + $0x1c] sm:$0xf] %vm368_vm0, %v513_v49  ;;  %v260_v61 = vmul.f32 %v545_v53, %v704_v0  ;;  %v261_v62 = vmul.f32 %v548_v54, %v704_v0  ;;  %v262_v63 = vmul.f32 %v549_v55, %v704_v0 }
  0x24   : > { %v263_v1 = vmul.f32 %v552_v56, %v704_v0  ;;  %v264_v2 = vmul.f32 %v553_v57, %v704_v0  ;;  %v280_v3 = vadd.f32 %v713_v9, %v257_v58  ;;  %v281_v4 = vadd.f32 %v713_v9, %v258_v59 }
  0x25   : > { %v282_v5 = vadd.f32 %v713_v9, %v259_v60  ;;  %v283_v6 = vadd.f32 %v713_v9, %v260_v61  ;;  %v284_v7 = vadd.f32 %v713_v9, %v261_v62  ;;  %v285_v8 = vadd.f32 %v713_v9, %v262_v63 }
  0x26   : > { %v286_v10 = vadd.f32 %v713_v9, %v263_v1  ;;  %v287_v11 = vadd.f32 %v713_v9, %v264_v2  ;;  %v296_v12 = vmax.f32 %v280_v3, 0.0  ;;  %v297_v13 = vmax.f32 %v281_v4, 0.0 }
  0x27   : > { %v298_v0 = vmax.f32 %v282_v5, 0.0  ;;  %v299_v14 = vmax.f32 %v283_v6, 0.0  ;;  %v300_v15 = vmax.f32 %v284_v7, 0.0  ;;  %v301_v16 = vmax.f32 %v285_v8, 0.0 }
  0x28   : > { %v302_v17 = vmax.f32 %v286_v10, 0.0  ;;  %v303_v18 = vmax.f32 %v287_v11, 0.0  ;;  %v514_v19 = vpack.c.bf16 %v296_v12, %v296_v12  ;;  %v515_v20 = vpack.c.bf16 %v297_v13, %v297_v13 }
  0x29   : > { %v516_v21 = vpack.c.bf16 %v298_v0, %v298_v0  ;;  %v517_v9 = vpack.c.bf16 %v299_v14, %v299_v14  ;;  %v518_v22 = vpack.c.bf16 %v300_v15, %v300_v15  ;;  %v519_v23 = vpack.c.bf16 %v301_v16, %v301_v16 }
  0x2a   : > { %v520_v24 = vpack.c.bf16 %v302_v17, %v302_v17  ;;  %v521_v25 = vpack.c.bf16 %v303_v18, %v303_v18  ;;  %377 = vst.msk [vmem:[%s736_s5 + $0x20] sm:$0xf] %vm368_vm0, %v514_v19  ;;  %378 = vst.msk [vmem:[%s736_s5 + $0x24] sm:$0xf] %vm368_vm0, %v515_v20 }
  0x2b   : > { %379 = vst.msk [vmem:[%s736_s5 + $0x28] sm:$0xf] %vm368_vm0, %v516_v21  ;;  %380 = vst.msk [vmem:[%s736_s5 + $0x2c] sm:$0xf] %vm368_vm0, %v517_v9 }
  0x2c   : > { %381 = vst.msk [vmem:[%s736_s5 + $0x30] sm:$0xf] %vm368_vm0, %v518_v22  ;;  %382 = vst.msk [vmem:[%s736_s5 + $0x34] sm:$0xf] %vm368_vm0, %v519_v23 }
  0x2d   : > { %383 = vst.msk [vmem:[%s736_s5 + $0x38] sm:$0xf] %vm368_vm0, %v520_v24  ;;  %384 = vst.msk [vmem:[%s736_s5 + $0x3c] sm:$0xf] %vm368_vm0, %v521_v25 }
  0x2e PF: > { %s13_s16 = sadd.s32 1, %s639_s16   ;;  %s809_s12 = smov %s631_s14 }
  0x2f   : > { %p10_p7 = scmp.ge.s32.totalorder %s13_s16, 6   ;;  %s810_s13 = smov %s635_s15 }
  0x30   : > { %s811_s14 = smov %s814_s17  ;;  %s812_s15 = smov %s818_s18 }
  0x31   :  { %12 = sbr.rel (!%p10_p7) target bundleno = 3 (0x3), region = 62 }

// kernel: generator_forward.14
= control target key start
LH: loop header
LB: loop body
LE: loop exit
PB: predicated region body
PF: predicated region fallthrough
CT: control target
= control target key end

     0   :  { %s661_s12 = smov 0   ;;  %s663_s13 = smov 0   ;;  %s805_s0 = inlined_call_operand.vmem [shape: bf16[2,1024,16], index: 0, kind: input, shape index: {}]   ;;  %s806_s1 = inlined_call_operand.vmem [shape: f32[1,1,16], index: 1, kind: input, shape index: {}]   ;;  %s807_s2 = inlined_call_operand.vmem [shape: f32[1,1,16], index: 2, kind: input, shape index: {}]   ;;  %s808_s3 = inlined_call_operand.vmem [shape: bf16[2,1024,16], index: 3, kind: output, shape index: {}]  }
   0x1   :  { %s665_s14 = smov 0   ;;  %s667_s15 = smov 0  }
   0x2   :  { %s669_s16 = smov 0  }
   0x3 LB: > { %s22_s17 = sadd.s32 1, %s631_s14  ;;  %s25_s18 = sadd.s32 1, %s635_s15  ;;  %s639_s16 = sphi %s669_s16, %s13_s16   ;;  %s635_s15 = sphi %s667_s15, %s812_s15   ;;  %s631_s14 = sphi %s665_s14, %s811_s14   ;;  %s627_s13 = sphi %s663_s13, %s810_s13   ;;  %s623_s12 = sphi %s661_s12, %s809_s12  }
   0x4   : > { %p23_p0 = scmp.ge.s32.totalorder %s22_s17, 8  ;;  %p479_p1 = scmp.ge.s32.totalorder %s639_s16, 1 }
   0x5   : > { %p158_p2 = scmp.lt.s32.totalorder %s639_s16, 17 }
   0x6   : > { %s814_s17 = smov (%p23_p0, %s22_s17), 0  ;;  %s816_s18 = smov (!%p23_p0, %s25_s18), %s635_s15 }
   0x7   : > { %p159_p3 = pnand %p479_p1, %p158_p2  ;;  %p27_p4 = scmp.ge.s32.totalorder %s816_s18, 2 }
   0x8   : > { %s480_s19 = sshll.u32 (!%p159_p3), %s623_s12, 4  ;;  %p191_p5 = scmp.lt.s32.totalorder (!%p159_p3), %s627_s13, 1  ;;  %v704_v0 = vld [vmem:[%s806_s1] ss:$0 sm:$0xff] (!%p159_p3)  ;;  %vm368_vm0 = vcmask (!%p159_p3), 125952  }
   0x9   : > { %s818_s18 = smov (%p27_p4, %s816_s18), 0  ;;  %162 = sbr.rel (%p159_p3) target bundleno = 46 (0x2e), region = 32 }
   0xa   : > { %p193_p6 = scmp.lt.s32.totalorder (!%p159_p3), %s480_s19, 127  ;;  %v713_v9 = vld [vmem:[%s807_s2] ss:$0 sm:$0xff] (!%p159_p3) }
  0x10   : > { %s820_s13 = smov (!%p191_p5, %s627_s13), 1  ;;  %s822_s19 = smov (!%p193_p6, %s480_s19), 127 }
  0x11   : > { %s481_s20 = sshll.u32 %s820_s13, 7 }
  0x12   : > { %s691_s21 = sadd.s32 %s481_s20, %s822_s19 }
  0x13   : > { %s482_s22 = sshll.u32 %s691_s21, 2 }
  0x14   : > { %s699_s25 = scalar_lea.vmem %s805_s0, %s482_s22  ;;  %s736_s5 = scalar_lea.vmem %s808_s3, %s482_s22 }
  0x15   : > { %v523_v1 = vld [vmem:[%s699_s25] sm:$0xff]   ;;  %v554_v2 = vld [vmem:[%s699_s25 + $0x8] sm:$0xff]   ;;  %v555_v3 = vld [vmem:[%s699_s25 + $0x10] sm:$0xff]  }
  0x16   : > { %v524_v4 = vunpack.c.l.bf16 %v523_v1  ;;  %v525_v5 = vunpack.c.h.bf16 %v523_v1  ;;  %v528_v6 = vunpack.c.l.bf16 %v554_v2  ;;  %v529_v7 = vunpack.c.h.bf16 %v554_v2  ;;  %v556_v8 = vld [vmem:[%s699_s25 + $0x18] sm:$0xff]   ;;  %v557_v38 = vld [vmem:[%s699_s25 + $0x20] sm:$0xff]   ;;  %v558_v39 = vld [vmem:[%s699_s25 + $0x28] sm:$0xff]  }
  0x17   : > { %v532_v10 = vunpack.c.l.bf16 %v555_v3  ;;  %v533_v11 = vunpack.c.h.bf16 %v555_v3  ;;  %v536_v12 = vunpack.c.l.bf16 %v556_v8  ;;  %v537_v13 = vunpack.c.h.bf16 %v556_v8  ;;  %v559_v44 = vld [vmem:[%s699_s25 + $0x30] sm:$0xff]   ;;  %v560_v45 = vld [vmem:[%s699_s25 + $0x38] sm:$0xff]  }
  0x18   : > { %v249_v14 = vmul.f32 %v524_v4, %v704_v0  ;;  %v250_v15 = vmul.f32 %v525_v5, %v704_v0  ;;  %v251_v16 = vmul.f32 %v528_v6, %v704_v0  ;;  %v252_v17 = vmul.f32 %v529_v7, %v704_v0 }
  0x19   : > { %v253_v18 = vmul.f32 %v532_v10, %v704_v0  ;;  %v254_v19 = vmul.f32 %v533_v11, %v704_v0  ;;  %v255_v20 = vmul.f32 %v536_v12, %v704_v0  ;;  %v256_v21 = vmul.f32 %v537_v13, %v704_v0 }
  0x1a   : > { %v272_v22 = vadd.f32 %v713_v9, %v249_v14  ;;  %v273_v23 = vadd.f32 %v713_v9, %v250_v15  ;;  %v274_v24 = vadd.f32 %v713_v9, %v251_v16  ;;  %v275_v25 = vadd.f32 %v713_v9, %v252_v17 }
  0x1b   : > { %v276_v26 = vadd.f32 %v713_v9, %v253_v18  ;;  %v277_v27 = vadd.f32 %v713_v9, %v254_v19  ;;  %v278_v28 = vadd.f32 %v713_v9, %v255_v20  ;;  %v279_v29 = vadd.f32 %v713_v9, %v256_v21 }
  0x1c   : > { %v288_v30 = vmax.f32 %v272_v22, 0.0  ;;  %v289_v31 = vmax.f32 %v273_v23, 0.0  ;;  %v290_v32 = vmax.f32 %v274_v24, 0.0  ;;  %v291_v33 = vmax.f32 %v275_v25, 0.0 }
  0x1d   : > { %v292_v34 = vmax.f32 %v276_v26, 0.0  ;;  %v293_v35 = vmax.f32 %v277_v27, 0.0  ;;  %v294_v36 = vmax.f32 %v278_v28, 0.0  ;;  %v295_v37 = vmax.f32 %v279_v29, 0.0 }
  0x1e   : > { %v506_v40 = vpack.c.bf16 %v288_v30, %v288_v30  ;;  %v507_v41 = vpack.c.bf16 %v289_v31, %v289_v31  ;;  %v508_v42 = vpack.c.bf16 %v290_v32, %v290_v32  ;;  %v509_v43 = vpack.c.bf16 %v291_v33, %v291_v33 }
  0x1f   : > { %v510_v46 = vpack.c.bf16 %v292_v34, %v292_v34  ;;  %v511_v47 = vpack.c.bf16 %v293_v35, %v293_v35  ;;  %v512_v48 = vpack.c.bf16 %v294_v36, %v294_v36  ;;  %v513_v49 = vpack.c.bf16 %v295_v37, %v295_v37 }
  0x20   : > { %369 = vst.msk [vmem:[%s736_s5] sm:$0xf] %vm368_vm0, %v506_v40  ;;  %370 = vst.msk [vmem:[%s736_s5 + $0x4] sm:$0xf] %vm368_vm0, %v507_v41  ;;  %v540_v50 = vunpack.c.l.bf16 %v557_v38  ;;  %v541_v51 = vunpack.c.h.bf16 %v557_v38  ;;  %v544_v52 = vunpack.c.l.bf16 %v558_v39  ;;  %v545_v53 = vunpack.c.h.bf16 %v558_v39 }
  0x21   : > { %371 = vst.msk [vmem:[%s736_s5 + $0x8] sm:$0xf] %vm368_vm0, %v508_v42  ;;  %372 = vst.msk [vmem:[%s736_s5 + $0xc] sm:$0xf] %vm368_vm0, %v509_v43  ;;  %v548_v54 = vunpack.c.l.bf16 %v559_v44  ;;  %v549_v55 = vunpack.c.h.bf16 %v559_v44  ;;  %v552_v56 = vunpack.c.l.bf16 %v560_v45  ;;  %v553_v57 = vunpack.c.h.bf16 %v560_v45 }
  0x22   : > { %373 = vst.msk [vmem:[%s736_s5 + $0x10] sm:$0xf] %vm368_vm0, %v510_v46  ;;  %374 = vst.msk [vmem:[%s736_s5 + $0x14] sm:$0xf] %vm368_vm0, %v511_v47  ;;  %v257_v58 = vmul.f32 %v540_v50, %v704_v0  ;;  %v258_v59 = vmul.f32 %v541_v51, %v704_v0  ;;  %v259_v60 = vmul.f32 %v544_v52, %v704_v0 }
  0x23   : > { %375 = vst.msk [vmem:[%s736_s5 + $0x18] sm:$0xf] %vm368_vm0, %v512_v48  ;;  %376 = vst.msk [vmem:[%s736_s5 + $0x1c] sm:$0xf] %vm368_vm0, %v513_v49  ;;  %v260_v61 = vmul.f32 %v545_v53, %v704_v0  ;;  %v261_v62 = vmul.f32 %v548_v54, %v704_v0  ;;  %v262_v63 = vmul.f32 %v549_v55, %v704_v0 }
  0x24   : > { %v263_v1 = vmul.f32 %v552_v56, %v704_v0  ;;  %v264_v2 = vmul.f32 %v553_v57, %v704_v0  ;;  %v280_v3 = vadd.f32 %v713_v9, %v257_v58  ;;  %v281_v4 = vadd.f32 %v713_v9, %v258_v59 }
  0x25   : > { %v282_v5 = vadd.f32 %v713_v9, %v259_v60  ;;  %v283_v6 = vadd.f32 %v713_v9, %v260_v61  ;;  %v284_v7 = vadd.f32 %v713_v9, %v261_v62  ;;  %v285_v8 = vadd.f32 %v713_v9, %v262_v63 }
  0x26   : > { %v286_v10 = vadd.f32 %v713_v9, %v263_v1  ;;  %v287_v11 = vadd.f32 %v713_v9, %v264_v2  ;;  %v296_v12 = vmax.f32 %v280_v3, 0.0  ;;  %v297_v13 = vmax.f32 %v281_v4, 0.0 }
  0x27   : > { %v298_v0 = vmax.f32 %v282_v5, 0.0  ;;  %v299_v14 = vmax.f32 %v283_v6, 0.0  ;;  %v300_v15 = vmax.f32 %v284_v7, 0.0  ;;  %v301_v16 = vmax.f32 %v285_v8, 0.0 }
  0x28   : > { %v302_v17 = vmax.f32 %v286_v10, 0.0  ;;  %v303_v18 = vmax.f32 %v287_v11, 0.0  ;;  %v514_v19 = vpack.c.bf16 %v296_v12, %v296_v12  ;;  %v515_v20 = vpack.c.bf16 %v297_v13, %v297_v13 }
  0x29   : > { %v516_v21 = vpack.c.bf16 %v298_v0, %v298_v0  ;;  %v517_v9 = vpack.c.bf16 %v299_v14, %v299_v14  ;;  %v518_v22 = vpack.c.bf16 %v300_v15, %v300_v15  ;;  %v519_v23 = vpack.c.bf16 %v301_v16, %v301_v16 }
  0x2a   : > { %v520_v24 = vpack.c.bf16 %v302_v17, %v302_v17  ;;  %v521_v25 = vpack.c.bf16 %v303_v18, %v303_v18  ;;  %377 = vst.msk [vmem:[%s736_s5 + $0x20] sm:$0xf] %vm368_vm0, %v514_v19  ;;  %378 = vst.msk [vmem:[%s736_s5 + $0x24] sm:$0xf] %vm368_vm0, %v515_v20 }
  0x2b   : > { %379 = vst.msk [vmem:[%s736_s5 + $0x28] sm:$0xf] %vm368_vm0, %v516_v21  ;;  %380 = vst.msk [vmem:[%s736_s5 + $0x2c] sm:$0xf] %vm368_vm0, %v517_v9 }
  0x2c   : > { %381 = vst.msk [vmem:[%s736_s5 + $0x30] sm:$0xf] %vm368_vm0, %v518_v22  ;;  %382 = vst.msk [vmem:[%s736_s5 + $0x34] sm:$0xf] %vm368_vm0, %v519_v23 }
  0x2d   : > { %383 = vst.msk [vmem:[%s736_s5 + $0x38] sm:$0xf] %vm368_vm0, %v520_v24  ;;  %384 = vst.msk [vmem:[%s736_s5 + $0x3c] sm:$0xf] %vm368_vm0, %v521_v25 }
  0x2e PF: > { %s13_s16 = sadd.s32 1, %s639_s16   ;;  %s809_s12 = smov %s631_s14 }
  0x2f   : > { %p10_p7 = scmp.ge.s32.totalorder %s13_s16, 18   ;;  %s810_s13 = smov %s635_s15 }
  0x30   : > { %s811_s14 = smov %s814_s17  ;;  %s812_s15 = smov %s818_s18 }
  0x31   :  { %12 = sbr.rel (!%p10_p7) target bundleno = 3 (0x3), region = 62 }

// kernel: generator_forward.13
= control target key start
LH: loop header
LB: loop body
LE: loop exit
PB: predicated region body
PF: predicated region fallthrough
CT: control target
= control target key end

     0   :  { %s1997_s12 = smov 0   ;;  %s2288_s0 = inlined_call_operand.vmem [shape: bf16[2,18,18,32], index: 0, kind: input, shape index: {}]   ;;  %s2289_s1 = inlined_call_operand.vmem [shape: bf16[4,4,32,16], index: 1, kind: input, shape index: {}]   ;;  %s2290_s2 = inlined_call_operand.vmem [shape: bf16[2,64,16,16], index: 2, kind: output, shape index: {0}]   ;;  %s2291_s3 = inlined_call_operand.vmem [shape: f32[2,2,16], index: 3, kind: output, shape index: {1}]  }
   0x1 LB: > { %s1514_s13 = sadd.s32 4294967295, %s1968_s12   ;;  %p1518_p0 = scmp.ge.s32.totalorder %s1968_s12, 1  ;;  %s1968_s12 = sphi %s1997_s12, %s14_s12  }
   0x2   : > { %p140_p1 = scmp.lt.s32.totalorder %s1968_s12, 3 }
   0x4   : > { %p141_p2 = pnand %p1518_p0, %p140_p1 }
   0x5   : > { %p168_p3 = scmp.lt.s32.totalorder (!%p141_p2), %s1514_s13, 1  ;;  %vm183_vm0 = vcmask (!%p141_p2), 123904   ;;  %v1974_v0 = vmov (!%p141_p2), 0.0   ;;  %s2021_s26 = smov (!%p141_p2), 0  }
   0x6   : > { %144 = sbr.rel (%p141_p2) target bundleno = 354 (0x162), region = 28  ;;  %184 = vst.msk [vmem:[#allocation2] sm:$0x3] (!%p141_p2), %vm183_vm0, %v1974_v0 }
   0xd   : > { %s2293_s13 = smov (!%p168_p3, %s1514_s13), 1 }
   0xe   : > { %s1900_s14 = smul.u32 216, %s2293_s13  ;;  %s1665_s15 = sshll.u32 %s2293_s13, 9 }
   0xf   : > { %s2009_s18 = scalar_lea.vmem %s2290_s2, %s1665_s15  ;;  %s1522_s19 = sshll.u32 %s2293_s13, 1 }
  0x10   : > { %s2014_s22 = scalar_lea.vmem %s2288_s0, %s1900_s14  ;;  %s2019_s25 = scalar_lea.vmem %s2291_s3, %s1522_s19 }
  0x11 LB: >> { %v1920_v1 = vld [vmem:[%s2289_s1 + $0x30] sm:$0xff]   ;;  %v1975_v2 = vmov 0.0   ;;  %v1921_v3 = vld [vmem:[%s2289_s1 + $0x20] sm:$0xff]   ;;  %v1922_v4 = vld [vmem:[%s2289_s1 + $0x38] sm:$0xff]   ;;  %vm1976_vm1 = vmmov 0   ;;  %s1666_s6 = smul.u32 12, %s1972_s26  ;;  %s1972_s26 = sphi %s2021_s26, %s190_s26  }
  0x12   : >> { %1756 = vmatprep.subr.bf16.mxu1 %v1975_v2  ;;  %1724 = vmatprep.subr.bf16.mxu0 %v1975_v2  ;;  %v1923_v5 = vld [vmem:[%s2289_s1 + $0x28] sm:$0xff]   ;;  %vm253_vm2 = vcmask 261120   ;;  %vm228_vm3 = vsmask.f32 7424  ;;  %vm545_vm4 = vcmask 1046528   ;;  %v1927_v8 = vld [vmem:[%s2289_s1 + $0x10] sm:$0xff]  }
  0x13   : >> { %1757 = vmatpush3.bf16.msra.mxu1 %v1920_v1  ;;  %1760 = vmatprep.mubr.msk.bf16.mxu1 %vm1976_vm1, %v1975_v2  ;;  %s2046_s9 = scalar_lea.vmem %s2014_s22, %s1666_s6  ;;  %v1926_v17 = vld [vmem:[%s2289_s1] sm:$0xff]   ;;  %v1928_v19 = vld [vmem:[%s2289_s1 + $0x18] sm:$0xff]   ;;  %v1929_v21 = vld [vmem:[%s2289_s1 + $0x8] sm:$0xff]   ;;  %s1669_s27 = sshll.u32 %s1972_s26, 3  ;;  %vm498_vm5 = vcmask 130048   ;;  %vm532_vm6 = vcmask 125952  }
  0x14   : >> { %1725 = vmatpush3.bf16.msra.mxu0 %v1921_v3  ;;  %1758 = vmatprep.subr.bf16.mxu1 %v1975_v2  ;;  %v1924_v6 = vld [vmem:[%s2046_s9] sm:$0xff]   ;;  %v1925_v7 = vld [vmem:[%s2046_s9 + $0x8] ss:$0 sps:$4 sm:$0x11]   ;;  %v2074_v22 = vld [vmem:[%s2046_s9 + $0xc] sm:$0xff]   ;;  %s2246_s28 = scalar_lea.vmem %s2009_s18, %s1669_s27  ;;  %vm1397_vm7 = vcmask 122880  }
  0x15   : >> { %1726 = vmatprep.subr.bf16.mxu0 %v1975_v2  ;;  %1728 = vmatprep.mubr.msk.bf16.mxu0 %vm1976_vm1, %v1975_v2  ;;  %v546_v9 = vrot.slane %v1924_v6, 1  ;;  %v547_v10 = vrot.slane %v1925_v7, 1  ;;  %v230_v11 = vshrl.u32 %v1924_v6, 16  ;;  %v232_v12 = vshll.u32 %v1924_v6, 16  ;;  %v1931_v23 = vld [vmem:[%s2289_s1 + $0x90] sm:$0xff]   ;;  %v1930_v26 = vld [vmem:[%s2289_s1 + $0x80] sm:$0xff]  }
  0x16   : >> { %v237_v13 = vshll.u32 %v1925_v7, 16  ;;  %v1935_v24 = vld [vmem:[%s2046_s9 + $0x14] ss:$0 sps:$4 sm:$0x11]   ;;  %v431_v25 = vshll.u32 %v2074_v22, 16  ;;  %v1932_v27 = vld [vmem:[%s2289_s1 + $0x98] sm:$0xff]  }
  0x17   : >> { %1759 = vmatpush3.bf16.msra.mxu1 %v1922_v4  ;;  %v548_v14 = vsel %vm545_vm4, %v546_v9, %v547_v10  ;;  %v234_v15 = vrot.slane %v232_v12, 1  ;;  %v429_v28 = vshrl.u32 %v2074_v22, 16  ;;  %v436_v30 = vshll.u32 %v1935_v24, 16  ;;  %v1933_v31 = vld [vmem:[%s2289_s1 + $0x88] sm:$0xff]   ;;  %v1937_v35 = vld [vmem:[%s2289_s1 + $0xb0] sm:$0xff]   ;;  %v2113_v36 = vld [vmem:[%s2046_s9 + $0x18] sm:$0xff]  }
  0x18   : >> { %1727 = vmatpush3.bf16.msra.mxu0 %v1923_v5  ;;  %1764 = vmatprep.subr.bf16.mxu1 %v1975_v2  ;;  %v239_v16 = vrot.slane %v237_v13, 1  ;;  %v433_v29 = vrot.slane %v431_v25, 1  ;;  %v1953_v37 = vld [vmem:[%s2046_s9 + $0x20] ss:$0 sps:$4 sm:$0x11]   ;;  %v1938_v39 = vld [vmem:[%s2289_s1 + $0xb8] sm:$0xff]  }
  0x19   : >> { %1732 = vmatprep.subr.bf16.mxu0 %v1975_v2  ;;  %v235_v18 = vor.u32 %v234_v15, %v230_v11  ;;  %v438_v33 = vrot.slane %v436_v30, 1  ;;  %v1936_v38 = vld [vmem:[%s2289_s1 + $0xa0] sm:$0xff]   ;;  %v1012_v40 = vshrl.u32 %v2113_v36, 16  ;;  %v1014_v41 = vshll.u32 %v2113_v36, 16  ;;  %v1939_v47 = vld [vmem:[%s2289_s1 + $0xa8] sm:$0xff]   ;;  %v1940_v54 = vld [vmem:[%s2289_s1 + $0x70] sm:$0xff]  }
  0x1a   : >> { %1761 = vmatmul.mubr.msk.bf16.vlgmr.msra.gmra.mrb[0].mxu1 %vm253_vm2, %v548_v14  ;;  %v434_v32 = vor.u32 %v433_v29, %v429_v28  ;;  %v1019_v42 = vshll.u32 %v1953_v37, 16  ;;  %v1298_v43 = vrot.slane %v2113_v36, 1  ;;  %v1299_v46 = vrot.slane %v1953_v37, 1  ;;  %v1941_v55 = vld [vmem:[%s2289_s1 + $0x60] sm:$0xff]   ;;  %v1942_v56 = vld [vmem:[%s2289_s1 + $0x78] sm:$0xff]   ;;  %v1943_v57 = vld [vmem:[%s2289_s1 + $0x68] sm:$0xff]  }
  0x1b   : >> { %1765 = vmatpush3.bf16.msra.mxu1 %v1927_v8  ;;  %1768 = vmatprep.mubr.msk.bf16.mxu1 %vm1976_vm1, %v1975_v2  ;;  %v240_v20 = vsel %vm228_vm3, %v235_v18, %v239_v16  ;;  %v1016_v44 = vrot.slane %v1014_v41, 1  ;;  %v723_v48 = vrot.slane %v2074_v22, 1  ;;  %v724_v49 = vrot.slane %v1935_v24, 1  ;;  %v1945_v58 = vld [vmem:[%s2289_s1 + $0x50] sm:$0xff]   ;;  %v1944_v59 = vld [vmem:[%s2289_s1 + $0x40] sm:$0xff]   ;;  %v1946_v60 = vld [vmem:[%s2289_s1 + $0x58] sm:$0xff]  }
  0x1c   : >> { %1766 = vmatprep.subr.bf16.mxu1 %v1975_v2  ;;  %1729 = vmatmul.mubr.msk.bf16.vlgmr.msra.gmra.mrb[0].mxu0 %vm253_vm2, %v240_v20  ;;  %v2106_v34 = vsel %vm228_vm3, %v434_v32, %v438_v33  ;;  %v1021_v45 = vrot.slane %v1019_v42, 1  ;;  %v2139_v51 = vsel %vm545_vm4, %v1298_v43, %v1299_v46  ;;  %v1947_v61 = vld [vmem:[%s2289_s1 + $0x48] sm:$0xff]   ;;  %v1949_v62 = vld [vmem:[%s2289_s1 + $0xd0] sm:$0xff]   ;;  %v1948_v63 = vld [vmem:[%s2289_s1 + $0xc0] sm:$0xff]   ;;  %s190_s26 = sadd.s32 1, %s1972_s26  }
  0x1d   : >> { %1733 = vmatpush3.bf16.msra.mxu0 %v1926_v17  ;;  %1736 = vmatprep.mubr.msk.bf16.mxu0 %vm1976_vm1, %v1975_v2  ;;  %v1017_v50 = vor.u32 %v1016_v44, %v1012_v40  ;;  %v725_v53 = vsel %vm545_vm4, %v723_v48, %v724_v49  ;;  %v1950_v0 = vld [vmem:[%s2289_s1 + $0xd8] sm:$0xff]   ;;  %v1951_v1 = vld [vmem:[%s2289_s1 + $0xc8] sm:$0xff]   ;;  %v1955_v3 = vld [vmem:[%s2289_s1 + $0xf0] sm:$0xff]   ;;  %p187_p4 = scmp.ge.s32.totalorder %s190_s26, 16  }
  0x1e   : >> { %1734 = vmatprep.subr.bf16.mxu0 %v1975_v2  ;;  %v1954_v4 = vld [vmem:[%s2289_s1 + $0xe0] sm:$0xff]   ;;  %v1956_v5 = vld [vmem:[%s2289_s1 + $0xf8] sm:$0xff]  }
  0x1f   : >> { %1767 = vmatpush3.bf16.msra.mxu1 %v1928_v19  ;;  %v2144_v52 = vsel %vm228_vm3, %v1017_v50, %v1021_v45 }
  0x20   : >> { %1772 = vmatprep.subr.bf16.mxu1 %v1975_v2 }
  0x21   : >> { %1735 = vmatpush3.bf16.msra.mxu0 %v1929_v21 }
  0x22   : >> { %1740 = vmatprep.subr.bf16.mxu0 %v1975_v2 }
  0x26   : >> { %1769 = vmatmul.mubr.msk.bf16.vlgmr.msra.gmra.mrb[0].mxu1 %vm253_vm2, %v240_v20 }
  0x27   : >> { %1773 = vmatpush3.bf16.msra.mxu1 %v1931_v23  ;;  %1776 = vmatprep.mubr.msk.bf16.mxu1 %vm1976_vm1, %v1975_v2 }
  0x28   : >> { %1774 = vmatprep.subr.bf16.mxu1 %v1975_v2  ;;  %1737 = vmatmul.mubr.msk.bf16.vlgmr.msra.gmra.mrb[0].mxu0 %vm253_vm2, %v1924_v6  ;;  %v1957_v6 = vld [vmem:[%s2289_s1 + $0xe8] sm:$0xff]  }
  0x29   : >> { %1741 = vmatpush3.bf16.msra.mxu0 %v1930_v26  ;;  %1744 = vmatprep.mubr.msk.bf16.mxu0 %vm1976_vm1, %v1975_v2 }
  0x2a   : >> { %1742 = vmatprep.subr.bf16.mxu0 %v1975_v2 }
  0x2b   : >> { %1775 = vmatpush3.bf16.msra.mxu1 %v1932_v27 }
  0x2c   : >> { %1780 = vmatprep.subr.bf16.mxu1 %v1975_v2 }
  0x2d   : >> { %1743 = vmatpush3.bf16.msra.mxu0 %v1933_v31 }
  0x2e   : >> { %1748 = vmatprep.subr.bf16.mxu0 %v1975_v2 }
  0x32   : >> { %1777 = vmatmul.mubr.msk.bf16.vlgmr.msra.gmra.mrb[0].mxu1 %vm253_vm2, %v2106_v34 }
  0x33   : >> { %1781 = vmatpush3.bf16.msra.mxu1 %v1937_v35  ;;  %1784 = vmatprep.mubr.msk.bf16.mxu1 %vm1976_vm1, %v1975_v2 }
  0x34   : >> { %1782 = vmatprep.subr.bf16.mxu1 %v1975_v2  ;;  %1745 = vmatmul.mubr.msk.bf16.vlgmr.msra.gmra.mrb[0].mxu0 %vm253_vm2, %v2074_v22 }
  0x35   : >> { %1749 = vmatpush3.bf16.msra.mxu0 %v1936_v38  ;;  %1752 = vmatprep.mubr.msk.bf16.mxu0 %vm1976_vm1, %v1975_v2 }
  0x36   : >> { %1750 = vmatprep.subr.bf16.mxu0 %v1975_v2 }
  0x37   : >> { %1783 = vmatpush3.bf16.msra.mxu1 %v1938_v39 }
  0x38   : >> { %1820 = vmatprep.subr.bf16.mxu1 %v1975_v2 }
  0x39   : >> { %1751 = vmatpush3.bf16.msra.mxu0 %v1939_v47 }
  0x3a   : >> { %1788 = vmatprep.subr.bf16.mxu0 %v1975_v2 }
  0x3e   : >> { %1785 = vmatmul.mubr.msk.bf16.vlgmr.msra.gmra.mrb[0].mxu1 %vm253_vm2, %v725_v53 }
  0x3f   : >> { %1821 = vmatpush3.bf16.msra.mxu1 %v1940_v54  ;;  %1824 = vmatprep.mubr.msk.bf16.mxu1 %vm1976_vm1, %v1975_v2 }
  0x40   : >> { %1822 = vmatprep.subr.bf16.mxu1 %v1975_v2  ;;  %1753 = vmatmul.mubr.msk.bf16.vlgmr.msra.gmra.mrb[0].mxu0 %vm253_vm2, %v2106_v34 }
  0x41   : >> { %1789 = vmatpush3.bf16.msra.mxu0 %v1941_v55  ;;  %1792 = vmatprep.mubr.msk.bf16.mxu0 %vm1976_vm1, %v1975_v2 }
  0x42   : >> { %1790 = vmatprep.subr.bf16.mxu0 %v1975_v2 }
  0x43   : >> { %1823 = vmatpush3.bf16.msra.mxu1 %v1942_v56 }
  0x44   : >> { %1828 = vmatprep.subr.bf16.mxu1 %v1975_v2 }
  0x45   : >> { %1791 = vmatpush3.bf16.msra.mxu0 %v1943_v57 }
  0x46   : >> { %1825 = vmatmul.mubr.msk.bf16.vlgmr.msra.gmra.mrb[4].mxu1 %vm253_vm2, %v725_v53  ;;  %1796 = vmatprep.subr.bf16.mxu0 %v1975_v2 }
  0x47   : >> { %1829 = vmatpush3.bf16.msra.mxu1 %v1945_v58  ;;  %1832 = vmatprep.mubr.msk.bf16.mxu1 %vm1976_vm1, %v1975_v2 }
  0x48   : >> { %1830 = vmatprep.subr.bf16.mxu1 %v1975_v2  ;;  %1793 = vmatmul.mubr.msk.bf16.vlgmr.msra.gmra.mrb[4].mxu0 %vm253_vm2, %v2106_v34 }
  0x49   : >> { %1797 = vmatpush3.bf16.msra.mxu0 %v1944_v59  ;;  %1800 = vmatprep.mubr.msk.bf16.mxu0 %vm1976_vm1, %v1975_v2 }
  0x4a   : >> { %1798 = vmatprep.subr.bf16.mxu0 %v1975_v2 }
  0x4b   : >> { %1831 = vmatpush3.bf16.msra.mxu1 %v1946_v60 }
  0x4c   : >> { %1836 = vmatprep.subr.bf16.mxu1 %v1975_v2 }
  0x4d   : >> { %1799 = vmatpush3.bf16.msra.mxu0 %v1947_v61 }
  0x4e   : >> { %1804 = vmatprep.subr.bf16.mxu0 %v1975_v2 }
  0x52   : >> { %1833 = vmatmul.mubr.msk.bf16.vlgmr.msra.gmra.mrb[4].mxu1 %vm253_vm2, %v2106_v34 }
  0x53   : >> { %1837 = vmatpush3.bf16.msra.mxu1 %v1949_v62  ;;  %1840 = vmatprep.mubr.msk.bf16.mxu1 %vm1976_vm1, %v1975_v2 }
  0x54   : >> { %1838 = vmatprep.subr.bf16.mxu1 %v1975_v2  ;;  %1801 = vmatmul.mubr.msk.bf16.vlgmr.msra.gmra.mrb[4].mxu0 %vm253_vm2, %v2074_v22 }
  0x55   : >> { %1805 = vmatpush3.bf16.msra.mxu0 %v1948_v63  ;;  %1808 = vmatprep.mubr.msk.bf16.mxu0 %vm1976_vm1, %v1975_v2 }
  0x56   : >> { %1806 = vmatprep.subr.bf16.mxu0 %v1975_v2 }
  0x57   : >> { %1839 = vmatpush3.bf16.msra.mxu1 %v1950_v0 }
  0x58   : >> { %1844 = vmatprep.subr.bf16.mxu1 %v1975_v2 }
  0x59   : >> { %1807 = vmatpush3.bf16.msra.mxu0 %v1951_v1 }
  0x5a   : >> { %1812 = vmatprep.subr.bf16.mxu0 %v1975_v2 }
  0x5e   : >> { %1841 = vmatmul.mubr.msk.bf16.vlgmr.msra.gmra.mrb[4].mxu1 %vm253_vm2, %v2144_v52 }
  0x5f   : >> { %1845 = vmatpush3.bf16.msra.mxu1 %v1955_v3  ;;  %1848 = vmatprep.mubr.msk.bf16.mxu1 %vm1976_vm1, %v1975_v2 }
  0x60   : >> { %1846 = vmatprep.subr.bf16.mxu1 %v1975_v2  ;;  %1809 = vmatmul.mubr.msk.bf16.vlgmr.msra.gmra.mrb[4].mxu0 %vm253_vm2, %v2113_v36 }
  0x61   : >> { %1813 = vmatpush3.bf16.msra.mxu0 %v1954_v4  ;;  %1816 = vmatprep.mubr.msk.bf16.mxu0 %vm1976_vm1, %v1975_v2 }
  0x62   : >> { %1814 = vmatprep.subr.bf16.mxu0 %v1975_v2 }
  0x63   : >> { %1847 = vmatpush3.bf16.msra.mxu1 %v1956_v5 }
  0x65   : >> { %1815 = vmatpush3.bf16.msra.mxu0 %v1957_v6 }
  0x6a   : >> { %1849 = vmatmul.mubr.msk.bf16.vlgmr.msra.gmra.mrb[4].mxu1 %vm253_vm2, %v2139_v51 }
  0x6c   : >> { %1817 = vmatmul.mubr.msk.bf16.vlgmr.msra.gmra.mrb[4].mxu0 %vm253_vm2, %v2144_v52 }
 0x111   : >> { %v775_v7 = vpop.f32.mrb[0].mxu1 }
 0x112   : >> { %v795_v8 = vmul.f32 %v775_v7, %v775_v7  ;;  %v1670_v9 = vpack.c.bf16 %v775_v7, %v775_v7  ;;  %v1786_v10 = vpop.f32.mrb[1].mxu1  ;;  %v785_v2 = vsel %vm498_vm5, %v775_v7, 0.0 }
 0x113   : >> { %v778_v11 = vpop.f32.mrb[2].mxu1  ;;  %v489_v17 = vpop.f32.mrb[0].mxu0 }
 0x114   : >> { %1593 = vst.msk [vmem:[%s2246_s28 + $0x80] sm:$0xf] %vm532_vm6, %v1670_v9  ;;  %v786_v12 = vsel %vm498_vm5, %v778_v11, 0.0  ;;  %v796_v13 = vmul.f32 %v778_v11, %v778_v11  ;;  %v1671_v14 = vpack.c.bf16 %v778_v11, %v778_v11  ;;  %v1787_v15 = vpop.f32.mrb[3].mxu1  ;;  %v797_v18 = vsel %vm498_vm5, %v795_v8, 0.0  ;;  %v1754_v22 = vpop.f32.mrb[1].mxu0 }
 0x115   : >> { %v787_v16 = vadd.f32 %v786_v12, %v785_v2  ;;  %v509_v20 = vmul.f32 %v489_v17, %v489_v17  ;;  %v1667_v21 = vpack.c.bf16 %v489_v17, %v489_v17  ;;  %v492_v25 = vpop.f32.mrb[2].mxu0  ;;  %v499_v26 = vsel %vm498_vm5, %v489_v17, 0.0 }
 0x116   : >> { %v798_v19 = vsel %vm498_vm5, %v796_v13, 0.0  ;;  %1594 = vst.msk [vmem:[%s2246_s28 + $0x84] sm:$0xf] %vm532_vm6, %v1671_v14  ;;  %v500_v27 = vsel %vm498_vm5, %v492_v25, 0.0  ;;  %v510_v28 = vmul.f32 %v492_v25, %v492_v25  ;;  %v1668_v29 = vpack.c.bf16 %v492_v25, %v492_v25  ;;  %v1755_v30 = vpop.f32.mrb[3].mxu0 }
 0x117   : >> { %v788_v23 = vrot.slane %v787_v16, 4  ;;  %v799_v24 = vadd.f32 %v798_v19, %v797_v18  ;;  %533 = vst.msk [vmem:[%s2246_s28] sm:$0xf] %vm532_vm6, %v1667_v21  ;;  %v501_v33 = vadd.f32 %v500_v27, %v499_v26  ;;  %v511_v34 = vsel %vm498_vm5, %v509_v20, 0.0 }
 0x118   : >> { %v512_v35 = vsel %vm498_vm5, %v510_v28, 0.0  ;;  %534 = vst.msk [vmem:[%s2246_s28 + $0x4] sm:$0xf] %vm532_vm6, %v1668_v29 }
 0x119   : >> { %v789_v31 = vadd.f32 %v788_v23, %v787_v16  ;;  %v800_v32 = vrot.slane %v799_v24, 4  ;;  %v502_v38 = vrot.slane %v501_v33, 4  ;;  %v513_v39 = vadd.f32 %v512_v35, %v511_v34 }
 0x11b   : >> { %v790_v36 = vrot.slane %v789_v31, 2  ;;  %v801_v37 = vadd.f32 %v800_v32, %v799_v24  ;;  %v503_v42 = vadd.f32 %v502_v38, %v501_v33  ;;  %v514_v43 = vrot.slane %v513_v39, 4 }
 0x11d   : >> { %v791_v40 = vadd.f32 %v790_v36, %v789_v31  ;;  %v802_v41 = vrot.slane %v801_v37, 2  ;;  %v504_v45 = vrot.slane %v503_v42, 2  ;;  %v515_v46 = vadd.f32 %v514_v43, %v513_v39 }
 0x11f   : >> { %v803_v44 = vadd.f32 %v802_v41, %v801_v37  ;;  %v792_v47 = vrot.slane %v791_v40, 1  ;;  %v505_v48 = vadd.f32 %v504_v45, %v503_v42  ;;  %v516_v49 = vrot.slane %v515_v46, 2 }
 0x121   : >> { %v804_v50 = vrot.slane %v803_v44, 1  ;;  %v506_v51 = vrot.slane %v505_v48, 1  ;;  %v517_v52 = vadd.f32 %v516_v49, %v515_v46  ;;  %v793_v53 = vadd.f32 %v792_v47, %v791_v40 }
 0x123   : >> { %v507_v54 = vadd.f32 %v506_v51, %v505_v48  ;;  %v518_v55 = vrot.slane %v517_v52, 1  ;;  %v805_v56 = vadd.f32 %v804_v50, %v803_v44  ;;  %v1395_v48 = vld [vmem:[#allocation2] sm:$0x1] }
 0x125   : >> { %v519_v57 = vadd.f32 %v518_v55, %v517_v52  ;;  %v794_v58 = vadd.f32 %v793_v53, %v507_v54  ;;  %v1399_v52 = vld [vmem:[#allocation2 + $0x1] sm:$0x1] }
 0x127   : >> { %v806_v59 = vadd.f32 %v805_v56, %v519_v57 }
 0x13d   : >> { %v1350_v60 = vpop.f32.mrb[4].mxu1 }
 0x13e   : >> { %v1370_v61 = vmul.f32 %v1350_v60, %v1350_v60  ;;  %v1674_v62 = vpack.c.bf16 %v1350_v60, %v1350_v60  ;;  %v1850_v63 = vpop.f32.mrb[5].mxu1  ;;  %v1360_v1 = vsel %vm498_vm5, %v1350_v60, 0.0 }
 0x13f   : >> { %v1353_v0 = vpop.f32.mrb[6].mxu1  ;;  %v1072_v8 = vpop.f32.mrb[4].mxu0 }
 0x140   : >> { %1661 = vst.msk [vmem:[%s2246_s28 + $0x180] sm:$0xf] %vm532_vm6, %v1674_v62  ;;  %v1361_v3 = vsel %vm498_vm5, %v1353_v0, 0.0  ;;  %v1371_v4 = vmul.f32 %v1353_v0, %v1353_v0  ;;  %v1675_v5 = vpack.c.bf16 %v1353_v0, %v1353_v0  ;;  %v1851_v6 = vpop.f32.mrb[7].mxu1  ;;  %v1372_v9 = vsel %vm498_vm5, %v1370_v61, 0.0  ;;  %v1818_v12 = vpop.f32.mrb[5].mxu0 }
 0x141   : >> { %v1362_v7 = vadd.f32 %v1361_v3, %v1360_v1  ;;  %v1092_v11 = vmul.f32 %v1072_v8, %v1072_v8  ;;  %v1672_v2 = vpack.c.bf16 %v1072_v8, %v1072_v8  ;;  %v1075_v15 = vpop.f32.mrb[6].mxu0  ;;  %v1082_v16 = vsel %vm498_vm5, %v1072_v8, 0.0 }
 0x142   : >> { %v1373_v10 = vsel %vm498_vm5, %v1371_v4, 0.0  ;;  %1662 = vst.msk [vmem:[%s2246_s28 + $0x184] sm:$0xf] %vm532_vm6, %v1675_v5  ;;  %v1083_v17 = vsel %vm498_vm5, %v1075_v15, 0.0  ;;  %v1093_v18 = vmul.f32 %v1075_v15, %v1075_v15  ;;  %v1673_v19 = vpack.c.bf16 %v1075_v15, %v1075_v15  ;;  %v1819_v20 = vpop.f32.mrb[7].mxu0 }
 0x143   : >> { %v1363_v13 = vrot.slane %v1362_v7, 4  ;;  %v1374_v14 = vadd.f32 %v1373_v10, %v1372_v9  ;;  %1628 = vst.msk [vmem:[%s2246_s28 + $0x100] sm:$0xf] %vm532_vm6, %v1672_v2  ;;  %v1084_v23 = vadd.f32 %v1083_v17, %v1082_v16  ;;  %v1094_v24 = vsel %vm498_vm5, %v1092_v11, 0.0 }
 0x144   : >> { %v1095_v25 = vsel %vm498_vm5, %v1093_v18, 0.0  ;;  %1629 = vst.msk [vmem:[%s2246_s28 + $0x104] sm:$0xf] %vm532_vm6, %v1673_v19 }
 0x145   : >> { %v1364_v21 = vadd.f32 %v1363_v13, %v1362_v7  ;;  %v1375_v22 = vrot.slane %v1374_v14, 4  ;;  %v1085_v28 = vrot.slane %v1084_v23, 4  ;;  %v1096_v29 = vadd.f32 %v1095_v25, %v1094_v24 }
 0x147   : >> { %v1365_v26 = vrot.slane %v1364_v21, 2  ;;  %v1376_v27 = vadd.f32 %v1375_v22, %v1374_v14  ;;  %v1086_v31 = vadd.f32 %v1085_v28, %v1084_v23  ;;  %v1097_v32 = vrot.slane %v1096_v29, 4 }
 0x149   : >> { %v1377_v30 = vrot.slane %v1376_v27, 2  ;;  %v1366_v33 = vadd.f32 %v1365_v26, %v1364_v21  ;;  %v1087_v34 = vrot.slane %v1086_v31, 2  ;;  %v1098_v35 = vadd.f32 %v1097_v32, %v1096_v29 }
 0x14b   : >> { %v1378_v36 = vadd.f32 %v1377_v30, %v1376_v27  ;;  %v1088_v37 = vadd.f32 %v1087_v34, %v1086_v31  ;;  %v1099_v38 = vrot.slane %v1098_v35, 2  ;;  %v1367_v39 = vrot.slane %v1366_v33, 1 }
 0x14d   : >> { %v1089_v40 = vrot.slane %v1088_v37, 1  ;;  %v1100_v41 = vadd.f32 %v1099_v38, %v1098_v35  ;;  %v1379_v42 = vrot.slane %v1378_v36, 1  ;;  %v1368_v45 = vadd.f32 %v1367_v39, %v1366_v33 }
 0x14f   : >> { %v1090_v43 = vadd.f32 %v1089_v40, %v1088_v37  ;;  %v1101_v44 = vrot.slane %v1100_v41, 1  ;;  %v1380_v49 = vadd.f32 %v1379_v42, %v1378_v36 }
 0x151   : >> { %v1091_v46 = vadd.f32 %v1090_v43, %v794_v58  ;;  %v1102_v47 = vadd.f32 %v1101_v44, %v1100_v41 }
 0x153   : >> { %v1103_v50 = vadd.f32 %v1102_v47, %v806_v59  ;;  %v1369_v51 = vadd.f32 %v1368_v45, %v1091_v46  ;;  %189 = sbr.rel (!%p187_p4) target bundleno = 17 (0x11), region = 99 }
 0x155   : >> { %v1381_v53 = vadd.f32 %v1380_v49, %v1103_v50  ;;  %v1396_v54 = vadd.f32 %v1395_v48, %v1369_v51 }
 0x157   : >> { %1398 = vst.msk [vmem:[#allocation2] sm:$0x1] %vm1397_vm7, %v1396_v54  ;;  %v1400_v55 = vadd.f32 %v1399_v52, %v1381_v53 }
 0x159   : >> { %1401 = vst.msk [vmem:[#allocation2 + $0x1] sm:$0x1] %vm1397_vm7, %v1400_v55 }
 0x160   : > { %v1402_v56 = vld [vmem:[#allocation2] sm:$0x3] }
 0x161   : > { %1403 = vst.msk [vmem:[%s2019_s25] sm:$0x3] %vm183_vm0, %v1402_v56 }
 0x162 PF: > { %s14_s12 = sadd.s32 1, %s1968_s12  }
 0x163   : > { %p11_p5 = scmp.ge.s32.totalorder %s14_s12, 4  }
 0x165   :  { %13 = sbr.rel (!%p11_p5) target bundleno = 1 (0x1), region = 110 }

// kernel: generator_forward.15
= control target key start
LH: loop header
LB: loop body
LE: loop exit
PB: predicated region body
PF: predicated region fallthrough
CT: control target
= control target key end

     0   :  { %s1847_s9 = smov 0   ;;  %s2041_s0 = inlined_call_operand.vmem [shape: bf16[2,34,34,16], index: 0, kind: input, shape index: {}]   ;;  %s2042_s1 = inlined_call_operand.vmem [shape: bf16[4,4,16,3], index: 1, kind: input, shape index: {}]   ;;  %s2043_s2 = inlined_call_operand.vmem [shape: f32[2,128,32,3], index: 2, kind: output, shape index: {}]  }
   0x1 LB: > { %s1424_s10 = sadd.s32 4294967295, %s1826_s9   ;;  %p1428_p0 = scmp.ge.s32.totalorder %s1826_s9, 1  ;;  %s1826_s9 = sphi %s1847_s9, %s12_s9  }
   0x2   : > { %p112_p1 = scmp.lt.s32.totalorder %s1826_s9, 3 }
   0x4   : > { %p113_p2 = pnand %p1428_p0, %p112_p1 }
   0x5   : > { %p134_p3 = scmp.lt.s32.totalorder (!%p113_p2), %s1424_s10, 1  ;;  %s1865_s19 = smov (!%p113_p2), 0  }
   0x6   : > { %116 = sbr.rel (%p113_p2) target bundleno = 336 (0x150), region = 28 }
   0xd   : > { %s2045_s10 = smov (!%p134_p3, %s1424_s10), 1 }
   0xe   : > { %s1742_s11 = smul.u32 680, %s2045_s10  ;;  %s1548_s12 = sshll.u32 %s2045_s10, 12 }
   0xf   : > { %s1858_s15 = scalar_lea.vmem %s2043_s2, %s1548_s12 }
  0x10   : > { %s1863_s18 = scalar_lea.vmem %s2041_s0, %s1742_s11 }
  0x11 LB: >> { %v1759_v0 = vld [vmem:[%s2042_s1 + $0x18] sm:$0xff]   ;;  %v1760_v1 = vld [vmem:[%s2042_s1 + $0x10] sm:$0xff]   ;;  %s1549_s24 = smul.u32 20, %s1830_s19  ;;  %v1764_v2 = vld [vmem:[%s2042_s1] sm:$0xff]   ;;  %vm222_vm0 = vcmask 130048   ;;  %vm521_vm2 = vcmask 1046528   ;;  %s1830_s19 = sphi %s1865_s19, %s150_s19  }
  0x12   : >> { %1622 = vmatprep.subr.bf16.mxu1 %v1759_v0  ;;  %1598 = vmatprep.subr.bf16.mxu0 %v1760_v1  ;;  %v1765_v3 = vld [vmem:[%s2042_s1 + $0x8] sm:$0xff]   ;;  %vm195_vm1 = vsmask.f32 7424  ;;  %v1766_v26 = vld [vmem:[%s2042_s1 + $0x40] sm:$0xff]   ;;  %v1772_v36 = vld [vmem:[%s2042_s1 + $0x58] sm:$0xff]   ;;  %s1467_s30 = sshll.u32 %s1830_s19, 5 }
  0x13   : >> { %1623 = vmatpush3.bf16.msra.mxu1 %v1759_v0  ;;  %s1881_s27 = scalar_lea.vmem %s1863_s18, %s1549_s24  ;;  %1599 = vmatpush3.bf16.msra.mxu0 %v1760_v1  ;;  %v1767_v17 = vld [vmem:[%s2042_s1 + $0x48] sm:$0xff]   ;;  %v1771_v41 = vld [vmem:[%s2042_s1 + $0x50] sm:$0xff]   ;;  %v1774_v58 = vld [vmem:[%s2042_s1 + $0x38] sm:$0xff]   ;;  %s2001_s3 = scalar_lea.vmem %s1858_s15, %s1467_s30  ;;  %vm510_vm3 = vcmask 23552  }
  0x14   : >> { %1604 = vmatprep.subr.bf16.mxu0 %v1764_v2  ;;  %v1761_v4 = vld [vmem:[%s1881_s27] sm:$0xff]   ;;  %v1762_v5 = vld [vmem:[%s1881_s27 + $0x8] sm:$0xff]   ;;  %1628 = vmatprep.subr.bf16.mxu1 %v1765_v3  ;;  %v1763_v6 = vld [vmem:[%s1881_s27 + $0x10] ss:$0 sps:$4 sm:$0x11]   ;;  %s150_s19 = sadd.s32 1, %s1830_s19  }
  0x15   : >> { %v522_v7 = vrot.slane %v1761_v4, 1  ;;  %v523_v8 = vrot.slane %v1762_v5, 1  ;;  %v197_v9 = vshrl.u32 %v1761_v4, 16  ;;  %v199_v10 = vshll.u32 %v1761_v4, 16  ;;  %v1897_v22 = vld [vmem:[%s1881_s27 + $0x14] sm:$0xff]   ;;  %v1900_v23 = vld [vmem:[%s1881_s27 + $0x1c] sm:$0xff]  }
  0x16   : >> { %v525_v11 = vrot.slane %v1763_v6, 1  ;;  %v204_v12 = vshll.u32 %v1762_v5, 16  ;;  %v208_v13 = vshrl.u32 %v1762_v5, 16  ;;  %v212_v14 = vshll.u32 %v1763_v6, 16  ;;  %v1923_v39 = vld [vmem:[%s1881_s27 + $0x30] sm:$0xff]   ;;  %v1776_v62 = vld [vmem:[%s2042_s1 + $0x28] sm:$0xff]  }
  0x17   : >> { %v524_v15 = vsel %vm521_vm2, %v522_v7, %v523_v8  ;;  %v201_v16 = vrot.slane %v199_v10, 1  ;;  %v421_v27 = vshrl.u32 %v1897_v22, 16  ;;  %v423_v28 = vshll.u32 %v1897_v22, 16  ;;  %v1770_v34 = vld [vmem:[%s1881_s27 + $0x24] ss:$0 sps:$4 sm:$0x11]  }
  0x18   : >> { %1624 = vmatprep.mubr.msk.bf16.mxu1 %vm222_vm0, %v524_v15  ;;  %v526_v18 = vsel %vm521_vm2, %v523_v8, %v525_v11  ;;  %v206_v19 = vrot.slane %v204_v12, 1  ;;  %v214_v20 = vrot.slane %v212_v14, 1  ;;  %v427_v29 = vshll.u32 %v1900_v23, 16  ;;  %v1781_v40 = vld [vmem:[%s1881_s27 + $0x38] ss:$0 sps:$4 sm:$0x11]  }
  0x19   : >> { %1625 = vmatmul.mubr.msk.bf16.vlgmr.msra.gmra.mrb[0].mxu1 %vm222_vm0, %v526_v18  ;;  %v202_v21 = vor.u32 %v201_v16, %v197_v9  ;;  %v425_v31 = vrot.slane %v423_v28, 1  ;;  %v431_v37 = vshrl.u32 %v1900_v23, 16  ;;  %v435_v38 = vshll.u32 %v1770_v34, 16  ;;  %v1773_v59 = vld [vmem:[%s2042_s1 + $0x30] sm:$0xff]   ;;  %v1775_v63 = vld [vmem:[%s2042_s1 + $0x20] sm:$0xff]   ;;  %v1779_v0 = vld [vmem:[%s1881_s27 + $0x28] sm:$0xff]  }
  0x1a   : >> { %v210_v24 = vor.u32 %v208_v13, %v206_v19  ;;  %1629 = vmatpush3.bf16.msra.mxu1 %v1765_v3  ;;  %v429_v33 = vrot.slane %v427_v29, 1  ;;  %v995_v42 = vshll.u32 %v1923_v39, 16  ;;  %v999_v43 = vshrl.u32 %v1923_v39, 16  ;;  %v1778_v1 = vld [vmem:[%s2042_s1 + $0x68] sm:$0xff]   ;;  %v1777_v3 = vld [vmem:[%s2042_s1 + $0x60] sm:$0xff]   ;;  %v1783_v8 = vld [vmem:[%s2042_s1 + $0x78] sm:$0xff]  }
  0x1b   : >> { %v207_v25 = vsel %vm195_vm1, %v202_v21, %v206_v19  ;;  %1634 = vmatprep.subr.bf16.mxu1 %v1767_v17  ;;  %v426_v32 = vor.u32 %v425_v31, %v421_v27  ;;  %v1003_v44 = vshll.u32 %v1781_v40, 16  ;;  %v437_v45 = vrot.slane %v435_v38, 1  ;;  %v1782_v9 = vld [vmem:[%s2042_s1 + $0x70] sm:$0xff]   ;;  %p147_p4 = scmp.ge.s32.totalorder %s150_s19, 32  }
  0x1c   : >> { %1600 = vmatprep.mubr.msk.bf16.mxu0 %vm222_vm0, %v207_v25  ;;  %v215_v30 = vsel %vm195_vm1, %v210_v24, %v214_v20  ;;  %1630 = vmatprep.mubr.msk.bf16.mxu1 %vm222_vm0, %v207_v25  ;;  %v1265_v46 = vrot.slane %v1923_v39, 1  ;;  %v433_v47 = vor.u32 %v431_v37, %v429_v33  ;;  %v997_v48 = vrot.slane %v995_v42, 1 }
  0x1d   : >> { %1601 = vmatmul.mubr.msk.bf16.vlgmr.msra.gmra.mrb[0].mxu0 %vm222_vm0, %v215_v30  ;;  %v430_v35 = vsel %vm195_vm1, %v426_v32, %v429_v33  ;;  %v1005_v49 = vrot.slane %v1003_v44, 1  ;;  %v1267_v50 = vrot.slane %v1781_v40, 1  ;;  %v708_v51 = vrot.slane %v1897_v22, 1 }
  0x1e   : >> { %1605 = vmatpush3.bf16.msra.mxu0 %v1764_v2  ;;  %1606 = vmatprep.mubr.msk.bf16.mxu0 %vm222_vm0, %v1761_v4  ;;  %v709_v52 = vrot.slane %v1900_v23, 1  ;;  %v1001_v53 = vor.u32 %v999_v43, %v997_v48  ;;  %v438_v55 = vsel %vm195_vm1, %v433_v47, %v437_v45  ;;  %v711_v60 = vrot.slane %v1770_v34, 1 }
  0x1f   : >> { %1610 = vmatprep.subr.bf16.mxu0 %v1766_v26  ;;  %v1268_v54 = vsel %vm521_vm2, %v1265_v46, %v1267_v50  ;;  %v991_v2 = vshll.u32 %v1779_v0, 16  ;;  %v989_v4 = vshrl.u32 %v1779_v0, 16  ;;  %v1264_v10 = vrot.slane %v1779_v0, 1 }
  0x20   : >> { %v1006_v56 = vsel %vm195_vm1, %v1001_v53, %v1005_v49  ;;  %v710_v57 = vsel %vm521_vm2, %v708_v51, %v709_v52  ;;  %v712_v61 = vsel %vm521_vm2, %v709_v52, %v711_v60 }
  0x21   : >> { %v1266_v11 = vsel %vm521_vm2, %v1264_v10, %v1265_v46 }
  0x25   : >> { %1631 = vmatmul.mubr.msk.bf16.vlgmr.msra.gmra.mrb[0].mxu1 %vm222_vm0, %v215_v30 }
  0x26   : >> { %1635 = vmatpush3.bf16.msra.mxu1 %v1767_v17  ;;  %1636 = vmatprep.mubr.msk.bf16.mxu1 %vm222_vm0, %v430_v35 }
  0x27   : >> { %1640 = vmatprep.subr.bf16.mxu1 %v1772_v36 }
  0x29   : >> { %1607 = vmatmul.mubr.msk.bf16.vlgmr.msra.gmra.mrb[0].mxu0 %vm222_vm0, %v1762_v5  ;;  %v993_v5 = vrot.slane %v991_v2, 1 }
  0x2a   : >> { %1611 = vmatpush3.bf16.msra.mxu0 %v1766_v26  ;;  %1612 = vmatprep.mubr.msk.bf16.mxu0 %vm222_vm0, %v1897_v22 }
  0x2b   : >> { %1616 = vmatprep.subr.bf16.mxu0 %v1771_v41  ;;  %v994_v6 = vor.u32 %v993_v5, %v989_v4 }
  0x2d   : >> { %v998_v7 = vsel %vm195_vm1, %v994_v6, %v997_v48 }
  0x31   : >> { %1637 = vmatmul.mubr.msk.bf16.vlgmr.msra.gmra.mrb[0].mxu1 %vm222_vm0, %v438_v55 }
  0x32   : >> { %1641 = vmatpush3.bf16.msra.mxu1 %v1772_v36  ;;  %1642 = vmatprep.mubr.msk.bf16.mxu1 %vm222_vm0, %v710_v57 }
  0x33   : >> { %1670 = vmatprep.subr.bf16.mxu1 %v1774_v58 }
  0x35   : >> { %1613 = vmatmul.mubr.msk.bf16.vlgmr.msra.gmra.mrb[0].mxu0 %vm222_vm0, %v1900_v23 }
  0x36   : >> { %1617 = vmatpush3.bf16.msra.mxu0 %v1771_v41  ;;  %1618 = vmatprep.mubr.msk.bf16.mxu0 %vm222_vm0, %v430_v35 }
  0x37   : >> { %1646 = vmatprep.subr.bf16.mxu0 %v1773_v59 }
  0x3d   : >> { %1643 = vmatmul.mubr.msk.bf16.vlgmr.msra.gmra.mrb[0].mxu1 %vm222_vm0, %v712_v61 }
  0x3e   : >> { %1671 = vmatpush3.bf16.msra.mxu1 %v1774_v58  ;;  %1672 = vmatprep.mubr.msk.bf16.mxu1 %vm222_vm0, %v710_v57 }
  0x3f   : >> { %1676 = vmatprep.subr.bf16.mxu1 %v1776_v62 }
  0x41   : >> { %1619 = vmatmul.mubr.msk.bf16.vlgmr.msra.gmra.mrb[0].mxu0 %vm222_vm0, %v438_v55 }
  0x42   : >> { %1647 = vmatpush3.bf16.msra.mxu0 %v1773_v59  ;;  %1648 = vmatprep.mubr.msk.bf16.mxu0 %vm222_vm0, %v430_v35 }
  0x43   : >> { %1652 = vmatprep.subr.bf16.mxu0 %v1775_v63 }
  0x45   : >> { %1673 = vmatmul.mubr.msk.bf16.vlgmr.msra.gmra.mrb[4].mxu1 %vm222_vm0, %v712_v61 }
  0x46   : >> { %1677 = vmatpush3.bf16.msra.mxu1 %v1776_v62  ;;  %1678 = vmatprep.mubr.msk.bf16.mxu1 %vm222_vm0, %v430_v35 }
  0x47   : >> { %1682 = vmatprep.subr.bf16.mxu1 %v1778_v1 }
  0x49   : >> { %1649 = vmatmul.mubr.msk.bf16.vlgmr.msra.gmra.mrb[4].mxu0 %vm222_vm0, %v438_v55 }
  0x4a   : >> { %1653 = vmatpush3.bf16.msra.mxu0 %v1775_v63  ;;  %1654 = vmatprep.mubr.msk.bf16.mxu0 %vm222_vm0, %v1897_v22 }
  0x4b   : >> { %1658 = vmatprep.subr.bf16.mxu0 %v1777_v3 }
  0x51   : >> { %1679 = vmatmul.mubr.msk.bf16.vlgmr.msra.gmra.mrb[4].mxu1 %vm222_vm0, %v438_v55 }
  0x52   : >> { %1683 = vmatpush3.bf16.msra.mxu1 %v1778_v1  ;;  %1684 = vmatprep.mubr.msk.bf16.mxu1 %vm222_vm0, %v998_v7 }
  0x53   : >> { %1688 = vmatprep.subr.bf16.mxu1 %v1783_v8 }
  0x55   : >> { %1655 = vmatmul.mubr.msk.bf16.vlgmr.msra.gmra.mrb[4].mxu0 %vm222_vm0, %v1900_v23 }
  0x56   : >> { %1659 = vmatpush3.bf16.msra.mxu0 %v1777_v3  ;;  %1660 = vmatprep.mubr.msk.bf16.mxu0 %vm222_vm0, %v1779_v0 }
  0x57   : >> { %1664 = vmatprep.subr.bf16.mxu0 %v1782_v9 }
  0x5d   : >> { %1685 = vmatmul.mubr.msk.bf16.vlgmr.msra.gmra.mrb[4].mxu1 %vm222_vm0, %v1006_v56 }
  0x5e   : >> { %1689 = vmatpush3.bf16.msra.mxu1 %v1783_v8  ;;  %1690 = vmatprep.mubr.msk.bf16.mxu1 %vm222_vm0, %v1266_v11 }
  0x61   : >> { %1661 = vmatmul.mubr.msk.bf16.vlgmr.msra.gmra.mrb[4].mxu0 %vm222_vm0, %v1923_v39 }
  0x62   : >> { %1665 = vmatpush3.bf16.msra.mxu0 %v1782_v9  ;;  %1666 = vmatprep.mubr.msk.bf16.mxu0 %vm222_vm0, %v998_v7 }
  0x69   : >> { %1691 = vmatmul.mubr.msk.bf16.vlgmr.msra.gmra.mrb[4].mxu1 %vm222_vm0, %v1268_v54 }
  0x6d   : >> { %1667 = vmatmul.mubr.msk.bf16.vlgmr.msra.gmra.mrb[4].mxu0 %vm222_vm0, %v1006_v56 }
 0x110   : >> { %v1644_v12 = vpop.f32.mrb[0].mxu1 }
 0x111   : >> { %1784 = vtanh.f32 %v1644_v12  ;;  %v759_v13 = vpop.f32.mrb[1].mxu1 }
 0x112   : >> { %1786 = vtanh.f32 %v759_v13  ;;  %v1645_v14 = vpop.f32.mrb[2].mxu1 }
 0x113   : >> { %1788 = vtanh.f32 %v1645_v14  ;;  %v762_v15 = vpop.f32.mrb[3].mxu1 }
 0x114   : >> { %1790 = vtanh.f32 %v762_v15  ;;  %v1620_v16 = vpop.f32.mrb[0].mxu0 }
 0x115   : >> { %1792 = vtanh.f32 %v1620_v16  ;;  %v485_v17 = vpop.f32.mrb[1].mxu0 }
 0x116   : >> { %1794 = vtanh.f32 %v485_v17  ;;  %v1621_v18 = vpop.f32.mrb[2].mxu0 }
 0x117   : >> { %1796 = vtanh.f32 %v1621_v18  ;;  %v488_v19 = vpop.f32.mrb[3].mxu0 }
 0x118   : >> { %1798 = vtanh.f32 %v488_v19 }
 0x11b   : >> { %v1785_v20 = vpop.eup %1784 }
 0x11c   : >> { %v1787_v21 = vpop.eup %1786  ;;  %1491 = vst.msk [vmem:[%s2001_s3 + $0x410] sm:$0xff] %vm510_vm3, %v1785_v20 }
 0x11d   : >> { %v1789_v22 = vpop.eup %1788  ;;  %1489 = vst.msk [vmem:[%s2001_s3 + $0x400] sm:$0xff] %vm510_vm3, %v1787_v21 }
 0x11e   : >> { %v1791_v23 = vpop.eup %1790  ;;  %1492 = vst.msk [vmem:[%s2001_s3 + $0x418] sm:$0xff] %vm510_vm3, %v1789_v22 }
 0x11f   : >> { %v1793_v24 = vpop.eup %1792  ;;  %1490 = vst.msk [vmem:[%s2001_s3 + $0x408] sm:$0xff] %vm510_vm3, %v1791_v23 }
 0x120   : >> { %v1795_v25 = vpop.eup %1794  ;;  %513 = vst.msk [vmem:[%s2001_s3 + $0x10] sm:$0xff] %vm510_vm3, %v1793_v24 }
 0x121   : >> { %v1797_v26 = vpop.eup %1796  ;;  %511 = vst.msk [vmem:[%s2001_s3] sm:$0xff] %vm510_vm3, %v1795_v25 }
 0x122   : >> { %v1799_v27 = vpop.eup %1798  ;;  %514 = vst.msk [vmem:[%s2001_s3 + $0x18] sm:$0xff] %vm510_vm3, %v1797_v26 }
 0x123   : >> { %512 = vst.msk [vmem:[%s2001_s3 + $0x8] sm:$0xff] %vm510_vm3, %v1799_v27 }
 0x13c   : >> { %v1692_v28 = vpop.f32.mrb[4].mxu1 }
 0x13d   : >> { %1800 = vtanh.f32 %v1692_v28  ;;  %v1315_v29 = vpop.f32.mrb[5].mxu1 }
 0x13e   : >> { %1802 = vtanh.f32 %v1315_v29  ;;  %v1693_v30 = vpop.f32.mrb[6].mxu1 }
 0x13f   : >> { %1804 = vtanh.f32 %v1693_v30  ;;  %v1318_v31 = vpop.f32.mrb[7].mxu1 }
 0x140   : >> { %1806 = vtanh.f32 %v1318_v31  ;;  %v1668_v32 = vpop.f32.mrb[4].mxu0 }
 0x141   : >> { %1808 = vtanh.f32 %v1668_v32  ;;  %v1053_v33 = vpop.f32.mrb[5].mxu0 }
 0x142   : >> { %1810 = vtanh.f32 %v1053_v33  ;;  %v1669_v34 = vpop.f32.mrb[6].mxu0 }
 0x143   : >> { %1812 = vtanh.f32 %v1669_v34  ;;  %v1056_v35 = vpop.f32.mrb[7].mxu0 }
 0x144   : >> { %1814 = vtanh.f32 %v1056_v35 }
 0x147   : >> { %v1801_v36 = vpop.eup %1800 }
 0x148   : >> { %v1803_v37 = vpop.eup %1802  ;;  %1544 = vst.msk [vmem:[%s2001_s3 + $0xc10] sm:$0xff] %vm510_vm3, %v1801_v36 }
 0x149   : >> { %v1805_v38 = vpop.eup %1804  ;;  %1542 = vst.msk [vmem:[%s2001_s3 + $0xc00] sm:$0xff] %vm510_vm3, %v1803_v37  ;;  %149 = sbr.rel (!%p147_p4) target bundleno = 17 (0x11), region = 87 }
 0x14a   : >> { %v1807_v39 = vpop.eup %1806  ;;  %1545 = vst.msk [vmem:[%s2001_s3 + $0xc18] sm:$0xff] %vm510_vm3, %v1805_v38 }
 0x14b   : >> { %v1809_v40 = vpop.eup %1808  ;;  %1543 = vst.msk [vmem:[%s2001_s3 + $0xc08] sm:$0xff] %vm510_vm3, %v1807_v39 }
 0x14c   : >> { %v1811_v41 = vpop.eup %1810  ;;  %1519 = vst.msk [vmem:[%s2001_s3 + $0x810] sm:$0xff] %vm510_vm3, %v1809_v40 }
 0x14d   : >> { %v1813_v42 = vpop.eup %1812  ;;  %1517 = vst.msk [vmem:[%s2001_s3 + $0x800] sm:$0xff] %vm510_vm3, %v1811_v41 }
 0x14e   : >> { %v1815_v43 = vpop.eup %1814  ;;  %1520 = vst.msk [vmem:[%s2001_s3 + $0x818] sm:$0xff] %vm510_vm3, %v1813_v42 }
 0x14f   : >> { %1518 = vst.msk [vmem:[%s2001_s3 + $0x808] sm:$0xff] %vm510_vm3, %v1815_v43 }
 0x150 PF: > { %s12_s9 = sadd.s32 1, %s1826_s9  }
 0x151   : > { %p9_p5 = scmp.ge.s32.totalorder %s12_s9, 4  }
 0x153   :  { %11 = sbr.rel (!%p9_p5) target bundleno = 1 (0x1), region = 98 }

</bundles_post_ra>
